<compile_context>
chip_gen: v7x
topology: tpu7x:2x2x1
jax: 0.10.0
libtpu: 0.0.40
codegen_flags: <defaults>
</compile_context>

<pallas_src>
import jax
import jax.numpy as jnp
from jax.experimental import pallas as pl
from jax.experimental.pallas import tpu as pltpu


# ---------------------------------------------------------------------------
# Kernel A: conv1 -> ReLU -> pool -> conv2 -> ReLU -> pool   (one image / step)
# ---------------------------------------------------------------------------
def _conv_block_kernel(xp_ref, w1_ref, b1_ref, w2_ref, b2_ref, out_ref,
                       hp1_scr, p2_scr, hp2_scr):
    # -------- conv1: 3x3 / pad 1 (input pre-padded to 34x34x3) --------------
    acc = jnp.zeros((32 * 32, 32), jnp.float32)
    for k in range(9):                        # static unroll over (dy, dx)
        dy, dx = k // 3, k % 3
        slab = xp_ref[0, dy:dy + 32, dx:dx + 32, :]          # (32, 32, 3)
        slab = slab.reshape(32 * 32, 3).astype(jnp.bfloat16)  # in-VMEM im2col
        acc = acc + jnp.dot(slab, w1_ref[k],
                            preferred_element_type=jnp.float32)
    acc = jnp.maximum(acc + b1_ref[...], 0.0)                # bias + ReLU

    # -------- maxpool 2x2 #1 (fused epilogue) --------------------------------
    v = acc.reshape(16, 2, 32, 32)                           # (h2, hp, w, c)
    v = jnp.maximum(v[:, 0], v[:, 1])                        # pooled over H
    hp1_scr[...] = v.reshape(16 * 32, 32)                    # rows = h2*32 + w
    p1 = jnp.maximum(hp1_scr[pl.ds(0, 256, 2), :],           # even w
                     hp1_scr[pl.ds(1, 256, 2), :])           # odd  w -> (256, 32)

    # -------- zero-padded conv2 input (18, 18, 32) in VMEM -------------------
    p2_scr[...] = jnp.zeros((18, 18, 32), jnp.float32)
    p2_scr[1:17, 1:17, :] = p1.reshape(16, 16, 32)

    # -------- conv2: 3x3 / pad 1 ---------------------------------------------
    acc = jnp.zeros((16 * 16, 64), jnp.float32)
    for k in range(9):
        dy, dx = k // 3, k % 3
        slab = p2_scr[dy:dy + 16, dx:dx + 16, :]             # (16, 16, 32)
        slab = slab.reshape(16 * 16, 32).astype(jnp.bfloat16)
        acc = acc + jnp.dot(slab, w2_ref[k],
                            preferred_element_type=jnp.float32)
    acc = jnp.maximum(acc + b2_ref[...], 0.0)                # bias + ReLU

    # -------- maxpool 2x2 #2 (fused epilogue) --------------------------------
    v = acc.reshape(8, 2, 16, 64)
    v = jnp.maximum(v[:, 0], v[:, 1])                        # (8, 16, 64)
    hp2_scr[...] = v.reshape(8 * 16, 64)
    p2 = jnp.maximum(hp2_scr[pl.ds(0, 64, 2), :],
                     hp2_scr[pl.ds(1, 64, 2), :])            # (64, 64): rows = h*8+w

    out_ref[0] = p2                                          # (h*8+w, c) fc-ready


def conv_block_pallas(xp, w1, b1, w2, b2):
    n = xp.shape[0]
    return pl.pallas_call(
        _conv_block_kernel,
        out_shape=jax.ShapeDtypeStruct((n, 64, 64), jnp.float32),
        grid_spec=pltpu.PrefetchScalarGridSpec(
            num_scalar_prefetch=0,
            grid=(n,),
            in_specs=[
                pl.BlockSpec((1, 34, 34, 3), lambda b: (b, 0, 0, 0)),
                pl.BlockSpec((9, 3, 32), lambda b: (0, 0, 0)),
                pl.BlockSpec((1, 32), lambda b: (0, 0)),
                pl.BlockSpec((9, 32, 64), lambda b: (0, 0, 0)),
                pl.BlockSpec((1, 64), lambda b: (0, 0)),
            ],
            out_specs=pl.BlockSpec((1, 64, 64), lambda b: (b, 0, 0)),
            scratch_shapes=[
                pltpu.VMEM((16 * 32, 32), jnp.float32),   # H-pooled conv1
                pltpu.VMEM((18, 18, 32), jnp.float32),    # padded conv2 input
                pltpu.VMEM((8 * 16, 64), jnp.float32),    # H-pooled conv2
            ],
        ),
        compiler_params=pltpu.CompilerParams(
            dimension_semantics=("parallel",)),            # batch across TCs (v7x)
    )(xp, w1, b1, w2, b2)


# ---------------------------------------------------------------------------
# Kernel B: fc1 -> ReLU -> fc2  (whole batch, single block, everything in VMEM)
# ---------------------------------------------------------------------------
def _fc_kernel(a_ref, wf1_ref, bf1_ref, wf2_ref, bf2_ref, o_ref):
    a = a_ref[...].astype(jnp.bfloat16)                      # (N, 4096)
    h = jnp.dot(a, wf1_ref[...], preferred_element_type=jnp.float32)
    h = jnp.maximum(h + bf1_ref[...], 0.0)                   # (N, 256)
    o = jnp.dot(h.astype(jnp.bfloat16), wf2_ref[...],
                preferred_element_type=jnp.float32)
    o_ref[...] = o + bf2_ref[...]                            # (N, 10)


def fc_pallas(a, wf1, bf1, wf2, bf2):
    n = a.shape[0]
    return pl.pallas_call(
        _fc_kernel,
        out_shape=jax.ShapeDtypeStruct((n, 10), jnp.float32),
    )(a, wf1, bf1, wf2, bf2)


# ---------------------------------------------------------------------------
# Parameter setup (PyTorch layouts -> kernel-friendly layouts) and forward pass
# ---------------------------------------------------------------------------
def init_params(key):
    def uniform(k, shape, fan_in):
        bound = 1.0 / jnp.sqrt(jnp.float32(fan_in))
        return jax.random.uniform(k, shape, jnp.float32, -bound, bound)

    ks = jax.random.split(key, 8)
    raw = {
        "conv1_w": uniform(ks[0], (32, 3, 3, 3), 3 * 9),
        "conv1_b": uniform(ks[1], (32,), 3 * 9),
        "conv2_w": uniform(ks[2], (64, 32, 3, 3), 32 * 9),
        "conv2_b": uniform(ks[3], (64,), 32 * 9),
        "fc1_w": uniform(ks[4], (256, 64 * 8 * 8), 64 * 8 * 8),
        "fc1_b": uniform(ks[5], (256,), 64 * 8 * 8),
        "fc2_w": uniform(ks[6], (10, 256), 256),
        "fc2_b": uniform(ks[7], (10,), 256),
    }
    # conv weights -> (9, Cin, Cout) with k = dy*3 + dx; fc1 rows permuted to the
    # kernel's (h, w, c) flatten order so no runtime transpose is needed.
    params = {
        "w1": jnp.transpose(raw["conv1_w"], (2, 3, 1, 0))
                 .reshape(9, 3, 32).astype(jnp.bfloat16),
        "b1": raw["conv1_b"].reshape(1, 32),
        "w2": jnp.transpose(raw["conv2_w"], (2, 3, 1, 0))
                 .reshape(9, 32, 64).astype(jnp.bfloat16),
        "b2": raw["conv2_b"].reshape(1, 64),
        "wf1": raw["fc1_w"].reshape(256, 64, 8, 8)
                 .transpose(2, 3, 1, 0).reshape(4096, 256).astype(jnp.bfloat16),
        "bf1": raw["fc1_b"].reshape(1, 256),
        "wf2": raw["fc2_w"].T.astype(jnp.bfloat16),
        "bf2": raw["fc2_b"].reshape(1, 10),
    }
    return raw, params


def net_forward(x_nchw, params):
    x = jnp.transpose(x_nchw, (0, 2, 3, 1)).astype(jnp.float32)   # -> NHWC
    xp = jnp.pad(x, ((0, 0), (1, 1), (1, 1), (0, 0)))             # pad=1 once
    act = conv_block_pallas(xp, params["w1"], params["b1"],
                            params["w2"], params["b2"])           # (N, 64, 64)
    act = act.reshape(act.shape[0], 64 * 64)                      # free reshape
    return fc_pallas(act, params["wf1"], params["bf1"],
                     params["wf2"], params["bf2"])                # (N, 10)


def net_forward_reference(x_nchw, raw):
    """Pure-JAX reference with PyTorch semantics (NCHW) for sanity checking."""
    def conv(x, w, b):
        y = jax.lax.conv_general_dilated(
            x, w, window_strides=(1, 1), padding=((1, 1), (1, 1)),
            dimension_numbers=("NCHW", "OIHW", "NCHW"))
        return y + b[None, :, None, None]

    def pool(x):
        return jax.lax.reduce_window(x, -jnp.inf, jax.lax.max,
                                     (1, 1, 2, 2), (1, 1, 2, 2), "VALID")

    x = pool(jax.nn.relu(conv(x_nchw, raw["conv1_w"], raw["conv1_b"])))
    x = pool(jax.nn.relu(conv(x, raw["conv2_w"], raw["conv2_b"])))
    x = x.reshape(x.shape[0], -1)
    x = jax.nn.relu(x @ raw["fc1_w"].T + raw["fc1_b"])
    return x @ raw["fc2_w"].T + raw["fc2_b"]


if __name__ == "__main__":
    key = jax.random.PRNGKey(0)
    k_x, k_p = jax.random.split(key)
    # Input shape implied by the module (fc1 expects 64*8*8): (N, 3, 32, 32)
    x = jax.random.normal(k_x, (2, 3, 32, 32), dtype=jnp.float32)
    raw, params = init_params(k_p)

    out = jax.block_until_ready(jax.jit(net_forward)(x, params))
    assert out.shape == (2, 10), out.shape

    ref = jax.block_until_ready(net_forward_reference(x, raw))
    max_err = float(jnp.max(jnp.abs(out - ref)))
    if max_err > 5e-2:
        raise RuntimeError(f"mismatch vs reference: max_abs_err={max_err}")

    print("KERNEL_OK")
</pallas_src>

<mosaic_0001>
module attributes {stable_mosaic.version = 11 : i64} {
  func.func @_conv_block_kernel(%arg0: i32, %arg1: memref<1x34x34x3xf32, #tpu.memory_space<vmem>>, %arg2: memref<9x3x32xbf16, #tpu.memory_space<vmem>>, %arg3: memref<1x32xf32, #tpu.memory_space<vmem>>, %arg4: memref<9x32x64xbf16, #tpu.memory_space<vmem>>, %arg5: memref<1x64xf32, #tpu.memory_space<vmem>>, %arg6: memref<1x64x64xf32, #tpu.memory_space<vmem>>, %arg7: memref<512x32xf32, #tpu.memory_space<vmem>>, %arg8: memref<18x18x32xf32, #tpu.memory_space<vmem>>, %arg9: memref<128x64xf32, #tpu.memory_space<vmem>>) attributes {dimension_semantics = [#tpu.dimension_semantics<parallel>], iteration_bounds = array<i64: 2>, scalar_prefetch = 0 : i64, scratch_operands = 3 : i64, tpu.core_type = #tpu.core_type<tc>, window_params = [{transform_indices = @transform_0, window_bounds = array<i64: 1, 34, 34, 3>}, {pipeline_mode = #tpu.pipeline_mode<synchronous>, transform_indices = @transform_1, window_bounds = array<i64: 9, 3, 32>}, {pipeline_mode = #tpu.pipeline_mode<synchronous>, transform_indices = @transform_2, window_bounds = array<i64: 1, 32>}, {pipeline_mode = #tpu.pipeline_mode<synchronous>, transform_indices = @transform_3, window_bounds = array<i64: 9, 32, 64>}, {pipeline_mode = #tpu.pipeline_mode<synchronous>, transform_indices = @transform_4, window_bounds = array<i64: 1, 64>}, {transform_indices = @transform_5, window_bounds = array<i64: 1, 64, 64>}]} {
    %cst = arith.constant 0.000000e+00 : f32
    %0 = vector.broadcast %cst : f32 to vector<1024x32xf32>
    %c0 = arith.constant 0 : index
    %c0_0 = arith.constant 0 : index
    %c0_1 = arith.constant 0 : index
    %c0_2 = arith.constant 0 : index
    %1 = vector.load %arg1[%c0, %c0_0, %c0_1, %c0_2] : memref<1x34x34x3xf32, #tpu.memory_space<vmem>>, vector<1x32x32x3xf32>
    %2 = vector.shape_cast %1 : vector<1x32x32x3xf32> to vector<32x32x3xf32>
    %3 = vector.shape_cast %2 : vector<32x32x3xf32> to vector<1024x3xf32>
    %4 = arith.truncf %3 : vector<1024x3xf32> to vector<1024x3xbf16>
    %c0_3 = arith.constant 0 : index
    %c0_4 = arith.constant 0 : index
    %c0_5 = arith.constant 0 : index
    %5 = vector.load %arg2[%c0_3, %c0_4, %c0_5] : memref<9x3x32xbf16, #tpu.memory_space<vmem>>, vector<1x3x32xbf16>
    %6 = vector.shape_cast %5 : vector<1x3x32xbf16> to vector<3x32xbf16>
    %cst_6 = arith.constant dense<0.000000e+00> : vector<1024x32xf32>
    %7 = tpu.matmul %4, %6, %cst_6 {dimension_numbers = #tpu.dot_dimension_numbers<[1], [0], [0], [1], [0, 0, 1, 1], [], []>} : vector<1024x3xbf16>, vector<3x32xbf16>, vector<1024x32xf32> -> vector<1024x32xf32>
    %8 = arith.addf %0, %7 : vector<1024x32xf32>
    %c0_7 = arith.constant 0 : index
    %c0_8 = arith.constant 0 : index
    %c1 = arith.constant 1 : index
    %c0_9 = arith.constant 0 : index
    %9 = vector.load %arg1[%c0_7, %c0_8, %c1, %c0_9] : memref<1x34x34x3xf32, #tpu.memory_space<vmem>>, vector<1x32x32x3xf32>
    %10 = vector.shape_cast %9 : vector<1x32x32x3xf32> to vector<32x32x3xf32>
    %11 = vector.shape_cast %10 : vector<32x32x3xf32> to vector<1024x3xf32>
    %12 = arith.truncf %11 : vector<1024x3xf32> to vector<1024x3xbf16>
    %c1_10 = arith.constant 1 : index
    %c0_11 = arith.constant 0 : index
    %c0_12 = arith.constant 0 : index
    %13 = vector.load %arg2[%c1_10, %c0_11, %c0_12] : memref<9x3x32xbf16, #tpu.memory_space<vmem>>, vector<1x3x32xbf16>
    %14 = vector.shape_cast %13 : vector<1x3x32xbf16> to vector<3x32xbf16>
    %cst_13 = arith.constant dense<0.000000e+00> : vector<1024x32xf32>
    %15 = tpu.matmul %12, %14, %cst_13 {dimension_numbers = #tpu.dot_dimension_numbers<[1], [0], [0], [1], [0, 0, 1, 1], [], []>} : vector<1024x3xbf16>, vector<3x32xbf16>, vector<1024x32xf32> -> vector<1024x32xf32>
    %16 = arith.addf %8, %15 : vector<1024x32xf32>
    %c0_14 = arith.constant 0 : index
    %c0_15 = arith.constant 0 : index
    %c2 = arith.constant 2 : index
    %c0_16 = arith.constant 0 : index
    %17 = vector.load %arg1[%c0_14, %c0_15, %c2, %c0_16] : memref<1x34x34x3xf32, #tpu.memory_space<vmem>>, vector<1x32x32x3xf32>
    %18 = vector.shape_cast %17 : vector<1x32x32x3xf32> to vector<32x32x3xf32>
    %19 = vector.shape_cast %18 : vector<32x32x3xf32> to vector<1024x3xf32>
    %20 = arith.truncf %19 : vector<1024x3xf32> to vector<1024x3xbf16>
    %c2_17 = arith.constant 2 : index
    %c0_18 = arith.constant 0 : index
    %c0_19 = arith.constant 0 : index
    %21 = vector.load %arg2[%c2_17, %c0_18, %c0_19] : memref<9x3x32xbf16, #tpu.memory_space<vmem>>, vector<1x3x32xbf16>
    %22 = vector.shape_cast %21 : vector<1x3x32xbf16> to vector<3x32xbf16>
    %cst_20 = arith.constant dense<0.000000e+00> : vector<1024x32xf32>
    %23 = tpu.matmul %20, %22, %cst_20 {dimension_numbers = #tpu.dot_dimension_numbers<[1], [0], [0], [1], [0, 0, 1, 1], [], []>} : vector<1024x3xbf16>, vector<3x32xbf16>, vector<1024x32xf32> -> vector<1024x32xf32>
    %24 = arith.addf %16, %23 : vector<1024x32xf32>
    %c0_21 = arith.constant 0 : index
    %c1_22 = arith.constant 1 : index
    %c0_23 = arith.constant 0 : index
    %c0_24 = arith.constant 0 : index
    %25 = vector.load %arg1[%c0_21, %c1_22, %c0_23, %c0_24] : memref<1x34x34x3xf32, #tpu.memory_space<vmem>>, vector<1x32x32x3xf32>
    %26 = vector.shape_cast %25 : vector<1x32x32x3xf32> to vector<32x32x3xf32>
    %27 = vector.shape_cast %26 : vector<32x32x3xf32> to vector<1024x3xf32>
    %28 = arith.truncf %27 : vector<1024x3xf32> to vector<1024x3xbf16>
    %c3 = arith.constant 3 : index
    %c0_25 = arith.constant 0 : index
    %c0_26 = arith.constant 0 : index
    %29 = vector.load %arg2[%c3, %c0_25, %c0_26] : memref<9x3x32xbf16, #tpu.memory_space<vmem>>, vector<1x3x32xbf16>
    %30 = vector.shape_cast %29 : vector<1x3x32xbf16> to vector<3x32xbf16>
    %cst_27 = arith.constant dense<0.000000e+00> : vector<1024x32xf32>
    %31 = tpu.matmul %28, %30, %cst_27 {dimension_numbers = #tpu.dot_dimension_numbers<[1], [0], [0], [1], [0, 0, 1, 1], [], []>} : vector<1024x3xbf16>, vector<3x32xbf16>, vector<1024x32xf32> -> vector<1024x32xf32>
    %32 = arith.addf %24, %31 : vector<1024x32xf32>
    %c0_28 = arith.constant 0 : index
    %c1_29 = arith.constant 1 : index
    %c1_30 = arith.constant 1 : index
    %c0_31 = arith.constant 0 : index
    %33 = vector.load %arg1[%c0_28, %c1_29, %c1_30, %c0_31] : memref<1x34x34x3xf32, #tpu.memory_space<vmem>>, vector<1x32x32x3xf32>
    %34 = vector.shape_cast %33 : vector<1x32x32x3xf32> to vector<32x32x3xf32>
    %35 = vector.shape_cast %34 : vector<32x32x3xf32> to vector<1024x3xf32>
    %36 = arith.truncf %35 : vector<1024x3xf32> to vector<1024x3xbf16>
    %c4 = arith.constant 4 : index
    %c0_32 = arith.constant 0 : index
    %c0_33 = arith.constant 0 : index
    %37 = vector.load %arg2[%c4, %c0_32, %c0_33] : memref<9x3x32xbf16, #tpu.memory_space<vmem>>, vector<1x3x32xbf16>
    %38 = vector.shape_cast %37 : vector<1x3x32xbf16> to vector<3x32xbf16>
    %cst_34 = arith.constant dense<0.000000e+00> : vector<1024x32xf32>
    %39 = tpu.matmul %36, %38, %cst_34 {dimension_numbers = #tpu.dot_dimension_numbers<[1], [0], [0], [1], [0, 0, 1, 1], [], []>} : vector<1024x3xbf16>, vector<3x32xbf16>, vector<1024x32xf32> -> vector<1024x32xf32>
    %40 = arith.addf %32, %39 : vector<1024x32xf32>
    %c0_35 = arith.constant 0 : index
    %c1_36 = arith.constant 1 : index
    %c2_37 = arith.constant 2 : index
    %c0_38 = arith.constant 0 : index
    %41 = vector.load %arg1[%c0_35, %c1_36, %c2_37, %c0_38] : memref<1x34x34x3xf32, #tpu.memory_space<vmem>>, vector<1x32x32x3xf32>
    %42 = vector.shape_cast %41 : vector<1x32x32x3xf32> to vector<32x32x3xf32>
    %43 = vector.shape_cast %42 : vector<32x32x3xf32> to vector<1024x3xf32>
    %44 = arith.truncf %43 : vector<1024x3xf32> to vector<1024x3xbf16>
    %c5 = arith.constant 5 : index
    %c0_39 = arith.constant 0 : index
    %c0_40 = arith.constant 0 : index
    %45 = vector.load %arg2[%c5, %c0_39, %c0_40] : memref<9x3x32xbf16, #tpu.memory_space<vmem>>, vector<1x3x32xbf16>
    %46 = vector.shape_cast %45 : vector<1x3x32xbf16> to vector<3x32xbf16>
    %cst_41 = arith.constant dense<0.000000e+00> : vector<1024x32xf32>
    %47 = tpu.matmul %44, %46, %cst_41 {dimension_numbers = #tpu.dot_dimension_numbers<[1], [0], [0], [1], [0, 0, 1, 1], [], []>} : vector<1024x3xbf16>, vector<3x32xbf16>, vector<1024x32xf32> -> vector<1024x32xf32>
    %48 = arith.addf %40, %47 : vector<1024x32xf32>
    %c0_42 = arith.constant 0 : index
    %c2_43 = arith.constant 2 : index
    %c0_44 = arith.constant 0 : index
    %c0_45 = arith.constant 0 : index
    %49 = vector.load %arg1[%c0_42, %c2_43, %c0_44, %c0_45] : memref<1x34x34x3xf32, #tpu.memory_space<vmem>>, vector<1x32x32x3xf32>
    %50 = vector.shape_cast %49 : vector<1x32x32x3xf32> to vector<32x32x3xf32>
    %51 = vector.shape_cast %50 : vector<32x32x3xf32> to vector<1024x3xf32>
    %52 = arith.truncf %51 : vector<1024x3xf32> to vector<1024x3xbf16>
    %c6 = arith.constant 6 : index
    %c0_46 = arith.constant 0 : index
    %c0_47 = arith.constant 0 : index
    %53 = vector.load %arg2[%c6, %c0_46, %c0_47] : memref<9x3x32xbf16, #tpu.memory_space<vmem>>, vector<1x3x32xbf16>
    %54 = vector.shape_cast %53 : vector<1x3x32xbf16> to vector<3x32xbf16>
    %cst_48 = arith.constant dense<0.000000e+00> : vector<1024x32xf32>
    %55 = tpu.matmul %52, %54, %cst_48 {dimension_numbers = #tpu.dot_dimension_numbers<[1], [0], [0], [1], [0, 0, 1, 1], [], []>} : vector<1024x3xbf16>, vector<3x32xbf16>, vector<1024x32xf32> -> vector<1024x32xf32>
    %56 = arith.addf %48, %55 : vector<1024x32xf32>
    %c0_49 = arith.constant 0 : index
    %c2_50 = arith.constant 2 : index
    %c1_51 = arith.constant 1 : index
    %c0_52 = arith.constant 0 : index
    %57 = vector.load %arg1[%c0_49, %c2_50, %c1_51, %c0_52] : memref<1x34x34x3xf32, #tpu.memory_space<vmem>>, vector<1x32x32x3xf32>
    %58 = vector.shape_cast %57 : vector<1x32x32x3xf32> to vector<32x32x3xf32>
    %59 = vector.shape_cast %58 : vector<32x32x3xf32> to vector<1024x3xf32>
    %60 = arith.truncf %59 : vector<1024x3xf32> to vector<1024x3xbf16>
    %c7 = arith.constant 7 : index
    %c0_53 = arith.constant 0 : index
    %c0_54 = arith.constant 0 : index
    %61 = vector.load %arg2[%c7, %c0_53, %c0_54] : memref<9x3x32xbf16, #tpu.memory_space<vmem>>, vector<1x3x32xbf16>
    %62 = vector.shape_cast %61 : vector<1x3x32xbf16> to vector<3x32xbf16>
    %cst_55 = arith.constant dense<0.000000e+00> : vector<1024x32xf32>
    %63 = tpu.matmul %60, %62, %cst_55 {dimension_numbers = #tpu.dot_dimension_numbers<[1], [0], [0], [1], [0, 0, 1, 1], [], []>} : vector<1024x3xbf16>, vector<3x32xbf16>, vector<1024x32xf32> -> vector<1024x32xf32>
    %64 = arith.addf %56, %63 : vector<1024x32xf32>
    %c0_56 = arith.constant 0 : index
    %c2_57 = arith.constant 2 : index
    %c2_58 = arith.constant 2 : index
    %c0_59 = arith.constant 0 : index
    %65 = vector.load %arg1[%c0_56, %c2_57, %c2_58, %c0_59] : memref<1x34x34x3xf32, #tpu.memory_space<vmem>>, vector<1x32x32x3xf32>
    %66 = vector.shape_cast %65 : vector<1x32x32x3xf32> to vector<32x32x3xf32>
    %67 = vector.shape_cast %66 : vector<32x32x3xf32> to vector<1024x3xf32>
    %68 = arith.truncf %67 : vector<1024x3xf32> to vector<1024x3xbf16>
    %c8 = arith.constant 8 : index
    %c0_60 = arith.constant 0 : index
    %c0_61 = arith.constant 0 : index
    %69 = vector.load %arg2[%c8, %c0_60, %c0_61] : memref<9x3x32xbf16, #tpu.memory_space<vmem>>, vector<1x3x32xbf16>
    %70 = vector.shape_cast %69 : vector<1x3x32xbf16> to vector<3x32xbf16>
    %cst_62 = arith.constant dense<0.000000e+00> : vector<1024x32xf32>
    %71 = tpu.matmul %68, %70, %cst_62 {dimension_numbers = #tpu.dot_dimension_numbers<[1], [0], [0], [1], [0, 0, 1, 1], [], []>} : vector<1024x3xbf16>, vector<3x32xbf16>, vector<1024x32xf32> -> vector<1024x32xf32>
    %72 = arith.addf %64, %71 : vector<1024x32xf32>
    %c0_63 = arith.constant 0 : index
    %c0_64 = arith.constant 0 : index
    %73 = vector.load %arg3[%c0_63, %c0_64] : memref<1x32xf32, #tpu.memory_space<vmem>>, vector<1x32xf32>
    %74 = vector.broadcast %73 : vector<1x32xf32> to vector<1024x32xf32>
    %75 = arith.addf %72, %74 : vector<1024x32xf32>
    %cst_65 = arith.constant 0.000000e+00 : f32
    %76 = vector.broadcast %cst_65 : f32 to vector<1024x32xf32>
    %77 = arith.maximumf %75, %76 : vector<1024x32xf32>
    %78 = vector.shape_cast %77 : vector<1024x32xf32> to vector<16x2x32x32xf32>
    %79 = vector.extract_strided_slice %78 {offsets = [0, 0, 0, 0], sizes = [16, 1, 32, 32], strides = [1, 1, 1, 1]} : vector<16x2x32x32xf32> to vector<16x1x32x32xf32>
    %80 = vector.shape_cast %79 : vector<16x1x32x32xf32> to vector<16x32x32xf32>
    %81 = vector.extract_strided_slice %78 {offsets = [0, 1, 0, 0], sizes = [16, 1, 32, 32], strides = [1, 1, 1, 1]} : vector<16x2x32x32xf32> to vector<16x1x32x32xf32>
    %82 = vector.shape_cast %81 : vector<16x1x32x32xf32> to vector<16x32x32xf32>
    %83 = arith.maximumf %80, %82 : vector<16x32x32xf32>
    %84 = vector.shape_cast %83 : vector<16x32x32xf32> to vector<512x32xf32>
    %c0_66 = arith.constant 0 : index
    %c0_67 = arith.constant 0 : index
    %85 = vector.load %arg7[%c0_66, %c0_67] : memref<512x32xf32, #tpu.memory_space<vmem>>, vector<512x32xf32>
    tpu.vector_store %arg7[%c0_66, %c0_67], %84 {strides = array<i32>} : memref<512x32xf32, #tpu.memory_space<vmem>>, vector<512x32xf32>,
    %c0_68 = arith.constant 0 : index
    %c0_69 = arith.constant 0 : index
    %86 = tpu.strided_load %arg7[%c0_68, %c0_69] {strides = array<i32: 2, 1>} : memref<512x32xf32, #tpu.memory_space<vmem>>, vector<256x32xf32>
    %c1_70 = arith.constant 1 : index
    %c0_71 = arith.constant 0 : index
    %87 = tpu.strided_load %arg7[%c1_70, %c0_71] {strides = array<i32: 2, 1>} : memref<512x32xf32, #tpu.memory_space<vmem>>, vector<256x32xf32>
    %88 = arith.maximumf %86, %87 : vector<256x32xf32>
    %cst_72 = arith.constant 0.000000e+00 : f32
    %89 = vector.broadcast %cst_72 : f32 to vector<18x18x32xf32>
    %c0_73 = arith.constant 0 : index
    %c0_74 = arith.constant 0 : index
    %c0_75 = arith.constant 0 : index
    %90 = vector.load %arg8[%c0_73, %c0_74, %c0_75] : memref<18x18x32xf32, #tpu.memory_space<vmem>>, vector<18x18x32xf32>
    tpu.vector_store %arg8[%c0_73, %c0_74, %c0_75], %89 {strides = array<i32>} : memref<18x18x32xf32, #tpu.memory_space<vmem>>, vector<18x18x32xf32>,
    %91 = vector.shape_cast %88 : vector<256x32xf32> to vector<16x16x32xf32>
    %c1_76 = arith.constant 1 : index
    %c1_77 = arith.constant 1 : index
    %c0_78 = arith.constant 0 : index
    %92 = vector.load %arg8[%c1_76, %c1_77, %c0_78] : memref<18x18x32xf32, #tpu.memory_space<vmem>>, vector<16x16x32xf32>
    tpu.vector_store %arg8[%c1_76, %c1_77, %c0_78], %91 {strides = array<i32>} : memref<18x18x32xf32, #tpu.memory_space<vmem>>, vector<16x16x32xf32>,
    %cst_79 = arith.constant 0.000000e+00 : f32
    %93 = vector.broadcast %cst_79 : f32 to vector<256x64xf32>
    %c0_80 = arith.constant 0 : index
    %c0_81 = arith.constant 0 : index
    %c0_82 = arith.constant 0 : index
    %94 = vector.load %arg8[%c0_80, %c0_81, %c0_82] : memref<18x18x32xf32, #tpu.memory_space<vmem>>, vector<16x16x32xf32>
    %95 = vector.shape_cast %94 : vector<16x16x32xf32> to vector<256x32xf32>
    %96 = arith.truncf %95 : vector<256x32xf32> to vector<256x32xbf16>
    %c0_83 = arith.constant 0 : index
    %c0_84 = arith.constant 0 : index
    %c0_85 = arith.constant 0 : index
    %97 = vector.load %arg4[%c0_83, %c0_84, %c0_85] : memref<9x32x64xbf16, #tpu.memory_space<vmem>>, vector<1x32x64xbf16>
    %98 = vector.shape_cast %97 : vector<1x32x64xbf16> to vector<32x64xbf16>
    %cst_86 = arith.constant dense<0.000000e+00> : vector<256x64xf32>
    %99 = tpu.matmul %96, %98, %cst_86 {dimension_numbers = #tpu.dot_dimension_numbers<[1], [0], [0], [1], [0, 0, 1, 1], [], []>} : vector<256x32xbf16>, vector<32x64xbf16>, vector<256x64xf32> -> vector<256x64xf32>
    %100 = arith.addf %93, %99 : vector<256x64xf32>
    %c0_87 = arith.constant 0 : index
    %c1_88 = arith.constant 1 : index
    %c0_89 = arith.constant 0 : index
    %101 = vector.load %arg8[%c0_87, %c1_88, %c0_89] : memref<18x18x32xf32, #tpu.memory_space<vmem>>, vector<16x16x32xf32>
    %102 = vector.shape_cast %101 : vector<16x16x32xf32> to vector<256x32xf32>
    %103 = arith.truncf %102 : vector<256x32xf32> to vector<256x32xbf16>
    %c1_90 = arith.constant 1 : index
    %c0_91 = arith.constant 0 : index
    %c0_92 = arith.constant 0 : index
    %104 = vector.load %arg4[%c1_90, %c0_91, %c0_92] : memref<9x32x64xbf16, #tpu.memory_space<vmem>>, vector<1x32x64xbf16>
    %105 = vector.shape_cast %104 : vector<1x32x64xbf16> to vector<32x64xbf16>
    %cst_93 = arith.constant dense<0.000000e+00> : vector<256x64xf32>
    %106 = tpu.matmul %103, %105, %cst_93 {dimension_numbers = #tpu.dot_dimension_numbers<[1], [0], [0], [1], [0, 0, 1, 1], [], []>} : vector<256x32xbf16>, vector<32x64xbf16>, vector<256x64xf32> -> vector<256x64xf32>
    %107 = arith.addf %100, %106 : vector<256x64xf32>
    %c0_94 = arith.constant 0 : index
    %c2_95 = arith.constant 2 : index
    %c0_96 = arith.constant 0 : index
    %108 = vector.load %arg8[%c0_94, %c2_95, %c0_96] : memref<18x18x32xf32, #tpu.memory_space<vmem>>, vector<16x16x32xf32>
    %109 = vector.shape_cast %108 : vector<16x16x32xf32> to vector<256x32xf32>
    %110 = arith.truncf %109 : vector<256x32xf32> to vector<256x32xbf16>
    %c2_97 = arith.constant 2 : index
    %c0_98 = arith.constant 0 : index
    %c0_99 = arith.constant 0 : index
    %111 = vector.load %arg4[%c2_97, %c0_98, %c0_99] : memref<9x32x64xbf16, #tpu.memory_space<vmem>>, vector<1x32x64xbf16>
    %112 = vector.shape_cast %111 : vector<1x32x64xbf16> to vector<32x64xbf16>
    %cst_100 = arith.constant dense<0.000000e+00> : vector<256x64xf32>
    %113 = tpu.matmul %110, %112, %cst_100 {dimension_numbers = #tpu.dot_dimension_numbers<[1], [0], [0], [1], [0, 0, 1, 1], [], []>} : vector<256x32xbf16>, vector<32x64xbf16>, vector<256x64xf32> -> vector<256x64xf32>
    %114 = arith.addf %107, %113 : vector<256x64xf32>
    %c1_101 = arith.constant 1 : index
    %c0_102 = arith.constant 0 : index
    %c0_103 = arith.constant 0 : index
    %115 = vector.load %arg8[%c1_101, %c0_102, %c0_103] : memref<18x18x32xf32, #tpu.memory_space<vmem>>, vector<16x16x32xf32>
    %116 = vector.shape_cast %115 : vector<16x16x32xf32> to vector<256x32xf32>
    %117 = arith.truncf %116 : vector<256x32xf32> to vector<256x32xbf16>
    %c3_104 = arith.constant 3 : index
    %c0_105 = arith.constant 0 : index
    %c0_106 = arith.constant 0 : index
    %118 = vector.load %arg4[%c3_104, %c0_105, %c0_106] : memref<9x32x64xbf16, #tpu.memory_space<vmem>>, vector<1x32x64xbf16>
    %119 = vector.shape_cast %118 : vector<1x32x64xbf16> to vector<32x64xbf16>
    %cst_107 = arith.constant dense<0.000000e+00> : vector<256x64xf32>
    %120 = tpu.matmul %117, %119, %cst_107 {dimension_numbers = #tpu.dot_dimension_numbers<[1], [0], [0], [1], [0, 0, 1, 1], [], []>} : vector<256x32xbf16>, vector<32x64xbf16>, vector<256x64xf32> -> vector<256x64xf32>
    %121 = arith.addf %114, %120 : vector<256x64xf32>
    %c1_108 = arith.constant 1 : index
    %c1_109 = arith.constant 1 : index
    %c0_110 = arith.constant 0 : index
    %122 = vector.load %arg8[%c1_108, %c1_109, %c0_110] : memref<18x18x32xf32, #tpu.memory_space<vmem>>, vector<16x16x32xf32>
    %123 = vector.shape_cast %122 : vector<16x16x32xf32> to vector<256x32xf32>
    %124 = arith.truncf %123 : vector<256x32xf32> to vector<256x32xbf16>
    %c4_111 = arith.constant 4 : index
    %c0_112 = arith.constant 0 : index
    %c0_113 = arith.constant 0 : index
    %125 = vector.load %arg4[%c4_111, %c0_112, %c0_113] : memref<9x32x64xbf16, #tpu.memory_space<vmem>>, vector<1x32x64xbf16>
    %126 = vector.shape_cast %125 : vector<1x32x64xbf16> to vector<32x64xbf16>
    %cst_114 = arith.constant dense<0.000000e+00> : vector<256x64xf32>
    %127 = tpu.matmul %124, %126, %cst_114 {dimension_numbers = #tpu.dot_dimension_numbers<[1], [0], [0], [1], [0, 0, 1, 1], [], []>} : vector<256x32xbf16>, vector<32x64xbf16>, vector<256x64xf32> -> vector<256x64xf32>
    %128 = arith.addf %121, %127 : vector<256x64xf32>
    %c1_115 = arith.constant 1 : index
    %c2_116 = arith.constant 2 : index
    %c0_117 = arith.constant 0 : index
    %129 = vector.load %arg8[%c1_115, %c2_116, %c0_117] : memref<18x18x32xf32, #tpu.memory_space<vmem>>, vector<16x16x32xf32>
    %130 = vector.shape_cast %129 : vector<16x16x32xf32> to vector<256x32xf32>
    %131 = arith.truncf %130 : vector<256x32xf32> to vector<256x32xbf16>
    %c5_118 = arith.constant 5 : index
    %c0_119 = arith.constant 0 : index
    %c0_120 = arith.constant 0 : index
    %132 = vector.load %arg4[%c5_118, %c0_119, %c0_120] : memref<9x32x64xbf16, #tpu.memory_space<vmem>>, vector<1x32x64xbf16>
    %133 = vector.shape_cast %132 : vector<1x32x64xbf16> to vector<32x64xbf16>
    %cst_121 = arith.constant dense<0.000000e+00> : vector<256x64xf32>
    %134 = tpu.matmul %131, %133, %cst_121 {dimension_numbers = #tpu.dot_dimension_numbers<[1], [0], [0], [1], [0, 0, 1, 1], [], []>} : vector<256x32xbf16>, vector<32x64xbf16>, vector<256x64xf32> -> vector<256x64xf32>
    %135 = arith.addf %128, %134 : vector<256x64xf32>
    %c2_122 = arith.constant 2 : index
    %c0_123 = arith.constant 0 : index
    %c0_124 = arith.constant 0 : index
    %136 = vector.load %arg8[%c2_122, %c0_123, %c0_124] : memref<18x18x32xf32, #tpu.memory_space<vmem>>, vector<16x16x32xf32>
    %137 = vector.shape_cast %136 : vector<16x16x32xf32> to vector<256x32xf32>
    %138 = arith.truncf %137 : vector<256x32xf32> to vector<256x32xbf16>
    %c6_125 = arith.constant 6 : index
    %c0_126 = arith.constant 0 : index
    %c0_127 = arith.constant 0 : index
    %139 = vector.load %arg4[%c6_125, %c0_126, %c0_127] : memref<9x32x64xbf16, #tpu.memory_space<vmem>>, vector<1x32x64xbf16>
    %140 = vector.shape_cast %139 : vector<1x32x64xbf16> to vector<32x64xbf16>
    %cst_128 = arith.constant dense<0.000000e+00> : vector<256x64xf32>
    %141 = tpu.matmul %138, %140, %cst_128 {dimension_numbers = #tpu.dot_dimension_numbers<[1], [0], [0], [1], [0, 0, 1, 1], [], []>} : vector<256x32xbf16>, vector<32x64xbf16>, vector<256x64xf32> -> vector<256x64xf32>
    %142 = arith.addf %135, %141 : vector<256x64xf32>
    %c2_129 = arith.constant 2 : index
    %c1_130 = arith.constant 1 : index
    %c0_131 = arith.constant 0 : index
    %143 = vector.load %arg8[%c2_129, %c1_130, %c0_131] : memref<18x18x32xf32, #tpu.memory_space<vmem>>, vector<16x16x32xf32>
    %144 = vector.shape_cast %143 : vector<16x16x32xf32> to vector<256x32xf32>
    %145 = arith.truncf %144 : vector<256x32xf32> to vector<256x32xbf16>
    %c7_132 = arith.constant 7 : index
    %c0_133 = arith.constant 0 : index
    %c0_134 = arith.constant 0 : index
    %146 = vector.load %arg4[%c7_132, %c0_133, %c0_134] : memref<9x32x64xbf16, #tpu.memory_space<vmem>>, vector<1x32x64xbf16>
    %147 = vector.shape_cast %146 : vector<1x32x64xbf16> to vector<32x64xbf16>
    %cst_135 = arith.constant dense<0.000000e+00> : vector<256x64xf32>
    %148 = tpu.matmul %145, %147, %cst_135 {dimension_numbers = #tpu.dot_dimension_numbers<[1], [0], [0], [1], [0, 0, 1, 1], [], []>} : vector<256x32xbf16>, vector<32x64xbf16>, vector<256x64xf32> -> vector<256x64xf32>
    %149 = arith.addf %142, %148 : vector<256x64xf32>
    %c2_136 = arith.constant 2 : index
    %c2_137 = arith.constant 2 : index
    %c0_138 = arith.constant 0 : index
    %150 = vector.load %arg8[%c2_136, %c2_137, %c0_138] : memref<18x18x32xf32, #tpu.memory_space<vmem>>, vector<16x16x32xf32>
    %151 = vector.shape_cast %150 : vector<16x16x32xf32> to vector<256x32xf32>
    %152 = arith.truncf %151 : vector<256x32xf32> to vector<256x32xbf16>
    %c8_139 = arith.constant 8 : index
    %c0_140 = arith.constant 0 : index
    %c0_141 = arith.constant 0 : index
    %153 = vector.load %arg4[%c8_139, %c0_140, %c0_141] : memref<9x32x64xbf16, #tpu.memory_space<vmem>>, vector<1x32x64xbf16>
    %154 = vector.shape_cast %153 : vector<1x32x64xbf16> to vector<32x64xbf16>
    %cst_142 = arith.constant dense<0.000000e+00> : vector<256x64xf32>
    %155 = tpu.matmul %152, %154, %cst_142 {dimension_numbers = #tpu.dot_dimension_numbers<[1], [0], [0], [1], [0, 0, 1, 1], [], []>} : vector<256x32xbf16>, vector<32x64xbf16>, vector<256x64xf32> -> vector<256x64xf32>
    %156 = arith.addf %149, %155 : vector<256x64xf32>
    %c0_143 = arith.constant 0 : index
    %c0_144 = arith.constant 0 : index
    %157 = vector.load %arg5[%c0_143, %c0_144] : memref<1x64xf32, #tpu.memory_space<vmem>>, vector<1x64xf32>
    %158 = vector.broadcast %157 : vector<1x64xf32> to vector<256x64xf32>
    %159 = arith.addf %156, %158 : vector<256x64xf32>
    %cst_145 = arith.constant 0.000000e+00 : f32
    %160 = vector.broadcast %cst_145 : f32 to vector<256x64xf32>
    %161 = arith.maximumf %159, %160 : vector<256x64xf32>
    %162 = vector.shape_cast %161 : vector<256x64xf32> to vector<8x2x16x64xf32>
    %163 = vector.extract_strided_slice %162 {offsets = [0, 0, 0, 0], sizes = [8, 1, 16, 64], strides = [1, 1, 1, 1]} : vector<8x2x16x64xf32> to vector<8x1x16x64xf32>
    %164 = vector.shape_cast %163 : vector<8x1x16x64xf32> to vector<8x16x64xf32>
    %165 = vector.extract_strided_slice %162 {offsets = [0, 1, 0, 0], sizes = [8, 1, 16, 64], strides = [1, 1, 1, 1]} : vector<8x2x16x64xf32> to vector<8x1x16x64xf32>
    %166 = vector.shape_cast %165 : vector<8x1x16x64xf32> to vector<8x16x64xf32>
    %167 = arith.maximumf %164, %166 : vector<8x16x64xf32>
    %168 = vector.shape_cast %167 : vector<8x16x64xf32> to vector<128x64xf32>
    %c0_146 = arith.constant 0 : index
    %c0_147 = arith.constant 0 : index
    %169 = vector.load %arg9[%c0_146, %c0_147] : memref<128x64xf32, #tpu.memory_space<vmem>>, vector<128x64xf32>
    tpu.vector_store %arg9[%c0_146, %c0_147], %168 {strides = array<i32>} : memref<128x64xf32, #tpu.memory_space<vmem>>, vector<128x64xf32>,
    %c0_148 = arith.constant 0 : index
    %c0_149 = arith.constant 0 : index
    %170 = tpu.strided_load %arg9[%c0_148, %c0_149] {strides = array<i32: 2, 1>} : memref<128x64xf32, #tpu.memory_space<vmem>>, vector<64x64xf32>
    %c1_150 = arith.constant 1 : index
    %c0_151 = arith.constant 0 : index
    %171 = tpu.strided_load %arg9[%c1_150, %c0_151] {strides = array<i32: 2, 1>} : memref<128x64xf32, #tpu.memory_space<vmem>>, vector<64x64xf32>
    %172 = arith.maximumf %170, %171 : vector<64x64xf32>
    %c0_152 = arith.constant 0 : index
    %c0_153 = arith.constant 0 : index
    %c0_154 = arith.constant 0 : index
    %173 = vector.load %arg6[%c0_152, %c0_153, %c0_154] : memref<1x64x64xf32, #tpu.memory_space<vmem>>, vector<1x64x64xf32>
    %174 = vector.shape_cast %173 : vector<1x64x64xf32> to vector<64x64xf32>
    %175 = vector.shape_cast %172 : vector<64x64xf32> to vector<1x64x64xf32>
    tpu.vector_store %arg6[%c0_152, %c0_153, %c0_154], %175 {strides = array<i32>} : memref<1x64x64xf32, #tpu.memory_space<vmem>>, vector<1x64x64xf32>,
    return
  }
  func.func @transform_0(%arg0: i32) -> (i32, i32, i32, i32) {
    %c0_i32 = arith.constant 0 : i32
    %c0_i32_0 = arith.constant 0 : i32
    %c0_i32_1 = arith.constant 0 : i32
    %c0_i32_2 = arith.constant 0 : i32
    return %arg0, %c0_i32, %c0_i32_0, %c0_i32_1 : i32, i32, i32, i32
  }
  func.func @transform_1(%arg0: i32) -> (i32, i32, i32) {
    %c0_i32 = arith.constant 0 : i32
    %c0_i32_0 = arith.constant 0 : i32
    %c0_i32_1 = arith.constant 0 : i32
    %c0_i32_2 = arith.constant 0 : i32
    return %c0_i32, %c0_i32_0, %c0_i32_1 : i32, i32, i32
  }
  func.func @transform_2(%arg0: i32) -> (i32, i32) {
    %c0_i32 = arith.constant 0 : i32
    %c0_i32_0 = arith.constant 0 : i32
    %c0_i32_1 = arith.constant 0 : i32
    return %c0_i32, %c0_i32_0 : i32, i32
  }
  func.func @transform_3(%arg0: i32) -> (i32, i32, i32) {
    %c0_i32 = arith.constant 0 : i32
    %c0_i32_0 = arith.constant 0 : i32
    %c0_i32_1 = arith.constant 0 : i32
    %c0_i32_2 = arith.constant 0 : i32
    return %c0_i32, %c0_i32_0, %c0_i32_1 : i32, i32, i32
  }
  func.func @transform_4(%arg0: i32) -> (i32, i32) {
    %c0_i32 = arith.constant 0 : i32
    %c0_i32_0 = arith.constant 0 : i32
    %c0_i32_1 = arith.constant 0 : i32
    return %c0_i32, %c0_i32_0 : i32, i32
  }
  func.func @transform_5(%arg0: i32) -> (i32, i32, i32) {
    %c0_i32 = arith.constant 0 : i32
    %c0_i32_0 = arith.constant 0 : i32
    %c0_i32_1 = arith.constant 0 : i32
    return %arg0, %c0_i32, %c0_i32_0 : i32, i32, i32
  }
}

module attributes {stable_mosaic.version = 11 : i64} {
  func.func @_fc_kernel(%arg0: memref<2x4096xf32, #tpu.memory_space<vmem>>, %arg1: memref<4096x256xbf16, #tpu.memory_space<vmem>>, %arg2: memref<1x256xf32, #tpu.memory_space<vmem>>, %arg3: memref<256x10xbf16, #tpu.memory_space<vmem>>, %arg4: memref<1x10xf32, #tpu.memory_space<vmem>>, %arg5: memref<2x10xf32, #tpu.memory_space<vmem>>) attributes {dimension_semantics = [], scalar_prefetch = 0 : i64, scratch_operands = 0 : i64, tpu.core_type = #tpu.core_type<tc>} {
    %c0 = arith.constant 0 : index
    %c0_0 = arith.constant 0 : index
    %0 = vector.load %arg0[%c0, %c0_0] : memref<2x4096xf32, #tpu.memory_space<vmem>>, vector<2x4096xf32>
    %1 = arith.truncf %0 : vector<2x4096xf32> to vector<2x4096xbf16>
    %c0_1 = arith.constant 0 : index
    %c0_2 = arith.constant 0 : index
    %2 = vector.load %arg1[%c0_1, %c0_2] : memref<4096x256xbf16, #tpu.memory_space<vmem>>, vector<4096x256xbf16>
    %cst = arith.constant dense<0.000000e+00> : vector<2x256xf32>
    %3 = tpu.matmul %1, %2, %cst {dimension_numbers = #tpu.dot_dimension_numbers<[1], [0], [0], [1], [0, 0, 1, 1], [], []>} : vector<2x4096xbf16>, vector<4096x256xbf16>, vector<2x256xf32> -> vector<2x256xf32>
    %c0_3 = arith.constant 0 : index
    %c0_4 = arith.constant 0 : index
    %4 = vector.load %arg2[%c0_3, %c0_4] : memref<1x256xf32, #tpu.memory_space<vmem>>, vector<1x256xf32>
    %5 = vector.broadcast %4 : vector<1x256xf32> to vector<2x256xf32>
    %6 = arith.addf %3, %5 : vector<2x256xf32>
    %cst_5 = arith.constant 0.000000e+00 : f32
    %7 = vector.broadcast %cst_5 : f32 to vector<2x256xf32>
    %8 = arith.maximumf %6, %7 : vector<2x256xf32>
    %9 = arith.truncf %8 : vector<2x256xf32> to vector<2x256xbf16>
    %c0_6 = arith.constant 0 : index
    %c0_7 = arith.constant 0 : index
    %10 = vector.load %arg3[%c0_6, %c0_7] : memref<256x10xbf16, #tpu.memory_space<vmem>>, vector<256x10xbf16>
    %cst_8 = arith.constant dense<0.000000e+00> : vector<2x10xf32>
    %11 = tpu.matmul %9, %10, %cst_8 {dimension_numbers = #tpu.dot_dimension_numbers<[1], [0], [0], [1], [0, 0, 1, 1], [], []>} : vector<2x256xbf16>, vector<256x10xbf16>, vector<2x10xf32> -> vector<2x10xf32>
    %c0_9 = arith.constant 0 : index
    %c0_10 = arith.constant 0 : index
    %12 = vector.load %arg4[%c0_9, %c0_10] : memref<1x10xf32, #tpu.memory_space<vmem>>, vector<1x10xf32>
    %13 = vector.broadcast %12 : vector<1x10xf32> to vector<2x10xf32>
    %14 = arith.addf %11, %13 : vector<2x10xf32>
    %c0_11 = arith.constant 0 : index
    %c0_12 = arith.constant 0 : index
    %15 = vector.load %arg5[%c0_11, %c0_12] : memref<2x10xf32, #tpu.memory_space<vmem>>, vector<2x10xf32>
    tpu.vector_store %arg5[%c0_11, %c0_12], %14 {strides = array<i32>} : memref<2x10xf32, #tpu.memory_space<vmem>>, vector<2x10xf32>,
    return
  }
}

</mosaic_0001>

<bundles_post_ra>
// kernel: net_forward.3
= control target key start
LH: loop header
LB: loop body
LE: loop exit
PB: predicated region body
PF: predicated region fallthrough
CT: control target
= control target key end

     0   :  { %v5602_v36 = vmov 1983009808   ;;  %v42_v38 = vlaneseq  ;;  %s7403_s0 = inlined_call_operand.vmem [shape: f32[2,4096], index: 0, kind: input, shape index: {}]   ;;  %s7404_s1 = inlined_call_operand.vmem [shape: bf16[4096,256], index: 1, kind: input, shape index: {}]   ;;  %s7405_s2 = inlined_call_operand.vmem [shape: f32[1,256], index: 2, kind: input, shape index: {}]   ;;  %s7406_s3 = inlined_call_operand.vmem [shape: bf16[256,10], index: 3, kind: input, shape index: {}]   ;;  %s7407_s4 = inlined_call_operand.vmem [shape: f32[1,10], index: 4, kind: input, shape index: {}]   ;;  %s7408_s5 = inlined_call_operand.hbm [shape: f32[2,10], index: 5, kind: output, shape index: {}]  }
   0x1   :  { %v4786_v0 = vld [vmem:[%s7404_s1 + $0x4] ss:$8 sps:$4 sm:$0xff]   ;;  %v4790_v2 = vld [vmem:[%s7404_s1] ss:$8 sps:$4 sm:$0xff]   ;;  %v4792_v4 = vld [vmem:[%s7404_s1 + $0x14] ss:$8 sps:$4 sm:$0xff]   ;;  %v40_v37 = vunpack.c.l.s4 %v5602_v36 }
   0x2   :  { %v4788_v1 = vld [vmem:[%s7404_s1 + $0x804] ss:$8 sps:$4 sm:$0xff]   ;;  %3322 = vmatprep.subr.bf16.mxu1 %v4786_v0  ;;  %v4791_v3 = vld [vmem:[%s7404_s1 + $0x800] ss:$8 sps:$4 sm:$0xff]   ;;  %v4794_v5 = vld [vmem:[%s7404_s1 + $0x814] ss:$8 sps:$4 sm:$0xff]  }
   0x3   :  { %3650 = vmatprep.subr.bf16.mxu0 %v4788_v1  ;;  %3323 = vmatpush1.bf16.msra.mxu1 %v4790_v2  ;;  %v4796_v6 = vld [vmem:[%s7404_s1 + $0x10] ss:$8 sps:$4 sm:$0xff]   ;;  %v4798_v8 = vld [vmem:[%s7404_s1 + $0x24] ss:$8 sps:$4 sm:$0xff]   ;;  %v4802_v10 = vld [vmem:[%s7404_s1 + $0x20] ss:$8 sps:$4 sm:$0xff]   ;;  %v41_v42 = vunpack.c.0.s8 %v40_v37 }
   0x4   :  { %3651 = vmatpush1.bf16.msra.mxu0 %v4791_v3  ;;  %3324 = vmatprep.subr.bf16.mxu1 %v4792_v4  ;;  %v4797_v7 = vld [vmem:[%s7404_s1 + $0x810] ss:$8 sps:$4 sm:$0xff]   ;;  %v4800_v9 = vld [vmem:[%s7404_s1 + $0x824] ss:$8 sps:$4 sm:$0xff]   ;;  %v4803_v11 = vld [vmem:[%s7404_s1 + $0x820] ss:$8 sps:$4 sm:$0xff]  }
   0x5   :  { %3652 = vmatprep.subr.bf16.mxu0 %v4794_v5  ;;  %v4804_v12 = vld [vmem:[%s7404_s1 + $0x34] ss:$8 sps:$4 sm:$0xff]   ;;  %v4808_v14 = vld [vmem:[%s7404_s1 + $0x30] ss:$8 sps:$4 sm:$0xff]   ;;  %v4810_v16 = vld [vmem:[%s7404_s1 + $0x44] ss:$8 sps:$4 sm:$0xff]  }
   0x6   :  { %v4806_v13 = vld [vmem:[%s7404_s1 + $0x834] ss:$8 sps:$4 sm:$0xff]   ;;  %v4809_v15 = vld [vmem:[%s7404_s1 + $0x830] ss:$8 sps:$4 sm:$0xff]   ;;  %v4812_v17 = vld [vmem:[%s7404_s1 + $0x844] ss:$8 sps:$4 sm:$0xff]  }
   0x7   :  { %3325 = vmatpush1.bf16.msra.mxu1 %v4796_v6  ;;  %v4814_v18 = vld [vmem:[%s7404_s1 + $0x40] ss:$8 sps:$4 sm:$0xff]   ;;  %v4816_v20 = vld [vmem:[%s7404_s1 + $0x54] ss:$8 sps:$4 sm:$0xff]   ;;  %v4820_v22 = vld [vmem:[%s7404_s1 + $0x50] ss:$8 sps:$4 sm:$0xff]  }
   0x8   :  { %3653 = vmatpush1.bf16.msra.mxu0 %v4797_v7  ;;  %3326 = vmatprep.subr.bf16.mxu1 %v4798_v8  ;;  %v4815_v19 = vld [vmem:[%s7404_s1 + $0x840] ss:$8 sps:$4 sm:$0xff]   ;;  %v4818_v21 = vld [vmem:[%s7404_s1 + $0x854] ss:$8 sps:$4 sm:$0xff]   ;;  %v4821_v23 = vld [vmem:[%s7404_s1 + $0x850] ss:$8 sps:$4 sm:$0xff]  }
   0x9   :  { %3654 = vmatprep.subr.bf16.mxu0 %v4800_v9  ;;  %v4822_v24 = vld [vmem:[%s7404_s1 + $0x64] ss:$8 sps:$4 sm:$0xff]   ;;  %v4826_v26 = vld [vmem:[%s7404_s1 + $0x60] ss:$8 sps:$4 sm:$0xff]   ;;  %v4828_v28 = vld [vmem:[%s7404_s1 + $0x74] ss:$8 sps:$4 sm:$0xff]  }
   0xa   :  { %v4824_v25 = vld [vmem:[%s7404_s1 + $0x864] ss:$8 sps:$4 sm:$0xff]   ;;  %v4827_v27 = vld [vmem:[%s7404_s1 + $0x860] ss:$8 sps:$4 sm:$0xff]   ;;  %v4830_v29 = vld [vmem:[%s7404_s1 + $0x874] ss:$8 sps:$4 sm:$0xff]  }
   0xb   :  { %3327 = vmatpush1.bf16.msra.mxu1 %v4802_v10  ;;  %v4832_v30 = vld [vmem:[%s7404_s1 + $0x70] ss:$8 sps:$4 sm:$0xff]   ;;  %v4834_v32 = vld [vmem:[%s7404_s1 + $0x84] ss:$8 sps:$4 sm:$0xff]   ;;  %v4838_v34 = vld [vmem:[%s7404_s1 + $0x80] ss:$8 sps:$4 sm:$0xff]  }
   0xc   :  { %3655 = vmatpush1.bf16.msra.mxu0 %v4803_v11  ;;  %3328 = vmatprep.subr.bf16.mxu1 %v4804_v12  ;;  %v4833_v31 = vld [vmem:[%s7404_s1 + $0x870] ss:$8 sps:$4 sm:$0xff]   ;;  %v4836_v33 = vld [vmem:[%s7404_s1 + $0x884] ss:$8 sps:$4 sm:$0xff]   ;;  %v4839_v35 = vld [vmem:[%s7404_s1 + $0x880] ss:$8 sps:$4 sm:$0xff]  }
   0xd   :  { %3656 = vmatprep.subr.bf16.mxu0 %v4806_v13  ;;  %v4840_v39 = vld [vmem:[%s7404_s1 + $0x94] ss:$8 sps:$4 sm:$0xff]   ;;  %v4844_v41 = vld [vmem:[%s7404_s1 + $0x90] ss:$8 sps:$4 sm:$0xff]   ;;  %v5751_v43 = vshrl.u32 %v42_v38, 7  ;;  %v22_v52 = vld [vmem:[%s7403_s0] sm:$0xff] }
   0xe   :  { %v4842_v40 = vld [vmem:[%s7404_s1 + $0x894] ss:$8 sps:$4 sm:$0xff]   ;;  %v4845_v44 = vld [vmem:[%s7404_s1 + $0x890] ss:$8 sps:$4 sm:$0xff]   ;;  %v4846_v45 = vld [vmem:[%s7404_s1 + $0xa4] ss:$8 sps:$4 sm:$0xff]   ;;  %v38_v8 = vcombine.high %v22_v52, %v22_v52 }
   0xf   :  { %3329 = vmatpush1.bf16.msra.mxu1 %v4808_v14  ;;  %v4848_v46 = vld [vmem:[%s7404_s1 + $0x8a4] ss:$8 sps:$4 sm:$0xff]   ;;  %v4850_v47 = vld [vmem:[%s7404_s1 + $0xa0] ss:$8 sps:$4 sm:$0xff]   ;;  %v5769_v49 = vsub.s32 %v41_v42, %v5751_v43  ;;  %v4852_v50 = vld [vmem:[%s7404_s1 + $0xb4] ss:$8 sps:$4 sm:$0xff]  }
  0x10   :  { %3657 = vmatpush1.bf16.msra.mxu0 %v4809_v15  ;;  %3330 = vmatprep.subr.bf16.mxu1 %v4810_v16  ;;  %v4851_v48 = vld [vmem:[%s7404_s1 + $0x8a0] ss:$8 sps:$4 sm:$0xff]   ;;  %v4854_v51 = vld [vmem:[%s7404_s1 + $0x8b4] ss:$8 sps:$4 sm:$0xff]   ;;  %v4856_v53 = vld [vmem:[%s7404_s1 + $0xb0] ss:$8 sps:$4 sm:$0xff]  }
  0x11   :  { %3658 = vmatprep.subr.bf16.mxu0 %v4812_v17  ;;  %v5784_v54 = vrot.slane %v22_v52, %v5769_v49  ;;  %v4857_v55 = vld [vmem:[%s7404_s1 + $0x8b0] ss:$8 sps:$4 sm:$0xff]   ;;  %v26_v56 = vld [vmem:[%s7403_s0 + $0x20] sm:$0xff]  ;;  %v4864_v1 = vld [vmem:[%s7404_s1 + $0xd4] ss:$8 sps:$4 sm:$0xff]   ;;  %v5838_v14 = vrot.slane %v38_v8, %v5769_v49 }
  0x12   :  { %v4858_v57 = vld [vmem:[%s7404_s1 + $0xc4] ss:$8 sps:$4 sm:$0xff]   ;;  %v113_v60 = vrot.slane %v26_v56, %v5769_v49  ;;  %v4862_v63 = vld [vmem:[%s7404_s1 + $0xc0] ss:$8 sps:$4 sm:$0xff]   ;;  %v4866_v2 = vld [vmem:[%s7404_s1 + $0x8d4] ss:$8 sps:$4 sm:$0xff]   ;;  %v106_v9 = vcombine.high %v26_v56, %v26_v56 }
  0x13   :  { %3331 = vmatpush1.bf16.msra.mxu1 %v4814_v18  ;;  %v4860_v58 = vld [vmem:[%s7404_s1 + $0x8c4] ss:$8 sps:$4 sm:$0xff]   ;;  %v53_v59 = vcombine.high %v5784_v54, %v5784_v54  ;;  %v4863_v0 = vld [vmem:[%s7404_s1 + $0x8c0] ss:$8 sps:$4 sm:$0xff]   ;;  %v4868_v4 = vld [vmem:[%s7404_s1 + $0xd0] ss:$8 sps:$4 sm:$0xff]  }
  0x14   :  { %3659 = vmatpush1.bf16.msra.mxu0 %v4815_v19  ;;  %3332 = vmatprep.subr.bf16.mxu1 %v4816_v20  ;;  %v121_v62 = vcombine.high %v113_v60, %v113_v60  ;;  %v4869_v5 = vld [vmem:[%s7404_s1 + $0x8d0] ss:$8 sps:$4 sm:$0xff]   ;;  %v4870_v6 = vld [vmem:[%s7404_s1 + $0xe4] ss:$8 sps:$4 sm:$0xff]   ;;  %v4874_v10 = vld [vmem:[%s7404_s1 + $0xe0] ss:$8 sps:$4 sm:$0xff]   ;;  %v5841_v15 = vrot.slane %v106_v9, %v5769_v49  ;;  %v54_v20 = vcombine.high %v5838_v14, %v5838_v14 }
  0x15   :  { %3660 = vmatprep.subr.bf16.mxu0 %v4818_v21  ;;  %v207_v61 = vpack.c.bf16 %v53_v59, %v53_v59  ;;  %v4872_v7 = vld [vmem:[%s7404_s1 + $0x8e4] ss:$8 sps:$4 sm:$0xff]   ;;  %v4875_v11 = vld [vmem:[%s7404_s1 + $0x8e0] ss:$8 sps:$4 sm:$0xff]   ;;  %v4876_v12 = vld [vmem:[%s7404_s1 + $0xf4] ss:$8 sps:$4 sm:$0xff]  }
  0x16   :  { %v223_v3 = vpack.c.bf16 %v121_v62, %v121_v62  ;;  %v4878_v13 = vld [vmem:[%s7404_s1 + $0x8f4] ss:$8 sps:$4 sm:$0xff]   ;;  %v4880_v16 = vld [vmem:[%s7404_s1 + $0xf0] ss:$8 sps:$4 sm:$0xff]   ;;  %v4885_v18 = vld [vmem:[%s7404_s1 + $0x104] ss:$8 sps:$4 sm:$0xff]   ;;  %v122_v21 = vcombine.high %v5841_v15, %v5841_v15 }
  0x17   :  { %3333 = vmatpush1.bf16.msra.mxu1 %v4820_v22  ;;  %3354 = vmatprep.mubr.bf16.mxu1 %v207_v61  ;;  %v4881_v17 = vld [vmem:[%s7404_s1 + $0x8f0] ss:$8 sps:$4 sm:$0xff]   ;;  %v4889_v19 = vld [vmem:[%s7404_s1 + $0x904] ss:$8 sps:$4 sm:$0xff]   ;;  %v206_v22 = vpack.c.bf16 %v5784_v54, %v5784_v54  ;;  %v4904_v36 = vld [vmem:[%s7404_s1 + $0x134] ss:$8 sps:$4 sm:$0xff]  }
  0x18   :  { %3661 = vmatpush1.bf16.msra.mxu0 %v4821_v23  ;;  %3334 = vmatprep.subr.bf16.mxu1 %v4822_v24  ;;  %v222_v23 = vpack.c.bf16 %v113_v60, %v113_v60  ;;  %v4883_v24 = vld [vmem:[%s7404_s1 + $0x100] ss:$8 sps:$4 sm:$0xff]   ;;  %v4907_v37 = vld [vmem:[%s7404_s1 + $0x934] ss:$8 sps:$4 sm:$0xff]   ;;  %v4902_v38 = vld [vmem:[%s7404_s1 + $0x130] ss:$8 sps:$4 sm:$0xff]  }
  0x19   :  { %3662 = vmatprep.subr.bf16.mxu0 %v4824_v25  ;;  %3682 = vmatprep.mubr.bf16.mxu0 %v223_v3  ;;  %v4887_v25 = vld [vmem:[%s7404_s1 + $0x900] ss:$8 sps:$4 sm:$0xff]   ;;  %v4928_v54 = vld [vmem:[%s7404_s1 + $0x174] ss:$8 sps:$4 sm:$0xff]   ;;  %v4926_v56 = vld [vmem:[%s7404_s1 + $0x170] ss:$8 sps:$4 sm:$0xff]  }
  0x1a   :  { %v4908_v42 = vld [vmem:[%s7404_s1 + $0x140] ss:$8 sps:$4 sm:$0xff]   ;;  %v4937_v59 = vld [vmem:[%s7404_s1 + $0x984] ss:$8 sps:$4 sm:$0xff]   ;;  %v4940_v62 = vld [vmem:[%s7404_s1 + $0x194] ss:$8 sps:$4 sm:$0xff]  }
  0x1b   :  { %3335 = vmatpush1.bf16.msra.mxu1 %v4826_v26  ;;  %v4892_v26 = vld [vmem:[%s7404_s1 + $0x114] ss:$8 sps:$4 sm:$0xff]   ;;  %v4920_v52 = vld [vmem:[%s7404_s1 + $0x160] ss:$8 sps:$4 sm:$0xff]   ;;  %v4949_v3 = vld [vmem:[%s7404_s1 + $0x9a4] ss:$8 sps:$4 sm:$0xff]  }
  0x1c   :  { %3663 = vmatpush1.bf16.msra.mxu0 %v4827_v27  ;;  %3336 = vmatprep.subr.bf16.mxu1 %v4828_v28  ;;  %v4895_v27 = vld [vmem:[%s7404_s1 + $0x914] ss:$8 sps:$4 sm:$0xff]   ;;  %v209_v28 = vpack.c.bf16 %v54_v20, %v54_v20  ;;  %v4932_v60 = vld [vmem:[%s7404_s1 + $0x180] ss:$8 sps:$4 sm:$0xff]   ;;  %v4950_v8 = vld [vmem:[%s7404_s1 + $0x1b0] ss:$8 sps:$4 sm:$0xff]  }
  0x1d   :  { %3664 = vmatprep.subr.bf16.mxu0 %v4830_v29  ;;  %v225_v29 = vpack.c.bf16 %v122_v21, %v122_v21  ;;  %v4935_v61 = vld [vmem:[%s7404_s1 + $0x980] ss:$8 sps:$4 sm:$0xff]   ;;  %v4953_v9 = vld [vmem:[%s7404_s1 + $0x9b0] ss:$8 sps:$4 sm:$0xff]   ;;  %v4970_v20 = vld [vmem:[%s7404_s1 + $0x1e4] ss:$8 sps:$4 sm:$0xff]  }
  0x1e   :  { %v4973_v21 = vld [vmem:[%s7404_s1 + $0x9e4] ss:$8 sps:$4 sm:$0xff]  }
  0x1f   :  { %3337 = vmatpush1.bf16.msra.mxu1 %v4832_v30  ;;  %v4890_v30 = vld [vmem:[%s7404_s1 + $0x110] ss:$8 sps:$4 sm:$0xff]  }
  0x20   :  { %3665 = vmatpush1.bf16.msra.mxu0 %v4833_v31  ;;  %3338 = vmatprep.subr.bf16.mxu1 %v4834_v32  ;;  %v4893_v31 = vld [vmem:[%s7404_s1 + $0x910] ss:$8 sps:$4 sm:$0xff]   ;;  %v4898_v32 = vld [vmem:[%s7404_s1 + $0x124] ss:$8 sps:$4 sm:$0xff]  }
  0x21   :  { %3666 = vmatprep.subr.bf16.mxu0 %v4836_v33  ;;  %v4901_v33 = vld [vmem:[%s7404_s1 + $0x924] ss:$8 sps:$4 sm:$0xff]  }
  0x23   :  { %3339 = vmatpush1.bf16.msra.mxu1 %v4838_v34  ;;  %v4896_v34 = vld [vmem:[%s7404_s1 + $0x120] ss:$8 sps:$4 sm:$0xff]  }
  0x24   :  { %3667 = vmatpush1.bf16.msra.mxu0 %v4839_v35  ;;  %3340 = vmatprep.subr.bf16.mxu1 %v4840_v39  ;;  %v4899_v35 = vld [vmem:[%s7404_s1 + $0x920] ss:$8 sps:$4 sm:$0xff]   ;;  %v4905_v39 = vld [vmem:[%s7404_s1 + $0x930] ss:$8 sps:$4 sm:$0xff]  }
  0x25   :  { %3668 = vmatprep.subr.bf16.mxu0 %v4842_v40  ;;  %v4910_v40 = vld [vmem:[%s7404_s1 + $0x144] ss:$8 sps:$4 sm:$0xff]  }
  0x27   :  { %3341 = vmatpush1.bf16.msra.mxu1 %v4844_v41  ;;  %v4913_v41 = vld [vmem:[%s7404_s1 + $0x944] ss:$8 sps:$4 sm:$0xff]  }
  0x28   :  { %3669 = vmatpush1.bf16.msra.mxu0 %v4845_v44  ;;  %3342 = vmatprep.subr.bf16.mxu1 %v4846_v45  ;;  %v4911_v44 = vld [vmem:[%s7404_s1 + $0x940] ss:$8 sps:$4 sm:$0xff]   ;;  %v4916_v45 = vld [vmem:[%s7404_s1 + $0x154] ss:$8 sps:$4 sm:$0xff]  }
  0x29   :  { %3670 = vmatprep.subr.bf16.mxu0 %v4848_v46  ;;  %v4919_v46 = vld [vmem:[%s7404_s1 + $0x954] ss:$8 sps:$4 sm:$0xff]  }
  0x2b   :  { %3343 = vmatpush1.bf16.msra.mxu1 %v4850_v47  ;;  %v4914_v47 = vld [vmem:[%s7404_s1 + $0x150] ss:$8 sps:$4 sm:$0xff]  }
  0x2c   :  { %3671 = vmatpush1.bf16.msra.mxu0 %v4851_v48  ;;  %3344 = vmatprep.subr.bf16.mxu1 %v4852_v50  ;;  %v4917_v48 = vld [vmem:[%s7404_s1 + $0x950] ss:$8 sps:$4 sm:$0xff]   ;;  %v4922_v50 = vld [vmem:[%s7404_s1 + $0x164] ss:$8 sps:$4 sm:$0xff]  }
  0x2d   :  { %3672 = vmatprep.subr.bf16.mxu0 %v4854_v51  ;;  %v4925_v51 = vld [vmem:[%s7404_s1 + $0x964] ss:$8 sps:$4 sm:$0xff]  }
  0x2f   :  { %3345 = vmatpush1.bf16.msra.mxu1 %v4856_v53  ;;  %v4923_v53 = vld [vmem:[%s7404_s1 + $0x960] ss:$8 sps:$4 sm:$0xff]  }
  0x30   :  { %3673 = vmatpush1.bf16.msra.mxu0 %v4857_v55  ;;  %3346 = vmatprep.subr.bf16.mxu1 %v4858_v57  ;;  %v4931_v55 = vld [vmem:[%s7404_s1 + $0x974] ss:$8 sps:$4 sm:$0xff]   ;;  %v4929_v57 = vld [vmem:[%s7404_s1 + $0x970] ss:$8 sps:$4 sm:$0xff]  }
  0x31   :  { %3674 = vmatprep.subr.bf16.mxu0 %v4860_v58  ;;  %v4934_v58 = vld [vmem:[%s7404_s1 + $0x184] ss:$8 sps:$4 sm:$0xff]  }
  0x33   :  { %3347 = vmatpush1.bf16.msra.mxu1 %v4862_v63  ;;  %v4943_v63 = vld [vmem:[%s7404_s1 + $0x994] ss:$8 sps:$4 sm:$0xff]  }
  0x34   :  { %3675 = vmatpush1.bf16.msra.mxu0 %v4863_v0  ;;  %3348 = vmatprep.subr.bf16.mxu1 %v4864_v1  ;;  %v4938_v0 = vld [vmem:[%s7404_s1 + $0x190] ss:$8 sps:$4 sm:$0xff]  }
  0x35   :  { %3676 = vmatprep.subr.bf16.mxu0 %v4866_v2  ;;  %v4941_v1 = vld [vmem:[%s7404_s1 + $0x990] ss:$8 sps:$4 sm:$0xff]   ;;  %v4946_v2 = vld [vmem:[%s7404_s1 + $0x1a4] ss:$8 sps:$4 sm:$0xff]  }
  0x37   :  { %3349 = vmatpush1.bf16.msra.mxu1 %v4868_v4  ;;  %v4944_v4 = vld [vmem:[%s7404_s1 + $0x1a0] ss:$8 sps:$4 sm:$0xff]  }
  0x38   :  { %3677 = vmatpush1.bf16.msra.mxu0 %v4869_v5  ;;  %3350 = vmatprep.subr.bf16.mxu1 %v4870_v6  ;;  %v4947_v5 = vld [vmem:[%s7404_s1 + $0x9a0] ss:$8 sps:$4 sm:$0xff]   ;;  %v4952_v6 = vld [vmem:[%s7404_s1 + $0x1b4] ss:$8 sps:$4 sm:$0xff]  }
  0x39   :  { %3678 = vmatprep.subr.bf16.mxu0 %v4872_v7  ;;  %v4955_v7 = vld [vmem:[%s7404_s1 + $0x9b4] ss:$8 sps:$4 sm:$0xff]  }
  0x3b   :  { %3351 = vmatpush1.bf16.msra.mxu1 %v4874_v10  ;;  %v4958_v10 = vld [vmem:[%s7404_s1 + $0x1c4] ss:$8 sps:$4 sm:$0xff]  }
  0x3c   :  { %3679 = vmatpush1.bf16.msra.mxu0 %v4875_v11  ;;  %3352 = vmatprep.subr.bf16.mxu1 %v4876_v12  ;;  %v4961_v11 = vld [vmem:[%s7404_s1 + $0x9c4] ss:$8 sps:$4 sm:$0xff]   ;;  %v4956_v12 = vld [vmem:[%s7404_s1 + $0x1c0] ss:$8 sps:$4 sm:$0xff]  }
  0x3d   :  { %3680 = vmatprep.subr.bf16.mxu0 %v4878_v13  ;;  %v4959_v13 = vld [vmem:[%s7404_s1 + $0x9c0] ss:$8 sps:$4 sm:$0xff]  }
  0x3f   :  { %3353 = vmatpush1.bf16.msra.mxu1 %v4880_v16  ;;  %v4964_v16 = vld [vmem:[%s7404_s1 + $0x1d4] ss:$8 sps:$4 sm:$0xff]  }
  0x40   :  { %3681 = vmatpush1.bf16.msra.mxu0 %v4881_v17  ;;  %3363 = vmatprep.subr.bf16.mxu1 %v4885_v18  ;;  %v4967_v17 = vld [vmem:[%s7404_s1 + $0x9d4] ss:$8 sps:$4 sm:$0xff]   ;;  %v4962_v18 = vld [vmem:[%s7404_s1 + $0x1d0] ss:$8 sps:$4 sm:$0xff]  }
  0x41   :  { %3691 = vmatprep.subr.bf16.mxu0 %v4889_v19  ;;  %v4965_v19 = vld [vmem:[%s7404_s1 + $0x9d0] ss:$8 sps:$4 sm:$0xff]  }
  0x42   :  { %3355 = vmatmul.mubr.bf16.vlgmr.msra.gmra.mrb[0].mxu1 %v206_v22  ;;  %v4968_v22 = vld [vmem:[%s7404_s1 + $0x1e0] ss:$8 sps:$4 sm:$0xff]  }
  0x43   :  { %3683 = vmatmul.mubr.bf16.vlgmr.msra.gmra.mrb[0].mxu0 %v222_v23  ;;  %3364 = vmatpush1.bf16.msra.mxu1 %v4883_v24  ;;  %v4971_v23 = vld [vmem:[%s7404_s1 + $0x9e0] ss:$8 sps:$4 sm:$0xff]   ;;  %v4976_v24 = vld [vmem:[%s7404_s1 + $0x1f4] ss:$8 sps:$4 sm:$0xff]  }
  0x44   :  { %3692 = vmatpush1.bf16.msra.mxu0 %v4887_v25  ;;  %3365 = vmatprep.subr.bf16.mxu1 %v4892_v26  ;;  %v4979_v25 = vld [vmem:[%s7404_s1 + $0x9f4] ss:$8 sps:$4 sm:$0xff]   ;;  %v4974_v26 = vld [vmem:[%s7404_s1 + $0x1f0] ss:$8 sps:$4 sm:$0xff]  }
  0x45   :  { %3693 = vmatprep.subr.bf16.mxu0 %v4895_v27  ;;  %3395 = vmatprep.mubr.bf16.mxu1 %v209_v28  ;;  %v4977_v27 = vld [vmem:[%s7404_s1 + $0x9f0] ss:$8 sps:$4 sm:$0xff]   ;;  %v4982_v28 = vld [vmem:[%s7404_s1 + $0x204] ss:$8 sps:$4 sm:$0xff]  }
  0x46   :  { %3723 = vmatprep.mubr.bf16.mxu0 %v225_v29  ;;  %v4985_v29 = vld [vmem:[%s7404_s1 + $0xa04] ss:$8 sps:$4 sm:$0xff]  }
  0x47   :  { %3366 = vmatpush1.bf16.msra.mxu1 %v4890_v30  ;;  %v4980_v30 = vld [vmem:[%s7404_s1 + $0x200] ss:$8 sps:$4 sm:$0xff]  }
  0x48   :  { %3694 = vmatpush1.bf16.msra.mxu0 %v4893_v31  ;;  %3367 = vmatprep.subr.bf16.mxu1 %v4898_v32  ;;  %v208_v31 = vpack.c.bf16 %v5838_v14, %v5838_v14  ;;  %v224_v32 = vpack.c.bf16 %v5841_v15, %v5841_v15  ;;  %v4991_v14 = vld [vmem:[%s7404_s1 + $0xa14] ss:$8 sps:$4 sm:$0xff]  }
  0x49   :  { %3695 = vmatprep.subr.bf16.mxu0 %v4901_v33  ;;  %v4983_v33 = vld [vmem:[%s7404_s1 + $0xa00] ss:$8 sps:$4 sm:$0xff]  }
  0x4b   :  { %3368 = vmatpush1.bf16.msra.mxu1 %v4896_v34  ;;  %v4988_v34 = vld [vmem:[%s7404_s1 + $0x214] ss:$8 sps:$4 sm:$0xff]  }
  0x4c   :  { %3696 = vmatpush1.bf16.msra.mxu0 %v4899_v35  ;;  %3369 = vmatprep.subr.bf16.mxu1 %v4904_v36  ;;  %v6069_v35 = vld [vmem:[%s7403_s0 + $0x8] sm:$0xff] }
  0x4d   :  { %3697 = vmatprep.subr.bf16.mxu0 %v4907_v37  ;;  %v6076_v15 = vrot.slane %v6069_v35, %v5769_v49  ;;  %v6081_v36 = vld [vmem:[%s7403_s0 + $0x28] sm:$0xff]  ;;  %v4986_v37 = vld [vmem:[%s7404_s1 + $0x210] ss:$8 sps:$4 sm:$0xff]  }
  0x4f   :  { %3370 = vmatpush1.bf16.msra.mxu1 %v4902_v38  ;;  %v4989_v38 = vld [vmem:[%s7404_s1 + $0xa10] ss:$8 sps:$4 sm:$0xff]  }
  0x50   :  { %3698 = vmatpush1.bf16.msra.mxu0 %v4905_v39  ;;  %3371 = vmatprep.subr.bf16.mxu1 %v4910_v40  ;;  %v70_v39 = vcombine.high %v6076_v15, %v6076_v15  ;;  %v6093_v40 = vrot.slane %v6081_v36, %v5769_v49 }
  0x51   :  { %3699 = vmatprep.subr.bf16.mxu0 %v4913_v41  ;;  %v4994_v41 = vld [vmem:[%s7404_s1 + $0x224] ss:$8 sps:$4 sm:$0xff]  }
  0x53   :  { %3372 = vmatpush1.bf16.msra.mxu1 %v4908_v42  ;;  %v4997_v42 = vld [vmem:[%s7404_s1 + $0xa24] ss:$8 sps:$4 sm:$0xff]  }
  0x54   :  { %3700 = vmatpush1.bf16.msra.mxu0 %v4911_v44  ;;  %3373 = vmatprep.subr.bf16.mxu1 %v4916_v45  ;;  %v211_v44 = vpack.c.bf16 %v70_v39, %v70_v39  ;;  %v138_v45 = vcombine.high %v6093_v40, %v6093_v40  ;;  %v5072_v39 = vld [vmem:[%s7404_s1 + $0x2f4] ss:$8 sps:$4 sm:$0xff]  }
  0x55   :  { %3701 = vmatprep.subr.bf16.mxu0 %v4919_v46  ;;  %v4992_v46 = vld [vmem:[%s7404_s1 + $0x220] ss:$8 sps:$4 sm:$0xff]  }
  0x57   :  { %3374 = vmatpush1.bf16.msra.mxu1 %v4914_v47  ;;  %v4995_v47 = vld [vmem:[%s7404_s1 + $0xa20] ss:$8 sps:$4 sm:$0xff]  }
  0x58   :  { %3702 = vmatpush1.bf16.msra.mxu0 %v4917_v48  ;;  %3375 = vmatprep.subr.bf16.mxu1 %v4922_v50  ;;  %v227_v48 = vpack.c.bf16 %v138_v45, %v138_v45  ;;  %v5000_v50 = vld [vmem:[%s7404_s1 + $0x234] ss:$8 sps:$4 sm:$0xff]   ;;  %v5078_v45 = vld [vmem:[%s7404_s1 + $0x304] ss:$8 sps:$4 sm:$0xff]  }
  0x59   :  { %3703 = vmatprep.subr.bf16.mxu0 %v4925_v51  ;;  %v5003_v51 = vld [vmem:[%s7404_s1 + $0xa34] ss:$8 sps:$4 sm:$0xff]  }
  0x5b   :  { %3376 = vmatpush1.bf16.msra.mxu1 %v4920_v52  ;;  %v4998_v52 = vld [vmem:[%s7404_s1 + $0x230] ss:$8 sps:$4 sm:$0xff]  }
  0x5c   :  { %3704 = vmatpush1.bf16.msra.mxu0 %v4923_v53  ;;  %3377 = vmatprep.subr.bf16.mxu1 %v4928_v54  ;;  %v5001_v53 = vld [vmem:[%s7404_s1 + $0xa30] ss:$8 sps:$4 sm:$0xff]   ;;  %v5006_v54 = vld [vmem:[%s7404_s1 + $0x244] ss:$8 sps:$4 sm:$0xff]  }
  0x5d   :  { %3705 = vmatprep.subr.bf16.mxu0 %v4931_v55  ;;  %v5009_v55 = vld [vmem:[%s7404_s1 + $0xa44] ss:$8 sps:$4 sm:$0xff]  }
  0x5f   :  { %3378 = vmatpush1.bf16.msra.mxu1 %v4926_v56  ;;  %v5004_v56 = vld [vmem:[%s7404_s1 + $0x240] ss:$8 sps:$4 sm:$0xff]  }
  0x60   :  { %3706 = vmatpush1.bf16.msra.mxu0 %v4929_v57  ;;  %3379 = vmatprep.subr.bf16.mxu1 %v4934_v58  ;;  %v5007_v57 = vld [vmem:[%s7404_s1 + $0xa40] ss:$8 sps:$4 sm:$0xff]   ;;  %v5012_v58 = vld [vmem:[%s7404_s1 + $0x254] ss:$8 sps:$4 sm:$0xff]  }
  0x61   :  { %3707 = vmatprep.subr.bf16.mxu0 %v4937_v59  ;;  %v5015_v59 = vld [vmem:[%s7404_s1 + $0xa54] ss:$8 sps:$4 sm:$0xff]  }
  0x63   :  { %3380 = vmatpush1.bf16.msra.mxu1 %v4932_v60  ;;  %v5010_v60 = vld [vmem:[%s7404_s1 + $0x250] ss:$8 sps:$4 sm:$0xff]  }
  0x64   :  { %3708 = vmatpush1.bf16.msra.mxu0 %v4935_v61  ;;  %3381 = vmatprep.subr.bf16.mxu1 %v4940_v62  ;;  %v5013_v61 = vld [vmem:[%s7404_s1 + $0xa50] ss:$8 sps:$4 sm:$0xff]   ;;  %v5018_v62 = vld [vmem:[%s7404_s1 + $0x264] ss:$8 sps:$4 sm:$0xff]  }
  0x65   :  { %3709 = vmatprep.subr.bf16.mxu0 %v4943_v63  ;;  %v5021_v63 = vld [vmem:[%s7404_s1 + $0xa64] ss:$8 sps:$4 sm:$0xff]  }
  0x67   :  { %3382 = vmatpush1.bf16.msra.mxu1 %v4938_v0  ;;  %v5016_v0 = vld [vmem:[%s7404_s1 + $0x260] ss:$8 sps:$4 sm:$0xff]  }
  0x68   :  { %3710 = vmatpush1.bf16.msra.mxu0 %v4941_v1  ;;  %3383 = vmatprep.subr.bf16.mxu1 %v4946_v2  ;;  %v5019_v1 = vld [vmem:[%s7404_s1 + $0xa60] ss:$8 sps:$4 sm:$0xff]   ;;  %v5024_v2 = vld [vmem:[%s7404_s1 + $0x274] ss:$8 sps:$4 sm:$0xff]  }
  0x69   :  { %3711 = vmatprep.subr.bf16.mxu0 %v4949_v3  ;;  %v5027_v3 = vld [vmem:[%s7404_s1 + $0xa74] ss:$8 sps:$4 sm:$0xff]  }
  0x6b   :  { %3384 = vmatpush1.bf16.msra.mxu1 %v4944_v4  ;;  %v5022_v4 = vld [vmem:[%s7404_s1 + $0x270] ss:$8 sps:$4 sm:$0xff]  }
  0x6c   :  { %3712 = vmatpush1.bf16.msra.mxu0 %v4947_v5  ;;  %3385 = vmatprep.subr.bf16.mxu1 %v4952_v6  ;;  %v5025_v5 = vld [vmem:[%s7404_s1 + $0xa70] ss:$8 sps:$4 sm:$0xff]   ;;  %v5030_v6 = vld [vmem:[%s7404_s1 + $0x284] ss:$8 sps:$4 sm:$0xff]  }
  0x6d   :  { %3713 = vmatprep.subr.bf16.mxu0 %v4955_v7  ;;  %v5033_v7 = vld [vmem:[%s7404_s1 + $0xa84] ss:$8 sps:$4 sm:$0xff]  }
  0x6f   :  { %3386 = vmatpush1.bf16.msra.mxu1 %v4950_v8  ;;  %v5028_v8 = vld [vmem:[%s7404_s1 + $0x280] ss:$8 sps:$4 sm:$0xff]  }
  0x70   :  { %3714 = vmatpush1.bf16.msra.mxu0 %v4953_v9  ;;  %3387 = vmatprep.subr.bf16.mxu1 %v4958_v10  ;;  %v5031_v9 = vld [vmem:[%s7404_s1 + $0xa80] ss:$8 sps:$4 sm:$0xff]   ;;  %v5036_v10 = vld [vmem:[%s7404_s1 + $0x294] ss:$8 sps:$4 sm:$0xff]  }
  0x71   :  { %3715 = vmatprep.subr.bf16.mxu0 %v4961_v11  ;;  %v5039_v11 = vld [vmem:[%s7404_s1 + $0xa94] ss:$8 sps:$4 sm:$0xff]  }
  0x73   :  { %3388 = vmatpush1.bf16.msra.mxu1 %v4956_v12  ;;  %v5034_v12 = vld [vmem:[%s7404_s1 + $0x290] ss:$8 sps:$4 sm:$0xff]  }
  0x74   :  { %3716 = vmatpush1.bf16.msra.mxu0 %v4959_v13  ;;  %3389 = vmatprep.subr.bf16.mxu1 %v4964_v16  ;;  %v5037_v13 = vld [vmem:[%s7404_s1 + $0xa90] ss:$8 sps:$4 sm:$0xff]   ;;  %v5042_v16 = vld [vmem:[%s7404_s1 + $0x2a4] ss:$8 sps:$4 sm:$0xff]  }
  0x75   :  { %3717 = vmatprep.subr.bf16.mxu0 %v4967_v17  ;;  %v5045_v17 = vld [vmem:[%s7404_s1 + $0xaa4] ss:$8 sps:$4 sm:$0xff]  }
  0x77   :  { %3390 = vmatpush1.bf16.msra.mxu1 %v4962_v18  ;;  %v5040_v18 = vld [vmem:[%s7404_s1 + $0x2a0] ss:$8 sps:$4 sm:$0xff]  }
  0x78   :  { %3718 = vmatpush1.bf16.msra.mxu0 %v4965_v19  ;;  %3391 = vmatprep.subr.bf16.mxu1 %v4970_v20  ;;  %v5043_v19 = vld [vmem:[%s7404_s1 + $0xaa0] ss:$8 sps:$4 sm:$0xff]   ;;  %v5048_v20 = vld [vmem:[%s7404_s1 + $0x2b4] ss:$8 sps:$4 sm:$0xff]  }
  0x79   :  { %3719 = vmatprep.subr.bf16.mxu0 %v4973_v21  ;;  %v5051_v21 = vld [vmem:[%s7404_s1 + $0xab4] ss:$8 sps:$4 sm:$0xff]  }
  0x7b   :  { %3392 = vmatpush1.bf16.msra.mxu1 %v4968_v22  ;;  %v5046_v22 = vld [vmem:[%s7404_s1 + $0x2b0] ss:$8 sps:$4 sm:$0xff]  }
  0x7c   :  { %3720 = vmatpush1.bf16.msra.mxu0 %v4971_v23  ;;  %3393 = vmatprep.subr.bf16.mxu1 %v4976_v24  ;;  %v5049_v23 = vld [vmem:[%s7404_s1 + $0xab0] ss:$8 sps:$4 sm:$0xff]   ;;  %v5054_v24 = vld [vmem:[%s7404_s1 + $0x2c4] ss:$8 sps:$4 sm:$0xff]  }
  0x7d   :  { %3721 = vmatprep.subr.bf16.mxu0 %v4979_v25  ;;  %v5057_v25 = vld [vmem:[%s7404_s1 + $0xac4] ss:$8 sps:$4 sm:$0xff]  }
  0x7f   :  { %3394 = vmatpush1.bf16.msra.mxu1 %v4974_v26  ;;  %v5052_v26 = vld [vmem:[%s7404_s1 + $0x2c0] ss:$8 sps:$4 sm:$0xff]  }
  0x80   :  { %3722 = vmatpush1.bf16.msra.mxu0 %v4977_v27  ;;  %3404 = vmatprep.subr.bf16.mxu1 %v4982_v28  ;;  %v5055_v27 = vld [vmem:[%s7404_s1 + $0xac0] ss:$8 sps:$4 sm:$0xff]   ;;  %v5060_v28 = vld [vmem:[%s7404_s1 + $0x2d4] ss:$8 sps:$4 sm:$0xff]  }
  0x81   :  { %3732 = vmatprep.subr.bf16.mxu0 %v4985_v29  ;;  %v5063_v29 = vld [vmem:[%s7404_s1 + $0xad4] ss:$8 sps:$4 sm:$0xff]  }
  0x82   :  { %3396 = vmatmul.mubr.bf16.vlgmr.msra.gmra.mrb[0].mxu1 %v208_v31  ;;  %v5061_v31 = vld [vmem:[%s7404_s1 + $0xad0] ss:$8 sps:$4 sm:$0xff]  }
  0x83   :  { %3724 = vmatmul.mubr.bf16.vlgmr.msra.gmra.mrb[0].mxu0 %v224_v32  ;;  %3405 = vmatpush1.bf16.msra.mxu1 %v4980_v30  ;;  %v5058_v30 = vld [vmem:[%s7404_s1 + $0x2d0] ss:$8 sps:$4 sm:$0xff]   ;;  %v5066_v32 = vld [vmem:[%s7404_s1 + $0x2e4] ss:$8 sps:$4 sm:$0xff]  }
  0x84   :  { %3733 = vmatpush1.bf16.msra.mxu0 %v4983_v33  ;;  %3406 = vmatprep.subr.bf16.mxu1 %v4988_v34  ;;  %v5069_v33 = vld [vmem:[%s7404_s1 + $0xae4] ss:$8 sps:$4 sm:$0xff]   ;;  %v55_v34 = vcombine.high %v6069_v35, %v6069_v35  ;;  %v5075_v35 = vld [vmem:[%s7404_s1 + $0xaf4] ss:$8 sps:$4 sm:$0xff]  }
  0x85   :  { %3734 = vmatprep.subr.bf16.mxu0 %v4991_v14  ;;  %3436 = vmatprep.mubr.bf16.mxu1 %v211_v44  ;;  %v123_v14 = vcombine.high %v6081_v36, %v6081_v36  ;;  %v5073_v44 = vld [vmem:[%s7404_s1 + $0xaf0] ss:$8 sps:$4 sm:$0xff]  }
  0x86   :  { %3764 = vmatprep.mubr.bf16.mxu0 %v227_v48  ;;  %v6264_v36 = vrot.slane %v55_v34, %v5769_v49  ;;  %v5142_v34 = vld [vmem:[%s7404_s1 + $0x3b0] ss:$8 sps:$4 sm:$0xff]  }
  0x87   :  { %3407 = vmatpush1.bf16.msra.mxu1 %v4986_v37  ;;  %v5064_v37 = vld [vmem:[%s7404_s1 + $0x2e0] ss:$8 sps:$4 sm:$0xff]  }
  0x88   :  { %3735 = vmatpush1.bf16.msra.mxu0 %v4989_v38  ;;  %3408 = vmatprep.subr.bf16.mxu1 %v4994_v41  ;;  %v5067_v38 = vld [vmem:[%s7404_s1 + $0xae0] ss:$8 sps:$4 sm:$0xff]   ;;  %v6267_v41 = vrot.slane %v123_v14, %v5769_v49  ;;  %v5145_v14 = vld [vmem:[%s7404_s1 + $0xbb0] ss:$8 sps:$4 sm:$0xff]  }
  0x89   :  { %3736 = vmatprep.subr.bf16.mxu0 %v4997_v42  ;;  %v5070_v42 = vld [vmem:[%s7404_s1 + $0x2f0] ss:$8 sps:$4 sm:$0xff]  }
  0x8a   :  { %v139_v48 = vcombine.high %v6267_v41, %v6267_v41 }
  0x8b   :  { %3409 = vmatpush1.bf16.msra.mxu1 %v4992_v46  ;;  %v5081_v46 = vld [vmem:[%s7404_s1 + $0xb04] ss:$8 sps:$4 sm:$0xff]  }
  0x8c   :  { %3737 = vmatpush1.bf16.msra.mxu0 %v4995_v47  ;;  %3410 = vmatprep.subr.bf16.mxu1 %v5000_v50  ;;  %v71_v47 = vcombine.high %v6264_v36, %v6264_v36  ;;  %v5076_v50 = vld [vmem:[%s7404_s1 + $0x300] ss:$8 sps:$4 sm:$0xff]  }
  0x8d   :  { %3738 = vmatprep.subr.bf16.mxu0 %v5003_v51  ;;  %v5079_v51 = vld [vmem:[%s7404_s1 + $0xb00] ss:$8 sps:$4 sm:$0xff]  }
  0x8f   :  { %3411 = vmatpush1.bf16.msra.mxu1 %v4998_v52  ;;  %v210_v52 = vpack.c.bf16 %v6076_v15, %v6076_v15  ;;  %v5082_v15 = vld [vmem:[%s7404_s1 + $0x310] ss:$8 sps:$4 sm:$0xff]  }
  0x90   :  { %3739 = vmatpush1.bf16.msra.mxu0 %v5001_v53  ;;  %3412 = vmatprep.subr.bf16.mxu1 %v5006_v54  ;;  %v226_v53 = vpack.c.bf16 %v6093_v40, %v6093_v40  ;;  %v5084_v54 = vld [vmem:[%s7404_s1 + $0x314] ss:$8 sps:$4 sm:$0xff]   ;;  %v5085_v40 = vld [vmem:[%s7404_s1 + $0xb10] ss:$8 sps:$4 sm:$0xff]  }
  0x91   :  { %3740 = vmatprep.subr.bf16.mxu0 %v5009_v55  ;;  %v5087_v55 = vld [vmem:[%s7404_s1 + $0xb14] ss:$8 sps:$4 sm:$0xff]  }
  0x93   :  { %3413 = vmatpush1.bf16.msra.mxu1 %v5004_v56  ;;  %v213_v56 = vpack.c.bf16 %v71_v47, %v71_v47  ;;  %v5162_v47 = vld [vmem:[%s7404_s1 + $0x3e4] ss:$8 sps:$4 sm:$0xff]  }
  0x94   :  { %3741 = vmatpush1.bf16.msra.mxu0 %v5007_v57  ;;  %3414 = vmatprep.subr.bf16.mxu1 %v5012_v58  ;;  %v229_v57 = vpack.c.bf16 %v139_v48, %v139_v48  ;;  %v5090_v58 = vld [vmem:[%s7404_s1 + $0x324] ss:$8 sps:$4 sm:$0xff]  }
  0x95   :  { %3742 = vmatprep.subr.bf16.mxu0 %v5015_v59  ;;  %v5093_v59 = vld [vmem:[%s7404_s1 + $0xb24] ss:$8 sps:$4 sm:$0xff]  }
  0x96   :  { %v5165_v48 = vld [vmem:[%s7404_s1 + $0xbe4] ss:$8 sps:$4 sm:$0xff]  }
  0x97   :  { %3415 = vmatpush1.bf16.msra.mxu1 %v5010_v60  ;;  %v5088_v60 = vld [vmem:[%s7404_s1 + $0x320] ss:$8 sps:$4 sm:$0xff]  }
  0x98   :  { %3743 = vmatpush1.bf16.msra.mxu0 %v5013_v61  ;;  %3416 = vmatprep.subr.bf16.mxu1 %v5018_v62  ;;  %v5091_v61 = vld [vmem:[%s7404_s1 + $0xb20] ss:$8 sps:$4 sm:$0xff]   ;;  %v5096_v62 = vld [vmem:[%s7404_s1 + $0x334] ss:$8 sps:$4 sm:$0xff]  }
  0x99   :  { %3744 = vmatprep.subr.bf16.mxu0 %v5021_v63  ;;  %v5099_v63 = vld [vmem:[%s7404_s1 + $0xb34] ss:$8 sps:$4 sm:$0xff]  }
  0x9b   :  { %3417 = vmatpush1.bf16.msra.mxu1 %v5016_v0  ;;  %v5094_v0 = vld [vmem:[%s7404_s1 + $0x330] ss:$8 sps:$4 sm:$0xff]  }
  0x9c   :  { %3745 = vmatpush1.bf16.msra.mxu0 %v5019_v1  ;;  %3418 = vmatprep.subr.bf16.mxu1 %v5024_v2  ;;  %v5097_v1 = vld [vmem:[%s7404_s1 + $0xb30] ss:$8 sps:$4 sm:$0xff]   ;;  %v5102_v2 = vld [vmem:[%s7404_s1 + $0x344] ss:$8 sps:$4 sm:$0xff]  }
  0x9d   :  { %3746 = vmatprep.subr.bf16.mxu0 %v5027_v3  ;;  %v5105_v3 = vld [vmem:[%s7404_s1 + $0xb44] ss:$8 sps:$4 sm:$0xff]  }
  0x9f   :  { %3419 = vmatpush1.bf16.msra.mxu1 %v5022_v4  ;;  %v5100_v4 = vld [vmem:[%s7404_s1 + $0x340] ss:$8 sps:$4 sm:$0xff]  }
  0xa0   :  { %3747 = vmatpush1.bf16.msra.mxu0 %v5025_v5  ;;  %3420 = vmatprep.subr.bf16.mxu1 %v5030_v6  ;;  %v5103_v5 = vld [vmem:[%s7404_s1 + $0xb40] ss:$8 sps:$4 sm:$0xff]   ;;  %v5108_v6 = vld [vmem:[%s7404_s1 + $0x354] ss:$8 sps:$4 sm:$0xff]  }
  0xa1   :  { %3748 = vmatprep.subr.bf16.mxu0 %v5033_v7  ;;  %v5111_v7 = vld [vmem:[%s7404_s1 + $0xb54] ss:$8 sps:$4 sm:$0xff]  }
  0xa3   :  { %3421 = vmatpush1.bf16.msra.mxu1 %v5028_v8  ;;  %v5106_v8 = vld [vmem:[%s7404_s1 + $0x350] ss:$8 sps:$4 sm:$0xff]  }
  0xa4   :  { %3749 = vmatpush1.bf16.msra.mxu0 %v5031_v9  ;;  %3422 = vmatprep.subr.bf16.mxu1 %v5036_v10  ;;  %v5109_v9 = vld [vmem:[%s7404_s1 + $0xb50] ss:$8 sps:$4 sm:$0xff]   ;;  %v5114_v10 = vld [vmem:[%s7404_s1 + $0x364] ss:$8 sps:$4 sm:$0xff]  }
  0xa5   :  { %3750 = vmatprep.subr.bf16.mxu0 %v5039_v11  ;;  %v5117_v11 = vld [vmem:[%s7404_s1 + $0xb64] ss:$8 sps:$4 sm:$0xff]  }
  0xa7   :  { %3423 = vmatpush1.bf16.msra.mxu1 %v5034_v12  ;;  %v5112_v12 = vld [vmem:[%s7404_s1 + $0x360] ss:$8 sps:$4 sm:$0xff]  }
  0xa8   :  { %3751 = vmatpush1.bf16.msra.mxu0 %v5037_v13  ;;  %3424 = vmatprep.subr.bf16.mxu1 %v5042_v16  ;;  %v5115_v13 = vld [vmem:[%s7404_s1 + $0xb60] ss:$8 sps:$4 sm:$0xff]   ;;  %v5120_v16 = vld [vmem:[%s7404_s1 + $0x374] ss:$8 sps:$4 sm:$0xff]  }
  0xa9   :  { %3752 = vmatprep.subr.bf16.mxu0 %v5045_v17  ;;  %v5123_v17 = vld [vmem:[%s7404_s1 + $0xb74] ss:$8 sps:$4 sm:$0xff]  }
  0xab   :  { %3425 = vmatpush1.bf16.msra.mxu1 %v5040_v18  ;;  %v5118_v18 = vld [vmem:[%s7404_s1 + $0x370] ss:$8 sps:$4 sm:$0xff]  }
  0xac   :  { %3753 = vmatpush1.bf16.msra.mxu0 %v5043_v19  ;;  %3426 = vmatprep.subr.bf16.mxu1 %v5048_v20  ;;  %v5121_v19 = vld [vmem:[%s7404_s1 + $0xb70] ss:$8 sps:$4 sm:$0xff]   ;;  %v5126_v20 = vld [vmem:[%s7404_s1 + $0x384] ss:$8 sps:$4 sm:$0xff]  }
  0xad   :  { %3754 = vmatprep.subr.bf16.mxu0 %v5051_v21  ;;  %v5129_v21 = vld [vmem:[%s7404_s1 + $0xb84] ss:$8 sps:$4 sm:$0xff]  }
  0xaf   :  { %3427 = vmatpush1.bf16.msra.mxu1 %v5046_v22  ;;  %v5124_v22 = vld [vmem:[%s7404_s1 + $0x380] ss:$8 sps:$4 sm:$0xff]  }
  0xb0   :  { %3755 = vmatpush1.bf16.msra.mxu0 %v5049_v23  ;;  %3428 = vmatprep.subr.bf16.mxu1 %v5054_v24  ;;  %v5127_v23 = vld [vmem:[%s7404_s1 + $0xb80] ss:$8 sps:$4 sm:$0xff]   ;;  %v5132_v24 = vld [vmem:[%s7404_s1 + $0x394] ss:$8 sps:$4 sm:$0xff]  }
  0xb1   :  { %3756 = vmatprep.subr.bf16.mxu0 %v5057_v25  ;;  %v5135_v25 = vld [vmem:[%s7404_s1 + $0xb94] ss:$8 sps:$4 sm:$0xff]  }
  0xb3   :  { %3429 = vmatpush1.bf16.msra.mxu1 %v5052_v26  ;;  %v5130_v26 = vld [vmem:[%s7404_s1 + $0x390] ss:$8 sps:$4 sm:$0xff]  }
  0xb4   :  { %3757 = vmatpush1.bf16.msra.mxu0 %v5055_v27  ;;  %3430 = vmatprep.subr.bf16.mxu1 %v5060_v28  ;;  %v5133_v27 = vld [vmem:[%s7404_s1 + $0xb90] ss:$8 sps:$4 sm:$0xff]   ;;  %v5138_v28 = vld [vmem:[%s7404_s1 + $0x3a4] ss:$8 sps:$4 sm:$0xff]  }
  0xb5   :  { %3758 = vmatprep.subr.bf16.mxu0 %v5063_v29  ;;  %v5141_v29 = vld [vmem:[%s7404_s1 + $0xba4] ss:$8 sps:$4 sm:$0xff]  }
  0xb7   :  { %3431 = vmatpush1.bf16.msra.mxu1 %v5058_v30  ;;  %v5136_v30 = vld [vmem:[%s7404_s1 + $0x3a0] ss:$8 sps:$4 sm:$0xff]  }
  0xb8   :  { %3759 = vmatpush1.bf16.msra.mxu0 %v5061_v31  ;;  %3432 = vmatprep.subr.bf16.mxu1 %v5066_v32  ;;  %v5139_v31 = vld [vmem:[%s7404_s1 + $0xba0] ss:$8 sps:$4 sm:$0xff]   ;;  %v5144_v32 = vld [vmem:[%s7404_s1 + $0x3b4] ss:$8 sps:$4 sm:$0xff]  }
  0xb9   :  { %3760 = vmatprep.subr.bf16.mxu0 %v5069_v33  ;;  %v5147_v33 = vld [vmem:[%s7404_s1 + $0xbb4] ss:$8 sps:$4 sm:$0xff]  }
  0xbb   :  { %3433 = vmatpush1.bf16.msra.mxu1 %v5064_v37  ;;  %v5150_v37 = vld [vmem:[%s7404_s1 + $0x3c4] ss:$8 sps:$4 sm:$0xff]  }
  0xbc   :  { %3761 = vmatpush1.bf16.msra.mxu0 %v5067_v38  ;;  %3434 = vmatprep.subr.bf16.mxu1 %v5072_v39  ;;  %v5153_v38 = vld [vmem:[%s7404_s1 + $0xbc4] ss:$8 sps:$4 sm:$0xff]   ;;  %v5148_v39 = vld [vmem:[%s7404_s1 + $0x3c0] ss:$8 sps:$4 sm:$0xff]  }
  0xbd   :  { %3762 = vmatprep.subr.bf16.mxu0 %v5075_v35  ;;  %v5151_v35 = vld [vmem:[%s7404_s1 + $0xbc0] ss:$8 sps:$4 sm:$0xff]  }
  0xbf   :  { %3435 = vmatpush1.bf16.msra.mxu1 %v5070_v42  ;;  %v5156_v42 = vld [vmem:[%s7404_s1 + $0x3d4] ss:$8 sps:$4 sm:$0xff]  }
  0xc0   :  { %3763 = vmatpush1.bf16.msra.mxu0 %v5073_v44  ;;  %3445 = vmatprep.subr.bf16.mxu1 %v5078_v45  ;;  %v5159_v44 = vld [vmem:[%s7404_s1 + $0xbd4] ss:$8 sps:$4 sm:$0xff]   ;;  %v5154_v45 = vld [vmem:[%s7404_s1 + $0x3d0] ss:$8 sps:$4 sm:$0xff]  }
  0xc1   :  { %3773 = vmatprep.subr.bf16.mxu0 %v5081_v46  ;;  %v5157_v46 = vld [vmem:[%s7404_s1 + $0xbd0] ss:$8 sps:$4 sm:$0xff]  }
  0xc2   :  { %3437 = vmatmul.mubr.bf16.vlgmr.msra.gmra.mrb[0].mxu1 %v210_v52  ;;  %v5160_v52 = vld [vmem:[%s7404_s1 + $0x3e0] ss:$8 sps:$4 sm:$0xff]  }
  0xc3   :  { %3765 = vmatmul.mubr.bf16.vlgmr.msra.gmra.mrb[0].mxu0 %v226_v53  ;;  %3446 = vmatpush1.bf16.msra.mxu1 %v5076_v50  ;;  %v6460_v50 = vld [vmem:[%s7403_s0 + $0x10] sm:$0xff]  ;;  %v5163_v53 = vld [vmem:[%s7404_s1 + $0xbe0] ss:$8 sps:$4 sm:$0xff]  }
  0xc4   :  { %3774 = vmatpush1.bf16.msra.mxu0 %v5079_v51  ;;  %3447 = vmatprep.subr.bf16.mxu1 %v5084_v54  ;;  %v6465_v51 = vld [vmem:[%s7403_s0 + $0x30] sm:$0xff] }
  0xc5   :  { %3775 = vmatprep.subr.bf16.mxu0 %v5087_v55  ;;  %3477 = vmatprep.mubr.bf16.mxu1 %v213_v56  ;;  %v5168_v54 = vld [vmem:[%s7404_s1 + $0x3f4] ss:$8 sps:$4 sm:$0xff]   ;;  %v6481_v56 = vrot.slane %v6460_v50, %v5769_v49 }
  0xc6   :  { %3805 = vmatprep.mubr.bf16.mxu0 %v229_v57  ;;  %v5171_v55 = vld [vmem:[%s7404_s1 + $0xbf4] ss:$8 sps:$4 sm:$0xff]   ;;  %v6485_v57 = vrot.slane %v6465_v51, %v5769_v49 }
  0xc7   :  { %3448 = vmatpush1.bf16.msra.mxu1 %v5082_v15  ;;  %v5166_v15 = vld [vmem:[%s7404_s1 + $0x3f0] ss:$8 sps:$4 sm:$0xff]  }
  0xc8   :  { %3776 = vmatpush1.bf16.msra.mxu0 %v5085_v40  ;;  %3449 = vmatprep.subr.bf16.mxu1 %v5090_v58  ;;  %v5169_v40 = vld [vmem:[%s7404_s1 + $0xbf0] ss:$8 sps:$4 sm:$0xff]   ;;  %v5175_v58 = vld [vmem:[%s7404_s1 + $0x404] ss:$8 sps:$4 sm:$0xff]  }
  0xc9   :  { %3777 = vmatprep.subr.bf16.mxu0 %v5093_v59  ;;  %v5179_v59 = vld [vmem:[%s7404_s1 + $0xc04] ss:$8 sps:$4 sm:$0xff]  }
  0xcb   :  { %3450 = vmatpush1.bf16.msra.mxu1 %v5088_v60  ;;  %v87_v60 = vcombine.high %v6481_v56, %v6481_v56 }
  0xcc   :  { %3778 = vmatpush1.bf16.msra.mxu0 %v5091_v61  ;;  %3451 = vmatprep.subr.bf16.mxu1 %v5096_v62  ;;  %v155_v61 = vcombine.high %v6485_v57, %v6485_v57  ;;  %v212_v62 = vpack.c.bf16 %v6264_v36, %v6264_v36  ;;  %v5185_v36 = vld [vmem:[%s7404_s1 + $0xc14] ss:$8 sps:$4 sm:$0xff]  }
  0xcd   :  { %3779 = vmatprep.subr.bf16.mxu0 %v5099_v63  ;;  %v228_v63 = vpack.c.bf16 %v6267_v41, %v6267_v41  ;;  %v215_v41 = vpack.c.bf16 %v87_v60, %v87_v60  ;;  %v5252_v60 = vld [vmem:[%s7404_s1 + $0x4d0] ss:$8 sps:$4 sm:$0xff]  }
  0xcf   :  { %3452 = vmatpush1.bf16.msra.mxu1 %v5094_v0  ;;  %v5173_v0 = vld [vmem:[%s7404_s1 + $0x400] ss:$8 sps:$4 sm:$0xff]  }
  0xd0   :  { %3780 = vmatpush1.bf16.msra.mxu0 %v5097_v1  ;;  %3453 = vmatprep.subr.bf16.mxu1 %v5102_v2  ;;  %v5177_v1 = vld [vmem:[%s7404_s1 + $0xc00] ss:$8 sps:$4 sm:$0xff]   ;;  %v5182_v2 = vld [vmem:[%s7404_s1 + $0x414] ss:$8 sps:$4 sm:$0xff]  }
  0xd1   :  { %3781 = vmatprep.subr.bf16.mxu0 %v5105_v3  ;;  %v231_v3 = vpack.c.bf16 %v155_v61, %v155_v61  ;;  %v5255_v61 = vld [vmem:[%s7404_s1 + $0xcd0] ss:$8 sps:$4 sm:$0xff]  }
  0xd3   :  { %3454 = vmatpush1.bf16.msra.mxu1 %v5100_v4  ;;  %v5180_v4 = vld [vmem:[%s7404_s1 + $0x410] ss:$8 sps:$4 sm:$0xff]  }
  0xd4   :  { %3782 = vmatpush1.bf16.msra.mxu0 %v5103_v5  ;;  %3455 = vmatprep.subr.bf16.mxu1 %v5108_v6  ;;  %v5183_v5 = vld [vmem:[%s7404_s1 + $0xc10] ss:$8 sps:$4 sm:$0xff]   ;;  %v5188_v6 = vld [vmem:[%s7404_s1 + $0x424] ss:$8 sps:$4 sm:$0xff]  }
  0xd5   :  { %3783 = vmatprep.subr.bf16.mxu0 %v5111_v7  ;;  %v5191_v7 = vld [vmem:[%s7404_s1 + $0xc24] ss:$8 sps:$4 sm:$0xff]  }
  0xd7   :  { %3456 = vmatpush1.bf16.msra.mxu1 %v5106_v8  ;;  %v5186_v8 = vld [vmem:[%s7404_s1 + $0x420] ss:$8 sps:$4 sm:$0xff]  }
  0xd8   :  { %3784 = vmatpush1.bf16.msra.mxu0 %v5109_v9  ;;  %3457 = vmatprep.subr.bf16.mxu1 %v5114_v10  ;;  %v5189_v9 = vld [vmem:[%s7404_s1 + $0xc20] ss:$8 sps:$4 sm:$0xff]   ;;  %v5194_v10 = vld [vmem:[%s7404_s1 + $0x434] ss:$8 sps:$4 sm:$0xff]  }
  0xd9   :  { %3785 = vmatprep.subr.bf16.mxu0 %v5117_v11  ;;  %v5197_v11 = vld [vmem:[%s7404_s1 + $0xc34] ss:$8 sps:$4 sm:$0xff]  }
  0xdb   :  { %3458 = vmatpush1.bf16.msra.mxu1 %v5112_v12  ;;  %v5192_v12 = vld [vmem:[%s7404_s1 + $0x430] ss:$8 sps:$4 sm:$0xff]  }
  0xdc   :  { %3786 = vmatpush1.bf16.msra.mxu0 %v5115_v13  ;;  %3459 = vmatprep.subr.bf16.mxu1 %v5120_v16  ;;  %v5195_v13 = vld [vmem:[%s7404_s1 + $0xc30] ss:$8 sps:$4 sm:$0xff]   ;;  %v5200_v16 = vld [vmem:[%s7404_s1 + $0x444] ss:$8 sps:$4 sm:$0xff]  }
  0xdd   :  { %3787 = vmatprep.subr.bf16.mxu0 %v5123_v17  ;;  %v5203_v17 = vld [vmem:[%s7404_s1 + $0xc44] ss:$8 sps:$4 sm:$0xff]  }
  0xdf   :  { %3460 = vmatpush1.bf16.msra.mxu1 %v5118_v18  ;;  %v5198_v18 = vld [vmem:[%s7404_s1 + $0x440] ss:$8 sps:$4 sm:$0xff]  }
  0xe0   :  { %3788 = vmatpush1.bf16.msra.mxu0 %v5121_v19  ;;  %3461 = vmatprep.subr.bf16.mxu1 %v5126_v20  ;;  %v5201_v19 = vld [vmem:[%s7404_s1 + $0xc40] ss:$8 sps:$4 sm:$0xff]   ;;  %v5206_v20 = vld [vmem:[%s7404_s1 + $0x454] ss:$8 sps:$4 sm:$0xff]  }
  0xe1   :  { %3789 = vmatprep.subr.bf16.mxu0 %v5129_v21  ;;  %v5209_v21 = vld [vmem:[%s7404_s1 + $0xc54] ss:$8 sps:$4 sm:$0xff]  }
  0xe3   :  { %3462 = vmatpush1.bf16.msra.mxu1 %v5124_v22  ;;  %v5204_v22 = vld [vmem:[%s7404_s1 + $0x450] ss:$8 sps:$4 sm:$0xff]  }
  0xe4   :  { %3790 = vmatpush1.bf16.msra.mxu0 %v5127_v23  ;;  %3463 = vmatprep.subr.bf16.mxu1 %v5132_v24  ;;  %v5207_v23 = vld [vmem:[%s7404_s1 + $0xc50] ss:$8 sps:$4 sm:$0xff]   ;;  %v5212_v24 = vld [vmem:[%s7404_s1 + $0x464] ss:$8 sps:$4 sm:$0xff]  }
  0xe5   :  { %3791 = vmatprep.subr.bf16.mxu0 %v5135_v25  ;;  %v5215_v25 = vld [vmem:[%s7404_s1 + $0xc64] ss:$8 sps:$4 sm:$0xff]  }
  0xe7   :  { %3464 = vmatpush1.bf16.msra.mxu1 %v5130_v26  ;;  %v5210_v26 = vld [vmem:[%s7404_s1 + $0x460] ss:$8 sps:$4 sm:$0xff]  }
  0xe8   :  { %3792 = vmatpush1.bf16.msra.mxu0 %v5133_v27  ;;  %3465 = vmatprep.subr.bf16.mxu1 %v5138_v28  ;;  %v5213_v27 = vld [vmem:[%s7404_s1 + $0xc60] ss:$8 sps:$4 sm:$0xff]   ;;  %v5218_v28 = vld [vmem:[%s7404_s1 + $0x474] ss:$8 sps:$4 sm:$0xff]  }
  0xe9   :  { %3793 = vmatprep.subr.bf16.mxu0 %v5141_v29  ;;  %v5221_v29 = vld [vmem:[%s7404_s1 + $0xc74] ss:$8 sps:$4 sm:$0xff]  }
  0xeb   :  { %3466 = vmatpush1.bf16.msra.mxu1 %v5136_v30  ;;  %v5216_v30 = vld [vmem:[%s7404_s1 + $0x470] ss:$8 sps:$4 sm:$0xff]  }
  0xec   :  { %3794 = vmatpush1.bf16.msra.mxu0 %v5139_v31  ;;  %3467 = vmatprep.subr.bf16.mxu1 %v5144_v32  ;;  %v5219_v31 = vld [vmem:[%s7404_s1 + $0xc70] ss:$8 sps:$4 sm:$0xff]   ;;  %v5224_v32 = vld [vmem:[%s7404_s1 + $0x484] ss:$8 sps:$4 sm:$0xff]  }
  0xed   :  { %3795 = vmatprep.subr.bf16.mxu0 %v5147_v33  ;;  %v5227_v33 = vld [vmem:[%s7404_s1 + $0xc84] ss:$8 sps:$4 sm:$0xff]  }
  0xef   :  { %3468 = vmatpush1.bf16.msra.mxu1 %v5142_v34  ;;  %v5222_v34 = vld [vmem:[%s7404_s1 + $0x480] ss:$8 sps:$4 sm:$0xff]  }
  0xf0   :  { %3796 = vmatpush1.bf16.msra.mxu0 %v5145_v14  ;;  %3469 = vmatprep.subr.bf16.mxu1 %v5150_v37  ;;  %v5225_v14 = vld [vmem:[%s7404_s1 + $0xc80] ss:$8 sps:$4 sm:$0xff]   ;;  %v5230_v37 = vld [vmem:[%s7404_s1 + $0x494] ss:$8 sps:$4 sm:$0xff]  }
  0xf1   :  { %3797 = vmatprep.subr.bf16.mxu0 %v5153_v38  ;;  %v5233_v38 = vld [vmem:[%s7404_s1 + $0xc94] ss:$8 sps:$4 sm:$0xff]  }
  0xf3   :  { %3470 = vmatpush1.bf16.msra.mxu1 %v5148_v39  ;;  %v5228_v39 = vld [vmem:[%s7404_s1 + $0x490] ss:$8 sps:$4 sm:$0xff]  }
  0xf4   :  { %3798 = vmatpush1.bf16.msra.mxu0 %v5151_v35  ;;  %3471 = vmatprep.subr.bf16.mxu1 %v5156_v42  ;;  %v5231_v35 = vld [vmem:[%s7404_s1 + $0xc90] ss:$8 sps:$4 sm:$0xff]   ;;  %v5236_v42 = vld [vmem:[%s7404_s1 + $0x4a4] ss:$8 sps:$4 sm:$0xff]  }
  0xf5   :  { %3799 = vmatprep.subr.bf16.mxu0 %v5159_v44  ;;  %v5239_v44 = vld [vmem:[%s7404_s1 + $0xca4] ss:$8 sps:$4 sm:$0xff]  }
  0xf7   :  { %3472 = vmatpush1.bf16.msra.mxu1 %v5154_v45  ;;  %v5234_v45 = vld [vmem:[%s7404_s1 + $0x4a0] ss:$8 sps:$4 sm:$0xff]  }
  0xf8   :  { %3800 = vmatpush1.bf16.msra.mxu0 %v5157_v46  ;;  %3473 = vmatprep.subr.bf16.mxu1 %v5162_v47  ;;  %v5237_v46 = vld [vmem:[%s7404_s1 + $0xca0] ss:$8 sps:$4 sm:$0xff]   ;;  %v5242_v47 = vld [vmem:[%s7404_s1 + $0x4b4] ss:$8 sps:$4 sm:$0xff]  }
  0xf9   :  { %3801 = vmatprep.subr.bf16.mxu0 %v5165_v48  ;;  %v5245_v48 = vld [vmem:[%s7404_s1 + $0xcb4] ss:$8 sps:$4 sm:$0xff]  }
  0xfb   :  { %3474 = vmatpush1.bf16.msra.mxu1 %v5160_v52  ;;  %v5240_v52 = vld [vmem:[%s7404_s1 + $0x4b0] ss:$8 sps:$4 sm:$0xff]  }
  0xfc   :  { %3802 = vmatpush1.bf16.msra.mxu0 %v5163_v53  ;;  %3475 = vmatprep.subr.bf16.mxu1 %v5168_v54  ;;  %v5243_v53 = vld [vmem:[%s7404_s1 + $0xcb0] ss:$8 sps:$4 sm:$0xff]   ;;  %v5248_v54 = vld [vmem:[%s7404_s1 + $0x4c4] ss:$8 sps:$4 sm:$0xff]  }
  0xfd   :  { %3803 = vmatprep.subr.bf16.mxu0 %v5171_v55  ;;  %v5251_v55 = vld [vmem:[%s7404_s1 + $0xcc4] ss:$8 sps:$4 sm:$0xff]  }
  0xff   :  { %3476 = vmatpush1.bf16.msra.mxu1 %v5166_v15  ;;  %v5246_v15 = vld [vmem:[%s7404_s1 + $0x4c0] ss:$8 sps:$4 sm:$0xff]  }
 0x100   :  { %3804 = vmatpush1.bf16.msra.mxu0 %v5169_v40  ;;  %3486 = vmatprep.subr.bf16.mxu1 %v5175_v58  ;;  %v5249_v40 = vld [vmem:[%s7404_s1 + $0xcc0] ss:$8 sps:$4 sm:$0xff]   ;;  %v5254_v58 = vld [vmem:[%s7404_s1 + $0x4d4] ss:$8 sps:$4 sm:$0xff]  }
 0x101   :  { %3814 = vmatprep.subr.bf16.mxu0 %v5179_v59  ;;  %v5257_v59 = vld [vmem:[%s7404_s1 + $0xcd4] ss:$8 sps:$4 sm:$0xff]  }
 0x102   :  { %3478 = vmatmul.mubr.bf16.vlgmr.msra.gmra.mrb[0].mxu1 %v212_v62  ;;  %v5260_v62 = vld [vmem:[%s7404_s1 + $0x4e4] ss:$8 sps:$4 sm:$0xff]  }
 0x103   :  { %3806 = vmatmul.mubr.bf16.vlgmr.msra.gmra.mrb[0].mxu0 %v228_v63  ;;  %3487 = vmatpush1.bf16.msra.mxu1 %v5173_v0  ;;  %v5263_v63 = vld [vmem:[%s7404_s1 + $0xce4] ss:$8 sps:$4 sm:$0xff]   ;;  %v72_v0 = vcombine.high %v6460_v50, %v6460_v50  ;;  %v5269_v50 = vld [vmem:[%s7404_s1 + $0xcf4] ss:$8 sps:$4 sm:$0xff]  }
 0x104   :  { %3815 = vmatpush1.bf16.msra.mxu0 %v5177_v1  ;;  %3488 = vmatprep.subr.bf16.mxu1 %v5182_v2  ;;  %v140_v1 = vcombine.high %v6465_v51, %v6465_v51  ;;  %v5258_v2 = vld [vmem:[%s7404_s1 + $0x4e0] ss:$8 sps:$4 sm:$0xff]  }
 0x105   :  { %3816 = vmatprep.subr.bf16.mxu0 %v5185_v36  ;;  %3518 = vmatprep.mubr.bf16.mxu1 %v215_v41  ;;  %v5261_v36 = vld [vmem:[%s7404_s1 + $0xce0] ss:$8 sps:$4 sm:$0xff]   ;;  %v5266_v41 = vld [vmem:[%s7404_s1 + $0x4f4] ss:$8 sps:$4 sm:$0xff]   ;;  %v6692_v51 = vrot.slane %v72_v0, %v5769_v49 }
 0x106   :  { %3846 = vmatprep.mubr.bf16.mxu0 %v231_v3  ;;  %v6695_v3 = vrot.slane %v140_v1, %v5769_v49 }
 0x107   :  { %3489 = vmatpush1.bf16.msra.mxu1 %v5180_v4  ;;  %v5264_v4 = vld [vmem:[%s7404_s1 + $0x4f0] ss:$8 sps:$4 sm:$0xff]  }
 0x108   :  { %3817 = vmatpush1.bf16.msra.mxu0 %v5183_v5  ;;  %3490 = vmatprep.subr.bf16.mxu1 %v5188_v6  ;;  %v5267_v5 = vld [vmem:[%s7404_s1 + $0xcf0] ss:$8 sps:$4 sm:$0xff]   ;;  %v5272_v6 = vld [vmem:[%s7404_s1 + $0x504] ss:$8 sps:$4 sm:$0xff]  }
 0x109   :  { %3818 = vmatprep.subr.bf16.mxu0 %v5191_v7  ;;  %v5275_v7 = vld [vmem:[%s7404_s1 + $0xd04] ss:$8 sps:$4 sm:$0xff]  }
 0x10b   :  { %3491 = vmatpush1.bf16.msra.mxu1 %v5186_v8  ;;  %v88_v8 = vcombine.high %v6692_v51, %v6692_v51 }
 0x10c   :  { %3819 = vmatpush1.bf16.msra.mxu0 %v5189_v9  ;;  %3492 = vmatprep.subr.bf16.mxu1 %v5194_v10  ;;  %v156_v9 = vcombine.high %v6695_v3, %v6695_v3  ;;  %v214_v10 = vpack.c.bf16 %v6481_v56, %v6481_v56  ;;  %v5281_v56 = vld [vmem:[%s7404_s1 + $0xd14] ss:$8 sps:$4 sm:$0xff]  }
 0x10d   :  { %3820 = vmatprep.subr.bf16.mxu0 %v5197_v11  ;;  %v230_v11 = vpack.c.bf16 %v6485_v57, %v6485_v57  ;;  %v217_v57 = vpack.c.bf16 %v88_v8, %v88_v8 }
 0x10f   :  { %3493 = vmatpush1.bf16.msra.mxu1 %v5192_v12  ;;  %v5270_v12 = vld [vmem:[%s7404_s1 + $0x500] ss:$8 sps:$4 sm:$0xff]  }
 0x110   :  { %3821 = vmatpush1.bf16.msra.mxu0 %v5195_v13  ;;  %3494 = vmatprep.subr.bf16.mxu1 %v5200_v16  ;;  %v5273_v13 = vld [vmem:[%s7404_s1 + $0xd00] ss:$8 sps:$4 sm:$0xff]   ;;  %v5278_v16 = vld [vmem:[%s7404_s1 + $0x514] ss:$8 sps:$4 sm:$0xff]  }
 0x111   :  { %3822 = vmatprep.subr.bf16.mxu0 %v5203_v17  ;;  %v233_v17 = vpack.c.bf16 %v156_v9, %v156_v9 }
 0x113   :  { %3495 = vmatpush1.bf16.msra.mxu1 %v5198_v18  ;;  %v5276_v18 = vld [vmem:[%s7404_s1 + $0x510] ss:$8 sps:$4 sm:$0xff]  }
 0x114   :  { %3823 = vmatpush1.bf16.msra.mxu0 %v5201_v19  ;;  %3496 = vmatprep.subr.bf16.mxu1 %v5206_v20  ;;  %v5279_v19 = vld [vmem:[%s7404_s1 + $0xd10] ss:$8 sps:$4 sm:$0xff]   ;;  %v5284_v20 = vld [vmem:[%s7404_s1 + $0x524] ss:$8 sps:$4 sm:$0xff]  }
 0x115   :  { %3824 = vmatprep.subr.bf16.mxu0 %v5209_v21  ;;  %v5287_v21 = vld [vmem:[%s7404_s1 + $0xd24] ss:$8 sps:$4 sm:$0xff]  }
 0x117   :  { %3497 = vmatpush1.bf16.msra.mxu1 %v5204_v22  ;;  %v5282_v22 = vld [vmem:[%s7404_s1 + $0x520] ss:$8 sps:$4 sm:$0xff]  }
 0x118   :  { %3825 = vmatpush1.bf16.msra.mxu0 %v5207_v23  ;;  %3498 = vmatprep.subr.bf16.mxu1 %v5212_v24  ;;  %v5285_v23 = vld [vmem:[%s7404_s1 + $0xd20] ss:$8 sps:$4 sm:$0xff]   ;;  %v5290_v24 = vld [vmem:[%s7404_s1 + $0x534] ss:$8 sps:$4 sm:$0xff]  }
 0x119   :  { %3826 = vmatprep.subr.bf16.mxu0 %v5215_v25  ;;  %v5293_v25 = vld [vmem:[%s7404_s1 + $0xd34] ss:$8 sps:$4 sm:$0xff]  }
 0x11b   :  { %3499 = vmatpush1.bf16.msra.mxu1 %v5210_v26  ;;  %v5288_v26 = vld [vmem:[%s7404_s1 + $0x530] ss:$8 sps:$4 sm:$0xff]  }
 0x11c   :  { %3827 = vmatpush1.bf16.msra.mxu0 %v5213_v27  ;;  %3500 = vmatprep.subr.bf16.mxu1 %v5218_v28  ;;  %v5291_v27 = vld [vmem:[%s7404_s1 + $0xd30] ss:$8 sps:$4 sm:$0xff]   ;;  %v5296_v28 = vld [vmem:[%s7404_s1 + $0x544] ss:$8 sps:$4 sm:$0xff]  }
 0x11d   :  { %3828 = vmatprep.subr.bf16.mxu0 %v5221_v29  ;;  %v5299_v29 = vld [vmem:[%s7404_s1 + $0xd44] ss:$8 sps:$4 sm:$0xff]  }
 0x11f   :  { %3501 = vmatpush1.bf16.msra.mxu1 %v5216_v30  ;;  %v5294_v30 = vld [vmem:[%s7404_s1 + $0x540] ss:$8 sps:$4 sm:$0xff]  }
 0x120   :  { %3829 = vmatpush1.bf16.msra.mxu0 %v5219_v31  ;;  %3502 = vmatprep.subr.bf16.mxu1 %v5224_v32  ;;  %v5297_v31 = vld [vmem:[%s7404_s1 + $0xd40] ss:$8 sps:$4 sm:$0xff]   ;;  %v5302_v32 = vld [vmem:[%s7404_s1 + $0x554] ss:$8 sps:$4 sm:$0xff]  }
 0x121   :  { %3830 = vmatprep.subr.bf16.mxu0 %v5227_v33  ;;  %v5305_v33 = vld [vmem:[%s7404_s1 + $0xd54] ss:$8 sps:$4 sm:$0xff]  }
 0x123   :  { %3503 = vmatpush1.bf16.msra.mxu1 %v5222_v34  ;;  %v5300_v34 = vld [vmem:[%s7404_s1 + $0x550] ss:$8 sps:$4 sm:$0xff]  }
 0x124   :  { %3831 = vmatpush1.bf16.msra.mxu0 %v5225_v14  ;;  %3504 = vmatprep.subr.bf16.mxu1 %v5230_v37  ;;  %v5303_v14 = vld [vmem:[%s7404_s1 + $0xd50] ss:$8 sps:$4 sm:$0xff]  }
 0x125   :  { %3832 = vmatprep.subr.bf16.mxu0 %v5233_v38 }
 0x127   :  { %3505 = vmatpush1.bf16.msra.mxu1 %v5228_v39 }
 0x128   :  { %3833 = vmatpush1.bf16.msra.mxu0 %v5231_v35  ;;  %3506 = vmatprep.subr.bf16.mxu1 %v5236_v42 }
 0x129   :  { %3834 = vmatprep.subr.bf16.mxu0 %v5239_v44 }
 0x12b   :  { %3507 = vmatpush1.bf16.msra.mxu1 %v5234_v45 }
 0x12c   :  { %3835 = vmatpush1.bf16.msra.mxu0 %v5237_v46  ;;  %3508 = vmatprep.subr.bf16.mxu1 %v5242_v47 }
 0x12d   :  { %3836 = vmatprep.subr.bf16.mxu0 %v5245_v48 }
 0x12f   :  { %3509 = vmatpush1.bf16.msra.mxu1 %v5240_v52 }
 0x130   :  { %3837 = vmatpush1.bf16.msra.mxu0 %v5243_v53  ;;  %3510 = vmatprep.subr.bf16.mxu1 %v5248_v54 }
 0x131   :  { %3838 = vmatprep.subr.bf16.mxu0 %v5251_v55 }
 0x133   :  { %3511 = vmatpush1.bf16.msra.mxu1 %v5246_v15 }
 0x134   :  { %3839 = vmatpush1.bf16.msra.mxu0 %v5249_v40  ;;  %3512 = vmatprep.subr.bf16.mxu1 %v5254_v58 }
 0x135   :  { %3840 = vmatprep.subr.bf16.mxu0 %v5257_v59 }
 0x137   :  { %3513 = vmatpush1.bf16.msra.mxu1 %v5252_v60 }
 0x138   :  { %3841 = vmatpush1.bf16.msra.mxu0 %v5255_v61  ;;  %3514 = vmatprep.subr.bf16.mxu1 %v5260_v62 }
 0x139   :  { %3842 = vmatprep.subr.bf16.mxu0 %v5263_v63 }
 0x13b   :  { %3515 = vmatpush1.bf16.msra.mxu1 %v5258_v2 }
 0x13c   :  { %3843 = vmatpush1.bf16.msra.mxu0 %v5261_v36  ;;  %3516 = vmatprep.subr.bf16.mxu1 %v5266_v41 }
 0x13d   :  { %3844 = vmatprep.subr.bf16.mxu0 %v5269_v50 }
 0x13f   :  { %3517 = vmatpush1.bf16.msra.mxu1 %v5264_v4 }
 0x140   :  { %3845 = vmatpush1.bf16.msra.mxu0 %v5267_v5  ;;  %3527 = vmatprep.subr.bf16.mxu1 %v5272_v6 }
 0x141   :  { %3855 = vmatprep.subr.bf16.mxu0 %v5275_v7 }
 0x142   :  { %3519 = vmatmul.mubr.bf16.vlgmr.msra.gmra.mrb[0].mxu1 %v214_v10 }
 0x143   :  { %3847 = vmatmul.mubr.bf16.vlgmr.msra.gmra.mrb[0].mxu0 %v230_v11  ;;  %3528 = vmatpush1.bf16.msra.mxu1 %v5270_v12 }
 0x144   :  { %3856 = vmatpush1.bf16.msra.mxu0 %v5273_v13  ;;  %3529 = vmatprep.subr.bf16.mxu1 %v5278_v16 }
 0x145   :  { %3857 = vmatprep.subr.bf16.mxu0 %v5281_v56  ;;  %3559 = vmatprep.mubr.bf16.mxu1 %v217_v57 }
 0x146   :  { %3887 = vmatprep.mubr.bf16.mxu0 %v233_v17 }
 0x147   :  { %3530 = vmatpush1.bf16.msra.mxu1 %v5276_v18 }
 0x148   :  { %3858 = vmatpush1.bf16.msra.mxu0 %v5279_v19  ;;  %3531 = vmatprep.subr.bf16.mxu1 %v5284_v20 }
 0x149   :  { %3859 = vmatprep.subr.bf16.mxu0 %v5287_v21 }
 0x14b   :  { %3532 = vmatpush1.bf16.msra.mxu1 %v5282_v22 }
 0x14c   :  { %3860 = vmatpush1.bf16.msra.mxu0 %v5285_v23  ;;  %3533 = vmatprep.subr.bf16.mxu1 %v5290_v24 }
 0x14d   :  { %3861 = vmatprep.subr.bf16.mxu0 %v5293_v25 }
 0x14f   :  { %3534 = vmatpush1.bf16.msra.mxu1 %v5288_v26 }
 0x150   :  { %3862 = vmatpush1.bf16.msra.mxu0 %v5291_v27  ;;  %3535 = vmatprep.subr.bf16.mxu1 %v5296_v28 }
 0x151   :  { %3863 = vmatprep.subr.bf16.mxu0 %v5299_v29 }
 0x153   :  { %3536 = vmatpush1.bf16.msra.mxu1 %v5294_v30 }
 0x154   :  { %3864 = vmatpush1.bf16.msra.mxu0 %v5297_v31 }
 0x155   :  { %10 = vsyncpa [#allocation3], 0  ;;  %3537 = vmatprep.subr.bf16.mxu1 %v5302_v32  ;;  %3865 = vmatprep.subr.bf16.mxu0 %v5305_v33  ;;  %v5308_v37 = vld [vmem:[%s7404_s1 + $0x564] ss:$8 sps:$4 sm:$0xff]   ;;  %v5306_v39 = vld [vmem:[%s7404_s1 + $0x560] ss:$8 sps:$4 sm:$0xff]   ;;  %v216_v24 = vpack.c.bf16 %v6692_v51, %v6692_v51  ;;  %v232_v25 = vpack.c.bf16 %v6695_v3, %v6695_v3 }
 0x156   :  { %v5311_v38 = vld [vmem:[%s7404_s1 + $0xd64] ss:$8 sps:$4 sm:$0xff]   ;;  %v5309_v35 = vld [vmem:[%s7404_s1 + $0xd60] ss:$8 sps:$4 sm:$0xff]   ;;  %v5314_v42 = vld [vmem:[%s7404_s1 + $0x574] ss:$8 sps:$4 sm:$0xff]  }
 0x157   :  { %3538 = vmatpush1.bf16.msra.mxu1 %v5300_v34  ;;  %v5317_v44 = vld [vmem:[%s7404_s1 + $0xd74] ss:$8 sps:$4 sm:$0xff]   ;;  %v5312_v45 = vld [vmem:[%s7404_s1 + $0x570] ss:$8 sps:$4 sm:$0xff]   ;;  %v5320_v47 = vld [vmem:[%s7404_s1 + $0x584] ss:$8 sps:$4 sm:$0xff]  }
 0x158   :  { %3866 = vmatpush1.bf16.msra.mxu0 %v5303_v14  ;;  %3539 = vmatprep.subr.bf16.mxu1 %v5308_v37  ;;  %v5315_v46 = vld [vmem:[%s7404_s1 + $0xd70] ss:$8 sps:$4 sm:$0xff]   ;;  %v5323_v48 = vld [vmem:[%s7404_s1 + $0xd84] ss:$8 sps:$4 sm:$0xff]   ;;  %v5318_v52 = vld [vmem:[%s7404_s1 + $0x580] ss:$8 sps:$4 sm:$0xff]  }
 0x159   :  { %3867 = vmatprep.subr.bf16.mxu0 %v5311_v38  ;;  %v5321_v53 = vld [vmem:[%s7404_s1 + $0xd80] ss:$8 sps:$4 sm:$0xff]   ;;  %v5326_v54 = vld [vmem:[%s7404_s1 + $0x594] ss:$8 sps:$4 sm:$0xff]   ;;  %v5324_v15 = vld [vmem:[%s7404_s1 + $0x590] ss:$8 sps:$4 sm:$0xff]  }
 0x15a   :  { %v5329_v55 = vld [vmem:[%s7404_s1 + $0xd94] ss:$8 sps:$4 sm:$0xff]   ;;  %v5327_v40 = vld [vmem:[%s7404_s1 + $0xd90] ss:$8 sps:$4 sm:$0xff]   ;;  %v5332_v58 = vld [vmem:[%s7404_s1 + $0x5a4] ss:$8 sps:$4 sm:$0xff]  }
 0x15b   :  { %3540 = vmatpush1.bf16.msra.mxu1 %v5306_v39  ;;  %v5335_v59 = vld [vmem:[%s7404_s1 + $0xda4] ss:$8 sps:$4 sm:$0xff]   ;;  %v5330_v60 = vld [vmem:[%s7404_s1 + $0x5a0] ss:$8 sps:$4 sm:$0xff]   ;;  %v5338_v62 = vld [vmem:[%s7404_s1 + $0x5b4] ss:$8 sps:$4 sm:$0xff]  }
 0x15c   :  { %3868 = vmatpush1.bf16.msra.mxu0 %v5309_v35  ;;  %3541 = vmatprep.subr.bf16.mxu1 %v5314_v42  ;;  %v5333_v61 = vld [vmem:[%s7404_s1 + $0xda0] ss:$8 sps:$4 sm:$0xff]   ;;  %v5341_v63 = vld [vmem:[%s7404_s1 + $0xdb4] ss:$8 sps:$4 sm:$0xff]   ;;  %v5336_v0 = vld [vmem:[%s7404_s1 + $0x5b0] ss:$8 sps:$4 sm:$0xff]  }
 0x15d   :  { %3869 = vmatprep.subr.bf16.mxu0 %v5317_v44  ;;  %v5339_v1 = vld [vmem:[%s7404_s1 + $0xdb0] ss:$8 sps:$4 sm:$0xff]   ;;  %v5344_v2 = vld [vmem:[%s7404_s1 + $0x5c4] ss:$8 sps:$4 sm:$0xff]   ;;  %v5342_v41 = vld [vmem:[%s7404_s1 + $0x5c0] ss:$8 sps:$4 sm:$0xff]  }
 0x15e   :  { %v5347_v36 = vld [vmem:[%s7404_s1 + $0xdc4] ss:$8 sps:$4 sm:$0xff]   ;;  %v5345_v50 = vld [vmem:[%s7404_s1 + $0xdc0] ss:$8 sps:$4 sm:$0xff]   ;;  %v5350_v4 = vld [vmem:[%s7404_s1 + $0x5d4] ss:$8 sps:$4 sm:$0xff]  }
 0x15f   :  { %3542 = vmatpush1.bf16.msra.mxu1 %v5312_v45  ;;  %v5353_v5 = vld [vmem:[%s7404_s1 + $0xdd4] ss:$8 sps:$4 sm:$0xff]   ;;  %v5348_v6 = vld [vmem:[%s7404_s1 + $0x5d0] ss:$8 sps:$4 sm:$0xff]   ;;  %v5356_v8 = vld [vmem:[%s7404_s1 + $0x5e4] ss:$8 sps:$4 sm:$0xff]  }
 0x160   :  { %3870 = vmatpush1.bf16.msra.mxu0 %v5315_v46  ;;  %3543 = vmatprep.subr.bf16.mxu1 %v5320_v47  ;;  %v5351_v7 = vld [vmem:[%s7404_s1 + $0xdd0] ss:$8 sps:$4 sm:$0xff]   ;;  %v5359_v9 = vld [vmem:[%s7404_s1 + $0xde4] ss:$8 sps:$4 sm:$0xff]   ;;  %v5354_v12 = vld [vmem:[%s7404_s1 + $0x5e0] ss:$8 sps:$4 sm:$0xff]  }
 0x161   :  { %3871 = vmatprep.subr.bf16.mxu0 %v5323_v48  ;;  %v6888_v10 = vld [vmem:[%s7403_s0 + $0x18] sm:$0xff]  ;;  %v5357_v13 = vld [vmem:[%s7404_s1 + $0xde0] ss:$8 sps:$4 sm:$0xff]   ;;  %v5369_v20 = vld [vmem:[%s7404_s1 + $0x604] ss:$8 sps:$4 sm:$0xff]   ;;  %s5603_s28 = smov [#allocation2]  }
 0x162   :  { %v6893_v11 = vld [vmem:[%s7403_s0 + $0x38] sm:$0xff]  ;;  %v6909_v57 = vrot.slane %v6888_v10, %v5769_v49  ;;  %v5373_v21 = vld [vmem:[%s7404_s1 + $0xe04] ss:$8 sps:$4 sm:$0xff]   ;;  %v5367_v26 = vld [vmem:[%s7404_s1 + $0x600] ss:$8 sps:$4 sm:$0xff]   ;;  %s4165_s29 = sshll.u32 %s5603_s28, 4  ;;  %s4166_s29 = int_to_ptr.vmem [resolvable:$true] %s4165_s29 }
 0x163   :  { %3544 = vmatpush1.bf16.msra.mxu1 %v5318_v52  ;;  %v5362_v16 = vld [vmem:[%s7404_s1 + $0x5f4] ss:$8 sps:$4 sm:$0xff]   ;;  %v6913_v17 = vrot.slane %v6893_v11, %v5769_v49  ;;  %v5360_v18 = vld [vmem:[%s7404_s1 + $0x5f0] ss:$8 sps:$4 sm:$0xff]   ;;  %v5371_v27 = vld [vmem:[%s7404_s1 + $0xe00] ss:$8 sps:$4 sm:$0xff]   ;;  %p5583_p1 = scmp.lt.s32.totalorder %s4166_s29, %s4166_s29 }
 0x164   :  { %3872 = vmatpush1.bf16.msra.mxu0 %v5321_v53  ;;  %3545 = vmatprep.subr.bf16.mxu1 %v5326_v54  ;;  %v5365_v56 = vld [vmem:[%s7404_s1 + $0xdf4] ss:$8 sps:$4 sm:$0xff]   ;;  %v5363_v19 = vld [vmem:[%s7404_s1 + $0xdf0] ss:$8 sps:$4 sm:$0xff]   ;;  %v104_v22 = vcombine.high %v6909_v57, %v6909_v57  ;;  %v5382_v32 = vld [vmem:[%s7404_s1 + $0x624] ss:$8 sps:$4 sm:$0xff]  }
 0x165   :  { %3873 = vmatprep.subr.bf16.mxu0 %v5329_v55  ;;  %v172_v23 = vcombine.high %v6913_v17, %v6913_v17  ;;  %v5376_v28 = vld [vmem:[%s7404_s1 + $0x614] ss:$8 sps:$4 sm:$0xff]   ;;  %v5374_v30 = vld [vmem:[%s7404_s1 + $0x610] ss:$8 sps:$4 sm:$0xff]   ;;  %v5385_v33 = vld [vmem:[%s7404_s1 + $0xe24] ss:$8 sps:$4 sm:$0xff]  }
 0x166   :  { %v5379_v51 = vld [vmem:[%s7404_s1 + $0xe14] ss:$8 sps:$4 sm:$0xff]   ;;  %v219_v3 = vpack.c.bf16 %v104_v22, %v104_v22  ;;  %v5377_v31 = vld [vmem:[%s7404_s1 + $0xe10] ss:$8 sps:$4 sm:$0xff]   ;;  %v5380_v34 = vld [vmem:[%s7404_s1 + $0x620] ss:$8 sps:$4 sm:$0xff]  }
 0x167   :  { %3546 = vmatpush1.bf16.msra.mxu1 %v5324_v15  ;;  %v235_v29 = vpack.c.bf16 %v172_v23, %v172_v23  ;;  %v5383_v14 = vld [vmem:[%s7404_s1 + $0xe20] ss:$8 sps:$4 sm:$0xff]   ;;  %v5388_v37 = vld [vmem:[%s7404_s1 + $0x634] ss:$8 sps:$4 sm:$0xff]   ;;  %v5386_v39 = vld [vmem:[%s7404_s1 + $0x630] ss:$8 sps:$4 sm:$0xff]  }
 0x168   :  { %3874 = vmatpush1.bf16.msra.mxu0 %v5327_v40  ;;  %3547 = vmatprep.subr.bf16.mxu1 %v5332_v58  ;;  %v5391_v38 = vld [vmem:[%s7404_s1 + $0xe34] ss:$8 sps:$4 sm:$0xff]   ;;  %v5389_v35 = vld [vmem:[%s7404_s1 + $0xe30] ss:$8 sps:$4 sm:$0xff]   ;;  %v5394_v42 = vld [vmem:[%s7404_s1 + $0x644] ss:$8 sps:$4 sm:$0xff]  }
 0x169   :  { %3875 = vmatprep.subr.bf16.mxu0 %v5335_v59  ;;  %v5397_v44 = vld [vmem:[%s7404_s1 + $0xe44] ss:$8 sps:$4 sm:$0xff]   ;;  %v5392_v45 = vld [vmem:[%s7404_s1 + $0x640] ss:$8 sps:$4 sm:$0xff]   ;;  %v5400_v47 = vld [vmem:[%s7404_s1 + $0x654] ss:$8 sps:$4 sm:$0xff]  }
 0x16a   :  { %v5395_v46 = vld [vmem:[%s7404_s1 + $0xe40] ss:$8 sps:$4 sm:$0xff]   ;;  %v5403_v48 = vld [vmem:[%s7404_s1 + $0xe54] ss:$8 sps:$4 sm:$0xff]   ;;  %v5398_v52 = vld [vmem:[%s7404_s1 + $0x650] ss:$8 sps:$4 sm:$0xff]  }
 0x16b   :  { %3548 = vmatpush1.bf16.msra.mxu1 %v5330_v60  ;;  %v5401_v53 = vld [vmem:[%s7404_s1 + $0xe50] ss:$8 sps:$4 sm:$0xff]   ;;  %v5406_v54 = vld [vmem:[%s7404_s1 + $0x664] ss:$8 sps:$4 sm:$0xff]   ;;  %v5404_v15 = vld [vmem:[%s7404_s1 + $0x660] ss:$8 sps:$4 sm:$0xff]  }
 0x16c   :  { %3876 = vmatpush1.bf16.msra.mxu0 %v5333_v61  ;;  %3549 = vmatprep.subr.bf16.mxu1 %v5338_v62  ;;  %v5409_v55 = vld [vmem:[%s7404_s1 + $0xe64] ss:$8 sps:$4 sm:$0xff]   ;;  %v5407_v40 = vld [vmem:[%s7404_s1 + $0xe60] ss:$8 sps:$4 sm:$0xff]   ;;  %v5412_v58 = vld [vmem:[%s7404_s1 + $0x674] ss:$8 sps:$4 sm:$0xff]  }
 0x16d   :  { %3877 = vmatprep.subr.bf16.mxu0 %v5341_v63  ;;  %v5415_v59 = vld [vmem:[%s7404_s1 + $0xe74] ss:$8 sps:$4 sm:$0xff]   ;;  %v5410_v60 = vld [vmem:[%s7404_s1 + $0x670] ss:$8 sps:$4 sm:$0xff]   ;;  %v5418_v62 = vld [vmem:[%s7404_s1 + $0x684] ss:$8 sps:$4 sm:$0xff]  }
 0x16e   :  { %v5413_v61 = vld [vmem:[%s7404_s1 + $0xe70] ss:$8 sps:$4 sm:$0xff]   ;;  %v5421_v63 = vld [vmem:[%s7404_s1 + $0xe84] ss:$8 sps:$4 sm:$0xff]   ;;  %vm4157_vm0 = vcmask 74752   ;;  %s5578_s30 = scalar_lea.vmem %s4166_s29, 32 }
 0x16f   :  { %3550 = vmatpush1.bf16.msra.mxu1 %v5336_v0  ;;  %v5416_v0 = vld [vmem:[%s7404_s1 + $0x680] ss:$8 sps:$4 sm:$0xff]   ;;  %v5446_v22 = vld [vmem:[%s7404_s1 + $0x6d0] ss:$8 sps:$4 sm:$0xff]   ;;  %p5579_p0 = scmp.ne.s32.totalorder %s4166_s29, %s5578_s30  ;;  %p5584_p2 = scmp.lt.s32.totalorder %s5578_s30, %s5578_s30 }
 0x170   :  { %3878 = vmatpush1.bf16.msra.mxu0 %v5339_v1  ;;  %3551 = vmatprep.subr.bf16.mxu1 %v5344_v2  ;;  %v5419_v1 = vld [vmem:[%s7404_s1 + $0xe80] ss:$8 sps:$4 sm:$0xff]   ;;  %v5424_v2 = vld [vmem:[%s7404_s1 + $0x694] ss:$8 sps:$4 sm:$0xff]   ;;  %v5449_v23 = vld [vmem:[%s7404_s1 + $0xed0] ss:$8 sps:$4 sm:$0xff]  }
 0x171   :  { %3879 = vmatprep.subr.bf16.mxu0 %v5347_v36  ;;  %v5427_v36 = vld [vmem:[%s7404_s1 + $0xe94] ss:$8 sps:$4 sm:$0xff]   ;;  %p5585_p3 = por %p5584_p2, %p5583_p1 }
 0x173   :  { %3552 = vmatpush1.bf16.msra.mxu1 %v5342_v41  ;;  %v5422_v41 = vld [vmem:[%s7404_s1 + $0x690] ss:$8 sps:$4 sm:$0xff]   ;;  %p5586_p4 = pnand %p5585_p3, %p5579_p0 }
 0x174   :  { %3880 = vmatpush1.bf16.msra.mxu0 %v5345_v50  ;;  %3553 = vmatprep.subr.bf16.mxu1 %v5350_v4  ;;  %v5425_v50 = vld [vmem:[%s7404_s1 + $0xe90] ss:$8 sps:$4 sm:$0xff]   ;;  %v5430_v4 = vld [vmem:[%s7404_s1 + $0x6a4] ss:$8 sps:$4 sm:$0xff]  }
 0x175   :  { %3881 = vmatprep.subr.bf16.mxu0 %v5353_v5  ;;  %v5433_v5 = vld [vmem:[%s7404_s1 + $0xea4] ss:$8 sps:$4 sm:$0xff]  }
 0x177   :  { %3554 = vmatpush1.bf16.msra.mxu1 %v5348_v6  ;;  %v5428_v6 = vld [vmem:[%s7404_s1 + $0x6a0] ss:$8 sps:$4 sm:$0xff]  }
 0x178   :  { %3882 = vmatpush1.bf16.msra.mxu0 %v5351_v7  ;;  %3555 = vmatprep.subr.bf16.mxu1 %v5356_v8  ;;  %v5431_v7 = vld [vmem:[%s7404_s1 + $0xea0] ss:$8 sps:$4 sm:$0xff]   ;;  %v5436_v8 = vld [vmem:[%s7404_s1 + $0x6b4] ss:$8 sps:$4 sm:$0xff]  }
 0x179   :  { %3883 = vmatprep.subr.bf16.mxu0 %v5359_v9  ;;  %v5439_v9 = vld [vmem:[%s7404_s1 + $0xeb4] ss:$8 sps:$4 sm:$0xff]  }
 0x17b   :  { %3556 = vmatpush1.bf16.msra.mxu1 %v5354_v12  ;;  %v5434_v12 = vld [vmem:[%s7404_s1 + $0x6b0] ss:$8 sps:$4 sm:$0xff]  }
 0x17c   :  { %3884 = vmatpush1.bf16.msra.mxu0 %v5357_v13  ;;  %3557 = vmatprep.subr.bf16.mxu1 %v5362_v16  ;;  %v5437_v13 = vld [vmem:[%s7404_s1 + $0xeb0] ss:$8 sps:$4 sm:$0xff]   ;;  %v5442_v16 = vld [vmem:[%s7404_s1 + $0x6c4] ss:$8 sps:$4 sm:$0xff]  }
 0x17d   :  { %3885 = vmatprep.subr.bf16.mxu0 %v5365_v56  ;;  %v5445_v56 = vld [vmem:[%s7404_s1 + $0xec4] ss:$8 sps:$4 sm:$0xff]  }
 0x17f   :  { %3558 = vmatpush1.bf16.msra.mxu1 %v5360_v18  ;;  %v5440_v18 = vld [vmem:[%s7404_s1 + $0x6c0] ss:$8 sps:$4 sm:$0xff]  }
 0x180   :  { %3886 = vmatpush1.bf16.msra.mxu0 %v5363_v19  ;;  %3568 = vmatprep.subr.bf16.mxu1 %v5369_v20  ;;  %v5443_v19 = vld [vmem:[%s7404_s1 + $0xec0] ss:$8 sps:$4 sm:$0xff]   ;;  %v5448_v20 = vld [vmem:[%s7404_s1 + $0x6d4] ss:$8 sps:$4 sm:$0xff]  }
 0x181   :  { %3896 = vmatprep.subr.bf16.mxu0 %v5373_v21  ;;  %v5451_v21 = vld [vmem:[%s7404_s1 + $0xed4] ss:$8 sps:$4 sm:$0xff]  }
 0x182   :  { %3560 = vmatmul.mubr.bf16.vlgmr.msra.gmra.mrb[0].mxu1 %v216_v24  ;;  %v5454_v24 = vld [vmem:[%s7404_s1 + $0x6e4] ss:$8 sps:$4 sm:$0xff]  }
 0x183   :  { %3888 = vmatmul.mubr.bf16.vlgmr.msra.gmra.mrb[0].mxu0 %v232_v25  ;;  %3569 = vmatpush1.bf16.msra.mxu1 %v5367_v26  ;;  %v5457_v25 = vld [vmem:[%s7404_s1 + $0xee4] ss:$8 sps:$4 sm:$0xff]   ;;  %v89_v26 = vcombine.high %v6888_v10, %v6888_v10  ;;  %v5463_v10 = vld [vmem:[%s7404_s1 + $0xef4] ss:$8 sps:$4 sm:$0xff]  }
 0x184   :  { %3897 = vmatpush1.bf16.msra.mxu0 %v5371_v27  ;;  %3570 = vmatprep.subr.bf16.mxu1 %v5376_v28  ;;  %v157_v27 = vcombine.high %v6893_v11, %v6893_v11  ;;  %v5452_v28 = vld [vmem:[%s7404_s1 + $0x6e0] ss:$8 sps:$4 sm:$0xff]  }
 0x185   :  { %3898 = vmatprep.subr.bf16.mxu0 %v5379_v51  ;;  %3600 = vmatprep.mubr.bf16.mxu1 %v219_v3  ;;  %v5455_v51 = vld [vmem:[%s7404_s1 + $0xee0] ss:$8 sps:$4 sm:$0xff]   ;;  %v5460_v3 = vld [vmem:[%s7404_s1 + $0x6f4] ss:$8 sps:$4 sm:$0xff]   ;;  %v7120_v11 = vrot.slane %v89_v26, %v5769_v49  ;;  %v5533_v26 = vld [vmem:[%s7404_s1 + $0xfb0] ss:$8 sps:$4 sm:$0xff]  }
 0x186   :  { %3928 = vmatprep.mubr.bf16.mxu0 %v235_v29  ;;  %v7123_v29 = vrot.slane %v157_v27, %v5769_v49  ;;  %v5469_v49 = vld [vmem:[%s7404_s1 + $0xf04] ss:$8 sps:$4 sm:$0xff]  }
 0x187   :  { %3571 = vmatpush1.bf16.msra.mxu1 %v5374_v30  ;;  %v5458_v30 = vld [vmem:[%s7404_s1 + $0x6f0] ss:$8 sps:$4 sm:$0xff]   ;;  %v5538_v27 = vld [vmem:[%s7404_s1 + $0x7c4] ss:$8 sps:$4 sm:$0xff]  }
 0x188   :  { %3899 = vmatpush1.bf16.msra.mxu0 %v5377_v31  ;;  %3572 = vmatprep.subr.bf16.mxu1 %v5382_v32  ;;  %v5461_v31 = vld [vmem:[%s7404_s1 + $0xef0] ss:$8 sps:$4 sm:$0xff]   ;;  %v5466_v32 = vld [vmem:[%s7404_s1 + $0x704] ss:$8 sps:$4 sm:$0xff]  }
 0x189   :  { %3900 = vmatprep.subr.bf16.mxu0 %v5385_v33  ;;  %v105_v33 = vcombine.high %v7120_v11, %v7120_v11 }
 0x18b   :  { %3573 = vmatpush1.bf16.msra.mxu1 %v5380_v34  ;;  %v173_v34 = vcombine.high %v7123_v29, %v7123_v29 }
 0x18c   :  { %3901 = vmatpush1.bf16.msra.mxu0 %v5383_v14  ;;  %3574 = vmatprep.subr.bf16.mxu1 %v5388_v37  ;;  %v218_v14 = vpack.c.bf16 %v6909_v57, %v6909_v57  ;;  %v234_v37 = vpack.c.bf16 %v6913_v17, %v6913_v17  ;;  %v5475_v57 = vld [vmem:[%s7404_s1 + $0xf14] ss:$8 sps:$4 sm:$0xff]   ;;  %v221_v17 = vpack.c.bf16 %v105_v33, %v105_v33  ;;  %v5553_v33 = vld [vmem:[%s7404_s1 + $0xfe4] ss:$8 sps:$4 sm:$0xff]  }
 0x18d   :  { %3902 = vmatprep.subr.bf16.mxu0 %v5391_v38  ;;  %v5464_v38 = vld [vmem:[%s7404_s1 + $0x700] ss:$8 sps:$4 sm:$0xff]  }
 0x18f   :  { %3575 = vmatpush1.bf16.msra.mxu1 %v5386_v39  ;;  %v5467_v39 = vld [vmem:[%s7404_s1 + $0xf00] ss:$8 sps:$4 sm:$0xff]  }
 0x190   :  { %3903 = vmatpush1.bf16.msra.mxu0 %v5389_v35  ;;  %3576 = vmatprep.subr.bf16.mxu1 %v5394_v42  ;;  %v5472_v35 = vld [vmem:[%s7404_s1 + $0x714] ss:$8 sps:$4 sm:$0xff]   ;;  %v237_v42 = vpack.c.bf16 %v173_v34, %v173_v34  ;;  %v5548_v34 = vld [vmem:[%s7404_s1 + $0x7e0] ss:$8 sps:$4 sm:$0xff]  }
 0x191   :  { %3904 = vmatprep.subr.bf16.mxu0 %v5397_v44  ;;  %v5470_v44 = vld [vmem:[%s7404_s1 + $0x710] ss:$8 sps:$4 sm:$0xff]  }
 0x193   :  { %3577 = vmatpush1.bf16.msra.mxu1 %v5392_v45  ;;  %v5473_v45 = vld [vmem:[%s7404_s1 + $0xf10] ss:$8 sps:$4 sm:$0xff]  }
 0x194   :  { %3905 = vmatpush1.bf16.msra.mxu0 %v5395_v46  ;;  %3578 = vmatprep.subr.bf16.mxu1 %v5400_v47  ;;  %v5478_v46 = vld [vmem:[%s7404_s1 + $0x724] ss:$8 sps:$4 sm:$0xff]  }
 0x195   :  { %3906 = vmatprep.subr.bf16.mxu0 %v5403_v48  ;;  %v5481_v47 = vld [vmem:[%s7404_s1 + $0xf24] ss:$8 sps:$4 sm:$0xff]   ;;  %v5476_v48 = vld [vmem:[%s7404_s1 + $0x720] ss:$8 sps:$4 sm:$0xff]  }
 0x197   :  { %3579 = vmatpush1.bf16.msra.mxu1 %v5398_v52  ;;  %v5479_v52 = vld [vmem:[%s7404_s1 + $0xf20] ss:$8 sps:$4 sm:$0xff]  }
 0x198   :  { %3907 = vmatpush1.bf16.msra.mxu0 %v5401_v53  ;;  %3580 = vmatprep.subr.bf16.mxu1 %v5406_v54  ;;  %v5484_v53 = vld [vmem:[%s7404_s1 + $0x734] ss:$8 sps:$4 sm:$0xff]  }
 0x199   :  { %3908 = vmatprep.subr.bf16.mxu0 %v5409_v55  ;;  %v5487_v54 = vld [vmem:[%s7404_s1 + $0xf34] ss:$8 sps:$4 sm:$0xff]   ;;  %v5482_v55 = vld [vmem:[%s7404_s1 + $0x730] ss:$8 sps:$4 sm:$0xff]  }
 0x19b   :  { %3581 = vmatpush1.bf16.msra.mxu1 %v5404_v15  ;;  %v5485_v15 = vld [vmem:[%s7404_s1 + $0xf30] ss:$8 sps:$4 sm:$0xff]  }
 0x19c   :  { %3909 = vmatpush1.bf16.msra.mxu0 %v5407_v40  ;;  %3582 = vmatprep.subr.bf16.mxu1 %v5412_v58  ;;  %v5490_v40 = vld [vmem:[%s7404_s1 + $0x744] ss:$8 sps:$4 sm:$0xff]  }
 0x19d   :  { %3910 = vmatprep.subr.bf16.mxu0 %v5415_v59  ;;  %v5493_v58 = vld [vmem:[%s7404_s1 + $0xf44] ss:$8 sps:$4 sm:$0xff]   ;;  %v5488_v59 = vld [vmem:[%s7404_s1 + $0x740] ss:$8 sps:$4 sm:$0xff]  }
 0x19f   :  { %3583 = vmatpush1.bf16.msra.mxu1 %v5410_v60  ;;  %v5491_v60 = vld [vmem:[%s7404_s1 + $0xf40] ss:$8 sps:$4 sm:$0xff]  }
 0x1a0   :  { %3911 = vmatpush1.bf16.msra.mxu0 %v5413_v61  ;;  %3584 = vmatprep.subr.bf16.mxu1 %v5418_v62  ;;  %v5496_v61 = vld [vmem:[%s7404_s1 + $0x754] ss:$8 sps:$4 sm:$0xff]  }
 0x1a1   :  { %3912 = vmatprep.subr.bf16.mxu0 %v5421_v63  ;;  %v5499_v62 = vld [vmem:[%s7404_s1 + $0xf54] ss:$8 sps:$4 sm:$0xff]   ;;  %v5494_v63 = vld [vmem:[%s7404_s1 + $0x750] ss:$8 sps:$4 sm:$0xff]  }
 0x1a3   :  { %3585 = vmatpush1.bf16.msra.mxu1 %v5416_v0  ;;  %v5497_v0 = vld [vmem:[%s7404_s1 + $0xf50] ss:$8 sps:$4 sm:$0xff]  }
 0x1a4   :  { %3913 = vmatpush1.bf16.msra.mxu0 %v5419_v1  ;;  %3586 = vmatprep.subr.bf16.mxu1 %v5424_v2  ;;  %v5502_v1 = vld [vmem:[%s7404_s1 + $0x764] ss:$8 sps:$4 sm:$0xff]  }
 0x1a5   :  { %3914 = vmatprep.subr.bf16.mxu0 %v5427_v36  ;;  %v5505_v2 = vld [vmem:[%s7404_s1 + $0xf64] ss:$8 sps:$4 sm:$0xff]   ;;  %v5500_v36 = vld [vmem:[%s7404_s1 + $0x760] ss:$8 sps:$4 sm:$0xff]  }
 0x1a7   :  { %3587 = vmatpush1.bf16.msra.mxu1 %v5422_v41  ;;  %v5503_v41 = vld [vmem:[%s7404_s1 + $0xf60] ss:$8 sps:$4 sm:$0xff]  }
 0x1a8   :  { %3915 = vmatpush1.bf16.msra.mxu0 %v5425_v50  ;;  %3588 = vmatprep.subr.bf16.mxu1 %v5430_v4  ;;  %v5508_v50 = vld [vmem:[%s7404_s1 + $0x774] ss:$8 sps:$4 sm:$0xff]  }
 0x1a9   :  { %3916 = vmatprep.subr.bf16.mxu0 %v5433_v5  ;;  %v5511_v4 = vld [vmem:[%s7404_s1 + $0xf74] ss:$8 sps:$4 sm:$0xff]   ;;  %v5506_v5 = vld [vmem:[%s7404_s1 + $0x770] ss:$8 sps:$4 sm:$0xff]  }
 0x1ab   :  { %3589 = vmatpush1.bf16.msra.mxu1 %v5428_v6  ;;  %v5509_v6 = vld [vmem:[%s7404_s1 + $0xf70] ss:$8 sps:$4 sm:$0xff]  }
 0x1ac   :  { %3917 = vmatpush1.bf16.msra.mxu0 %v5431_v7  ;;  %3590 = vmatprep.subr.bf16.mxu1 %v5436_v8  ;;  %v5514_v7 = vld [vmem:[%s7404_s1 + $0x784] ss:$8 sps:$4 sm:$0xff]  }
 0x1ad   :  { %3918 = vmatprep.subr.bf16.mxu0 %v5439_v9  ;;  %v5517_v8 = vld [vmem:[%s7404_s1 + $0xf84] ss:$8 sps:$4 sm:$0xff]   ;;  %v5512_v9 = vld [vmem:[%s7404_s1 + $0x780] ss:$8 sps:$4 sm:$0xff]  }
 0x1af   :  { %3591 = vmatpush1.bf16.msra.mxu1 %v5434_v12  ;;  %v5515_v12 = vld [vmem:[%s7404_s1 + $0xf80] ss:$8 sps:$4 sm:$0xff]  }
 0x1b0   :  { %3919 = vmatpush1.bf16.msra.mxu0 %v5437_v13  ;;  %3592 = vmatprep.subr.bf16.mxu1 %v5442_v16  ;;  %v5520_v13 = vld [vmem:[%s7404_s1 + $0x794] ss:$8 sps:$4 sm:$0xff]  }
 0x1b1   :  { %3920 = vmatprep.subr.bf16.mxu0 %v5445_v56  ;;  %v5523_v16 = vld [vmem:[%s7404_s1 + $0xf94] ss:$8 sps:$4 sm:$0xff]   ;;  %v5518_v56 = vld [vmem:[%s7404_s1 + $0x790] ss:$8 sps:$4 sm:$0xff]  }
 0x1b3   :  { %3593 = vmatpush1.bf16.msra.mxu1 %v5440_v18  ;;  %v5521_v18 = vld [vmem:[%s7404_s1 + $0xf90] ss:$8 sps:$4 sm:$0xff]  }
 0x1b4   :  { %3921 = vmatpush1.bf16.msra.mxu0 %v5443_v19  ;;  %3594 = vmatprep.subr.bf16.mxu1 %v5448_v20  ;;  %v5526_v19 = vld [vmem:[%s7404_s1 + $0x7a4] ss:$8 sps:$4 sm:$0xff]  }
 0x1b5   :  { %3922 = vmatprep.subr.bf16.mxu0 %v5451_v21  ;;  %v5529_v20 = vld [vmem:[%s7404_s1 + $0xfa4] ss:$8 sps:$4 sm:$0xff]   ;;  %v5524_v21 = vld [vmem:[%s7404_s1 + $0x7a0] ss:$8 sps:$4 sm:$0xff]  }
 0x1b7   :  { %3595 = vmatpush1.bf16.msra.mxu1 %v5446_v22  ;;  %v5527_v22 = vld [vmem:[%s7404_s1 + $0xfa0] ss:$8 sps:$4 sm:$0xff]  }
 0x1b8   :  { %3923 = vmatpush1.bf16.msra.mxu0 %v5449_v23  ;;  %3596 = vmatprep.subr.bf16.mxu1 %v5454_v24  ;;  %v5532_v23 = vld [vmem:[%s7404_s1 + $0x7b4] ss:$8 sps:$4 sm:$0xff]  }
 0x1b9   :  { %3924 = vmatprep.subr.bf16.mxu0 %v5457_v25  ;;  %v5535_v24 = vld [vmem:[%s7404_s1 + $0xfb4] ss:$8 sps:$4 sm:$0xff]   ;;  %v5530_v25 = vld [vmem:[%s7404_s1 + $0x7b0] ss:$8 sps:$4 sm:$0xff]  }
 0x1bb   :  { %3597 = vmatpush1.bf16.msra.mxu1 %v5452_v28  ;;  %v5541_v28 = vld [vmem:[%s7404_s1 + $0xfc4] ss:$8 sps:$4 sm:$0xff]  }
 0x1bc   :  { %3925 = vmatpush1.bf16.msra.mxu0 %v5455_v51  ;;  %3598 = vmatprep.subr.bf16.mxu1 %v5460_v3  ;;  %v5536_v51 = vld [vmem:[%s7404_s1 + $0x7c0] ss:$8 sps:$4 sm:$0xff]  }
 0x1bd   :  { %3926 = vmatprep.subr.bf16.mxu0 %v5463_v10  ;;  %v5539_v3 = vld [vmem:[%s7404_s1 + $0xfc0] ss:$8 sps:$4 sm:$0xff]   ;;  %v5544_v10 = vld [vmem:[%s7404_s1 + $0x7d4] ss:$8 sps:$4 sm:$0xff]  }
 0x1bf   :  { %3599 = vmatpush1.bf16.msra.mxu1 %v5458_v30  ;;  %v5547_v30 = vld [vmem:[%s7404_s1 + $0xfd4] ss:$8 sps:$4 sm:$0xff]  }
 0x1c0   :  { %3927 = vmatpush1.bf16.msra.mxu0 %v5461_v31  ;;  %3609 = vmatprep.subr.bf16.mxu1 %v5466_v32  ;;  %v5542_v31 = vld [vmem:[%s7404_s1 + $0x7d0] ss:$8 sps:$4 sm:$0xff]  }
 0x1c1   :  { %3937 = vmatprep.subr.bf16.mxu0 %v5469_v49  ;;  %v5545_v32 = vld [vmem:[%s7404_s1 + $0xfd0] ss:$8 sps:$4 sm:$0xff]   ;;  %v5550_v49 = vld [vmem:[%s7404_s1 + $0x7e4] ss:$8 sps:$4 sm:$0xff]  }
 0x1c2   :  { %3601 = vmatmul.mubr.bf16.vlgmr.msra.gmra.mrb[0].mxu1 %v218_v14  ;;  %v5551_v14 = vld [vmem:[%s7404_s1 + $0xfe0] ss:$8 sps:$4 sm:$0xff]  }
 0x1c3   :  { %3929 = vmatmul.mubr.bf16.vlgmr.msra.gmra.mrb[0].mxu0 %v234_v37  ;;  %3610 = vmatpush1.bf16.msra.mxu1 %v5464_v38  ;;  %v5556_v37 = vld [vmem:[%s7404_s1 + $0x7f4] ss:$8 sps:$4 sm:$0xff]  }
 0x1c4   :  { %3938 = vmatpush1.bf16.msra.mxu0 %v5467_v39  ;;  %3611 = vmatprep.subr.bf16.mxu1 %v5472_v35  ;;  %v5559_v38 = vld [vmem:[%s7404_s1 + $0xff4] ss:$8 sps:$4 sm:$0xff]   ;;  %v5554_v39 = vld [vmem:[%s7404_s1 + $0x7f0] ss:$8 sps:$4 sm:$0xff]  }
 0x1c5   :  { %3939 = vmatprep.subr.bf16.mxu0 %v5475_v57  ;;  %3641 = vmatprep.mubr.bf16.mxu1 %v221_v17  ;;  %v5557_v35 = vld [vmem:[%s7404_s1 + $0xff0] ss:$8 sps:$4 sm:$0xff]   ;;  %v5562_v57 = vld [vmem:[%s7406_s3 + $0x40] sm:$0xff]   ;;  %v220_v17 = vpack.c.bf16 %v7120_v11, %v7120_v11  ;;  %v5565_v11 = vld [vmem:[%s7406_s3 + $0x8] sm:$0xff]  }
 0x1c6   :  { %3969 = vmatprep.mubr.bf16.mxu0 %v237_v42  ;;  %v236_v42 = vpack.c.bf16 %v7123_v29, %v7123_v29  ;;  %v5566_v29 = vld [vmem:[%s7406_s3 + $0x50] sm:$0xff]  }
 0x1c7   :  { %3612 = vmatpush1.bf16.msra.mxu1 %v5470_v44  ;;  %v5563_v44 = vld [vmem:[%s7406_s3] sm:$0xff]  }
 0x1c8   :  { %3940 = vmatpush1.bf16.msra.mxu0 %v5473_v45  ;;  %3613 = vmatprep.subr.bf16.mxu1 %v5478_v46  ;;  %v5564_v45 = vld [vmem:[%s7406_s3 + $0x48] sm:$0xff]   ;;  %v5567_v46 = vld [vmem:[%s7406_s3 + $0x10] sm:$0xff]  }
 0x1c9   :  { %3941 = vmatprep.subr.bf16.mxu0 %v5481_v47  ;;  %v5568_v47 = vld [vmem:[%s7406_s3 + $0x58] sm:$0xff]  }
 0x1cb   :  { %3614 = vmatpush1.bf16.msra.mxu1 %v5476_v48  ;;  %v5569_v48 = vld [vmem:[%s7406_s3 + $0x18] sm:$0xff]  }
 0x1cc   :  { %3942 = vmatpush1.bf16.msra.mxu0 %v5479_v52  ;;  %3615 = vmatprep.subr.bf16.mxu1 %v5484_v53  ;;  %v5570_v52 = vld [vmem:[%s7406_s3 + $0x60] sm:$0xff]  }
 0x1cd   :  { %3943 = vmatprep.subr.bf16.mxu0 %v5487_v54  ;;  %v5571_v53 = vld [vmem:[%s7406_s3 + $0x20] sm:$0xff]   ;;  %v5572_v54 = vld [vmem:[%s7406_s3 + $0x68] sm:$0xff]  }
 0x1cf   :  { %3616 = vmatpush1.bf16.msra.mxu1 %v5482_v55  ;;  %v5573_v55 = vld [vmem:[%s7406_s3 + $0x28] sm:$0xff]  }
 0x1d0   :  { %3944 = vmatpush1.bf16.msra.mxu0 %v5485_v15  ;;  %3617 = vmatprep.subr.bf16.mxu1 %v5490_v40  ;;  %v5574_v15 = vld [vmem:[%s7406_s3 + $0x70] sm:$0xff]  }
 0x1d1   :  { %3945 = vmatprep.subr.bf16.mxu0 %v5493_v58  ;;  %v5575_v40 = vld [vmem:[%s7406_s3 + $0x30] sm:$0xff]   ;;  %v5576_v58 = vld [vmem:[%s7406_s3 + $0x78] sm:$0xff]  }
 0x1d3   :  { %3618 = vmatpush1.bf16.msra.mxu1 %v5488_v59  ;;  %v5577_v59 = vld [vmem:[%s7406_s3 + $0x38] sm:$0xff]  }
 0x1d4   :  { %3946 = vmatpush1.bf16.msra.mxu0 %v5491_v60  ;;  %3619 = vmatprep.subr.bf16.mxu1 %v5496_v61  ;;  %v754_v60 = vsub.s32 0, %v5751_v43  ;;  %v750_v61 = vld [vmem:[%s7405_s2] sm:$0x3] }
 0x1d5   :  { %3947 = vmatprep.subr.bf16.mxu0 %v5499_v62  ;;  %v758_v62 = vsub.s32 1, %v5751_v43 }
 0x1d7   :  { %3620 = vmatpush1.bf16.msra.mxu1 %v5494_v63  ;;  %v755_v63 = vrot.slane %v750_v61, %v754_v60 }
 0x1d8   :  { %3948 = vmatpush1.bf16.msra.mxu0 %v5497_v0  ;;  %3621 = vmatprep.subr.bf16.mxu1 %v5502_v1  ;;  %v759_v0 = vrot.slane %v750_v61, %v758_v62 }
 0x1d9   :  { %3949 = vmatprep.subr.bf16.mxu0 %v5505_v2 }
 0x1db   :  { %3622 = vmatpush1.bf16.msra.mxu1 %v5500_v36 }
 0x1dc   :  { %3950 = vmatpush1.bf16.msra.mxu0 %v5503_v41  ;;  %3623 = vmatprep.subr.bf16.mxu1 %v5508_v50 }
 0x1dd   :  { %3951 = vmatprep.subr.bf16.mxu0 %v5511_v4 }
 0x1df   :  { %3624 = vmatpush1.bf16.msra.mxu1 %v5506_v5 }
 0x1e0   :  { %3952 = vmatpush1.bf16.msra.mxu0 %v5509_v6  ;;  %3625 = vmatprep.subr.bf16.mxu1 %v5514_v7 }
 0x1e1   :  { %3953 = vmatprep.subr.bf16.mxu0 %v5517_v8 }
 0x1e3   :  { %3626 = vmatpush1.bf16.msra.mxu1 %v5512_v9 }
 0x1e4   :  { %3954 = vmatpush1.bf16.msra.mxu0 %v5515_v12  ;;  %3627 = vmatprep.subr.bf16.mxu1 %v5520_v13 }
 0x1e5   :  { %3955 = vmatprep.subr.bf16.mxu0 %v5523_v16 }
 0x1e7   :  { %3628 = vmatpush1.bf16.msra.mxu1 %v5518_v56 }
 0x1e8   :  { %3956 = vmatpush1.bf16.msra.mxu0 %v5521_v18  ;;  %3629 = vmatprep.subr.bf16.mxu1 %v5526_v19  ;;  %v4685_v19 = vld [vmem:[%s7407_s4] ss:$0 sm:$0xff] }
 0x1e9   :  { %3957 = vmatprep.subr.bf16.mxu0 %v5529_v20 }
 0x1eb   :  { %3630 = vmatpush1.bf16.msra.mxu1 %v5524_v21 }
 0x1ec   :  { %3958 = vmatpush1.bf16.msra.mxu0 %v5527_v22  ;;  %3631 = vmatprep.subr.bf16.mxu1 %v5532_v23 }
 0x1ed   :  { %3959 = vmatprep.subr.bf16.mxu0 %v5535_v24 }
 0x1ef   :  { %3632 = vmatpush1.bf16.msra.mxu1 %v5530_v25 }
 0x1f0   :  { %3960 = vmatpush1.bf16.msra.mxu0 %v5533_v26  ;;  %3633 = vmatprep.subr.bf16.mxu1 %v5538_v27 }
 0x1f1   :  { %3961 = vmatprep.subr.bf16.mxu0 %v5541_v28 }
 0x1f3   :  { %3634 = vmatpush1.bf16.msra.mxu1 %v5536_v51 }
 0x1f4   :  { %3962 = vmatpush1.bf16.msra.mxu0 %v5539_v3  ;;  %3635 = vmatprep.subr.bf16.mxu1 %v5544_v10 }
 0x1f5   :  { %3963 = vmatprep.subr.bf16.mxu0 %v5547_v30 }
 0x1f7   :  { %3636 = vmatpush1.bf16.msra.mxu1 %v5542_v31 }
 0x1f8   :  { %3964 = vmatpush1.bf16.msra.mxu0 %v5545_v32  ;;  %3637 = vmatprep.subr.bf16.mxu1 %v5550_v49 }
 0x1f9   :  { %3965 = vmatprep.subr.bf16.mxu0 %v5553_v33 }
 0x1fb   :  { %3638 = vmatpush1.bf16.msra.mxu1 %v5548_v34 }
 0x1fc   :  { %3966 = vmatpush1.bf16.msra.mxu0 %v5551_v14  ;;  %3639 = vmatprep.subr.bf16.mxu1 %v5556_v37 }
 0x1fd   :  { %3967 = vmatprep.subr.bf16.mxu0 %v5559_v38 }
 0x1ff   :  { %3640 = vmatpush1.bf16.msra.mxu1 %v5554_v39 }
 0x200   :  { %3968 = vmatpush1.bf16.msra.mxu0 %v5557_v35  ;;  %4702 = vmatprep.subr.bf16.mxu1 %v5562_v57 }
 0x202   :  { %3642 = vmatmul.mubr.bf16.vlgmr.msra.gmra.mrb[0].mxu1 %v220_v17 }
 0x203   :  { %3970 = vmatmul.mubr.bf16.vlgmr.msra.gmra.mrb[0].mxu0 %v236_v42  ;;  %4703 = vmatpush3.bf16.msra.mxu1 %v5563_v44 }
 0x204   :  { %4704 = vmatprep.subr.bf16.mxu1 %v5564_v45 }
 0x207   :  { %4705 = vmatpush3.bf16.msra.mxu1 %v5565_v11 }
 0x208   :  { %4706 = vmatprep.subr.bf16.mxu1 %v5566_v29 }
 0x20b   :  { %4707 = vmatpush3.bf16.msra.mxu1 %v5567_v46 }
 0x20c   :  { %4708 = vmatprep.subr.bf16.mxu1 %v5568_v47 }
 0x20f   :  { %4709 = vmatpush3.bf16.msra.mxu1 %v5569_v48 }
 0x210   :  { %4710 = vmatprep.subr.bf16.mxu1 %v5570_v52 }
 0x213   :  { %4711 = vmatpush3.bf16.msra.mxu1 %v5571_v53 }
 0x214   :  { %4712 = vmatprep.subr.bf16.mxu1 %v5572_v54 }
 0x217   :  { %4713 = vmatpush3.bf16.msra.mxu1 %v5573_v55 }
 0x218   :  { %4714 = vmatprep.subr.bf16.mxu1 %v5574_v15 }
 0x21b   :  { %4715 = vmatpush3.bf16.msra.mxu1 %v5575_v40 }
 0x21c   :  { %4716 = vmatprep.subr.bf16.mxu1 %v5576_v58 }
 0x21f   :  { %4717 = vmatpush3.bf16.msra.mxu1 %v5577_v59 }
 0x2d5   :  { %v3643_v1 = vpop.f32.mrb[0].mxu1 }
 0x2d6   :  { %v3971_v2 = vpop.f32.mrb[0].mxu0  ;;  %v4724_v36 = vadd.f32 %v3643_v1, %v755_v63  ;;  %v3645_v41 = vpop.f32.mrb[1].mxu1 }
 0x2d7   :  { %v3973_v50 = vpop.f32.mrb[1].mxu0  ;;  %v4726_v4 = vadd.f32 %v3645_v41, %v759_v0  ;;  %v3647_v5 = vpop.f32.mrb[2].mxu1 }
 0x2d8   :  { %v3975_v6 = vpop.f32.mrb[2].mxu0  ;;  %v4725_v7 = vadd.f32 %v4724_v36, %v3971_v2  ;;  %v3648_v8 = vpop.f32.mrb[3].mxu1 }
 0x2d9   :  { %v3976_v9 = vpop.f32.mrb[3].mxu0  ;;  %v4727_v12 = vadd.f32 %v4726_v4, %v3973_v50 }
 0x2da   :  { %v3978_v13 = vmax.f32 %v4725_v7, 0.0 }
 0x2db   :  { %v3979_v16 = vmax.f32 %v4727_v12, 0.0 }
 0x2dc   :  { %v3980_v18 = vpack.c.bf16 %v3978_v13, %v3978_v13 }
 0x2dd   :  { %v3981_v56 = vpack.c.bf16 %v3979_v16, %v3979_v16 }
 0x2df   :  { %4149 = vmatprep.mubr.bf16.mxu1 %v3981_v56 }
 0x2e0   :  { %4150 = vmatmul.mubr.bf16.vlgmr.msra.gmra.mrb[4].mxu1 %v3980_v18 }
 0x3b3   :  { %v4718_v43 = vpop.f32.mrb[4].mxu1 }
 0x3b4   :  { %v4719_v20 = vpop.f32.mrb[5].mxu1 }
 0x3b5   :  { %v4720_v21 = vadd.f32 %v4719_v20, %v4718_v43  ;;  %v4721_v22 = vpop.f32.mrb[6].mxu1 }
 0x3b6   :  { %v4722_v23 = vpop.f32.mrb[7].mxu1 }
 0x3b7   :  { %v4152_v24 = vadd.f32 %v4720_v21, %v4685_v19 }
 0x3b9   :  { %4158 = vst.msk [vmem:[#allocation2] sm:$0x3] %vm4157_vm0, %v4152_v24 }
 0x3ba   :  { %5589 = shalt.err (!%p5586_p4)
}
 0x3bb   :  { %s5590_s4 = scalar_lea.hbm %s7408_s5, 32 }
 0x3bc   :  { %p5591_p5 = scmp.ne.s32.totalorder %s7408_s5, %s5590_s4  ;;  %p5594_p6 = scmp.lt.u32.totalorder %s5590_s4, %s7408_s5 }
 0x3be   :  { %p5596_p7 = pnand %p5594_p6, %p5591_p5 }
 0x3c0   :  { %5599 = shalt.err (!%p5596_p7)
}
 0x3c1   :  { %4168 = dma.vmem_to_hbm [thread:$0]  %s4166_s29, 32, %s7408_s5, [#allocation3]  }
 0x3c2   :  { %5600 = dma.done.wait [#allocation3], 32  }
 0x3c3   :  { %5601 = vsyncadd [#allocation3], 4294967264 }
 0x3c4   :  { %4172 = vsyncpa [#allocation3], 1 }

// kernel: net_forward.2
= control target key start
LH: loop header
LB: loop body
LE: loop exit
PB: predicated region body
PF: predicated region fallthrough
CT: control target
= control target key end

     0   :  { %s18221_s18 = smov 0   ;;  %s21483_s0 = inlined_call_operand.vmem [shape: f32[2,34,34,3], index: 0, kind: input, shape index: {}]   ;;  %s21484_s1 = inlined_call_operand.vmem [shape: bf16[9,3,32], index: 1, kind: input, shape index: {}]   ;;  %s21485_s2 = inlined_call_operand.vmem [shape: f32[1,32], index: 2, kind: input, shape index: {}]   ;;  %s21486_s3 = inlined_call_operand.vmem [shape: bf16[9,32,64], index: 3, kind: input, shape index: {}]   ;;  %s21487_s4 = inlined_call_operand.vmem [shape: f32[1,64], index: 4, kind: input, shape index: {}]   ;;  %s21488_s5 = inlined_call_operand.vmem [shape: f32[2,64,64], index: 5, kind: output, shape index: {}]  }
   0x1 LB: > { %s13069_s19 = sadd.s32 4294967295, %s18187_s18   ;;  %p13073_p0 = scmp.ge.s32.totalorder %s18187_s18, 1  ;;  %s18187_s18 = sphi %s18221_s18, %s15_s18  }
   0x2   : > { %p187_p1 = scmp.lt.s32.totalorder %s18187_s18, 3 }
   0x4   : > { %p188_p2 = pnand %p13073_p0, %p187_p1 }
   0x6   : > { %191 = sbr.rel (%p188_p2) target bundleno = 2427 (0x97b), region = 40 }
   0xd   : > { %vm806_vm0 = vcmask 1040384   ;;  %vm807_vm1 = vcmask 1041408   ;;  %v13399_v0 = vld [vmem:[%s21484_s1 + $0x6] sm:$0x3]  ;;  %p215_p3 = scmp.lt.s32.totalorder %s13069_s19, 1  ;;  %v18189_v1 = vmov 65535  }
   0xe   : > { %v808_v2 = vsel %vm806_vm0, 4294967295, %v18189_v1  ;;  %v13077_v3 = vld [vmem:[%s21484_s1 + $0x2] sm:$0x3]  ;;  %v13592_v4 = vld [vmem:[%s21484_s1 + $0x8] sm:$0x3]  ;;  %vm613_vm2 = vcmask 23552  }
   0xf   : > { %v18238_v5 = vsel %vm807_vm1, %v808_v2, 0  ;;  %s21654_s19 = smov (!%p215_p3, %s13069_s19), 1  ;;  %vm9861_vm3 = vcmask 261120   ;;  %vm10087_vm4 = vcmask 254976   ;;  %vm12950_vm5 = vcmask 523264  }
  0x10   : > { %v18243_v6 = vand.u32 %v13399_v0, %v18238_v5  ;;  %v811_v7 = vand.u32 %v13077_v3, %v18238_v5  ;;  %v4610_v8 = vand.u32 %v13592_v4, %v18238_v5  ;;  %s18151_s26 = smul.u32 1360, %s21654_s19  ;;  %s14627_s13 = sshll.u32 %s21654_s19, 6 }
  0x11   : > { %s21425_s16 = scalar_lea.vmem %s21488_s5, %s14627_s13 }
  0x12   : > { %15765 = vmatprep.subr.bf16.mxu0 %v18243_v6  ;;  %15375 = vmatprep.subr.bf16.mxu1 %v811_v7  ;;  %s18253_s29 = scalar_lea.vmem %s21483_s0, %s18151_s26 }
  0x13   : > { %15766 = vmatpush3.bf16.msra.mxu0 %v18243_v6  ;;  %15376 = vmatpush3.bf16.msra.mxu1 %v811_v7  ;;  %v419_v9 = vld [vmem:[%s18253_s29 + $0x1] sm:$0xff]  ;;  %v420_v10 = vld [vmem:[%s18253_s29 + $0x9] sm:$0xff]  ;;  %v421_v14 = vld [vmem:[%s18253_s29 + $0x11] sm:$0xff] }
  0x14   : > { %v13271_v11 = vld [vmem:[%s18253_s29 + $0x28] sm:$0xff]  ;;  %15895 = vmatprep.subr.bf16.mxu0 %v4610_v8  ;;  %v547_v12 = vpack.c.bf16 %v420_v10, %v419_v9  ;;  %v13272_v13 = vld [vmem:[%s18253_s29 + $0x30] sm:$0xff]  ;;  %v422_v15 = vld [vmem:[%s18253_s29 + $0x19] sm:$0xff] }
  0x15   : > { %v3289_v16 = vpack.c.bf16 %v13272_v13, %v13271_v11  ;;  %v548_v17 = vpack.c.bf16 %v422_v15, %v421_v14  ;;  %v13273_v18 = vld [vmem:[%s18253_s29 + $0x38] sm:$0xff]  ;;  %v13274_v19 = vld [vmem:[%s18253_s29 + $0x40] sm:$0xff]  ;;  %v423_v20 = vld [vmem:[%s18253_s29 + $0x29] sm:$0xff] }
  0x16   : > { %15377 = vmatprep.mubr.msk.bf16.mxu1 %vm613_vm2, %v547_v12  ;;  %v3290_v21 = vpack.c.bf16 %v13274_v19, %v13273_v18  ;;  %v424_v22 = vld [vmem:[%s18253_s29 + $0x31] sm:$0xff]  ;;  %v425_v27 = vld [vmem:[%s18253_s29 + $0x39] sm:$0xff]  ;;  %v426_v28 = vld [vmem:[%s18253_s29 + $0x41] sm:$0xff] }
  0x17   : > { %v13275_v23 = vld [vmem:[%s18253_s29 + $0x50] sm:$0xff]  ;;  %v13276_v24 = vld [vmem:[%s18253_s29 + $0x58] sm:$0xff]  ;;  %15767 = vmatprep.mubr.msk.bf16.mxu0 %vm613_vm2, %v3289_v16  ;;  %15378 = vmatmul.mubr.msk.bf16.vlgmr.msra.gmra.mrb[0].mxu1 %vm613_vm2, %v548_v17  ;;  %v18270_v25 = vpack.c.bf16 %v424_v22, %v423_v20  ;;  %v13277_v29 = vld [vmem:[%s18253_s29 + $0x60] sm:$0xff]  ;;  %v18284_v35 = vpack.c.bf16 %v426_v28, %v425_v27 }
  0x18   : > { %v3291_v26 = vpack.c.bf16 %v13276_v24, %v13275_v23  ;;  %15768 = vmatmul.mubr.msk.bf16.vlgmr.msra.gmra.mrb[0].mxu0 %vm613_vm2, %v3290_v21  ;;  %v13278_v30 = vld [vmem:[%s18253_s29 + $0x68] sm:$0xff]  ;;  %v427_v31 = vld [vmem:[%s18253_s29 + $0x51] sm:$0xff]  ;;  %v428_v32 = vld [vmem:[%s18253_s29 + $0x59] sm:$0xff] }
  0x19   : > { %15896 = vmatpush3.bf16.msra.mxu0 %v4610_v8  ;;  %15381 = vmatprep.mubr.msk.bf16.mxu1 %vm613_vm2, %v18270_v25  ;;  %v13279_v33 = vld [vmem:[%s18253_s29 + $0x78] sm:$0xff]  ;;  %v13280_v34 = vld [vmem:[%s18253_s29 + $0x80] sm:$0xff]  ;;  %v3292_v36 = vpack.c.bf16 %v13278_v30, %v13277_v29  ;;  %v18286_v37 = vpack.c.bf16 %v428_v32, %v427_v31  ;;  %v430_v40 = vld [vmem:[%s18253_s29 + $0x69] sm:$0xff] }
  0x1a   : > { %15771 = vmatprep.mubr.msk.bf16.mxu0 %vm613_vm2, %v3291_v26  ;;  %v3293_v38 = vpack.c.bf16 %v13280_v34, %v13279_v33  ;;  %v429_v39 = vld [vmem:[%s18253_s29 + $0x61] sm:$0xff]  ;;  %v13282_v42 = vld [vmem:[%s18253_s29 + $0x90] sm:$0xff]  ;;  %v431_v43 = vld [vmem:[%s18253_s29 + $0x79] sm:$0xff] }
  0x1b   : > { %v13281_v41 = vld [vmem:[%s18253_s29 + $0x88] sm:$0xff]  ;;  %v13283_v45 = vld [vmem:[%s18253_s29 + $0xa0] sm:$0xff]  ;;  %v18302_v47 = vpack.c.bf16 %v430_v40, %v429_v39  ;;  %v434_v52 = vld [vmem:[%s18253_s29 + $0x91] sm:$0xff] }
  0x1c   : > { %v432_v44 = vld [vmem:[%s18253_s29 + $0x81] sm:$0xff]  ;;  %v3294_v48 = vpack.c.bf16 %v13282_v42, %v13281_v41  ;;  %v433_v51 = vld [vmem:[%s18253_s29 + $0x89] sm:$0xff]  ;;  %v13286_v54 = vld [vmem:[%s18253_s29 + $0xb8] sm:$0xff] }
  0x1d   : > { %v13284_v46 = vld [vmem:[%s18253_s29 + $0xa8] sm:$0xff]  ;;  %v18304_v49 = vpack.c.bf16 %v432_v44, %v431_v43  ;;  %v13285_v53 = vld [vmem:[%s18253_s29 + $0xb0] sm:$0xff]  ;;  %v18320_v59 = vpack.c.bf16 %v434_v52, %v433_v51  ;;  %v438_v0 = vld [vmem:[%s18253_s29 + $0xb9] sm:$0xff] }
  0x1e   : > { %v3295_v50 = vpack.c.bf16 %v13284_v46, %v13283_v45  ;;  %v435_v55 = vld [vmem:[%s18253_s29 + $0xa1] sm:$0xff]  ;;  %v436_v56 = vld [vmem:[%s18253_s29 + $0xa9] sm:$0xff]  ;;  %v3296_v60 = vpack.c.bf16 %v13286_v54, %v13285_v53  ;;  %v437_v63 = vld [vmem:[%s18253_s29 + $0xb1] sm:$0xff] }
  0x1f   : > { %15382 = vmatmul.mubr.msk.bf16.gmra.mrb[4].mxu1 %vm613_vm2, %v18284_v35  ;;  %v13287_v57 = vld [vmem:[%s18253_s29 + $0xc8] sm:$0xff]  ;;  %v13288_v58 = vld [vmem:[%s18253_s29 + $0xd0] sm:$0xff]  ;;  %v18322_v61 = vpack.c.bf16 %v436_v56, %v435_v55  ;;  %v13289_v1 = vld [vmem:[%s18253_s29 + $0xd8] sm:$0xff]  ;;  %v18338_v9 = vpack.c.bf16 %v438_v0, %v437_v63 }
  0x20   : > { %15772 = vmatmul.mubr.msk.bf16.gmra.mrb[4].mxu0 %vm613_vm2, %v3292_v36  ;;  %15385 = vmatprep.mubr.msk.bf16.mxu1 %vm613_vm2, %v18286_v37  ;;  %v3297_v62 = vpack.c.bf16 %v13288_v58, %v13287_v57  ;;  %v13290_v2 = vld [vmem:[%s18253_s29 + $0xe0] sm:$0xff]  ;;  %v439_v3 = vld [vmem:[%s18253_s29 + $0xc9] sm:$0xff]  ;;  %v440_v4 = vld [vmem:[%s18253_s29 + $0xd1] sm:$0xff] }
  0x21   : > { %15775 = vmatprep.mubr.msk.bf16.mxu0 %vm613_vm2, %v3293_v38  ;;  %v13291_v7 = vld [vmem:[%s18253_s29 + $0xf0] sm:$0xff]  ;;  %v13292_v8 = vld [vmem:[%s18253_s29 + $0xf8] sm:$0xff]  ;;  %v3298_v10 = vpack.c.bf16 %v13290_v2, %v13289_v1  ;;  %v18340_v11 = vpack.c.bf16 %v440_v4, %v439_v3  ;;  %v442_v14 = vld [vmem:[%s18253_s29 + $0xe1] sm:$0xff] }
  0x22   : > { %v3299_v12 = vpack.c.bf16 %v13292_v8, %v13291_v7  ;;  %v441_v13 = vld [vmem:[%s18253_s29 + $0xd9] sm:$0xff]  ;;  %v13294_v16 = vld [vmem:[%s18253_s29 + $0x108] sm:$0xff]  ;;  %v443_v17 = vld [vmem:[%s18253_s29 + $0xf1] sm:$0xff] }
  0x23   : > { %v13293_v15 = vld [vmem:[%s18253_s29 + $0x100] sm:$0xff]  ;;  %v13295_v19 = vld [vmem:[%s18253_s29 + $0x118] sm:$0xff]  ;;  %v18356_v21 = vpack.c.bf16 %v442_v14, %v441_v13  ;;  %v446_v27 = vld [vmem:[%s18253_s29 + $0x109] sm:$0xff] }
  0x24   : > { %v444_v18 = vld [vmem:[%s18253_s29 + $0xf9] sm:$0xff]  ;;  %v3300_v22 = vpack.c.bf16 %v13294_v16, %v13293_v15  ;;  %v445_v26 = vld [vmem:[%s18253_s29 + $0x101] sm:$0xff]  ;;  %v13298_v29 = vld [vmem:[%s18253_s29 + $0x130] sm:$0xff] }
  0x25   : > { %v13296_v20 = vld [vmem:[%s18253_s29 + $0x120] sm:$0xff]  ;;  %v18358_v23 = vpack.c.bf16 %v444_v18, %v443_v17  ;;  %v13297_v28 = vld [vmem:[%s18253_s29 + $0x128] sm:$0xff]  ;;  %v18374_v34 = vpack.c.bf16 %v446_v27, %v445_v26  ;;  %v450_v41 = vld [vmem:[%s18253_s29 + $0x131] sm:$0xff] }
  0x26   : > { %v3301_v24 = vpack.c.bf16 %v13296_v20, %v13295_v19  ;;  %v447_v30 = vld [vmem:[%s18253_s29 + $0x119] sm:$0xff]  ;;  %v448_v31 = vld [vmem:[%s18253_s29 + $0x121] sm:$0xff]  ;;  %v3302_v36 = vpack.c.bf16 %v13298_v29, %v13297_v28  ;;  %v449_v40 = vld [vmem:[%s18253_s29 + $0x129] sm:$0xff] }
  0x27   : > { %15386 = vmatmul.mubr.msk.bf16.gmra.mrb[8].mxu1 %vm613_vm2, %v18302_v47  ;;  %v13299_v32 = vld [vmem:[%s18253_s29 + $0x140] sm:$0xff]  ;;  %v13300_v33 = vld [vmem:[%s18253_s29 + $0x148] sm:$0xff]  ;;  %v18376_v38 = vpack.c.bf16 %v448_v31, %v447_v30  ;;  %v13301_v42 = vld [vmem:[%s18253_s29 + $0x150] sm:$0xff]  ;;  %v18398_v52 = vpack.c.bf16 %v450_v41, %v449_v40 }
  0x28   : > { %15776 = vmatmul.mubr.msk.bf16.gmra.mrb[8].mxu0 %vm613_vm2, %v3294_v48  ;;  %15389 = vmatprep.mubr.msk.bf16.mxu1 %vm613_vm2, %v18304_v49  ;;  %v3303_v39 = vpack.c.bf16 %v13300_v33, %v13299_v32  ;;  %v13302_v43 = vld [vmem:[%s18253_s29 + $0x158] sm:$0xff]  ;;  %v451_v44 = vld [vmem:[%s18253_s29 + $0x141] sm:$0xff]  ;;  %v452_v45 = vld [vmem:[%s18253_s29 + $0x149] sm:$0xff] }
  0x29   : > { %15779 = vmatprep.mubr.msk.bf16.mxu0 %vm613_vm2, %v3295_v50  ;;  %v13785_v46 = vld [vmem:[%s21484_s1 + $0xa] sm:$0x3]  ;;  %v13304_v50 = vld [vmem:[%s18253_s29 + $0x170] sm:$0xff]  ;;  %v3304_v53 = vpack.c.bf16 %v13302_v43, %v13301_v42  ;;  %v18400_v54 = vpack.c.bf16 %v452_v45, %v451_v44  ;;  %v454_v57 = vld [vmem:[%s18253_s29 + $0x159] sm:$0xff] }
  0x2a   : > { %v13303_v48 = vld [vmem:[%s18253_s29 + $0x168] sm:$0xff]  ;;  %v18396_v51 = vand.u32 %v13785_v46, %v18238_v5  ;;  %v453_v56 = vld [vmem:[%s18253_s29 + $0x151] sm:$0xff]  ;;  %v457_v8 = vld [vmem:[%s18253_s29 + $0x179] sm:$0xff] }
  0x2b   : > { %v3305_v55 = vpack.c.bf16 %v13304_v50, %v13303_v48  ;;  %v13305_v58 = vld [vmem:[%s18253_s29 + $0x178] sm:$0xff]  ;;  %v13307_v0 = vld [vmem:[%s18253_s29 + $0x190] sm:$0xff]  ;;  %v18417_v2 = vpack.c.bf16 %v454_v57, %v453_v56  ;;  %v13310_v13 = vld [vmem:[%s18253_s29 + $0x1a8] sm:$0xff] }
  0x2c   : > { %16025 = vmatprep.subr.bf16.mxu0 %v18396_v51  ;;  %v456_v63 = vld [vmem:[%s18253_s29 + $0x171] sm:$0xff]  ;;  %v460_v15 = vld [vmem:[%s18253_s29 + $0x199] sm:$0xff]  ;;  %v462_v26 = vld [vmem:[%s18253_s29 + $0x1a9] sm:$0xff] }
  0x2d   : > { %v13308_v1 = vld [vmem:[%s18253_s29 + $0x198] sm:$0xff]  ;;  %v13312_v17 = vld [vmem:[%s18253_s29 + $0x1c0] sm:$0xff]  ;;  %v13313_v27 = vld [vmem:[%s18253_s29 + $0x1c8] sm:$0xff] }
  0x2e   : > { %v3307_v7 = vpack.c.bf16 %v13308_v1, %v13307_v0  ;;  %v459_v14 = vld [vmem:[%s18253_s29 + $0x191] sm:$0xff]  ;;  %v463_v29 = vld [vmem:[%s18253_s29 + $0x1b9] sm:$0xff]  ;;  %v464_v30 = vld [vmem:[%s18253_s29 + $0x1c1] sm:$0xff] }
  0x2f   : > { %15390 = vmatmul.mubr.msk.bf16.gmra.mrb[12].mxu1 %vm613_vm2, %v18320_v59  ;;  %v13311_v16 = vld [vmem:[%s18253_s29 + $0x1b8] sm:$0xff]  ;;  %v18437_v20 = vpack.c.bf16 %v460_v15, %v459_v14  ;;  %v13314_v28 = vld [vmem:[%s18253_s29 + $0x1d0] sm:$0xff]  ;;  %v13315_v31 = vld [vmem:[%s18253_s29 + $0x1e0] sm:$0xff] }
  0x30   : > { %15780 = vmatmul.mubr.msk.bf16.gmra.mrb[12].mxu0 %vm613_vm2, %v3296_v60  ;;  %15393 = vmatprep.mubr.msk.bf16.mxu1 %vm613_vm2, %v18322_v61  ;;  %v13306_v60 = vld [vmem:[%s18253_s29 + $0x180] sm:$0xff]  ;;  %v13316_v32 = vld [vmem:[%s18253_s29 + $0x1e8] sm:$0xff]  ;;  %v466_v42 = vld [vmem:[%s18253_s29 + $0x1d1] sm:$0xff] }
  0x31   : > { %15783 = vmatprep.mubr.msk.bf16.mxu0 %vm613_vm2, %v3297_v62  ;;  %v455_v62 = vld [vmem:[%s18253_s29 + $0x169] sm:$0xff]  ;;  %v3306_v3 = vpack.c.bf16 %v13306_v60, %v13305_v58  ;;  %v3311_v40 = vpack.c.bf16 %v13316_v32, %v13315_v31  ;;  %v13318_v44 = vld [vmem:[%s18253_s29 + $0x1f8] sm:$0xff]  ;;  %v467_v45 = vld [vmem:[%s18253_s29 + $0x1e1] sm:$0xff] }
  0x32   : > { %v18419_v4 = vpack.c.bf16 %v456_v63, %v455_v62  ;;  %v465_v41 = vld [vmem:[%s18253_s29 + $0x1c9] sm:$0xff]  ;;  %v469_v58 = vld [vmem:[%s18253_s29 + $0x1f1] sm:$0xff]  ;;  %v470_v60 = vld [vmem:[%s18253_s29 + $0x1f9] sm:$0xff] }
  0x33   : > { %v13317_v43 = vld [vmem:[%s18253_s29 + $0x1f0] sm:$0xff]  ;;  %v13319_v48 = vld [vmem:[%s18253_s29 + $0x208] sm:$0xff]  ;;  %v13321_v62 = vld [vmem:[%s18253_s29 + $0x218] sm:$0xff] }
  0x34   : > { %v468_v46 = vld [vmem:[%s18253_s29 + $0x1e9] sm:$0xff]  ;;  %v13322_v63 = vld [vmem:[%s18253_s29 + $0x220] sm:$0xff]  ;;  %v472_v1 = vld [vmem:[%s18253_s29 + $0x211] sm:$0xff] }
  0x35   : > { %v13320_v50 = vld [vmem:[%s18253_s29 + $0x210] sm:$0xff]  ;;  %v18473_v56 = vpack.c.bf16 %v468_v46, %v467_v45  ;;  %v473_v14 = vld [vmem:[%s18253_s29 + $0x219] sm:$0xff]  ;;  %v474_v15 = vld [vmem:[%s18253_s29 + $0x221] sm:$0xff] }
  0x36   : > { %v3313_v57 = vpack.c.bf16 %v13320_v50, %v13319_v48  ;;  %v471_v0 = vld [vmem:[%s18253_s29 + $0x209] sm:$0xff]  ;;  %v477_v31 = vld [vmem:[%s18253_s29 + $0x241] sm:$0xff] }
  0x37   : > { %15394 = vmatmul.mubr.msk.bf16.gmra.mrb[16].mxu1 %vm613_vm2, %v18338_v9  ;;  %v478_v32 = vld [vmem:[%s18253_s29 + $0x249] sm:$0xff] }
  0x38   : > { %15784 = vmatmul.mubr.msk.bf16.gmra.mrb[16].mxu0 %vm613_vm2, %v3298_v10  ;;  %15397 = vmatprep.mubr.msk.bf16.mxu1 %vm613_vm2, %v18340_v11  ;;  %v458_v10 = vld [vmem:[%s18253_s29 + $0x181] sm:$0xff]  ;;  %v18525_v45 = vpack.c.bf16 %v478_v32, %v477_v31 }
  0x39   : > { %15787 = vmatprep.mubr.msk.bf16.mxu0 %vm613_vm2, %v3299_v12  ;;  %v13309_v12 = vld [vmem:[%s18253_s29 + $0x1a0] sm:$0xff]  ;;  %v18435_v18 = vpack.c.bf16 %v458_v10, %v457_v8  ;;  %v18489_v8 = vpack.c.bf16 %v470_v60, %v469_v58  ;;  %v3314_v10 = vpack.c.bf16 %v13322_v63, %v13321_v62  ;;  %v13333_v58 = vld [vmem:[%s18253_s29 + $0x290] sm:$0xff]  ;;  %v13334_v60 = vld [vmem:[%s18253_s29 + $0x298] sm:$0xff] }
  0x3a   : > { %v3308_v19 = vpack.c.bf16 %v13310_v13, %v13309_v12  ;;  %v18491_v12 = vpack.c.bf16 %v472_v1, %v471_v0  ;;  %v483_v62 = vld [vmem:[%s18253_s29 + $0x281] sm:$0xff]  ;;  %v484_v63 = vld [vmem:[%s18253_s29 + $0x289] sm:$0xff] }
  0x3b   : > { %v13335_v0 = vld [vmem:[%s18253_s29 + $0x2a8] sm:$0xff]  ;;  %v13336_v1 = vld [vmem:[%s18253_s29 + $0x2b0] sm:$0xff] }
  0x3f   : > { %15398 = vmatmul.mubr.msk.bf16.gmra.mrb[20].mxu1 %vm613_vm2, %v18356_v21 }
  0x40   : > { %15788 = vmatmul.mubr.msk.bf16.gmra.mrb[20].mxu0 %vm613_vm2, %v3300_v22  ;;  %15401 = vmatprep.mubr.msk.bf16.mxu1 %vm613_vm2, %v18358_v23  ;;  %v3309_v22 = vpack.c.bf16 %v13312_v17, %v13311_v16  ;;  %v13325_v16 = vld [vmem:[%s18253_s29 + $0x240] sm:$0xff]  ;;  %v13326_v17 = vld [vmem:[%s18253_s29 + $0x248] sm:$0xff] }
  0x41   : > { %15791 = vmatprep.mubr.msk.bf16.mxu0 %vm613_vm2, %v3301_v24  ;;  %v461_v24 = vld [vmem:[%s18253_s29 + $0x1a1] sm:$0xff] }
  0x42   : > { %v18453_v33 = vpack.c.bf16 %v462_v26, %v461_v24  ;;  %v13327_v24 = vld [vmem:[%s18253_s29 + $0x258] sm:$0xff]  ;;  %v13328_v26 = vld [vmem:[%s18253_s29 + $0x260] sm:$0xff] }
  0x47   : > { %15402 = vmatmul.mubr.msk.bf16.gmra.mrb[24].mxu1 %vm613_vm2, %v18374_v34 }
  0x48   : > { %15792 = vmatmul.mubr.msk.bf16.gmra.mrb[24].mxu0 %vm613_vm2, %v3302_v36  ;;  %15405 = vmatprep.mubr.msk.bf16.mxu1 %vm613_vm2, %v18376_v38  ;;  %v3310_v36 = vpack.c.bf16 %v13314_v28, %v13313_v27  ;;  %v18507_v27 = vpack.c.bf16 %v474_v15, %v473_v14  ;;  %v3316_v28 = vpack.c.bf16 %v13326_v17, %v13325_v16  ;;  %v485_v14 = vld [vmem:[%s18253_s29 + $0x291] sm:$0xff]  ;;  %v486_v15 = vld [vmem:[%s18253_s29 + $0x299] sm:$0xff] }
  0x49   : > { %15795 = vmatprep.mubr.msk.bf16.mxu0 %vm613_vm2, %v3303_v39  ;;  %v18455_v39 = vpack.c.bf16 %v464_v30, %v463_v29  ;;  %v3317_v30 = vpack.c.bf16 %v13328_v26, %v13327_v24  ;;  %v13337_v16 = vld [vmem:[%s18253_s29 + $0x2b8] sm:$0xff]  ;;  %v418_v17 = vld [vmem:[%s21484_s1] sm:$0x3]  ;;  %v18565_v31 = vpack.c.bf16 %v486_v15, %v485_v14 }
  0x4a   : > { %v488_v24 = vld [vmem:[%s18253_s29 + $0x2b1] sm:$0xff]  ;;  %v1551_v26 = vand.u32 %v18238_v5, %v418_v17  ;;  %v495_v14 = vld [vmem:[%s18253_s29 + $0x2f9] sm:$0xff]  ;;  %v496_v15 = vld [vmem:[%s18253_s29 + $0x301] sm:$0xff] }
  0x4b   : > { %v13348_v17 = vld [vmem:[%s18253_s29 + $0x328] sm:$0xff] }
  0x4c   : > { %15505 = vmatprep.subr.bf16.mxu1 %v1551_v26 }
  0x4d   : > { %15506 = vmatpush3.bf16.msra.mxu1 %v1551_v26 }
  0x4f   : > { %15406 = vmatmul.mubr.msk.bf16.gmra.mrb[28].mxu1 %vm613_vm2, %v18398_v52 }
  0x50   : > { %15796 = vmatmul.mubr.msk.bf16.gmra.mrb[28].mxu0 %vm613_vm2, %v3304_v53  ;;  %15409 = vmatprep.mubr.msk.bf16.mxu1 %vm613_vm2, %v18400_v54  ;;  %v18471_v53 = vpack.c.bf16 %v466_v42, %v465_v41  ;;  %v479_v41 = vld [vmem:[%s18253_s29 + $0x259] sm:$0xff]  ;;  %v480_v42 = vld [vmem:[%s18253_s29 + $0x261] sm:$0xff] }
  0x51   : > { %15799 = vmatprep.mubr.msk.bf16.mxu0 %vm613_vm2, %v3305_v55  ;;  %v3312_v55 = vpack.c.bf16 %v13318_v44, %v13317_v43  ;;  %v13331_v43 = vld [vmem:[%s18253_s29 + $0x280] sm:$0xff]  ;;  %v13332_v44 = vld [vmem:[%s18253_s29 + $0x288] sm:$0xff]  ;;  %v18527_v48 = vpack.c.bf16 %v480_v42, %v479_v41 }
  0x52   : > { %v3319_v50 = vpack.c.bf16 %v13332_v44, %v13331_v43  ;;  %v489_v41 = vld [vmem:[%s18253_s29 + $0x2b9] sm:$0xff]  ;;  %v490_v42 = vld [vmem:[%s18253_s29 + $0x2c1] sm:$0xff] }
  0x53   : > { %v13341_v43 = vld [vmem:[%s18253_s29 + $0x2e0] sm:$0xff]  ;;  %v13342_v44 = vld [vmem:[%s18253_s29 + $0x2e8] sm:$0xff] }
  0x57   : > { %15410 = vmatmul.mubr.msk.bf16.gmra.mrb[32].mxu1 %vm613_vm2, %v18417_v2 }
  0x58   : > { %15800 = vmatmul.mubr.msk.bf16.gmra.mrb[32].mxu0 %vm613_vm2, %v3306_v3  ;;  %15413 = vmatprep.mubr.msk.bf16.mxu1 %vm613_vm2, %v18419_v4  ;;  %v13323_v3 = vld [vmem:[%s18253_s29 + $0x230] sm:$0xff] }
  0x59   : > { %15803 = vmatprep.mubr.msk.bf16.mxu0 %vm613_vm2, %v3307_v7  ;;  %v13324_v7 = vld [vmem:[%s18253_s29 + $0x238] sm:$0xff] }
  0x5a   : > { %v3315_v13 = vpack.c.bf16 %v13324_v7, %v13323_v3  ;;  %v3320_v7 = vpack.c.bf16 %v13334_v60, %v13333_v58  ;;  %v18583_v58 = vpack.c.bf16 %v490_v42, %v489_v41  ;;  %v3324_v60 = vpack.c.bf16 %v13342_v44, %v13341_v43  ;;  %v499_v41 = vld [vmem:[%s18253_s29 + $0x321] sm:$0xff]  ;;  %v500_v42 = vld [vmem:[%s18253_s29 + $0x329] sm:$0xff] }
  0x5f   : > { %15414 = vmatmul.mubr.msk.bf16.gmra.mrb[36].mxu1 %vm613_vm2, %v18435_v18 }
  0x60   : > { %15804 = vmatmul.mubr.msk.bf16.gmra.mrb[36].mxu0 %vm613_vm2, %v3308_v19  ;;  %15417 = vmatprep.mubr.msk.bf16.mxu1 %vm613_vm2, %v18437_v20  ;;  %v475_v19 = vld [vmem:[%s18253_s29 + $0x231] sm:$0xff] }
  0x61   : > { %15807 = vmatprep.mubr.msk.bf16.mxu0 %vm613_vm2, %v3309_v22  ;;  %v476_v22 = vld [vmem:[%s18253_s29 + $0x239] sm:$0xff] }
  0x62   : > { %v18509_v29 = vpack.c.bf16 %v476_v22, %v475_v19  ;;  %v13338_v19 = vld [vmem:[%s18253_s29 + $0x2c0] sm:$0xff]  ;;  %v487_v22 = vld [vmem:[%s18253_s29 + $0x2a9] sm:$0xff] }
  0x63   : > { %v3322_v32 = vpack.c.bf16 %v13338_v19, %v13337_v16  ;;  %v13347_v16 = vld [vmem:[%s18253_s29 + $0x320] sm:$0xff] }
  0x64   : > { %v3327_v26 = vpack.c.bf16 %v13348_v17, %v13347_v16  ;;  %v512_v16 = vld [vmem:[%s18253_s29 + $0x3a1] sm:$0xff] }
  0x67   : > { %15418 = vmatmul.mubr.msk.bf16.gmra.mrb[40].mxu1 %vm613_vm2, %v18453_v33 }
  0x68   : > { %15808 = vmatmul.mubr.msk.bf16.gmra.mrb[40].mxu0 %vm613_vm2, %v3310_v36  ;;  %15421 = vmatprep.mubr.msk.bf16.mxu1 %vm613_vm2, %v18455_v39  ;;  %v13329_v36 = vld [vmem:[%s18253_s29 + $0x268] sm:$0xff] }
  0x69   : > { %15811 = vmatprep.mubr.msk.bf16.mxu0 %vm613_vm2, %v3311_v40  ;;  %v13330_v40 = vld [vmem:[%s18253_s29 + $0x270] sm:$0xff] }
  0x6a   : > { %v3318_v46 = vpack.c.bf16 %v13330_v40, %v13329_v36  ;;  %v18567_v36 = vpack.c.bf16 %v488_v24, %v487_v22  ;;  %v18603_v24 = vpack.c.bf16 %v496_v15, %v495_v14 }
  0x6f   : > { %15422 = vmatmul.mubr.msk.bf16.gmra.mrb[44].mxu1 %vm613_vm2, %v18471_v53 }
  0x70   : > { %15812 = vmatmul.mubr.msk.bf16.gmra.mrb[44].mxu0 %vm613_vm2, %v3312_v55  ;;  %15425 = vmatprep.mubr.msk.bf16.mxu1 %vm613_vm2, %v18473_v56  ;;  %v481_v55 = vld [vmem:[%s18253_s29 + $0x269] sm:$0xff] }
  0x71   : > { %15815 = vmatprep.mubr.msk.bf16.mxu0 %vm613_vm2, %v3313_v57  ;;  %v482_v57 = vld [vmem:[%s18253_s29 + $0x271] sm:$0xff] }
  0x72   : > { %v18543_v3 = vpack.c.bf16 %v482_v57, %v481_v55  ;;  %v13343_v55 = vld [vmem:[%s18253_s29 + $0x2f8] sm:$0xff]  ;;  %v13344_v57 = vld [vmem:[%s18253_s29 + $0x300] sm:$0xff] }
  0x77   : > { %15426 = vmatmul.mubr.msk.bf16.gmra.mrb[48].mxu1 %vm613_vm2, %v18489_v8 }
  0x78   : > { %15816 = vmatmul.mubr.msk.bf16.gmra.mrb[48].mxu0 %vm613_vm2, %v3314_v10  ;;  %15429 = vmatprep.mubr.msk.bf16.mxu1 %vm613_vm2, %v18491_v12  ;;  %v18545_v10 = vpack.c.bf16 %v484_v63, %v483_v62  ;;  %v3325_v63 = vpack.c.bf16 %v13344_v57, %v13343_v55  ;;  %v502_v55 = vld [vmem:[%s18253_s29 + $0x339] sm:$0xff]  ;;  %v503_v57 = vld [vmem:[%s18253_s29 + $0x349] sm:$0xff] }
  0x79   : > { %15819 = vmatprep.mubr.msk.bf16.mxu0 %vm613_vm2, %v3315_v13  ;;  %v3321_v13 = vpack.c.bf16 %v13336_v1, %v13335_v0  ;;  %v493_v0 = vld [vmem:[%s18253_s29 + $0x2e1] sm:$0xff]  ;;  %v494_v1 = vld [vmem:[%s18253_s29 + $0x2e9] sm:$0xff] }
  0x7a   : > { %v18601_v19 = vpack.c.bf16 %v494_v1, %v493_v0  ;;  %v506_v1 = vld [vmem:[%s18253_s29 + $0x361] sm:$0xff] }
  0x7f   : > { %15430 = vmatmul.mubr.msk.bf16.gmra.mrb[52].mxu1 %vm613_vm2, %v18507_v27 }
  0x80   : > { %15820 = vmatmul.mubr.msk.bf16.gmra.mrb[52].mxu0 %vm613_vm2, %v3316_v28  ;;  %15433 = vmatprep.mubr.msk.bf16.mxu1 %vm613_vm2, %v18509_v29  ;;  %v13339_v28 = vld [vmem:[%s18253_s29 + $0x2d0] sm:$0xff] }
  0x81   : > { %15823 = vmatprep.mubr.msk.bf16.mxu0 %vm613_vm2, %v3317_v30  ;;  %v13340_v30 = vld [vmem:[%s18253_s29 + $0x2d8] sm:$0xff] }
  0x82   : > { %v3323_v40 = vpack.c.bf16 %v13340_v30, %v13339_v28  ;;  %v497_v28 = vld [vmem:[%s18253_s29 + $0x309] sm:$0xff]  ;;  %v498_v30 = vld [vmem:[%s18253_s29 + $0x311] sm:$0xff] }
  0x83   : > { %v18617_v43 = vpack.c.bf16 %v498_v30, %v497_v28  ;;  %v516_v28 = vld [vmem:[%s18253_s29 + $0x3c9] sm:$0xff] }
  0x87   : > { %15434 = vmatmul.mubr.msk.bf16.gmra.mrb[56].mxu1 %vm613_vm2, %v18525_v45 }
  0x88   : > { %15824 = vmatmul.mubr.msk.bf16.gmra.mrb[56].mxu0 %vm613_vm2, %v3318_v46  ;;  %15437 = vmatprep.mubr.msk.bf16.mxu1 %vm613_vm2, %v18527_v48  ;;  %v491_v46 = vld [vmem:[%s18253_s29 + $0x2d1] sm:$0xff] }
  0x89   : > { %15827 = vmatprep.mubr.msk.bf16.mxu0 %vm613_vm2, %v3319_v50  ;;  %v492_v50 = vld [vmem:[%s18253_s29 + $0x2d9] sm:$0xff] }
  0x8a   : > { %v18585_v62 = vpack.c.bf16 %v492_v50, %v491_v46  ;;  %v18619_v46 = vpack.c.bf16 %v500_v42, %v499_v41  ;;  %v501_v50 = vld [vmem:[%s18253_s29 + $0x331] sm:$0xff] }
  0x8b   : > { %v520_v41 = vld [vmem:[%s18253_s29 + $0x3f1] sm:$0xff] }
  0x8f   : > { %15438 = vmatmul.mubr.msk.bf16.gmra.mrb[60].mxu1 %vm613_vm2, %v18543_v3 }
  0x90   : > { %15828 = vmatmul.mubr.msk.bf16.gmra.mrb[60].mxu0 %vm613_vm2, %v3320_v7  ;;  %15441 = vmatprep.mubr.msk.bf16.mxu1 %vm613_vm2, %v18545_v10  ;;  %v13345_v7 = vld [vmem:[%s18253_s29 + $0x308] sm:$0xff] }
  0x91   : > { %15831 = vmatprep.mubr.msk.bf16.mxu0 %vm613_vm2, %v3321_v13  ;;  %v13346_v13 = vld [vmem:[%s18253_s29 + $0x310] sm:$0xff] }
  0x92   : > { %v3326_v22 = vpack.c.bf16 %v13346_v13, %v13345_v7  ;;  %v507_v7 = vld [vmem:[%s18253_s29 + $0x371] sm:$0xff]  ;;  %v508_v13 = vld [vmem:[%s18253_s29 + $0x379] sm:$0xff] }
  0x93   : > { %v18651_v15 = vpack.c.bf16 %v508_v13, %v507_v7 }
  0x97   : > { %15442 = vmatmul.mubr.msk.bf16.gmra.mrb[64].mxu1 %vm613_vm2, %v18565_v31 }
  0x98   : > { %15832 = vmatmul.mubr.msk.bf16.gmra.mrb[64].mxu0 %vm613_vm2, %v3322_v32  ;;  %15445 = vmatprep.mubr.msk.bf16.mxu1 %vm613_vm2, %v18567_v36  ;;  %v13349_v32 = vld [vmem:[%s18253_s29 + $0x330] sm:$0xff] }
  0x99   : > { %15835 = vmatprep.mubr.msk.bf16.mxu0 %vm613_vm2, %v3323_v40  ;;  %v13350_v40 = vld [vmem:[%s18253_s29 + $0x338] sm:$0xff] }
  0x9a   : > { %v3328_v44 = vpack.c.bf16 %v13350_v40, %v13349_v32  ;;  %v519_v40 = vld [vmem:[%s18253_s29 + $0x3e9] sm:$0xff] }
  0x9f   : > { %15446 = vmatmul.mubr.msk.bf16.gmra.mrb[68].mxu1 %vm613_vm2, %v18583_v58 }
  0xa0   : > { %15836 = vmatmul.mubr.msk.bf16.gmra.mrb[68].mxu0 %vm613_vm2, %v3324_v60  ;;  %15449 = vmatprep.mubr.msk.bf16.mxu1 %vm613_vm2, %v18585_v62  ;;  %v504_v60 = vld [vmem:[%s18253_s29 + $0x351] sm:$0xff] }
  0xa1   : > { %15839 = vmatprep.mubr.msk.bf16.mxu0 %vm613_vm2, %v3325_v63  ;;  %v18632_v63 = vpack.c.bf16 %v502_v55, %v501_v50  ;;  %v18634_v0 = vpack.c.bf16 %v504_v60, %v503_v57  ;;  %v523_v50 = vld [vmem:[%s18253_s29 + $0x411] sm:$0xff]  ;;  %v524_v55 = vld [vmem:[%s18253_s29 + $0x419] sm:$0xff] }
  0xa2   : > { %v18715_v60 = vpack.c.bf16 %v524_v55, %v523_v50 }
  0xa7   : > { %15450 = vmatmul.mubr.msk.bf16.gmra.mrb[72].mxu1 %vm613_vm2, %v18601_v19 }
  0xa8   : > { %15840 = vmatmul.mubr.msk.bf16.gmra.mrb[72].mxu0 %vm613_vm2, %v3326_v22  ;;  %15453 = vmatprep.mubr.msk.bf16.mxu1 %vm613_vm2, %v18603_v24 }
  0xa9   : > { %15843 = vmatprep.mubr.msk.bf16.mxu0 %vm613_vm2, %v3327_v26  ;;  %v515_v26 = vld [vmem:[%s18253_s29 + $0x3c1] sm:$0xff] }
  0xaa   : > { %v18683_v32 = vpack.c.bf16 %v516_v28, %v515_v26 }
  0xaf   : > { %15454 = vmatmul.mubr.msk.bf16.gmra.mrb[76].mxu1 %vm613_vm2, %v18617_v43 }
  0xb0   : > { %15844 = vmatmul.mubr.msk.bf16.gmra.mrb[76].mxu0 %vm613_vm2, %v3328_v44  ;;  %15457 = vmatprep.mubr.msk.bf16.mxu1 %vm613_vm2, %v18619_v46  ;;  %v18699_v44 = vpack.c.bf16 %v520_v41, %v519_v40 }
  0xb1   : > { %15897 = vmatprep.mubr.msk.bf16.mxu0 %vm613_vm2, %v18270_v25  ;;  %v505_v25 = vld [vmem:[%s18253_s29 + $0x359] sm:$0xff] }
  0xb2   : > { %v18649_v14 = vpack.c.bf16 %v506_v1, %v505_v25  ;;  %v527_v25 = vld [vmem:[%s18253_s29 + $0x439] sm:$0xff]  ;;  %v528_v1 = vld [vmem:[%s18253_s29 + $0x441] sm:$0xff] }
  0xb3   : > { %v18731_v13 = vpack.c.bf16 %v528_v1, %v527_v25 }
  0xb7   : > { %15458 = vmatmul.mubr.msk.bf16.gmra.mrb[80].mxu1 %vm613_vm2, %v18632_v63 }
  0xb8   : > { %15898 = vmatmul.mubr.msk.bf16.vlgmr.msra.gmra.mrb[0].mxu0 %vm613_vm2, %v18284_v35  ;;  %15461 = vmatprep.mubr.msk.bf16.mxu1 %vm613_vm2, %v18634_v0  ;;  %v509_v35 = vld [vmem:[%s18253_s29 + $0x381] sm:$0xff] }
  0xb9   : > { %16026 = vmatpush3.bf16.msra.mxu0 %v18396_v51  ;;  %15901 = vmatprep.mubr.msk.bf16.mxu0 %vm613_vm2, %v18286_v37  ;;  %v510_v37 = vld [vmem:[%s18253_s29 + $0x389] sm:$0xff]  ;;  %v511_v51 = vld [vmem:[%s18253_s29 + $0x399] sm:$0xff] }
  0xba   : > { %v18665_v17 = vpack.c.bf16 %v510_v37, %v509_v35  ;;  %v18667_v22 = vpack.c.bf16 %v512_v16, %v511_v51  ;;  %v531_v35 = vld [vmem:[%s18253_s29 + $0x461] sm:$0xff]  ;;  %v532_v37 = vld [vmem:[%s18253_s29 + $0x469] sm:$0xff] }
  0xbb   : > { %v18747_v16 = vpack.c.bf16 %v532_v37, %v531_v35 }
  0xbf   : > { %15462 = vmatmul.mubr.msk.bf16.gmra.mrb[84].mxu1 %vm613_vm2, %v18649_v14 }
  0xc0   : > { %15902 = vmatmul.mubr.msk.bf16.gmra.mrb[4].mxu0 %vm613_vm2, %v18302_v47  ;;  %15465 = vmatprep.mubr.msk.bf16.mxu1 %vm613_vm2, %v18651_v15  ;;  %v513_v47 = vld [vmem:[%s18253_s29 + $0x3a9] sm:$0xff] }
  0xc1   : > { %15905 = vmatprep.mubr.msk.bf16.mxu0 %vm613_vm2, %v18304_v49  ;;  %v514_v49 = vld [vmem:[%s18253_s29 + $0x3b1] sm:$0xff] }
  0xc2   : > { %v18681_v30 = vpack.c.bf16 %v514_v49, %v513_v47  ;;  %v535_v47 = vld [vmem:[%s18253_s29 + $0x489] sm:$0xff]  ;;  %v536_v49 = vld [vmem:[%s18253_s29 + $0x491] sm:$0xff] }
  0xc3   : > { %v18763_v28 = vpack.c.bf16 %v536_v49, %v535_v47 }
  0xc7   : > { %15466 = vmatmul.mubr.msk.bf16.gmra.mrb[88].mxu1 %vm613_vm2, %v18665_v17 }
  0xc8   : > { %15906 = vmatmul.mubr.msk.bf16.gmra.mrb[8].mxu0 %vm613_vm2, %v18320_v59  ;;  %15469 = vmatprep.mubr.msk.bf16.mxu1 %vm613_vm2, %v18667_v22  ;;  %v517_v59 = vld [vmem:[%s18253_s29 + $0x3d1] sm:$0xff] }
  0xc9   : > { %15909 = vmatprep.mubr.msk.bf16.mxu0 %vm613_vm2, %v18322_v61  ;;  %v518_v61 = vld [vmem:[%s18253_s29 + $0x3d9] sm:$0xff] }
  0xca   : > { %v18697_v42 = vpack.c.bf16 %v518_v61, %v517_v59  ;;  %v539_v59 = vld [vmem:[%s18253_s29 + $0x4b1] sm:$0xff]  ;;  %v540_v61 = vld [vmem:[%s18253_s29 + $0x4b9] sm:$0xff] }
  0xcb   : > { %v18779_v41 = vpack.c.bf16 %v540_v61, %v539_v59 }
  0xcf   : > { %15470 = vmatmul.mubr.msk.bf16.gmra.mrb[92].mxu1 %vm613_vm2, %v18681_v30 }
  0xd0   : > { %15910 = vmatmul.mubr.msk.bf16.gmra.mrb[12].mxu0 %vm613_vm2, %v18338_v9  ;;  %15473 = vmatprep.mubr.msk.bf16.mxu1 %vm613_vm2, %v18683_v32  ;;  %v521_v9 = vld [vmem:[%s18253_s29 + $0x3f9] sm:$0xff] }
  0xd1   : > { %15913 = vmatprep.mubr.msk.bf16.mxu0 %vm613_vm2, %v18340_v11  ;;  %v522_v11 = vld [vmem:[%s18253_s29 + $0x401] sm:$0xff] }
  0xd2   : > { %v18713_v57 = vpack.c.bf16 %v522_v11, %v521_v9  ;;  %v543_v9 = vld [vmem:[%s18253_s29 + $0x4d9] sm:$0xff]  ;;  %v544_v11 = vld [vmem:[%s18253_s29 + $0x4e1] sm:$0xff] }
  0xd3   : > { %v18795_v55 = vpack.c.bf16 %v544_v11, %v543_v9 }
  0xd7   : > { %15474 = vmatmul.mubr.msk.bf16.gmra.mrb[96].mxu1 %vm613_vm2, %v18697_v42 }
  0xd8   : > { %15914 = vmatmul.mubr.msk.bf16.gmra.mrb[16].mxu0 %vm613_vm2, %v18356_v21  ;;  %15477 = vmatprep.mubr.msk.bf16.mxu1 %vm613_vm2, %v18699_v44  ;;  %v525_v21 = vld [vmem:[%s18253_s29 + $0x421] sm:$0xff] }
  0xd9   : > { %15917 = vmatprep.mubr.msk.bf16.mxu0 %vm613_vm2, %v18358_v23  ;;  %v526_v23 = vld [vmem:[%s18253_s29 + $0x429] sm:$0xff] }
  0xda   : > { %v18729_v7 = vpack.c.bf16 %v526_v23, %v525_v21  ;;  %v226_v21 = vld [vmem:[%s18253_s29] sm:$0xff]  ;;  %v227_v23 = vld [vmem:[%s18253_s29 + $0x8] sm:$0xff] }
  0xdb   : > { %v354_v1 = vpack.c.bf16 %v227_v23, %v226_v21  ;;  %v13978_v21 = vld [vmem:[%s21484_s1 + $0xc] sm:$0x3] }
  0xdc   : > { %v18866_v23 = vand.u32 %v13978_v21, %v18238_v5 }
  0xde   : > { %16155 = vmatprep.subr.bf16.mxu0 %v18866_v23 }
  0xdf   : > { %15478 = vmatmul.mubr.msk.bf16.gmra.mrb[100].mxu1 %vm613_vm2, %v18713_v57 }
  0xe0   : > { %15918 = vmatmul.mubr.msk.bf16.gmra.mrb[20].mxu0 %vm613_vm2, %v18374_v34  ;;  %15481 = vmatprep.mubr.msk.bf16.mxu1 %vm613_vm2, %v18715_v60  ;;  %v529_v34 = vld [vmem:[%s18253_s29 + $0x449] sm:$0xff] }
  0xe1   : > { %15921 = vmatprep.mubr.msk.bf16.mxu0 %vm613_vm2, %v18376_v38  ;;  %v530_v38 = vld [vmem:[%s18253_s29 + $0x451] sm:$0xff] }
  0xe2   : > { %v18745_v51 = vpack.c.bf16 %v530_v38, %v529_v34  ;;  %v229_v34 = vld [vmem:[%s18253_s29 + $0x18] sm:$0xff]  ;;  %v231_v38 = vld [vmem:[%s18253_s29 + $0x30] sm:$0xff] }
  0xe7   : > { %15482 = vmatmul.mubr.msk.bf16.gmra.mrb[104].mxu1 %vm613_vm2, %v18729_v7 }
  0xe8   : > { %15922 = vmatmul.mubr.msk.bf16.gmra.mrb[24].mxu0 %vm613_vm2, %v18398_v52  ;;  %15485 = vmatprep.mubr.msk.bf16.mxu1 %vm613_vm2, %v18731_v13  ;;  %v533_v52 = vld [vmem:[%s18253_s29 + $0x471] sm:$0xff] }
  0xe9   : > { %15925 = vmatprep.mubr.msk.bf16.mxu0 %vm613_vm2, %v18400_v54  ;;  %v534_v54 = vld [vmem:[%s18253_s29 + $0x479] sm:$0xff] }
  0xea   : > { %v18761_v26 = vpack.c.bf16 %v534_v54, %v533_v52  ;;  %v233_v52 = vld [vmem:[%s18253_s29 + $0x40] sm:$0xff]  ;;  %v235_v54 = vld [vmem:[%s18253_s29 + $0x58] sm:$0xff] }
  0xef   : > { %15486 = vmatmul.mubr.msk.bf16.gmra.mrb[108].mxu1 %vm613_vm2, %v18745_v51 }
  0xf0   : > { %15926 = vmatmul.mubr.msk.bf16.gmra.mrb[28].mxu0 %vm613_vm2, %v18417_v2  ;;  %15489 = vmatprep.mubr.msk.bf16.mxu1 %vm613_vm2, %v18747_v16  ;;  %v537_v2 = vld [vmem:[%s18253_s29 + $0x499] sm:$0xff] }
  0xf1   : > { %15929 = vmatprep.mubr.msk.bf16.mxu0 %vm613_vm2, %v18419_v4  ;;  %v538_v4 = vld [vmem:[%s18253_s29 + $0x4a1] sm:$0xff] }
  0xf2   : > { %v18777_v40 = vpack.c.bf16 %v538_v4, %v537_v2  ;;  %v237_v2 = vld [vmem:[%s18253_s29 + $0x68] sm:$0xff]  ;;  %v239_v4 = vld [vmem:[%s18253_s29 + $0x80] sm:$0xff] }
  0xf7   : > { %15490 = vmatmul.mubr.msk.bf16.gmra.mrb[112].mxu1 %vm613_vm2, %v18761_v26 }
  0xf8   : > { %15930 = vmatmul.mubr.msk.bf16.gmra.mrb[32].mxu0 %vm613_vm2, %v18435_v18  ;;  %15493 = vmatprep.mubr.msk.bf16.mxu1 %vm613_vm2, %v18763_v28  ;;  %v541_v18 = vld [vmem:[%s18253_s29 + $0x4c1] sm:$0xff] }
  0xf9   : > { %15933 = vmatprep.mubr.msk.bf16.mxu0 %vm613_vm2, %v18437_v20  ;;  %v542_v20 = vld [vmem:[%s18253_s29 + $0x4c9] sm:$0xff] }
  0xfa   : > { %v18793_v50 = vpack.c.bf16 %v542_v20, %v541_v18  ;;  %v241_v18 = vld [vmem:[%s18253_s29 + $0x90] sm:$0xff]  ;;  %v243_v20 = vld [vmem:[%s18253_s29 + $0xa8] sm:$0xff] }
  0xff   : > { %15494 = vmatmul.mubr.msk.bf16.gmra.mrb[116].mxu1 %vm613_vm2, %v18777_v40 }
 0x100   : > { %15934 = vmatmul.mubr.msk.bf16.gmra.mrb[36].mxu0 %vm613_vm2, %v18453_v33  ;;  %15497 = vmatprep.mubr.msk.bf16.mxu1 %vm613_vm2, %v18779_v41  ;;  %v545_v33 = vld [vmem:[%s18253_s29 + $0x4e9] sm:$0xff] }
 0x101   : > { %15937 = vmatprep.mubr.msk.bf16.mxu0 %vm613_vm2, %v18455_v39  ;;  %v546_v39 = vld [vmem:[%s18253_s29 + $0x4f1] sm:$0xff] }
 0x102   : > { %v18809_v25 = vpack.c.bf16 %v546_v39, %v545_v33  ;;  %v245_v33 = vld [vmem:[%s18253_s29 + $0xb8] sm:$0xff]  ;;  %v247_v39 = vld [vmem:[%s18253_s29 + $0xd0] sm:$0xff] }
 0x107   : > { %15498 = vmatmul.mubr.msk.bf16.gmra.mrb[120].mxu1 %vm613_vm2, %v18793_v50 }
 0x108   : > { %15938 = vmatmul.mubr.msk.bf16.gmra.mrb[40].mxu0 %vm613_vm2, %v18471_v53  ;;  %15501 = vmatprep.mubr.msk.bf16.mxu1 %vm613_vm2, %v18795_v55  ;;  %v228_v53 = vld [vmem:[%s18253_s29 + $0x10] sm:$0xff] }
 0x109   : > { %15941 = vmatprep.mubr.msk.bf16.mxu0 %vm613_vm2, %v18473_v56  ;;  %v230_v56 = vld [vmem:[%s18253_s29 + $0x28] sm:$0xff]  ;;  %v355_v35 = vpack.c.bf16 %v229_v34, %v228_v53  ;;  %v249_v53 = vld [vmem:[%s18253_s29 + $0xe0] sm:$0xff]  ;;  %v250_v34 = vld [vmem:[%s18253_s29 + $0xf0] sm:$0xff] }
 0x10a   : > { %v356_v37 = vpack.c.bf16 %v231_v38, %v230_v56  ;;  %v251_v56 = vld [vmem:[%s18253_s29 + $0xf8] sm:$0xff] }
 0x10f   : > { %15502 = vmatmul.mubr.msk.bf16.gmra.mrb[124].mxu1 %vm613_vm2, %v18809_v25 }
 0x110   : > { %15942 = vmatmul.mubr.msk.bf16.gmra.mrb[44].mxu0 %vm613_vm2, %v18489_v8  ;;  %15507 = vmatprep.mubr.msk.bf16.mxu1 %vm613_vm2, %v354_v1  ;;  %v232_v8 = vld [vmem:[%s18253_s29 + $0x38] sm:$0xff] }
 0x111   : > { %15945 = vmatprep.mubr.msk.bf16.mxu0 %vm613_vm2, %v18491_v12  ;;  %v234_v12 = vld [vmem:[%s18253_s29 + $0x50] sm:$0xff]  ;;  %v357_v47 = vpack.c.bf16 %v233_v52, %v232_v8  ;;  %v255_v8 = vld [vmem:[%s18253_s29 + $0x120] sm:$0xff] }
 0x112   : > { %v358_v49 = vpack.c.bf16 %v235_v54, %v234_v12  ;;  %v257_v54 = vld [vmem:[%s18253_s29 + $0x130] sm:$0xff] }
 0x117   : > { %15508 = vmatmul.mubr.msk.bf16.vlgmr.msra.gmra.mrb[0].mxu1 %vm613_vm2, %v355_v35  ;;  %v366_v35 = vpack.c.bf16 %v251_v56, %v250_v34  ;;  %v281_v34 = vld [vmem:[%s18253_s29 + $0x220] sm:$0xff]  ;;  %v283_v56 = vld [vmem:[%s18253_s29 + $0x238] sm:$0xff] }
 0x118   : > { %15946 = vmatmul.mubr.msk.bf16.gmra.mrb[48].mxu0 %vm613_vm2, %v18507_v27  ;;  %15511 = vmatprep.mubr.msk.bf16.mxu1 %vm613_vm2, %v356_v37  ;;  %v236_v27 = vld [vmem:[%s18253_s29 + $0x60] sm:$0xff]  ;;  %v253_v37 = vld [vmem:[%s18253_s29 + $0x108] sm:$0xff] }
 0x119   : > { %15949 = vmatprep.mubr.msk.bf16.mxu0 %vm613_vm2, %v18509_v29  ;;  %v238_v29 = vld [vmem:[%s18253_s29 + $0x78] sm:$0xff]  ;;  %v359_v59 = vpack.c.bf16 %v237_v2, %v236_v27 }
 0x11a   : > { %v360_v61 = vpack.c.bf16 %v239_v4, %v238_v29  ;;  %v261_v2 = vld [vmem:[%s18253_s29 + $0x158] sm:$0xff]  ;;  %v263_v29 = vld [vmem:[%s18253_s29 + $0x170] sm:$0xff] }
 0x11f   : > { %15512 = vmatmul.mubr.msk.bf16.gmra.mrb[4].mxu1 %vm613_vm2, %v357_v47  ;;  %v259_v47 = vld [vmem:[%s18253_s29 + $0x148] sm:$0xff] }
 0x120   : > { %15950 = vmatmul.mubr.msk.bf16.gmra.mrb[52].mxu0 %vm613_vm2, %v18525_v45  ;;  %15515 = vmatprep.mubr.msk.bf16.mxu1 %vm613_vm2, %v358_v49  ;;  %v240_v45 = vld [vmem:[%s18253_s29 + $0x88] sm:$0xff] }
 0x121   : > { %15953 = vmatprep.mubr.msk.bf16.mxu0 %vm613_vm2, %v18527_v48  ;;  %v242_v48 = vld [vmem:[%s18253_s29 + $0xa0] sm:$0xff]  ;;  %v361_v9 = vpack.c.bf16 %v241_v18, %v240_v45  ;;  %v267_v45 = vld [vmem:[%s18253_s29 + $0x198] sm:$0xff] }
 0x122   : > { %v362_v11 = vpack.c.bf16 %v243_v20, %v242_v48  ;;  %v269_v20 = vld [vmem:[%s18253_s29 + $0x1a8] sm:$0xff] }
 0x127   : > { %15516 = vmatmul.mubr.msk.bf16.gmra.mrb[8].mxu1 %vm613_vm2, %v359_v59 }
 0x128   : > { %15954 = vmatmul.mubr.msk.bf16.gmra.mrb[56].mxu0 %vm613_vm2, %v18543_v3  ;;  %15519 = vmatprep.mubr.msk.bf16.mxu1 %vm613_vm2, %v360_v61  ;;  %v244_v3 = vld [vmem:[%s18253_s29 + $0xb0] sm:$0xff]  ;;  %v265_v61 = vld [vmem:[%s18253_s29 + $0x180] sm:$0xff] }
 0x129   : > { %15957 = vmatprep.mubr.msk.bf16.mxu0 %vm613_vm2, %v18545_v10  ;;  %v246_v10 = vld [vmem:[%s18253_s29 + $0xc8] sm:$0xff] }
 0x12a   : > { %v364_v1 = vpack.c.bf16 %v247_v39, %v246_v10  ;;  %v275_v10 = vld [vmem:[%s18253_s29 + $0x1e8] sm:$0xff] }
 0x12f   : > { %15520 = vmatmul.mubr.msk.bf16.gmra.mrb[12].mxu1 %vm613_vm2, %v361_v9  ;;  %v271_v9 = vld [vmem:[%s18253_s29 + $0x1c0] sm:$0xff] }
 0x130   : > { %15958 = vmatmul.mubr.msk.bf16.gmra.mrb[60].mxu0 %vm613_vm2, %v18565_v31  ;;  %15523 = vmatprep.mubr.msk.bf16.mxu1 %vm613_vm2, %v362_v11  ;;  %v363_v31 = vpack.c.bf16 %v245_v33, %v244_v3  ;;  %v273_v33 = vld [vmem:[%s18253_s29 + $0x1d0] sm:$0xff] }
 0x131   : > { %15961 = vmatprep.mubr.msk.bf16.mxu0 %vm613_vm2, %v18567_v36  ;;  %v248_v36 = vld [vmem:[%s18253_s29 + $0xd8] sm:$0xff] }
 0x132   : > { %v365_v38 = vpack.c.bf16 %v249_v53, %v248_v36 }
 0x137   : > { %15524 = vmatmul.mubr.msk.bf16.gmra.mrb[16].mxu1 %vm613_vm2, %v363_v31  ;;  %v277_v31 = vld [vmem:[%s18253_s29 + $0x1f8] sm:$0xff] }
 0x138   : > { %15962 = vmatmul.mubr.msk.bf16.gmra.mrb[64].mxu0 %vm613_vm2, %v18583_v58  ;;  %15527 = vmatprep.mubr.msk.bf16.mxu1 %vm613_vm2, %v364_v1  ;;  %v252_v58 = vld [vmem:[%s18253_s29 + $0x100] sm:$0xff]  ;;  %v279_v1 = vld [vmem:[%s18253_s29 + $0x210] sm:$0xff] }
 0x139   : > { %15965 = vmatprep.mubr.msk.bf16.mxu0 %vm613_vm2, %v18585_v62  ;;  %v254_v62 = vld [vmem:[%s18253_s29 + $0x118] sm:$0xff]  ;;  %v367_v52 = vpack.c.bf16 %v253_v37, %v252_v58  ;;  %v285_v58 = vld [vmem:[%s18253_s29 + $0x248] sm:$0xff]  ;;  %v287_v37 = vld [vmem:[%s18253_s29 + $0x260] sm:$0xff] }
 0x13a   : > { %v368_v12 = vpack.c.bf16 %v255_v8, %v254_v62 }
 0x13f   : > { %15528 = vmatmul.mubr.msk.bf16.gmra.mrb[20].mxu1 %vm613_vm2, %v365_v38 }
 0x140   : > { %15966 = vmatmul.mubr.msk.bf16.gmra.mrb[68].mxu0 %vm613_vm2, %v18601_v19  ;;  %15531 = vmatprep.mubr.msk.bf16.mxu1 %vm613_vm2, %v366_v35  ;;  %v256_v19 = vld [vmem:[%s18253_s29 + $0x128] sm:$0xff] }
 0x141   : > { %15969 = vmatprep.mubr.msk.bf16.mxu0 %vm613_vm2, %v18603_v24  ;;  %v258_v24 = vld [vmem:[%s18253_s29 + $0x140] sm:$0xff]  ;;  %v369_v49 = vpack.c.bf16 %v257_v54, %v256_v19 }
 0x142   : > { %v370_v27 = vpack.c.bf16 %v259_v47, %v258_v24  ;;  %v293_v24 = vld [vmem:[%s18253_s29 + $0x298] sm:$0xff]  ;;  %v13206_v47 = vld [vmem:[%s21484_s1 + $0x4] sm:$0x3] }
 0x147   : > { %15532 = vmatmul.mubr.msk.bf16.gmra.mrb[24].mxu1 %vm613_vm2, %v367_v52  ;;  %v289_v52 = vld [vmem:[%s18253_s29 + $0x270] sm:$0xff] }
 0x148   : > { %15970 = vmatmul.mubr.msk.bf16.gmra.mrb[72].mxu0 %vm613_vm2, %v18617_v43  ;;  %15535 = vmatprep.mubr.msk.bf16.mxu1 %vm613_vm2, %v368_v12  ;;  %v260_v43 = vld [vmem:[%s18253_s29 + $0x150] sm:$0xff]  ;;  %v291_v12 = vld [vmem:[%s18253_s29 + $0x288] sm:$0xff] }
 0x149   : > { %15973 = vmatprep.mubr.msk.bf16.mxu0 %vm613_vm2, %v18619_v46  ;;  %v262_v46 = vld [vmem:[%s18253_s29 + $0x168] sm:$0xff]  ;;  %v371_v4 = vpack.c.bf16 %v261_v2, %v260_v43  ;;  %v297_v2 = vld [vmem:[%s18253_s29 + $0x2c0] sm:$0xff] }
 0x14a   : > { %v372_v59 = vpack.c.bf16 %v263_v29, %v262_v46  ;;  %v298_v46 = vld [vmem:[%s18253_s29 + $0x2d0] sm:$0xff]  ;;  %v299_v29 = vld [vmem:[%s18253_s29 + $0x2d8] sm:$0xff] }
 0x14f   : > { %15536 = vmatmul.mubr.msk.bf16.gmra.mrb[28].mxu1 %vm613_vm2, %v369_v49  ;;  %v295_v49 = vld [vmem:[%s18253_s29 + $0x2b0] sm:$0xff] }
 0x150   : > { %15974 = vmatmul.mubr.msk.bf16.gmra.mrb[76].mxu0 %vm613_vm2, %v18632_v63  ;;  %15539 = vmatprep.mubr.msk.bf16.mxu1 %vm613_vm2, %v370_v27  ;;  %v264_v63 = vld [vmem:[%s18253_s29 + $0x178] sm:$0xff]  ;;  %v2485_v27 = vand.u32 %v13206_v47, %v18238_v5  ;;  %v319_v47 = vld [vmem:[%s18253_s29 + $0x3a0] sm:$0xff] }
 0x151   : > { %15977 = vmatprep.mubr.msk.bf16.mxu0 %vm613_vm2, %v18634_v0  ;;  %v266_v0 = vld [vmem:[%s18253_s29 + $0x190] sm:$0xff]  ;;  %v373_v18 = vpack.c.bf16 %v265_v61, %v264_v63  ;;  %v301_v63 = vld [vmem:[%s18253_s29 + $0x2e8] sm:$0xff]  ;;  %v303_v61 = vld [vmem:[%s18253_s29 + $0x300] sm:$0xff] }
 0x152   : > { %v374_v48 = vpack.c.bf16 %v267_v45, %v266_v0  ;;  %15635 = vmatprep.subr.bf16.mxu1 %v2485_v27  ;;  %v13588_v0 = vld [vmem:[%s18253_s29 + $0x501] sm:$0xff]  ;;  %v13589_v45 = vld [vmem:[%s18253_s29 + $0x509] sm:$0xff] }
 0x153   : > { %15636 = vmatpush3.bf16.msra.mxu1 %v2485_v27 }
 0x154   : > { %16869 = vmatprep.subr.bf16.mxu1 %v18243_v6 }
 0x157   : > { %15540 = vmatmul.mubr.msk.bf16.gmra.mrb[32].mxu1 %vm613_vm2, %v371_v4 }
 0x158   : > { %15978 = vmatmul.mubr.msk.bf16.gmra.mrb[80].mxu0 %vm613_vm2, %v18649_v14  ;;  %15543 = vmatprep.mubr.msk.bf16.mxu1 %vm613_vm2, %v372_v59  ;;  %v268_v14 = vld [vmem:[%s18253_s29 + $0x1a0] sm:$0xff]  ;;  %v390_v59 = vpack.c.bf16 %v299_v29, %v298_v46  ;;  %v321_v46 = vld [vmem:[%s18253_s29 + $0x3b0] sm:$0xff] }
 0x159   : > { %15981 = vmatprep.mubr.msk.bf16.mxu0 %vm613_vm2, %v18651_v15  ;;  %v270_v15 = vld [vmem:[%s18253_s29 + $0x1b8] sm:$0xff]  ;;  %v375_v11 = vpack.c.bf16 %v269_v20, %v268_v14  ;;  %v304_v14 = vld [vmem:[%s18253_s29 + $0x308] sm:$0xff] }
 0x15a   : > { %v376_v3 = vpack.c.bf16 %v271_v9, %v270_v15  ;;  %v13590_v20 = vld [vmem:[%s18253_s29 + $0x511] sm:$0xff]  ;;  %v13591_v15 = vld [vmem:[%s18253_s29 + $0x519] sm:$0xff] }
 0x15b   : > { %v306_v9 = vld [vmem:[%s18253_s29 + $0x320] sm:$0xff]  ;;  %v13671_v29 = vld [vmem:[%s18253_s29 + $0xb2] sm:$0xff] }
 0x15f   : > { %15544 = vmatmul.mubr.msk.bf16.gmra.mrb[36].mxu1 %vm613_vm2, %v373_v18 }
 0x160   : > { %15982 = vmatmul.mubr.msk.bf16.gmra.mrb[84].mxu0 %vm613_vm2, %v18665_v17  ;;  %15547 = vmatprep.mubr.msk.bf16.mxu1 %vm613_vm2, %v374_v48  ;;  %v272_v17 = vld [vmem:[%s18253_s29 + $0x1c8] sm:$0xff]  ;;  %v4413_v48 = vpack.c.bf16 %v13589_v45, %v13588_v0 }
 0x161   : > { %15985 = vmatprep.mubr.msk.bf16.mxu0 %vm613_vm2, %v18667_v22  ;;  %v274_v22 = vld [vmem:[%s18253_s29 + $0x1e0] sm:$0xff]  ;;  %v377_v39 = vpack.c.bf16 %v273_v33, %v272_v17  ;;  %v13658_v17 = vld [vmem:[%s18253_s29 + $0x32] sm:$0xff]  ;;  %v4414_v33 = vpack.c.bf16 %v13591_v15, %v13590_v20  ;;  %v326_v20 = vld [vmem:[%s18253_s29 + $0x3e8] sm:$0xff] }
 0x162   : > { %v378_v21 = vpack.c.bf16 %v275_v10, %v274_v22  ;;  %v327_v15 = vld [vmem:[%s18253_s29 + $0x3f0] sm:$0xff] }
 0x167   : > { %15548 = vmatmul.mubr.msk.bf16.gmra.mrb[40].mxu1 %vm613_vm2, %v375_v11  ;;  %v307_v11 = vld [vmem:[%s18253_s29 + $0x328] sm:$0xff] }
 0x168   : > { %15986 = vmatmul.mubr.msk.bf16.gmra.mrb[88].mxu0 %vm613_vm2, %v18681_v30  ;;  %15551 = vmatprep.mubr.msk.bf16.mxu1 %vm613_vm2, %v376_v3  ;;  %v276_v30 = vld [vmem:[%s18253_s29 + $0x1f0] sm:$0xff]  ;;  %v394_v22 = vpack.c.bf16 %v307_v11, %v306_v9  ;;  %v13678_v11 = vld [vmem:[%s18253_s29 + $0xfa] sm:$0xff] }
 0x169   : > { %15989 = vmatprep.mubr.msk.bf16.mxu0 %vm613_vm2, %v18683_v32  ;;  %v278_v32 = vld [vmem:[%s18253_s29 + $0x208] sm:$0xff]  ;;  %v379_v36 = vpack.c.bf16 %v277_v31, %v276_v30  ;;  %v13659_v30 = vld [vmem:[%s18253_s29 + $0x3a] sm:$0xff]  ;;  %v13677_v9 = vld [vmem:[%s18253_s29 + $0xf2] sm:$0xff] }
 0x16a   : > { %v380_v53 = vpack.c.bf16 %v279_v1, %v278_v32  ;;  %v13657_v3 = vld [vmem:[%s18253_s29 + $0x2a] sm:$0xff]  ;;  %v13660_v31 = vld [vmem:[%s18253_s29 + $0x42] sm:$0xff] }
 0x16b   : > { %v19029_v10 = vpack.c.bf16 %v13658_v17, %v13657_v3  ;;  %v310_v32 = vld [vmem:[%s18253_s29 + $0x348] sm:$0xff]  ;;  %v311_v1 = vld [vmem:[%s18253_s29 + $0x350] sm:$0xff] }
 0x16f   : > { %15552 = vmatmul.mubr.msk.bf16.gmra.mrb[44].mxu1 %vm613_vm2, %v377_v39  ;;  %v308_v39 = vld [vmem:[%s18253_s29 + $0x330] sm:$0xff] }
 0x170   : > { %15990 = vmatmul.mubr.msk.bf16.gmra.mrb[92].mxu0 %vm613_vm2, %v18697_v42  ;;  %15555 = vmatprep.mubr.msk.bf16.mxu1 %vm613_vm2, %v378_v21  ;;  %v280_v42 = vld [vmem:[%s18253_s29 + $0x218] sm:$0xff] }
 0x171   : > { %15993 = vmatprep.mubr.msk.bf16.mxu0 %vm613_vm2, %v18699_v44  ;;  %v282_v44 = vld [vmem:[%s18253_s29 + $0x230] sm:$0xff]  ;;  %v381_v38 = vpack.c.bf16 %v281_v34, %v280_v42  ;;  %v309_v21 = vld [vmem:[%s18253_s29 + $0x338] sm:$0xff]  ;;  %v19044_v34 = vpack.c.bf16 %v13660_v31, %v13659_v30 }
 0x172   : > { %v382_v35 = vpack.c.bf16 %v283_v56, %v282_v44  ;;  %v395_v42 = vpack.c.bf16 %v309_v21, %v308_v39  ;;  %v396_v44 = vpack.c.bf16 %v311_v1, %v310_v32  ;;  %v329_v39 = vld [vmem:[%s18253_s29 + $0x400] sm:$0xff]  ;;  %v13680_v30 = vld [vmem:[%s18253_s29 + $0x10a] sm:$0xff]  ;;  %v331_v32 = vld [vmem:[%s18253_s29 + $0x418] sm:$0xff] }
 0x173   : > { %v13679_v21 = vld [vmem:[%s18253_s29 + $0x102] sm:$0xff]  ;;  %v330_v31 = vld [vmem:[%s18253_s29 + $0x410] sm:$0xff]  ;;  %v13681_v1 = vld [vmem:[%s18253_s29 + $0x11a] sm:$0xff] }
 0x177   : > { %15556 = vmatmul.mubr.msk.bf16.gmra.mrb[48].mxu1 %vm613_vm2, %v379_v36  ;;  %v13661_v36 = vld [vmem:[%s18253_s29 + $0x52] sm:$0xff] }
 0x178   : > { %15994 = vmatmul.mubr.msk.bf16.gmra.mrb[96].mxu0 %vm613_vm2, %v18713_v57  ;;  %15559 = vmatprep.mubr.msk.bf16.mxu1 %vm613_vm2, %v380_v53  ;;  %v284_v57 = vld [vmem:[%s18253_s29 + $0x240] sm:$0xff] }
 0x179   : > { %15997 = vmatprep.mubr.msk.bf16.mxu0 %vm613_vm2, %v18715_v60  ;;  %v286_v60 = vld [vmem:[%s18253_s29 + $0x258] sm:$0xff]  ;;  %v383_v62 = vpack.c.bf16 %v285_v58, %v284_v57  ;;  %v13663_v57 = vld [vmem:[%s18253_s29 + $0x62] sm:$0xff]  ;;  %v13664_v58 = vld [vmem:[%s18253_s29 + $0x6a] sm:$0xff] }
 0x17a   : > { %v384_v8 = vpack.c.bf16 %v287_v37, %v286_v60  ;;  %v13662_v53 = vld [vmem:[%s18253_s29 + $0x5a] sm:$0xff]  ;;  %v314_v60 = vld [vmem:[%s18253_s29 + $0x370] sm:$0xff] }
 0x17b   : > { %v19046_v56 = vpack.c.bf16 %v13662_v53, %v13661_v36  ;;  %v315_v37 = vld [vmem:[%s18253_s29 + $0x378] sm:$0xff]  ;;  %v13682_v36 = vld [vmem:[%s18253_s29 + $0x122] sm:$0xff] }
 0x17f   : > { %15560 = vmatmul.mubr.msk.bf16.gmra.mrb[52].mxu1 %vm613_vm2, %v381_v38  ;;  %v312_v38 = vld [vmem:[%s18253_s29 + $0x358] sm:$0xff] }
 0x180   : > { %15998 = vmatmul.mubr.msk.bf16.gmra.mrb[100].mxu0 %vm613_vm2, %v18729_v7  ;;  %15563 = vmatprep.mubr.msk.bf16.mxu1 %vm613_vm2, %v382_v35  ;;  %v288_v7 = vld [vmem:[%s18253_s29 + $0x268] sm:$0xff]  ;;  %v313_v35 = vld [vmem:[%s18253_s29 + $0x360] sm:$0xff] }
 0x181   : > { %16001 = vmatprep.mubr.msk.bf16.mxu0 %vm613_vm2, %v18731_v13  ;;  %v290_v13 = vld [vmem:[%s18253_s29 + $0x280] sm:$0xff]  ;;  %v385_v19 = vpack.c.bf16 %v289_v52, %v288_v7  ;;  %v397_v7 = vpack.c.bf16 %v313_v35, %v312_v38  ;;  %v19063_v52 = vpack.c.bf16 %v13664_v58, %v13663_v57  ;;  %v19137_v38 = vpack.c.bf16 %v13682_v36, %v13681_v1  ;;  %v333_v57 = vld [vmem:[%s18253_s29 + $0x428] sm:$0xff] }
 0x182   : > { %v386_v54 = vpack.c.bf16 %v291_v12, %v290_v13  ;;  %v398_v13 = vpack.c.bf16 %v315_v37, %v314_v60  ;;  %v332_v35 = vld [vmem:[%s18253_s29 + $0x420] sm:$0xff]  ;;  %v13683_v58 = vld [vmem:[%s18253_s29 + $0x12a] sm:$0xff]  ;;  %v13684_v60 = vld [vmem:[%s18253_s29 + $0x132] sm:$0xff] }
 0x183   : > { %v334_v37 = vld [vmem:[%s18253_s29 + $0x438] sm:$0xff] }
 0x187   : > { %15564 = vmatmul.mubr.msk.bf16.gmra.mrb[56].mxu1 %vm613_vm2, %v383_v62  ;;  %v13665_v62 = vld [vmem:[%s18253_s29 + $0x7a] sm:$0xff] }
 0x188   : > { %16002 = vmatmul.mubr.msk.bf16.gmra.mrb[104].mxu0 %vm613_vm2, %v18745_v51  ;;  %15567 = vmatprep.mubr.msk.bf16.mxu1 %vm613_vm2, %v384_v8  ;;  %v292_v51 = vld [vmem:[%s18253_s29 + $0x290] sm:$0xff]  ;;  %v13666_v8 = vld [vmem:[%s18253_s29 + $0x82] sm:$0xff] }
 0x189   : > { %16005 = vmatprep.mubr.msk.bf16.mxu0 %vm613_vm2, %v18747_v16  ;;  %v294_v16 = vld [vmem:[%s18253_s29 + $0x2a8] sm:$0xff]  ;;  %v19065_v12 = vpack.c.bf16 %v13666_v8, %v13665_v62  ;;  %v335_v62 = vld [vmem:[%s18253_s29 + $0x440] sm:$0xff] }
 0x18a   : > { %v388_v43 = vpack.c.bf16 %v295_v49, %v294_v16  ;;  %v13669_v16 = vld [vmem:[%s18253_s29 + $0xa2] sm:$0xff]  ;;  %v13670_v49 = vld [vmem:[%s18253_s29 + $0xaa] sm:$0xff] }
 0x18b   : > { %v13685_v8 = vld [vmem:[%s18253_s29 + $0x142] sm:$0xff] }
 0x18f   : > { %15568 = vmatmul.mubr.msk.bf16.gmra.mrb[60].mxu1 %vm613_vm2, %v385_v19  ;;  %v317_v19 = vld [vmem:[%s18253_s29 + $0x388] sm:$0xff] }
 0x190   : > { %16006 = vmatmul.mubr.msk.bf16.gmra.mrb[108].mxu0 %vm613_vm2, %v18761_v26  ;;  %15571 = vmatprep.mubr.msk.bf16.mxu1 %vm613_vm2, %v386_v54  ;;  %v387_v26 = vpack.c.bf16 %v293_v24, %v292_v51  ;;  %v13667_v54 = vld [vmem:[%s18253_s29 + $0x8a] sm:$0xff]  ;;  %v13668_v51 = vld [vmem:[%s18253_s29 + $0x92] sm:$0xff] }
 0x191   : > { %16009 = vmatprep.mubr.msk.bf16.mxu0 %vm613_vm2, %v18763_v28  ;;  %v296_v28 = vld [vmem:[%s18253_s29 + $0x2b8] sm:$0xff] }
 0x192   : > { %v389_v4 = vpack.c.bf16 %v297_v2, %v296_v28  ;;  %v318_v24 = vld [vmem:[%s18253_s29 + $0x398] sm:$0xff]  ;;  %v19083_v28 = vpack.c.bf16 %v13670_v49, %v13669_v16  ;;  %v320_v2 = vld [vmem:[%s18253_s29 + $0x3a8] sm:$0xff]  ;;  %v338_v49 = vld [vmem:[%s18253_s29 + $0x460] sm:$0xff] }
 0x193   : > { %v13688_v16 = vld [vmem:[%s18253_s29 + $0x15a] sm:$0xff] }
 0x197   : > { %15572 = vmatmul.mubr.msk.bf16.gmra.mrb[64].mxu1 %vm613_vm2, %v387_v26  ;;  %v19081_v26 = vpack.c.bf16 %v13668_v51, %v13667_v54  ;;  %v336_v51 = vld [vmem:[%s18253_s29 + $0x448] sm:$0xff] }
 0x198   : > { %16010 = vmatmul.mubr.msk.bf16.gmra.mrb[112].mxu0 %vm613_vm2, %v18777_v40  ;;  %15575 = vmatprep.mubr.msk.bf16.mxu1 %vm613_vm2, %v388_v43  ;;  %v300_v40 = vld [vmem:[%s18253_s29 + $0x2e0] sm:$0xff]  ;;  %v400_v43 = vpack.c.bf16 %v319_v47, %v318_v24  ;;  %v337_v24 = vld [vmem:[%s18253_s29 + $0x450] sm:$0xff] }
 0x199   : > { %16013 = vmatprep.mubr.msk.bf16.mxu0 %vm613_vm2, %v18779_v41  ;;  %v302_v41 = vld [vmem:[%s18253_s29 + $0x2f8] sm:$0xff]  ;;  %v391_v18 = vpack.c.bf16 %v301_v63, %v300_v40  ;;  %v323_v40 = vld [vmem:[%s18253_s29 + $0x3c8] sm:$0xff] }
 0x19a   : > { %v13673_v63 = vld [vmem:[%s18253_s29 + $0xca] sm:$0xff]  ;;  %v13687_v47 = vld [vmem:[%s18253_s29 + $0x152] sm:$0xff] }
 0x19f   : > { %15576 = vmatmul.mubr.msk.bf16.gmra.mrb[68].mxu1 %vm613_vm2, %v389_v4  ;;  %v13672_v4 = vld [vmem:[%s18253_s29 + $0xba] sm:$0xff] }
 0x1a0   : > { %16014 = vmatmul.mubr.msk.bf16.gmra.mrb[116].mxu0 %vm613_vm2, %v18793_v50  ;;  %15579 = vmatprep.mubr.msk.bf16.mxu1 %vm613_vm2, %v390_v59  ;;  %v392_v50 = vpack.c.bf16 %v303_v61, %v302_v41  ;;  %v322_v59 = vld [vmem:[%s18253_s29 + $0x3c0] sm:$0xff]  ;;  %v13674_v41 = vld [vmem:[%s18253_s29 + $0xd2] sm:$0xff]  ;;  %v401_v61 = vpack.c.bf16 %v321_v46, %v320_v2  ;;  %v19099_v0 = vpack.c.bf16 %v13672_v4, %v13671_v29 }
 0x1a1   : > { %16017 = vmatprep.mubr.msk.bf16.mxu0 %vm613_vm2, %v18795_v55  ;;  %v305_v55 = vld [vmem:[%s18253_s29 + $0x310] sm:$0xff]  ;;  %v402_v45 = vpack.c.bf16 %v323_v40, %v322_v59  ;;  %v409_v46 = vpack.c.bf16 %v337_v24, %v336_v51  ;;  %v19171_v29 = vpack.c.bf16 %v13688_v16, %v13687_v47  ;;  %v352_v24 = vld [vmem:[%s18253_s29 + $0x4e8] sm:$0xff] }
 0x1a2   : > { %v13690_v2 = vld [vmem:[%s18253_s29 + $0x172] sm:$0xff] }
 0x1a3   : > { %v340_v40 = vld [vmem:[%s18253_s29 + $0x470] sm:$0xff] }
 0x1a4   : > { %v353_v47 = vld [vmem:[%s18253_s29 + $0x4f0] sm:$0xff] }
 0x1a5   : > { %v13703_v16 = vld [vmem:[%s18253_s29 + $0x1f2] sm:$0xff] }
 0x1a7   : > { %15580 = vmatmul.mubr.msk.bf16.gmra.mrb[72].mxu1 %vm613_vm2, %v391_v18  ;;  %v19101_v18 = vpack.c.bf16 %v13674_v41, %v13673_v63  ;;  %v341_v63 = vld [vmem:[%s18253_s29 + $0x478] sm:$0xff] }
 0x1a8   : > { %16018 = vmatmul.mubr.msk.bf16.gmra.mrb[120].mxu0 %vm613_vm2, %v18809_v25  ;;  %15583 = vmatprep.mubr.msk.bf16.mxu1 %vm613_vm2, %v392_v50  ;;  %v393_v25 = vpack.c.bf16 %v305_v55, %v304_v14  ;;  %v324_v50 = vld [vmem:[%s18253_s29 + $0x3d0] sm:$0xff]  ;;  %v13675_v14 = vld [vmem:[%s18253_s29 + $0xda] sm:$0xff]  ;;  %v13676_v55 = vld [vmem:[%s18253_s29 + $0xe2] sm:$0xff] }
 0x1a9   : > { %16021 = vmatprep.mubr.msk.bf16.mxu0 %vm613_vm2, %v4413_v48  ;;  %v325_v48 = vld [vmem:[%s18253_s29 + $0x3d8] sm:$0xff]  ;;  %v19117_v17 = vpack.c.bf16 %v13676_v55, %v13675_v14  ;;  %v411_v55 = vpack.c.bf16 %v341_v63, %v340_v40 }
 0x1aa   : > { %v403_v3 = vpack.c.bf16 %v325_v48, %v324_v50  ;;  %v13691_v41 = vld [vmem:[%s18253_s29 + $0x17a] sm:$0xff]  ;;  %v343_v50 = vld [vmem:[%s18253_s29 + $0x490] sm:$0xff] }
 0x1ab   : > { %v13693_v48 = vld [vmem:[%s18253_s29 + $0x192] sm:$0xff]  ;;  %v13694_v14 = vld [vmem:[%s18253_s29 + $0x19a] sm:$0xff] }
 0x1af   : > { %15584 = vmatmul.mubr.msk.bf16.gmra.mrb[76].mxu1 %vm613_vm2, %v393_v25  ;;  %v404_v25 = vpack.c.bf16 %v327_v15, %v326_v20 }
 0x1b0   : > { %16022 = vmatmul.mubr.msk.bf16.gmra.mrb[124].mxu0 %vm613_vm2, %v4414_v33  ;;  %15587 = vmatprep.mubr.msk.bf16.mxu1 %vm613_vm2, %v394_v22  ;;  %v19119_v33 = vpack.c.bf16 %v13678_v11, %v13677_v9  ;;  %v328_v22 = vld [vmem:[%s18253_s29 + $0x3f8] sm:$0xff]  ;;  %v19191_v9 = vpack.c.bf16 %v13694_v14, %v13693_v48  ;;  %v13708_v48 = vld [vmem:[%s18253_s29 + $0x222] sm:$0xff] }
 0x1b1   : > { %16027 = vmatprep.mubr.msk.bf16.mxu0 %vm613_vm2, %v19029_v10  ;;  %v405_v53 = vpack.c.bf16 %v329_v39, %v328_v22  ;;  %v344_v11 = vld [vmem:[%s18253_s29 + $0x498] sm:$0xff]  ;;  %v13696_v22 = vld [vmem:[%s18253_s29 + $0x1aa] sm:$0xff] }
 0x1b2   : > { %v346_v39 = vld [vmem:[%s18253_s29 + $0x4b0] sm:$0xff] }
 0x1b3   : > { %v13709_v14 = vld [vmem:[%s18253_s29 + $0x232] sm:$0xff] }
 0x1b7   : > { %15588 = vmatmul.mubr.msk.bf16.gmra.mrb[80].mxu1 %vm613_vm2, %v395_v42  ;;  %v19135_v42 = vpack.c.bf16 %v13680_v30, %v13679_v21  ;;  %v347_v21 = vld [vmem:[%s18253_s29 + $0x4b8] sm:$0xff] }
 0x1b8   : > { %16028 = vmatmul.mubr.msk.bf16.vlgmr.msra.gmra.mrb[0].mxu0 %vm613_vm2, %v19044_v34  ;;  %15591 = vmatprep.mubr.msk.bf16.mxu1 %vm613_vm2, %v396_v44  ;;  %v406_v44 = vpack.c.bf16 %v331_v32, %v330_v31  ;;  %v13697_v30 = vld [vmem:[%s18253_s29 + $0x1ba] sm:$0xff]  ;;  %v13698_v31 = vld [vmem:[%s18253_s29 + $0x1c2] sm:$0xff]  ;;  %v414_v36 = vpack.c.bf16 %v347_v21, %v346_v39 }
 0x1b9   : > { %16156 = vmatpush3.bf16.msra.mxu0 %v18866_v23  ;;  %16031 = vmatprep.mubr.msk.bf16.mxu0 %vm613_vm2, %v19046_v56  ;;  %v316_v23 = vld [vmem:[%s18253_s29 + $0x380] sm:$0xff] }
 0x1ba   : > { %v399_v27 = vpack.c.bf16 %v317_v19, %v316_v23  ;;  %v19153_v23 = vpack.c.bf16 %v13684_v60, %v13683_v58  ;;  %v408_v19 = vpack.c.bf16 %v335_v62, %v334_v37  ;;  %v13700_v58 = vld [vmem:[%s18253_s29 + $0x1d2] sm:$0xff]  ;;  %v351_v37 = vld [vmem:[%s18253_s29 + $0x4e0] sm:$0xff] }
 0x1bb   : > { %v350_v60 = vld [vmem:[%s18253_s29 + $0x4d8] sm:$0xff]  ;;  %v13701_v62 = vld [vmem:[%s18253_s29 + $0x1e2] sm:$0xff] }
 0x1bc   : > { %v13713_v39 = vld [vmem:[%s18253_s29 + $0x25a] sm:$0xff]  ;;  %v13714_v21 = vld [vmem:[%s18253_s29 + $0x262] sm:$0xff] }
 0x1bf   : > { %15592 = vmatmul.mubr.msk.bf16.gmra.mrb[84].mxu1 %vm613_vm2, %v397_v7  ;;  %v13686_v7 = vld [vmem:[%s18253_s29 + $0x14a] sm:$0xff] }
 0x1c0   : > { %16032 = vmatmul.mubr.msk.bf16.gmra.mrb[4].mxu0 %vm613_vm2, %v19063_v52  ;;  %15595 = vmatprep.mubr.msk.bf16.mxu1 %vm613_vm2, %v398_v13  ;;  %v407_v13 = vpack.c.bf16 %v333_v57, %v332_v35  ;;  %v19155_v54 = vpack.c.bf16 %v13686_v7, %v13685_v8  ;;  %v349_v35 = vld [vmem:[%s18253_s29 + $0x4c8] sm:$0xff] }
 0x1c1   : > { %16035 = vmatprep.mubr.msk.bf16.mxu0 %vm613_vm2, %v19065_v12  ;;  %v13699_v57 = vld [vmem:[%s18253_s29 + $0x1ca] sm:$0xff] }
 0x1c2   : > { %v13702_v8 = vld [vmem:[%s18253_s29 + $0x1ea] sm:$0xff] }
 0x1c3   : > { %v19227_v51 = vpack.c.bf16 %v13702_v8, %v13701_v62  ;;  %v14171_v62 = vld [vmem:[%s21484_s1 + $0xe] sm:$0x3]  ;;  %v13726_v8 = vld [vmem:[%s18253_s29 + $0x2da] sm:$0xff] }
 0x1c7   : > { %15596 = vmatmul.mubr.msk.bf16.gmra.mrb[88].mxu1 %vm613_vm2, %v399_v27  ;;  %v339_v27 = vld [vmem:[%s18253_s29 + $0x468] sm:$0xff] }
 0x1c8   : > { %16036 = vmatmul.mubr.msk.bf16.gmra.mrb[8].mxu0 %vm613_vm2, %v19081_v26  ;;  %15599 = vmatprep.mubr.msk.bf16.mxu1 %vm613_vm2, %v400_v43  ;;  %v13689_v43 = vld [vmem:[%s18253_s29 + $0x16a] sm:$0xff]  ;;  %v410_v4 = vpack.c.bf16 %v339_v27, %v338_v49  ;;  %v13704_v49 = vld [vmem:[%s18253_s29 + $0x1fa] sm:$0xff]  ;;  %v2098_v27 = vld [vmem:[%s18253_s29 + $0x2] sm:$0xff] }
 0x1c9   : > { %16039 = vmatprep.mubr.msk.bf16.mxu0 %vm613_vm2, %v19083_v28  ;;  %v19173_v59 = vpack.c.bf16 %v13690_v2, %v13689_v43  ;;  %v2099_v43 = vld [vmem:[%s18253_s29 + $0xa] sm:$0xff]  ;;  %v19243_v40 = vpack.c.bf16 %v13704_v49, %v13703_v16  ;;  %v13729_v16 = vld [vmem:[%s18253_s29 + $0x2fa] sm:$0xff]  ;;  %v13730_v49 = vld [vmem:[%s18253_s29 + $0x302] sm:$0xff] }
 0x1ca   : > { %v13705_v2 = vld [vmem:[%s18253_s29 + $0x20a] sm:$0xff]  ;;  %v2226_v63 = vpack.c.bf16 %v2099_v43, %v2098_v27  ;;  %v19348_v43 = vpack.c.bf16 %v13730_v49, %v13729_v16 }
 0x1cf   : > { %15600 = vmatmul.mubr.msk.bf16.gmra.mrb[92].mxu1 %vm613_vm2, %v401_v61  ;;  %v13692_v61 = vld [vmem:[%s18253_s29 + $0x182] sm:$0xff] }
 0x1d0   : > { %16040 = vmatmul.mubr.msk.bf16.gmra.mrb[12].mxu0 %vm613_vm2, %v19099_v0  ;;  %15603 = vmatprep.mubr.msk.bf16.mxu1 %vm613_vm2, %v402_v45  ;;  %v342_v45 = vld [vmem:[%s18253_s29 + $0x488] sm:$0xff]  ;;  %v19189_v20 = vpack.c.bf16 %v13692_v61, %v13691_v41  ;;  %v2100_v61 = vld [vmem:[%s18253_s29 + $0x12] sm:$0xff] }
 0x1d1   : > { %16043 = vmatprep.mubr.msk.bf16.mxu0 %vm613_vm2, %v19101_v18  ;;  %v412_v15 = vpack.c.bf16 %v343_v50, %v342_v45  ;;  %v2101_v45 = vld [vmem:[%s18253_s29 + $0x1a] sm:$0xff] }
 0x1d2   : > { %v13707_v50 = vld [vmem:[%s18253_s29 + $0x21a] sm:$0xff] }
 0x1d7   : > { %15604 = vmatmul.mubr.msk.bf16.gmra.mrb[96].mxu1 %vm613_vm2, %v403_v3  ;;  %v345_v3 = vld [vmem:[%s18253_s29 + $0x4a0] sm:$0xff] }
 0x1d8   : > { %16044 = vmatmul.mubr.msk.bf16.gmra.mrb[16].mxu0 %vm613_vm2, %v19117_v17  ;;  %15607 = vmatprep.mubr.msk.bf16.mxu1 %vm613_vm2, %v404_v25  ;;  %v13695_v25 = vld [vmem:[%s18253_s29 + $0x1a2] sm:$0xff]  ;;  %v413_v32 = vpack.c.bf16 %v345_v3, %v344_v11  ;;  %v19259_v11 = vpack.c.bf16 %v13708_v48, %v13707_v50 }
 0x1d9   : > { %16047 = vmatprep.mubr.msk.bf16.mxu0 %vm613_vm2, %v19119_v33  ;;  %v19207_v1 = vpack.c.bf16 %v13696_v22, %v13695_v25  ;;  %v13711_v25 = vld [vmem:[%s18253_s29 + $0x242] sm:$0xff]  ;;  %v13712_v22 = vld [vmem:[%s18253_s29 + $0x24a] sm:$0xff] }
 0x1df   : > { %15608 = vmatmul.mubr.msk.bf16.gmra.mrb[100].mxu1 %vm613_vm2, %v405_v53  ;;  %v19209_v53 = vpack.c.bf16 %v13698_v31, %v13697_v30  ;;  %v19275_v30 = vpack.c.bf16 %v13712_v22, %v13711_v25  ;;  %v19277_v31 = vpack.c.bf16 %v13714_v21, %v13713_v39  ;;  %v13745_v22 = vld [vmem:[%s18253_s29 + $0x39a] sm:$0xff]  ;;  %v13746_v39 = vld [vmem:[%s18253_s29 + $0x3a2] sm:$0xff] }
 0x1e0   : > { %16048 = vmatmul.mubr.msk.bf16.gmra.mrb[20].mxu0 %vm613_vm2, %v19135_v42  ;;  %15611 = vmatprep.mubr.msk.bf16.mxu1 %vm613_vm2, %v406_v44  ;;  %v348_v44 = vld [vmem:[%s18253_s29 + $0x4c0] sm:$0xff] }
 0x1e1   : > { %16051 = vmatprep.mubr.msk.bf16.mxu0 %vm613_vm2, %v19137_v38  ;;  %v415_v7 = vpack.c.bf16 %v349_v35, %v348_v44 }
 0x1e7   : > { %15612 = vmatmul.mubr.msk.bf16.gmra.mrb[104].mxu1 %vm613_vm2, %v407_v13  ;;  %v19225_v13 = vpack.c.bf16 %v13700_v58, %v13699_v57  ;;  %v13721_v57 = vld [vmem:[%s18253_s29 + $0x2aa] sm:$0xff]  ;;  %v13722_v58 = vld [vmem:[%s18253_s29 + $0x2b2] sm:$0xff] }
 0x1e8   : > { %16052 = vmatmul.mubr.msk.bf16.gmra.mrb[24].mxu0 %vm613_vm2, %v19153_v23  ;;  %15615 = vmatprep.mubr.msk.bf16.mxu1 %vm613_vm2, %v408_v19  ;;  %v416_v19 = vpack.c.bf16 %v351_v37, %v350_v60  ;;  %v19309_v37 = vpack.c.bf16 %v13722_v58, %v13721_v57  ;;  %v13754_v57 = vld [vmem:[%s18253_s29 + $0x3f2] sm:$0xff] }
 0x1e9   : > { %16055 = vmatprep.mubr.msk.bf16.mxu0 %vm613_vm2, %v19155_v54 }
 0x1ef   : > { %15616 = vmatmul.mubr.msk.bf16.gmra.mrb[108].mxu1 %vm613_vm2, %v409_v46  ;;  %v13706_v46 = vld [vmem:[%s18253_s29 + $0x212] sm:$0xff] }
 0x1f0   : > { %16056 = vmatmul.mubr.msk.bf16.gmra.mrb[28].mxu0 %vm613_vm2, %v19171_v29  ;;  %15619 = vmatprep.mubr.msk.bf16.mxu1 %vm613_vm2, %v410_v4  ;;  %v417_v4 = vpack.c.bf16 %v353_v47, %v352_v24  ;;  %v19245_v41 = vpack.c.bf16 %v13706_v46, %v13705_v2  ;;  %v13727_v24 = vld [vmem:[%s18253_s29 + $0x2e2] sm:$0xff]  ;;  %v13728_v47 = vld [vmem:[%s18253_s29 + $0x2ea] sm:$0xff] }
 0x1f1   : > { %16059 = vmatprep.mubr.msk.bf16.mxu0 %vm613_vm2, %v19173_v59  ;;  %v19346_v27 = vpack.c.bf16 %v13728_v47, %v13727_v24  ;;  %v13733_v2 = vld [vmem:[%s18253_s29 + $0x322] sm:$0xff]  ;;  %v13734_v46 = vld [vmem:[%s18253_s29 + $0x32a] sm:$0xff]  ;;  %v13761_v24 = vld [vmem:[%s18253_s29 + $0x43a] sm:$0xff] }
 0x1f2   : > { %v13762_v47 = vld [vmem:[%s18253_s29 + $0x442] sm:$0xff] }
 0x1f3   : > { %v19476_v49 = vpack.c.bf16 %v13762_v47, %v13761_v24 }
 0x1f7   : > { %15620 = vmatmul.mubr.msk.bf16.gmra.mrb[112].mxu1 %vm613_vm2, %v411_v55  ;;  %v13710_v55 = vld [vmem:[%s18253_s29 + $0x23a] sm:$0xff] }
 0x1f8   : > { %16060 = vmatmul.mubr.msk.bf16.gmra.mrb[32].mxu0 %vm613_vm2, %v19189_v20  ;;  %15623 = vmatprep.mubr.msk.bf16.mxu1 %vm613_vm2, %v412_v15  ;;  %v2227_v15 = vpack.c.bf16 %v2101_v45, %v2100_v61  ;;  %v19261_v3 = vpack.c.bf16 %v13710_v55, %v13709_v14  ;;  %v13737_v61 = vld [vmem:[%s18253_s29 + $0x34a] sm:$0xff]  ;;  %v13738_v45 = vld [vmem:[%s18253_s29 + $0x352] sm:$0xff]  ;;  %v13742_v55 = vld [vmem:[%s18253_s29 + $0x37a] sm:$0xff] }
 0x1f9   : > { %16063 = vmatprep.mubr.msk.bf16.mxu0 %vm613_vm2, %v19191_v9  ;;  %v19380_v48 = vpack.c.bf16 %v13738_v45, %v13737_v61  ;;  %v13741_v14 = vld [vmem:[%s18253_s29 + $0x372] sm:$0xff] }
 0x1fa   : > { %v19396_v25 = vpack.c.bf16 %v13742_v55, %v13741_v14 }
 0x1ff   : > { %15624 = vmatmul.mubr.msk.bf16.gmra.mrb[116].mxu1 %vm613_vm2, %v413_v32  ;;  %v13717_v32 = vld [vmem:[%s18253_s29 + $0x282] sm:$0xff] }
 0x200   : > { %16064 = vmatmul.mubr.msk.bf16.gmra.mrb[36].mxu0 %vm613_vm2, %v19207_v1  ;;  %15627 = vmatprep.mubr.msk.bf16.mxu1 %vm613_vm2, %v414_v36  ;;  %v13718_v36 = vld [vmem:[%s18253_s29 + $0x28a] sm:$0xff] }
 0x201   : > { %16067 = vmatprep.mubr.msk.bf16.mxu0 %vm613_vm2, %v19209_v53  ;;  %v19293_v35 = vpack.c.bf16 %v13718_v36, %v13717_v32  ;;  %v13750_v32 = vld [vmem:[%s18253_s29 + $0x3ca] sm:$0xff] }
 0x207   : > { %15628 = vmatmul.mubr.msk.bf16.gmra.mrb[120].mxu1 %vm613_vm2, %v415_v7  ;;  %v19327_v7 = vand.u32 %v14171_v62, %v18238_v5  ;;  %v13758_v62 = vld [vmem:[%s18253_s29 + $0x41a] sm:$0xff] }
 0x208   : > { %16068 = vmatmul.mubr.msk.bf16.gmra.mrb[40].mxu0 %vm613_vm2, %v19225_v13  ;;  %15631 = vmatprep.mubr.msk.bf16.mxu1 %vm613_vm2, %v416_v19 }
 0x209   : > { %16071 = vmatprep.mubr.msk.bf16.mxu0 %vm613_vm2, %v19227_v51  ;;  %16285 = vmatprep.subr.bf16.mxu0 %v19327_v7 }
 0x20f   : > { %15632 = vmatmul.mubr.msk.bf16.gmra.mrb[124].mxu1 %vm613_vm2, %v417_v4 }
 0x210   : > { %16072 = vmatmul.mubr.msk.bf16.gmra.mrb[44].mxu0 %vm613_vm2, %v19243_v40  ;;  %15637 = vmatprep.mubr.msk.bf16.mxu1 %vm613_vm2, %v2226_v63  ;;  %v19364_v63 = vpack.c.bf16 %v13734_v46, %v13733_v2 }
 0x211   : > { %16075 = vmatprep.mubr.msk.bf16.mxu0 %vm613_vm2, %v19245_v41 }
 0x217   : > { %15638 = vmatmul.mubr.msk.bf16.vlgmr.msra.gmra.mrb[0].mxu1 %vm613_vm2, %v2227_v15 }
 0x218   : > { %16076 = vmatmul.mubr.msk.bf16.gmra.mrb[48].mxu0 %vm613_vm2, %v19259_v11  ;;  %15641 = vmatprep.mubr.msk.bf16.mxu1 %vm613_vm2, %v19029_v10  ;;  %v13716_v10 = vld [vmem:[%s18253_s29 + $0x272] sm:$0xff] }
 0x219   : > { %16079 = vmatprep.mubr.msk.bf16.mxu0 %vm613_vm2, %v19261_v3  ;;  %16870 = vmatpush3.bf16.msra.mxu1 %v18243_v6  ;;  %v13715_v6 = vld [vmem:[%s18253_s29 + $0x26a] sm:$0xff] }
 0x21a   : > { %v19291_v44 = vpack.c.bf16 %v13716_v10, %v13715_v6  ;;  %v19412_v6 = vpack.c.bf16 %v13746_v39, %v13745_v22  ;;  %v13749_v10 = vld [vmem:[%s18253_s29 + $0x3c2] sm:$0xff] }
 0x21f   : > { %15642 = vmatmul.mubr.msk.bf16.gmra.mrb[4].mxu1 %vm613_vm2, %v19044_v34  ;;  %v13719_v34 = vld [vmem:[%s18253_s29 + $0x292] sm:$0xff] }
 0x220   : > { %16080 = vmatmul.mubr.msk.bf16.gmra.mrb[52].mxu0 %vm613_vm2, %v19275_v30  ;;  %15645 = vmatprep.mubr.msk.bf16.mxu1 %vm613_vm2, %v19046_v56  ;;  %v13720_v56 = vld [vmem:[%s18253_s29 + $0x29a] sm:$0xff] }
 0x221   : > { %16083 = vmatprep.mubr.msk.bf16.mxu0 %vm613_vm2, %v19277_v31  ;;  %v19307_v60 = vpack.c.bf16 %v13720_v56, %v13719_v34  ;;  %v19428_v34 = vpack.c.bf16 %v13750_v32, %v13749_v10  ;;  %v13753_v56 = vld [vmem:[%s18253_s29 + $0x3ea] sm:$0xff] }
 0x227   : > { %15646 = vmatmul.mubr.msk.bf16.gmra.mrb[8].mxu1 %vm613_vm2, %v19063_v52  ;;  %v13723_v52 = vld [vmem:[%s18253_s29 + $0x2ba] sm:$0xff] }
 0x228   : > { %16084 = vmatmul.mubr.msk.bf16.gmra.mrb[56].mxu0 %vm613_vm2, %v19291_v44  ;;  %15649 = vmatprep.mubr.msk.bf16.mxu1 %vm613_vm2, %v19065_v12  ;;  %v13724_v12 = vld [vmem:[%s18253_s29 + $0x2c2] sm:$0xff] }
 0x229   : > { %16087 = vmatprep.mubr.msk.bf16.mxu0 %vm613_vm2, %v19293_v35  ;;  %v19329_v19 = vpack.c.bf16 %v13724_v12, %v13723_v52  ;;  %v19444_v52 = vpack.c.bf16 %v13754_v57, %v13753_v56  ;;  %v13757_v12 = vld [vmem:[%s18253_s29 + $0x412] sm:$0xff] }
 0x22f   : > { %15650 = vmatmul.mubr.msk.bf16.gmra.mrb[12].mxu1 %vm613_vm2, %v19081_v26  ;;  %v13725_v26 = vld [vmem:[%s18253_s29 + $0x2d2] sm:$0xff] }
 0x230   : > { %16088 = vmatmul.mubr.msk.bf16.gmra.mrb[60].mxu0 %vm613_vm2, %v19307_v60  ;;  %15653 = vmatprep.mubr.msk.bf16.mxu1 %vm613_vm2, %v19083_v28  ;;  %v19332_v28 = vpack.c.bf16 %v13726_v8, %v13725_v26  ;;  %v19460_v8 = vpack.c.bf16 %v13758_v62, %v13757_v12 }
 0x231   : > { %16091 = vmatprep.mubr.msk.bf16.mxu0 %vm613_vm2, %v19309_v37 }
 0x237   : > { %15654 = vmatmul.mubr.msk.bf16.gmra.mrb[16].mxu1 %vm613_vm2, %v19099_v0  ;;  %v13731_v0 = vld [vmem:[%s18253_s29 + $0x30a] sm:$0xff] }
 0x238   : > { %16092 = vmatmul.mubr.msk.bf16.gmra.mrb[64].mxu0 %vm613_vm2, %v19329_v19  ;;  %15657 = vmatprep.mubr.msk.bf16.mxu1 %vm613_vm2, %v19101_v18  ;;  %v13732_v18 = vld [vmem:[%s18253_s29 + $0x312] sm:$0xff] }
 0x239   : > { %16095 = vmatprep.mubr.msk.bf16.mxu0 %vm613_vm2, %v19332_v28  ;;  %v19362_v4 = vpack.c.bf16 %v13732_v18, %v13731_v0  ;;  %v13765_v0 = vld [vmem:[%s18253_s29 + $0x462] sm:$0xff]  ;;  %v13766_v18 = vld [vmem:[%s18253_s29 + $0x46a] sm:$0xff] }
 0x23a   : > { %v19492_v46 = vpack.c.bf16 %v13766_v18, %v13765_v0  ;;  %v13866_v18 = vld [vmem:[%s18253_s29 + $0xf0] sm:$0xff] }
 0x23f   : > { %15658 = vmatmul.mubr.msk.bf16.gmra.mrb[20].mxu1 %vm613_vm2, %v19117_v17  ;;  %v13735_v17 = vld [vmem:[%s18253_s29 + $0x332] sm:$0xff] }
 0x240   : > { %16096 = vmatmul.mubr.msk.bf16.gmra.mrb[68].mxu0 %vm613_vm2, %v19346_v27  ;;  %15661 = vmatprep.mubr.msk.bf16.mxu1 %vm613_vm2, %v19119_v33  ;;  %v13736_v33 = vld [vmem:[%s18253_s29 + $0x33a] sm:$0xff] }
 0x241   : > { %16099 = vmatprep.mubr.msk.bf16.mxu0 %vm613_vm2, %v19348_v43  ;;  %v19378_v50 = vpack.c.bf16 %v13736_v33, %v13735_v17  ;;  %v13769_v17 = vld [vmem:[%s18253_s29 + $0x48a] sm:$0xff]  ;;  %v13770_v33 = vld [vmem:[%s18253_s29 + $0x492] sm:$0xff] }
 0x242   : > { %v19508_v45 = vpack.c.bf16 %v13770_v33, %v13769_v17  ;;  %v13870_v33 = vld [vmem:[%s18253_s29 + $0x118] sm:$0xff] }
 0x247   : > { %15662 = vmatmul.mubr.msk.bf16.gmra.mrb[24].mxu1 %vm613_vm2, %v19135_v42  ;;  %v13739_v42 = vld [vmem:[%s18253_s29 + $0x35a] sm:$0xff] }
 0x248   : > { %16100 = vmatmul.mubr.msk.bf16.gmra.mrb[72].mxu0 %vm613_vm2, %v19362_v4  ;;  %15665 = vmatprep.mubr.msk.bf16.mxu1 %vm613_vm2, %v19137_v38  ;;  %v13740_v38 = vld [vmem:[%s18253_s29 + $0x362] sm:$0xff] }
 0x249   : > { %16103 = vmatprep.mubr.msk.bf16.mxu0 %vm613_vm2, %v19364_v63  ;;  %v19394_v15 = vpack.c.bf16 %v13740_v38, %v13739_v42  ;;  %v13773_v42 = vld [vmem:[%s18253_s29 + $0x4b2] sm:$0xff]  ;;  %v13774_v38 = vld [vmem:[%s18253_s29 + $0x4ba] sm:$0xff] }
 0x24a   : > { %v19524_v55 = vpack.c.bf16 %v13774_v38, %v13773_v42  ;;  %v13874_v38 = vld [vmem:[%s18253_s29 + $0x140] sm:$0xff] }
 0x24f   : > { %15666 = vmatmul.mubr.msk.bf16.gmra.mrb[28].mxu1 %vm613_vm2, %v19153_v23  ;;  %v13743_v23 = vld [vmem:[%s18253_s29 + $0x382] sm:$0xff] }
 0x250   : > { %16104 = vmatmul.mubr.msk.bf16.gmra.mrb[76].mxu0 %vm613_vm2, %v19378_v50  ;;  %15669 = vmatprep.mubr.msk.bf16.mxu1 %vm613_vm2, %v19155_v54  ;;  %v13744_v54 = vld [vmem:[%s18253_s29 + $0x38a] sm:$0xff] }
 0x251   : > { %16107 = vmatprep.mubr.msk.bf16.mxu0 %vm613_vm2, %v19380_v48  ;;  %v19410_v21 = vpack.c.bf16 %v13744_v54, %v13743_v23  ;;  %v13777_v23 = vld [vmem:[%s18253_s29 + $0x4da] sm:$0xff]  ;;  %v13778_v54 = vld [vmem:[%s18253_s29 + $0x4e2] sm:$0xff] }
 0x252   : > { %v19540_v39 = vpack.c.bf16 %v13778_v54, %v13777_v23  ;;  %v13878_v54 = vld [vmem:[%s18253_s29 + $0x168] sm:$0xff] }
 0x257   : > { %15670 = vmatmul.mubr.msk.bf16.gmra.mrb[32].mxu1 %vm613_vm2, %v19171_v29  ;;  %v13747_v29 = vld [vmem:[%s18253_s29 + $0x3aa] sm:$0xff] }
 0x258   : > { %16108 = vmatmul.mubr.msk.bf16.gmra.mrb[80].mxu0 %vm613_vm2, %v19394_v15  ;;  %15673 = vmatprep.mubr.msk.bf16.mxu1 %vm613_vm2, %v19173_v59  ;;  %v13748_v59 = vld [vmem:[%s18253_s29 + $0x3b2] sm:$0xff] }
 0x259   : > { %16111 = vmatprep.mubr.msk.bf16.mxu0 %vm613_vm2, %v19396_v25  ;;  %v19426_v36 = vpack.c.bf16 %v13748_v59, %v13747_v29  ;;  %v13781_v29 = vld [vmem:[%s18253_s29 + $0x502] sm:$0xff]  ;;  %v13782_v59 = vld [vmem:[%s18253_s29 + $0x50a] sm:$0xff] }
 0x25a   : > { %v5475_v32 = vpack.c.bf16 %v13782_v59, %v13781_v29  ;;  %v13882_v59 = vld [vmem:[%s18253_s29 + $0x190] sm:$0xff] }
 0x25f   : > { %15674 = vmatmul.mubr.msk.bf16.gmra.mrb[36].mxu1 %vm613_vm2, %v19189_v20  ;;  %v13751_v20 = vld [vmem:[%s18253_s29 + $0x3d2] sm:$0xff] }
 0x260   : > { %16112 = vmatmul.mubr.msk.bf16.gmra.mrb[84].mxu0 %vm613_vm2, %v19410_v21  ;;  %15677 = vmatprep.mubr.msk.bf16.mxu1 %vm613_vm2, %v19191_v9  ;;  %v13752_v9 = vld [vmem:[%s18253_s29 + $0x3da] sm:$0xff] }
 0x261   : > { %16115 = vmatprep.mubr.msk.bf16.mxu0 %vm613_vm2, %v19412_v6  ;;  %v19442_v58 = vpack.c.bf16 %v13752_v9, %v13751_v20  ;;  %v13850_v20 = vld [vmem:[%s18253_s29 + $0x50] sm:$0xff]  ;;  %v13851_v9 = vld [vmem:[%s18253_s29 + $0x58] sm:$0xff] }
 0x262   : > { %v6476_v57 = vpack.c.bf16 %v13851_v9, %v13850_v20 }
 0x267   : > { %15678 = vmatmul.mubr.msk.bf16.gmra.mrb[40].mxu1 %vm613_vm2, %v19207_v1  ;;  %v13755_v1 = vld [vmem:[%s18253_s29 + $0x3fa] sm:$0xff] }
 0x268   : > { %16116 = vmatmul.mubr.msk.bf16.gmra.mrb[88].mxu0 %vm613_vm2, %v19426_v36  ;;  %15681 = vmatprep.mubr.msk.bf16.mxu1 %vm613_vm2, %v19209_v53  ;;  %v13756_v53 = vld [vmem:[%s18253_s29 + $0x402] sm:$0xff] }
 0x269   : > { %16119 = vmatprep.mubr.msk.bf16.mxu0 %vm613_vm2, %v19428_v34  ;;  %v19458_v26 = vpack.c.bf16 %v13756_v53, %v13755_v1  ;;  %v13854_v1 = vld [vmem:[%s18253_s29 + $0x78] sm:$0xff]  ;;  %v13855_v53 = vld [vmem:[%s18253_s29 + $0x80] sm:$0xff] }
 0x26a   : > { %v6478_v62 = vpack.c.bf16 %v13855_v53, %v13854_v1 }
 0x26f   : > { %15682 = vmatmul.mubr.msk.bf16.gmra.mrb[44].mxu1 %vm613_vm2, %v19225_v13  ;;  %v13759_v13 = vld [vmem:[%s18253_s29 + $0x422] sm:$0xff] }
 0x270   : > { %16120 = vmatmul.mubr.msk.bf16.gmra.mrb[92].mxu0 %vm613_vm2, %v19442_v58  ;;  %15685 = vmatprep.mubr.msk.bf16.mxu1 %vm613_vm2, %v19227_v51  ;;  %v13760_v51 = vld [vmem:[%s18253_s29 + $0x42a] sm:$0xff] }
 0x271   : > { %16123 = vmatprep.mubr.msk.bf16.mxu0 %vm613_vm2, %v19444_v52  ;;  %v19474_v16 = vpack.c.bf16 %v13760_v51, %v13759_v13  ;;  %v13858_v13 = vld [vmem:[%s18253_s29 + $0xa0] sm:$0xff]  ;;  %v13859_v51 = vld [vmem:[%s18253_s29 + $0xa8] sm:$0xff] }
 0x272   : > { %v6480_v47 = vpack.c.bf16 %v13859_v51, %v13858_v13  ;;  %v13890_v13 = vld [vmem:[%s18253_s29 + $0x1e0] sm:$0xff]  ;;  %v13891_v51 = vld [vmem:[%s18253_s29 + $0x1e8] sm:$0xff] }
 0x277   : > { %15686 = vmatmul.mubr.msk.bf16.gmra.mrb[48].mxu1 %vm613_vm2, %v19243_v40  ;;  %v13763_v40 = vld [vmem:[%s18253_s29 + $0x44a] sm:$0xff] }
 0x278   : > { %16124 = vmatmul.mubr.msk.bf16.gmra.mrb[96].mxu0 %vm613_vm2, %v19458_v26  ;;  %15689 = vmatprep.mubr.msk.bf16.mxu1 %vm613_vm2, %v19245_v41  ;;  %v13764_v41 = vld [vmem:[%s18253_s29 + $0x452] sm:$0xff] }
 0x279   : > { %16127 = vmatprep.mubr.msk.bf16.mxu0 %vm613_vm2, %v19460_v8  ;;  %v19490_v2 = vpack.c.bf16 %v13764_v41, %v13763_v40  ;;  %v13863_v40 = vld [vmem:[%s18253_s29 + $0xd0] sm:$0xff] }
 0x27f   : > { %15690 = vmatmul.mubr.msk.bf16.gmra.mrb[52].mxu1 %vm613_vm2, %v19259_v11  ;;  %v13767_v11 = vld [vmem:[%s18253_s29 + $0x472] sm:$0xff] }
 0x280   : > { %16128 = vmatmul.mubr.msk.bf16.gmra.mrb[100].mxu0 %vm613_vm2, %v19474_v16  ;;  %15693 = vmatprep.mubr.msk.bf16.mxu1 %vm613_vm2, %v19261_v3  ;;  %v13768_v3 = vld [vmem:[%s18253_s29 + $0x47a] sm:$0xff] }
 0x281   : > { %16131 = vmatprep.mubr.msk.bf16.mxu0 %vm613_vm2, %v19476_v49  ;;  %v19506_v61 = vpack.c.bf16 %v13768_v3, %v13767_v11  ;;  %v13867_v11 = vld [vmem:[%s18253_s29 + $0xf8] sm:$0xff] }
 0x282   : > { %v6484_v17 = vpack.c.bf16 %v13867_v11, %v13866_v18 }
 0x287   : > { %15694 = vmatmul.mubr.msk.bf16.gmra.mrb[56].mxu1 %vm613_vm2, %v19275_v30  ;;  %v13771_v30 = vld [vmem:[%s18253_s29 + $0x49a] sm:$0xff] }
 0x288   : > { %16132 = vmatmul.mubr.msk.bf16.gmra.mrb[104].mxu0 %vm613_vm2, %v19490_v2  ;;  %15697 = vmatprep.mubr.msk.bf16.mxu1 %vm613_vm2, %v19277_v31  ;;  %v13772_v31 = vld [vmem:[%s18253_s29 + $0x4a2] sm:$0xff] }
 0x289   : > { %16135 = vmatprep.mubr.msk.bf16.mxu0 %vm613_vm2, %v19492_v46  ;;  %v19522_v14 = vpack.c.bf16 %v13772_v31, %v13771_v30  ;;  %v13871_v30 = vld [vmem:[%s18253_s29 + $0x120] sm:$0xff] }
 0x28a   : > { %v6486_v42 = vpack.c.bf16 %v13871_v30, %v13870_v33  ;;  %v13898_v33 = vld [vmem:[%s18253_s29 + $0x230] sm:$0xff]  ;;  %v13899_v30 = vld [vmem:[%s18253_s29 + $0x238] sm:$0xff] }
 0x28f   : > { %15698 = vmatmul.mubr.msk.bf16.gmra.mrb[60].mxu1 %vm613_vm2, %v19291_v44  ;;  %v13775_v44 = vld [vmem:[%s18253_s29 + $0x4c2] sm:$0xff] }
 0x290   : > { %16136 = vmatmul.mubr.msk.bf16.gmra.mrb[108].mxu0 %vm613_vm2, %v19506_v61  ;;  %15701 = vmatprep.mubr.msk.bf16.mxu1 %vm613_vm2, %v19293_v35  ;;  %v13776_v35 = vld [vmem:[%s18253_s29 + $0x4ca] sm:$0xff] }
 0x291   : > { %16139 = vmatprep.mubr.msk.bf16.mxu0 %vm613_vm2, %v19508_v45  ;;  %v19538_v22 = vpack.c.bf16 %v13776_v35, %v13775_v44  ;;  %v13875_v44 = vld [vmem:[%s18253_s29 + $0x148] sm:$0xff] }
 0x292   : > { %v6488_v23 = vpack.c.bf16 %v13875_v44, %v13874_v38  ;;  %v13353_v44 = vld [vmem:[%s18253_s29 + $0x358] sm:$0xff] }
 0x297   : > { %15702 = vmatmul.mubr.msk.bf16.gmra.mrb[64].mxu1 %vm613_vm2, %v19307_v60  ;;  %v13779_v60 = vld [vmem:[%s18253_s29 + $0x4ea] sm:$0xff] }
 0x298   : > { %16140 = vmatmul.mubr.msk.bf16.gmra.mrb[112].mxu0 %vm613_vm2, %v19522_v14  ;;  %15705 = vmatprep.mubr.msk.bf16.mxu1 %vm613_vm2, %v19309_v37  ;;  %v13780_v37 = vld [vmem:[%s18253_s29 + $0x4f2] sm:$0xff] }
 0x299   : > { %16143 = vmatprep.mubr.msk.bf16.mxu0 %vm613_vm2, %v19524_v55  ;;  %v19554_v10 = vpack.c.bf16 %v13780_v37, %v13779_v60  ;;  %v13879_v60 = vld [vmem:[%s18253_s29 + $0x170] sm:$0xff] }
 0x29a   : > { %v6490_v29 = vpack.c.bf16 %v13879_v60, %v13878_v54  ;;  %v13356_v54 = vld [vmem:[%s18253_s29 + $0x378] sm:$0xff] }
 0x29b   : > { %v13902_v60 = vld [vmem:[%s18253_s29 + $0x258] sm:$0xff] }
 0x29f   : > { %15706 = vmatmul.mubr.msk.bf16.gmra.mrb[68].mxu1 %vm613_vm2, %v19329_v19  ;;  %v13783_v19 = vld [vmem:[%s18253_s29 + $0x512] sm:$0xff] }
 0x2a0   : > { %16144 = vmatmul.mubr.msk.bf16.gmra.mrb[116].mxu0 %vm613_vm2, %v19538_v22  ;;  %15709 = vmatprep.mubr.msk.bf16.mxu1 %vm613_vm2, %v19332_v28  ;;  %v13784_v28 = vld [vmem:[%s18253_s29 + $0x51a] sm:$0xff] }
 0x2a1   : > { %16147 = vmatprep.mubr.msk.bf16.mxu0 %vm613_vm2, %v19540_v39  ;;  %v5476_v56 = vpack.c.bf16 %v13784_v28, %v13783_v19 }
 0x2a7   : > { %15710 = vmatmul.mubr.msk.bf16.gmra.mrb[72].mxu1 %vm613_vm2, %v19346_v27  ;;  %v13852_v27 = vld [vmem:[%s18253_s29 + $0x60] sm:$0xff] }
 0x2a8   : > { %16148 = vmatmul.mubr.msk.bf16.gmra.mrb[120].mxu0 %vm613_vm2, %v19554_v10  ;;  %15713 = vmatprep.mubr.msk.bf16.mxu1 %vm613_vm2, %v19348_v43  ;;  %v13853_v43 = vld [vmem:[%s18253_s29 + $0x68] sm:$0xff] }
 0x2a9   : > { %16151 = vmatprep.mubr.msk.bf16.mxu0 %vm613_vm2, %v5475_v32  ;;  %v6477_v12 = vpack.c.bf16 %v13853_v43, %v13852_v27  ;;  %v13883_v32 = vld [vmem:[%s18253_s29 + $0x198] sm:$0xff]  ;;  %v13887_v43 = vld [vmem:[%s18253_s29 + $0x1c0] sm:$0xff] }
 0x2aa   : > { %v6492_v9 = vpack.c.bf16 %v13883_v32, %v13882_v59  ;;  %v13886_v27 = vld [vmem:[%s18253_s29 + $0x1b8] sm:$0xff] }
 0x2af   : > { %15714 = vmatmul.mubr.msk.bf16.gmra.mrb[76].mxu1 %vm613_vm2, %v19362_v4  ;;  %v13856_v4 = vld [vmem:[%s18253_s29 + $0x88] sm:$0xff] }
 0x2b0   : > { %16152 = vmatmul.mubr.msk.bf16.gmra.mrb[124].mxu0 %vm613_vm2, %v5476_v56  ;;  %15717 = vmatprep.mubr.msk.bf16.mxu1 %vm613_vm2, %v19364_v63  ;;  %v13857_v63 = vld [vmem:[%s18253_s29 + $0x90] sm:$0xff] }
 0x2b1   : > { %16157 = vmatprep.mubr.msk.bf16.mxu0 %vm613_vm2, %v6476_v57  ;;  %v6479_v24 = vpack.c.bf16 %v13857_v63, %v13856_v4  ;;  %v13885_v57 = vld [vmem:[%s18253_s29 + $0x1a8] sm:$0xff]  ;;  %v13889_v63 = vld [vmem:[%s18253_s29 + $0x1d0] sm:$0xff] }
 0x2b7   : > { %15718 = vmatmul.mubr.msk.bf16.gmra.mrb[80].mxu1 %vm613_vm2, %v19378_v50  ;;  %v13861_v50 = vld [vmem:[%s18253_s29 + $0xb8] sm:$0xff] }
 0x2b8   : > { %16158 = vmatmul.mubr.msk.bf16.vlgmr.msra.gmra.mrb[0].mxu0 %vm613_vm2, %v6477_v12  ;;  %15721 = vmatprep.mubr.msk.bf16.mxu1 %vm613_vm2, %v19380_v48  ;;  %v13862_v48 = vld [vmem:[%s18253_s29 + $0xc8] sm:$0xff] }
 0x2b9   : > { %16286 = vmatpush3.bf16.msra.mxu0 %v19327_v7  ;;  %16161 = vmatprep.mubr.msk.bf16.mxu0 %vm613_vm2, %v6478_v62  ;;  %v13860_v7 = vld [vmem:[%s18253_s29 + $0xb0] sm:$0xff]  ;;  %v6482_v0 = vpack.c.bf16 %v13863_v40, %v13862_v48  ;;  %v6494_v62 = vpack.c.bf16 %v13887_v43, %v13886_v27  ;;  %v13893_v40 = vld [vmem:[%s18253_s29 + $0x1f8] sm:$0xff]  ;;  %v13904_v27 = vld [vmem:[%s18253_s29 + $0x268] sm:$0xff] }
 0x2ba   : > { %v6481_v41 = vpack.c.bf16 %v13861_v50, %v13860_v7  ;;  %v6496_v50 = vpack.c.bf16 %v13891_v51, %v13890_v13  ;;  %v13905_v43 = vld [vmem:[%s18253_s29 + $0x270] sm:$0xff] }
 0x2bf   : > { %15722 = vmatmul.mubr.msk.bf16.gmra.mrb[84].mxu1 %vm613_vm2, %v19394_v15  ;;  %v13864_v15 = vld [vmem:[%s18253_s29 + $0xd8] sm:$0xff] }
 0x2c0   : > { %16162 = vmatmul.mubr.msk.bf16.gmra.mrb[4].mxu0 %vm613_vm2, %v6479_v24  ;;  %15725 = vmatprep.mubr.msk.bf16.mxu1 %vm613_vm2, %v19396_v25  ;;  %v13865_v25 = vld [vmem:[%s18253_s29 + $0xe0] sm:$0xff] }
 0x2c1   : > { %16165 = vmatprep.mubr.msk.bf16.mxu0 %vm613_vm2, %v6480_v47  ;;  %v6483_v3 = vpack.c.bf16 %v13865_v25, %v13864_v15 }
 0x2c7   : > { %15726 = vmatmul.mubr.msk.bf16.gmra.mrb[88].mxu1 %vm613_vm2, %v19410_v21  ;;  %v13868_v21 = vld [vmem:[%s18253_s29 + $0x100] sm:$0xff] }
 0x2c8   : > { %16166 = vmatmul.mubr.msk.bf16.gmra.mrb[8].mxu0 %vm613_vm2, %v6481_v41  ;;  %15729 = vmatprep.mubr.msk.bf16.mxu1 %vm613_vm2, %v19412_v6  ;;  %v13869_v6 = vld [vmem:[%s18253_s29 + $0x108] sm:$0xff] }
 0x2c9   : > { %16169 = vmatprep.mubr.msk.bf16.mxu0 %vm613_vm2, %v6482_v0  ;;  %v6485_v31 = vpack.c.bf16 %v13869_v6, %v13868_v21  ;;  %v13894_v41 = vld [vmem:[%s18253_s29 + $0x208] sm:$0xff]  ;;  %v13895_v0 = vld [vmem:[%s18253_s29 + $0x210] sm:$0xff] }
 0x2ca   : > { %v6498_v11 = vpack.c.bf16 %v13895_v0, %v13894_v41  ;;  %v13351_v21 = vld [vmem:[%s18253_s29 + $0x348] sm:$0xff]  ;;  %v13352_v6 = vld [vmem:[%s18253_s29 + $0x350] sm:$0xff] }
 0x2cf   : > { %15730 = vmatmul.mubr.msk.bf16.gmra.mrb[92].mxu1 %vm613_vm2, %v19426_v36  ;;  %v13872_v36 = vld [vmem:[%s18253_s29 + $0x128] sm:$0xff] }
 0x2d0   : > { %16170 = vmatmul.mubr.msk.bf16.gmra.mrb[12].mxu0 %vm613_vm2, %v6483_v3  ;;  %15733 = vmatprep.mubr.msk.bf16.mxu1 %vm613_vm2, %v19428_v34  ;;  %v13873_v34 = vld [vmem:[%s18253_s29 + $0x130] sm:$0xff]  ;;  %v13896_v3 = vld [vmem:[%s18253_s29 + $0x218] sm:$0xff] }
 0x2d1   : > { %16173 = vmatprep.mubr.msk.bf16.mxu0 %vm613_vm2, %v6484_v17  ;;  %v6487_v35 = vpack.c.bf16 %v13873_v34, %v13872_v36  ;;  %v13897_v17 = vld [vmem:[%s18253_s29 + $0x220] sm:$0xff]  ;;  %v6500_v34 = vpack.c.bf16 %v13899_v30, %v13898_v33  ;;  %v13910_v33 = vld [vmem:[%s18253_s29 + $0x2a8] sm:$0xff]  ;;  %v13911_v30 = vld [vmem:[%s18253_s29 + $0x2b0] sm:$0xff] }
 0x2d7   : > { %15734 = vmatmul.mubr.msk.bf16.gmra.mrb[96].mxu1 %vm613_vm2, %v19442_v58  ;;  %v13876_v58 = vld [vmem:[%s18253_s29 + $0x150] sm:$0xff] }
 0x2d8   : > { %16174 = vmatmul.mubr.msk.bf16.gmra.mrb[16].mxu0 %vm613_vm2, %v6485_v31  ;;  %15737 = vmatprep.mubr.msk.bf16.mxu1 %vm613_vm2, %v19444_v52  ;;  %v13877_v52 = vld [vmem:[%s18253_s29 + $0x158] sm:$0xff] }
 0x2d9   : > { %16177 = vmatprep.mubr.msk.bf16.mxu0 %vm613_vm2, %v6486_v42  ;;  %v6489_v37 = vpack.c.bf16 %v13877_v52, %v13876_v58  ;;  %v19726_v42 = vpack.c.bf16 %v13352_v6, %v13351_v21  ;;  %v13901_v58 = vld [vmem:[%s18253_s29 + $0x248] sm:$0xff]  ;;  %v13355_v52 = vld [vmem:[%s18253_s29 + $0x370] sm:$0xff]  ;;  %v13363_v21 = vld [vmem:[%s18253_s29 + $0x3c0] sm:$0xff] }
 0x2da   : > { %v19752_v59 = vpack.c.bf16 %v13356_v54, %v13355_v52  ;;  %v13364_v6 = vld [vmem:[%s18253_s29 + $0x3c8] sm:$0xff]  ;;  %v6506_v52 = vpack.c.bf16 %v13911_v30, %v13910_v33  ;;  %v13371_v33 = vld [vmem:[%s18253_s29 + $0x410] sm:$0xff]  ;;  %v13372_v30 = vld [vmem:[%s18253_s29 + $0x418] sm:$0xff] }
 0x2df   : > { %15738 = vmatmul.mubr.msk.bf16.gmra.mrb[100].mxu1 %vm613_vm2, %v19458_v26  ;;  %v13880_v26 = vld [vmem:[%s18253_s29 + $0x178] sm:$0xff] }
 0x2e0   : > { %16178 = vmatmul.mubr.msk.bf16.gmra.mrb[20].mxu0 %vm613_vm2, %v6487_v35  ;;  %15741 = vmatprep.mubr.msk.bf16.mxu1 %vm613_vm2, %v19460_v8  ;;  %v13881_v8 = vld [vmem:[%s18253_s29 + $0x180] sm:$0xff] }
 0x2e1   : > { %16181 = vmatprep.mubr.msk.bf16.mxu0 %vm613_vm2, %v6488_v23  ;;  %v13354_v35 = vld [vmem:[%s18253_s29 + $0x360] sm:$0xff] }
 0x2e2   : > { %v13900_v23 = vld [vmem:[%s18253_s29 + $0x240] sm:$0xff] }
 0x2e7   : > { %15742 = vmatmul.mubr.msk.bf16.gmra.mrb[104].mxu1 %vm613_vm2, %v19474_v16  ;;  %v6491_v16 = vpack.c.bf16 %v13881_v8, %v13880_v26  ;;  %v6501_v8 = vpack.c.bf16 %v13901_v58, %v13900_v23  ;;  %v19804_v23 = vpack.c.bf16 %v13364_v6, %v13363_v21  ;;  %v13916_v21 = vld [vmem:[%s18253_s29 + $0x2e0] sm:$0xff]  ;;  %v13917_v6 = vld [vmem:[%s18253_s29 + $0x2e8] sm:$0xff] }
 0x2e8   : > { %16182 = vmatmul.mubr.msk.bf16.gmra.mrb[24].mxu0 %vm613_vm2, %v6489_v37  ;;  %15745 = vmatprep.mubr.msk.bf16.mxu1 %vm613_vm2, %v19476_v49  ;;  %v13884_v49 = vld [vmem:[%s18253_s29 + $0x1a0] sm:$0xff] }
 0x2e9   : > { %16185 = vmatprep.mubr.msk.bf16.mxu0 %vm613_vm2, %v6490_v29  ;;  %v13903_v37 = vld [vmem:[%s18253_s29 + $0x260] sm:$0xff]  ;;  %v19748_v29 = vpack.c.bf16 %v13354_v35, %v13353_v44 }
 0x2ea   : > { %v19648_v19 = vpop.f32.mrb[0].mxu1 }
 0x2eb   : > { %v19650_v28 = vpop.f32.mrb[1].mxu1 }
 0x2ec   : > { %v19652_v20 = vpop.f32.mrb[2].mxu1 }
 0x2ed   : > { %v19654_v56 = vpop.f32.mrb[3].mxu1 }
 0x2ef   : > { %15746 = vmatmul.mubr.msk.bf16.gmra.mrb[108].mxu1 %vm613_vm2, %v19490_v2  ;;  %v6493_v2 = vpack.c.bf16 %v13885_v57, %v13884_v49  ;;  %v13357_v49 = vld [vmem:[%s18253_s29 + $0x380] sm:$0xff]  ;;  %v13358_v57 = vld [vmem:[%s18253_s29 + $0x388] sm:$0xff] }
 0x2f0   : > { %16186 = vmatmul.mubr.msk.bf16.gmra.mrb[28].mxu0 %vm613_vm2, %v6491_v16  ;;  %15749 = vmatprep.mubr.msk.bf16.mxu1 %vm613_vm2, %v19492_v46  ;;  %v13888_v46 = vld [vmem:[%s18253_s29 + $0x1c8] sm:$0xff]  ;;  %v6502_v16 = vpack.c.bf16 %v13903_v37, %v13902_v60  ;;  %v19774_v51 = vpack.c.bf16 %v13358_v57, %v13357_v49  ;;  %v13365_v60 = vld [vmem:[%s18253_s29 + $0x3d0] sm:$0xff]  ;;  %v13366_v37 = vld [vmem:[%s18253_s29 + $0x3d8] sm:$0xff] }
 0x2f1   : > { %16189 = vmatprep.mubr.msk.bf16.mxu0 %vm613_vm2, %v6492_v9  ;;  %v13367_v49 = vld [vmem:[%s18253_s29 + $0x3e8] sm:$0xff]  ;;  %v13368_v57 = vld [vmem:[%s18253_s29 + $0x3f0] sm:$0xff] }
 0x2f2   : > { %v19666_v1 = vpop.f32.mrb[4].mxu1 }
 0x2f3   : > { %v19668_v53 = vpop.f32.mrb[5].mxu1 }
 0x2f4   : > { %v19670_v12 = vpop.f32.mrb[6].mxu1 }
 0x2f5   : > { %v19672_v4 = vpop.f32.mrb[7].mxu1 }
 0x2f7   : > { %15750 = vmatmul.mubr.msk.bf16.gmra.mrb[112].mxu1 %vm613_vm2, %v19506_v61  ;;  %v6495_v61 = vpack.c.bf16 %v13889_v63, %v13888_v46  ;;  %v13906_v46 = vld [vmem:[%s18253_s29 + $0x280] sm:$0xff]  ;;  %v13907_v63 = vld [vmem:[%s18253_s29 + $0x288] sm:$0xff] }
 0x2f8   : > { %16190 = vmatmul.mubr.msk.bf16.gmra.mrb[32].mxu0 %vm613_vm2, %v6493_v2  ;;  %15753 = vmatprep.mubr.msk.bf16.mxu1 %vm613_vm2, %v19508_v45  ;;  %v13892_v45 = vld [vmem:[%s18253_s29 + $0x1f0] sm:$0xff]  ;;  %v13359_v2 = vld [vmem:[%s18253_s29 + $0x398] sm:$0xff]  ;;  %v6504_v41 = vpack.c.bf16 %v13907_v63, %v13906_v46 }
 0x2f9   : > { %16193 = vmatprep.mubr.msk.bf16.mxu0 %vm613_vm2, %v6494_v62  ;;  %v6497_v25 = vpack.c.bf16 %v13893_v40, %v13892_v45  ;;  %v13360_v62 = vld [vmem:[%s18253_s29 + $0x3a0] sm:$0xff] }
 0x2fa   : > { %v19684_v24 = vpop.f32.mrb[8].mxu1  ;;  %v19778_v45 = vpack.c.bf16 %v13360_v62, %v13359_v2  ;;  %v19826_v62 = vpack.c.bf16 %v13366_v37, %v13365_v60  ;;  %v13919_v60 = vld [vmem:[%s18253_s29 + $0x300] sm:$0xff] }
 0x2fb   : > { %v19686_v47 = vpop.f32.mrb[9].mxu1 }
 0x2fc   : > { %v19688_v7 = vpop.f32.mrb[10].mxu1 }
 0x2fd   : > { %v19690_v48 = vpop.f32.mrb[11].mxu1 }
 0x2ff   : > { %15754 = vmatmul.mubr.msk.bf16.gmra.mrb[116].mxu1 %vm613_vm2, %v19522_v14 }
 0x300   : > { %16194 = vmatmul.mubr.msk.bf16.gmra.mrb[36].mxu0 %vm613_vm2, %v6495_v61  ;;  %15757 = vmatprep.mubr.msk.bf16.mxu1 %vm613_vm2, %v19524_v55 }
 0x301   : > { %16197 = vmatprep.mubr.msk.bf16.mxu0 %vm613_vm2, %v6496_v50  ;;  %v6503_v50 = vpack.c.bf16 %v13905_v43, %v13904_v27  ;;  %v13914_v27 = vld [vmem:[%s18253_s29 + $0x2d0] sm:$0xff]  ;;  %v13915_v43 = vld [vmem:[%s18253_s29 + $0x2d8] sm:$0xff] }
 0x302   : > { %v19702_v15 = vpop.f32.mrb[12].mxu1 }
 0x303   : > { %v19704_v14 = vpop.f32.mrb[13].mxu1 }
 0x304   : > { %v19706_v18 = vpop.f32.mrb[14].mxu1 }
 0x305   : > { %v19708_v55 = vpop.f32.mrb[15].mxu1 }
 0x307   : > { %15758 = vmatmul.mubr.msk.bf16.gmra.mrb[120].mxu1 %vm613_vm2, %v19538_v22 }
 0x308   : > { %16198 = vmatmul.mubr.msk.bf16.gmra.mrb[40].mxu0 %vm613_vm2, %v6497_v25  ;;  %15761 = vmatprep.mubr.msk.bf16.mxu1 %vm613_vm2, %v19540_v39  ;;  %v6499_v39 = vpack.c.bf16 %v13897_v17, %v13896_v3  ;;  %v13361_v25 = vld [vmem:[%s18253_s29 + $0x3a8] sm:$0xff]  ;;  %v13908_v3 = vld [vmem:[%s18253_s29 + $0x290] sm:$0xff]  ;;  %v13909_v17 = vld [vmem:[%s18253_s29 + $0x298] sm:$0xff] }
 0x309   : > { %16201 = vmatprep.mubr.msk.bf16.mxu0 %vm613_vm2, %v6498_v11  ;;  %v13362_v11 = vld [vmem:[%s18253_s29 + $0x3b0] sm:$0xff]  ;;  %v6505_v35 = vpack.c.bf16 %v13909_v17, %v13908_v3  ;;  %v13369_v3 = vld [vmem:[%s18253_s29 + $0x3f8] sm:$0xff]  ;;  %v13370_v17 = vld [vmem:[%s18253_s29 + $0x400] sm:$0xff] }
 0x30a   : > { %v19722_v31 = vpop.f32.mrb[16].mxu1 }
 0x30b   : > { %v19724_v22 = vpop.f32.mrb[17].mxu1 }
 0x30c   : > { %v19728_v36 = vpop.f32.mrb[18].mxu1 }
 0x30d   : > { %v19730_v38 = vpop.f32.mrb[19].mxu1 }
 0x30f   : > { %15762 = vmatmul.mubr.msk.bf16.gmra.mrb[124].mxu1 %vm613_vm2, %v19554_v10 }
 0x310   : > { %16202 = vmatmul.mubr.msk.bf16.gmra.mrb[44].mxu0 %vm613_vm2, %v6499_v39  ;;  %15847 = vmatprep.mubr.msk.bf16.mxu1 %vm613_vm2, %v19726_v42 }
 0x311   : > { %16205 = vmatprep.mubr.msk.bf16.mxu0 %vm613_vm2, %v6500_v34  ;;  %v19800_v34 = vpack.c.bf16 %v13362_v11, %v13361_v25  ;;  %v6508_v25 = vpack.c.bf16 %v13915_v43, %v13914_v27  ;;  %v19862_v27 = vpack.c.bf16 %v13372_v30, %v13371_v33  ;;  %v13376_v33 = vld [vmem:[%s18253_s29 + $0x440] sm:$0xff] }
 0x312   : > { %v19746_v10 = vpop.f32.mrb[20].mxu1  ;;  %v13922_v30 = vld [vmem:[%s18253_s29 + $0x320] sm:$0xff] }
 0x313   : > { %v19750_v26 = vpop.f32.mrb[21].mxu1 }
 0x314   : > { %v19754_v32 = vpop.f32.mrb[22].mxu1 }
 0x315   : > { %v19756_v9 = vpop.f32.mrb[23].mxu1 }
 0x317   : > { %15848 = vmatmul.mubr.msk.bf16.vlgmr.msra.gmra.mrb[80].mxu1 %vm613_vm2, %v19748_v29 }
 0x318   : > { %16206 = vmatmul.mubr.msk.bf16.gmra.mrb[48].mxu0 %vm613_vm2, %v6501_v8  ;;  %15851 = vmatprep.mubr.msk.bf16.mxu1 %vm613_vm2, %v19752_v59  ;;  %v13912_v8 = vld [vmem:[%s18253_s29 + $0x2b8] sm:$0xff] }
 0x319   : > { %16209 = vmatprep.mubr.msk.bf16.mxu0 %vm613_vm2, %v6502_v16  ;;  %v13913_v16 = vld [vmem:[%s18253_s29 + $0x2c0] sm:$0xff] }
 0x31a   : > { %v19772_v13 = vpop.f32.mrb[24].mxu1  ;;  %v6507_v63 = vpack.c.bf16 %v13913_v16, %v13912_v8  ;;  %v19858_v16 = vpack.c.bf16 %v13370_v17, %v13369_v3  ;;  %v13374_v3 = vld [vmem:[%s18253_s29 + $0x428] sm:$0xff] }
 0x31b   : > { %v19776_v61 = vpop.f32.mrb[25].mxu1  ;;  %v13920_v17 = vld [vmem:[%s18253_s29 + $0x308] sm:$0xff] }
 0x31c   : > { %v19780_v40 = vpop.f32.mrb[26].mxu1 }
 0x31d   : > { %v19782_v0 = vpop.f32.mrb[27].mxu1 }
 0x31f   : > { %15852 = vmatmul.mubr.msk.bf16.gmra.mrb[84].mxu1 %vm613_vm2, %v19774_v51 }
 0x320   : > { %16210 = vmatmul.mubr.msk.bf16.gmra.mrb[52].mxu0 %vm613_vm2, %v6503_v50  ;;  %15855 = vmatprep.mubr.msk.bf16.mxu1 %vm613_vm2, %v19778_v45  ;;  %v19830_v50 = vpack.c.bf16 %v13368_v57, %v13367_v49  ;;  %v6509_v57 = vpack.c.bf16 %v13917_v6, %v13916_v21  ;;  %v13921_v21 = vld [vmem:[%s18253_s29 + $0x310] sm:$0xff]  ;;  %v13375_v6 = vld [vmem:[%s18253_s29 + $0x438] sm:$0xff] }
 0x321   : > { %16213 = vmatprep.mubr.msk.bf16.mxu0 %vm613_vm2, %v6504_v41 }
 0x322   : > { %v19798_v39 = vpop.f32.mrb[28].mxu1 }
 0x323   : > { %v19802_v44 = vpop.f32.mrb[29].mxu1 }
 0x324   : > { %v19806_v58 = vpop.f32.mrb[30].mxu1 }
 0x325   : > { %v19808_v54 = vpop.f32.mrb[31].mxu1 }
 0x327   : > { %15856 = vmatmul.mubr.msk.bf16.gmra.mrb[88].mxu1 %vm613_vm2, %v19800_v34 }
 0x328   : > { %16214 = vmatmul.mubr.msk.bf16.gmra.mrb[56].mxu0 %vm613_vm2, %v6505_v35  ;;  %15859 = vmatprep.mubr.msk.bf16.mxu1 %vm613_vm2, %v19804_v23  ;;  %v14364_v35 = vld [vmem:[%s21484_s1 + $0x10] sm:$0x3] }
 0x329   : > { %16217 = vmatprep.mubr.msk.bf16.mxu0 %vm613_vm2, %v6506_v52  ;;  %v13918_v52 = vld [vmem:[%s18253_s29 + $0x2f8] sm:$0xff]  ;;  %v19856_v8 = vand.u32 %v14364_v35, %v18238_v5  ;;  %v13373_v5 = vld [vmem:[%s18253_s29 + $0x420] sm:$0xff]  ;;  %v13923_v35 = vld [vmem:[%s18253_s29 + $0x328] sm:$0xff] }
 0x32a   : > { %v19824_v2 = vpop.f32.mrb[32].mxu1 }
 0x32b   : > { %v19828_v46 = vpop.f32.mrb[33].mxu1  ;;  %16415 = vmatprep.subr.bf16.mxu0 %v19856_v8 }
 0x32c   : > { %v19832_v41 = vpop.f32.mrb[34].mxu1 }
 0x32d   : > { %v19834_v11 = vpop.f32.mrb[35].mxu1 }
 0x32f   : > { %15860 = vmatmul.mubr.msk.bf16.gmra.mrb[92].mxu1 %vm613_vm2, %v19826_v62 }
 0x330   : > { %16218 = vmatmul.mubr.msk.bf16.gmra.mrb[60].mxu0 %vm613_vm2, %v6507_v63  ;;  %15863 = vmatprep.mubr.msk.bf16.mxu1 %vm613_vm2, %v19830_v50  ;;  %v6510_v63 = vpack.c.bf16 %v13919_v60, %v13918_v52  ;;  %v19885_v60 = vpack.c.bf16 %v13374_v3, %v13373_v5  ;;  %v13377_v5 = vld [vmem:[%s18253_s29 + $0x448] sm:$0xff]  ;;  %v13378_v3 = vld [vmem:[%s18253_s29 + $0x450] sm:$0xff] }
 0x331   : > { %16221 = vmatprep.mubr.msk.bf16.mxu0 %vm613_vm2, %v6508_v25 }
 0x332   : > { %v19853_v37 = vpop.f32.mrb[36].mxu1 }
 0x333   : > { %21489 = vst [vmem:[#allocation5_spill] sm:$0xff] %v19853_v37  ;;  %v19860_v49 = vpop.f32.mrb[37].mxu1 }
 0x334   : > { %21490 = vst [vmem:[#allocation6_spill] sm:$0xff] %v19860_v49  ;;  %v19864_v43 = vpop.f32.mrb[38].mxu1  ;;  %v6512_v49 = vpack.c.bf16 %v13923_v35, %v13922_v30  ;;  %v19909_v30 = vpack.c.bf16 %v13378_v3, %v13377_v5  ;;  %v13382_v5 = vld [vmem:[%s18253_s29 + $0x478] sm:$0xff]  ;;  %v13384_v3 = vld [vmem:[%s18253_s29 + $0x490] sm:$0xff] }
 0x335   : > { %21491 = vst [vmem:[#allocation7_spill] sm:$0xff] %v19864_v43  ;;  %v19867_v25 = vpop.f32.mrb[39].mxu1  ;;  %v19889_v43 = vpack.c.bf16 %v13376_v33, %v13375_v6  ;;  %v13380_v6 = vld [vmem:[%s18253_s29 + $0x468] sm:$0xff] }
 0x336   : > { %21492 = vst [vmem:[#allocation8_spill] sm:$0xff] %v19867_v25  ;;  %v6511_v25 = vpack.c.bf16 %v13921_v21, %v13920_v17  ;;  %v13925_v17 = vld [vmem:[%s18253_s29 + $0x338] sm:$0xff]  ;;  %v13379_v21 = vld [vmem:[%s18253_s29 + $0x460] sm:$0xff] }
 0x337   : > { %15864 = vmatmul.mubr.msk.bf16.gmra.mrb[96].mxu1 %vm613_vm2, %v19858_v16 }
 0x338   : > { %16222 = vmatmul.mubr.msk.bf16.gmra.mrb[64].mxu0 %vm613_vm2, %v6509_v57  ;;  %15867 = vmatprep.mubr.msk.bf16.mxu1 %vm613_vm2, %v19862_v27 }
 0x339   : > { %16225 = vmatprep.mubr.msk.bf16.mxu0 %vm613_vm2, %v6510_v63 }
 0x33a   : > { %v19883_v52 = vpop.f32.mrb[40].mxu1 }
 0x33b   : > { %21493 = vst [vmem:[#allocation9_spill] sm:$0xff] %v19883_v52  ;;  %v19887_v57 = vpop.f32.mrb[41].mxu1 }
 0x33c   : > { %21494 = vst [vmem:[#allocation10_spill] sm:$0xff] %v19887_v57  ;;  %v19891_v63 = vpop.f32.mrb[42].mxu1  ;;  %v13924_v57 = vld [vmem:[%s18253_s29 + $0x330] sm:$0xff] }
 0x33d   : > { %21495 = vst [vmem:[#allocation11_spill] sm:$0xff] %v19891_v63  ;;  %v19893_v37 = vpop.f32.mrb[43].mxu1  ;;  %v6513_v35 = vpack.c.bf16 %v13925_v17, %v13924_v57  ;;  %v13383_v57 = vld [vmem:[%s18253_s29 + $0x488] sm:$0xff] }
 0x33e   : > { %21496 = vst [vmem:[#allocation12_spill] sm:$0xff] %v19893_v37  ;;  %v19913_v37 = vpack.c.bf16 %v13380_v6, %v13379_v21 }
 0x33f   : > { %15868 = vmatmul.mubr.msk.bf16.gmra.mrb[100].mxu1 %vm613_vm2, %v19885_v60 }
 0x340   : > { %16226 = vmatmul.mubr.msk.bf16.gmra.mrb[68].mxu0 %vm613_vm2, %v6511_v25  ;;  %15871 = vmatprep.mubr.msk.bf16.mxu1 %vm613_vm2, %v19889_v43 }
 0x341   : > { %16229 = vmatprep.mubr.msk.bf16.mxu0 %vm613_vm2, %v6512_v49  ;;  %v13381_v49 = vld [vmem:[%s18253_s29 + $0x470] sm:$0xff] }
 0x342   : > { %v19907_v33 = vpop.f32.mrb[44].mxu1  ;;  %v19932_v21 = vpack.c.bf16 %v13382_v5, %v13381_v49  ;;  %v13386_v49 = vld [vmem:[%s18253_s29 + $0x4a0] sm:$0xff]  ;;  %v13387_v5 = vld [vmem:[%s18253_s29 + $0x4b0] sm:$0xff] }
 0x343   : > { %v19911_v25 = vpop.f32.mrb[45].mxu1 }
 0x344   : > { %21497 = vst [vmem:[#allocation13_spill] sm:$0xff] %v19911_v25  ;;  %v19915_v63 = vpop.f32.mrb[46].mxu1  ;;  %v13394_v25 = vld [vmem:[%s18253_s29 + $0x4f0] sm:$0xff] }
 0x345   : > { %21498 = vst [vmem:[#allocation14_spill] sm:$0xff] %v19915_v63  ;;  %v19917_v52 = vpop.f32.mrb[47].mxu1 }
 0x346   : > { %21499 = vst [vmem:[#allocation15_spill] sm:$0xff] %v19917_v52 }
 0x347   : > { %15872 = vmatmul.mubr.msk.bf16.gmra.mrb[104].mxu1 %vm613_vm2, %v19909_v30 }
 0x348   : > { %16230 = vmatmul.mubr.msk.bf16.gmra.mrb[72].mxu0 %vm613_vm2, %v6513_v35  ;;  %15875 = vmatprep.mubr.msk.bf16.mxu1 %vm613_vm2, %v19913_v37  ;;  %v19936_v35 = vpack.c.bf16 %v13384_v3, %v13383_v57  ;;  %v13388_v57 = vld [vmem:[%s18253_s29 + $0x4b8] sm:$0xff] }
 0x349   : > { %16233 = vmatprep.mubr.msk.bf16.mxu0 %vm613_vm2, %v19726_v42  ;;  %v13385_v42 = vld [vmem:[%s18253_s29 + $0x498] sm:$0xff] }
 0x34a   : > { %v19930_v17 = vpop.f32.mrb[48].mxu1 }
 0x34b   : > { %21500 = vst [vmem:[#allocation16_spill] sm:$0xff] %v19930_v17  ;;  %v19934_v6 = vpop.f32.mrb[49].mxu1 }
 0x34c   : > { %21501 = vst [vmem:[#allocation17_spill] sm:$0xff] %v19934_v6  ;;  %v19938_v52 = vpop.f32.mrb[50].mxu1 }
 0x34d   : > { %21502 = vst [vmem:[#allocation18_spill] sm:$0xff] %v19938_v52  ;;  %v19940_v63 = vpop.f32.mrb[51].mxu1 }
 0x34e   : > { %21503 = vst [vmem:[#allocation19_spill] sm:$0xff] %v19940_v63  ;;  %v19956_v63 = vpack.c.bf16 %v13386_v49, %v13385_v42  ;;  %v13390_v42 = vld [vmem:[%s18253_s29 + $0x4c8] sm:$0xff]  ;;  %v13391_v49 = vld [vmem:[%s18253_s29 + $0x4d8] sm:$0xff] }
 0x34f   : > { %15876 = vmatmul.mubr.msk.bf16.gmra.mrb[108].mxu1 %vm613_vm2, %v19932_v21 }
 0x350   : > { %16234 = vmatmul.mubr.msk.bf16.gmra.mrb[76].mxu0 %vm613_vm2, %v19748_v29  ;;  %15879 = vmatprep.mubr.msk.bf16.mxu1 %vm613_vm2, %v19936_v35  ;;  %v19960_v29 = vpack.c.bf16 %v13388_v57, %v13387_v5  ;;  %v13392_v5 = vld [vmem:[%s18253_s29 + $0x4e0] sm:$0xff] }
 0x351   : > { %16237 = vmatprep.mubr.msk.bf16.mxu0 %vm613_vm2, %v19752_v59  ;;  %v13389_v59 = vld [vmem:[%s18253_s29 + $0x4c0] sm:$0xff] }
 0x352   : > { %v19954_v3 = vpop.f32.mrb[52].mxu1 }
 0x353   : > { %21504 = vst [vmem:[#allocation20_spill] sm:$0xff] %v19954_v3  ;;  %v19958_v52 = vpop.f32.mrb[53].mxu1 }
 0x354   : > { %21505 = vst [vmem:[#allocation21_spill] sm:$0xff] %v19958_v52  ;;  %v19962_v6 = vpop.f32.mrb[54].mxu1 }
 0x355   : > { %21506 = vst [vmem:[#allocation22_spill] sm:$0xff] %v19962_v6  ;;  %v19964_v17 = vpop.f32.mrb[55].mxu1 }
 0x356   : > { %21507 = vst [vmem:[#allocation23_spill] sm:$0xff] %v19964_v17  ;;  %v3348_v17 = vpack.c.bf16 %v13390_v42, %v13389_v59  ;;  %v13395_v59 = vld [vmem:[%s18253_s29 + $0x500] sm:$0xff]  ;;  %v13396_v42 = vld [vmem:[%s18253_s29 + $0x508] sm:$0xff] }
 0x357   : > { %15880 = vmatmul.mubr.msk.bf16.gmra.mrb[112].mxu1 %vm613_vm2, %v19956_v63 }
 0x358   : > { %16238 = vmatmul.mubr.msk.bf16.gmra.mrb[80].mxu0 %vm613_vm2, %v19774_v51  ;;  %15883 = vmatprep.mubr.msk.bf16.mxu1 %vm613_vm2, %v19960_v29  ;;  %v3349_v51 = vpack.c.bf16 %v13392_v5, %v13391_v49 }
 0x359   : > { %16241 = vmatprep.mubr.msk.bf16.mxu0 %vm613_vm2, %v19778_v45  ;;  %v13393_v45 = vld [vmem:[%s18253_s29 + $0x4e8] sm:$0xff] }
 0x35a   : > { %v19978_v57 = vpop.f32.mrb[56].mxu1  ;;  %v3350_v5 = vpack.c.bf16 %v13394_v25, %v13393_v45 }
 0x35b   : > { %21508 = vst [vmem:[#allocation24_spill] sm:$0xff] %v19978_v57  ;;  %v19980_v6 = vpop.f32.mrb[57].mxu1  ;;  %v13398_v57 = vld [vmem:[%s18253_s29 + $0x518] sm:$0xff] }
 0x35c   : > { %21509 = vst [vmem:[#allocation25_spill] sm:$0xff] %v19980_v6  ;;  %v19982_v52 = vpop.f32.mrb[58].mxu1 }
 0x35d   : > { %21510 = vst [vmem:[#allocation26_spill] sm:$0xff] %v19982_v52  ;;  %v19984_v3 = vpop.f32.mrb[59].mxu1  ;;  %v3351_v52 = vpack.c.bf16 %v13396_v42, %v13395_v59 }
 0x35e   : > { %21511 = vst [vmem:[#allocation27_spill] sm:$0xff] %v19984_v3 }
 0x35f   : > { %15884 = vmatmul.mubr.msk.bf16.gmra.mrb[116].mxu1 %vm613_vm2, %v3348_v17 }
 0x360   : > { %16242 = vmatmul.mubr.msk.bf16.gmra.mrb[84].mxu0 %vm613_vm2, %v19800_v34  ;;  %15887 = vmatprep.mubr.msk.bf16.mxu1 %vm613_vm2, %v3349_v51 }
 0x361   : > { %16245 = vmatprep.mubr.msk.bf16.mxu0 %vm613_vm2, %v19804_v23  ;;  %v13397_v23 = vld [vmem:[%s18253_s29 + $0x510] sm:$0xff] }
 0x362   : > { %v19996_v49 = vpop.f32.mrb[60].mxu1  ;;  %v3352_v45 = vpack.c.bf16 %v13398_v57, %v13397_v23 }
 0x363   : > { %v19998_v3 = vpop.f32.mrb[61].mxu1 }
 0x364   : > { %v20000_v6 = vpop.f32.mrb[62].mxu1 }
 0x365   : > { %v20002_v34 = vpop.f32.mrb[63].mxu1 }
 0x366   : > { %21512 = vst [vmem:[#allocation28_spill] sm:$0xff] %v20002_v34 }
 0x367   : > { %15888 = vmatmul.mubr.msk.bf16.gmra.mrb[120].mxu1 %vm613_vm2, %v3350_v5 }
 0x368   : > { %16246 = vmatmul.mubr.msk.bf16.gmra.mrb[88].mxu0 %vm613_vm2, %v19826_v62  ;;  %15891 = vmatprep.mubr.msk.bf16.mxu1 %vm613_vm2, %v3351_v52 }
 0x369   : > { %16249 = vmatprep.mubr.msk.bf16.mxu0 %vm613_vm2, %v19830_v50 }
 0x36a   : > { %v20012_v25 = vpop.f32.mrb[64].mxu1 }
 0x36b   : > { %21513 = vst [vmem:[#allocation29_spill] sm:$0xff] %v20012_v25  ;;  %v20014_v59 = vpop.f32.mrb[65].mxu1 }
 0x36c   : > { %v20016_v42 = vpop.f32.mrb[66].mxu1 }
 0x36d   : > { %v20018_v34 = vpop.f32.mrb[67].mxu1 }
 0x36e   : > { %21514 = vst [vmem:[#allocation30_spill] sm:$0xff] %v20018_v34 }
 0x36f   : > { %15892 = vmatmul.mubr.msk.bf16.gmra.mrb[124].mxu1 %vm613_vm2, %v3352_v45 }
 0x370   : > { %16250 = vmatmul.mubr.msk.bf16.gmra.mrb[92].mxu0 %vm613_vm2, %v19858_v16 }
 0x371   : > { %16253 = vmatprep.mubr.msk.bf16.mxu0 %vm613_vm2, %v19862_v27 }
 0x372   : > { %v20025_v62 = vpop.f32.mrb[68].mxu1 }
 0x373   : > { %v20027_v50 = vpop.f32.mrb[69].mxu1 }
 0x374   : > { %v20029_v25 = vpop.f32.mrb[70].mxu1 }
 0x375   : > { %v20031_v57 = vpop.f32.mrb[71].mxu1 }
 0x376   : > { %21515 = vst [vmem:[#allocation31_spill] sm:$0xff] %v20031_v57 }
 0x378   : > { %16254 = vmatmul.mubr.msk.bf16.gmra.mrb[96].mxu0 %vm613_vm2, %v19885_v60 }
 0x379   : > { %16257 = vmatprep.mubr.msk.bf16.mxu0 %vm613_vm2, %v19889_v43 }
 0x37a   : > { %v20037_v23 = vpop.f32.mrb[72].mxu1 }
 0x37b   : > { %v20039_v16 = vpop.f32.mrb[73].mxu1 }
 0x37c   : > { %21516 = vst [vmem:[#allocation32_spill] sm:$0xff] %v20039_v16  ;;  %v20041_v34 = vpop.f32.mrb[74].mxu1 }
 0x37d   : > { %21517 = vst [vmem:[#allocation33_spill] sm:$0xff] %v20041_v34  ;;  %v20043_v27 = vpop.f32.mrb[75].mxu1 }
 0x37e   : > { %21518 = vst [vmem:[#allocation34_spill] sm:$0xff] %v20043_v27 }
 0x380   : > { %16258 = vmatmul.mubr.msk.bf16.gmra.mrb[100].mxu0 %vm613_vm2, %v19909_v30  ;;  %v13975_v30 = vld [vmem:[%s18253_s29 + $0x530] sm:$0xff] }
 0x381   : > { %16261 = vmatprep.mubr.msk.bf16.mxu0 %vm613_vm2, %v19913_v37  ;;  %v13974_v37 = vld [vmem:[%s18253_s29 + $0x528] sm:$0xff] }
 0x382   : > { %v20049_v60 = vpop.f32.mrb[76].mxu1 }
 0x383   : > { %21519 = vst [vmem:[#allocation35_spill] sm:$0xff] %v20049_v60  ;;  %v20051_v57 = vpop.f32.mrb[77].mxu1 }
 0x384   : > { %21520 = vst [vmem:[#allocation36_spill] sm:$0xff] %v20051_v57  ;;  %v20053_v43 = vpop.f32.mrb[78].mxu1  ;;  %v14348_v57 = vld [vmem:[%s18253_s29 + $0x4b2] sm:$0xff] }
 0x385   : > { %21521 = vst [vmem:[#allocation37_spill] sm:$0xff] %v20053_v43  ;;  %v20055_v16 = vpop.f32.mrb[79].mxu1 }
 0x386   : > { %21522 = vst [vmem:[#allocation38_spill] sm:$0xff] %v20055_v16 }
 0x388   : > { %16262 = vmatmul.mubr.msk.bf16.gmra.mrb[104].mxu0 %vm613_vm2, %v19932_v21  ;;  %v6538_v21 = vpack.c.bf16 %v13975_v30, %v13974_v37  ;;  %v14046_v37 = vld [vmem:[%s18253_s29 + $0x69] sm:$0xff]  ;;  %v14048_v30 = vld [vmem:[%s18253_s29 + $0x81] sm:$0xff] }
 0x389   : > { %16265 = vmatprep.mubr.msk.bf16.mxu0 %vm613_vm2, %v19936_v35  ;;  %v13977_v35 = vld [vmem:[%s18253_s29 + $0x540] sm:$0xff] }
 0x390   : > { %16266 = vmatmul.mubr.msk.bf16.gmra.mrb[108].mxu0 %vm613_vm2, %v19956_v63  ;;  %v13976_v63 = vld [vmem:[%s18253_s29 + $0x538] sm:$0xff] }
 0x391   : > { %16269 = vmatprep.mubr.msk.bf16.mxu0 %vm613_vm2, %v19960_v29  ;;  %v14044_v29 = vld [vmem:[%s18253_s29 + $0x59] sm:$0xff] }
 0x398   : > { %16270 = vmatmul.mubr.msk.bf16.gmra.mrb[112].mxu0 %vm613_vm2, %v3348_v17  ;;  %v14043_v17 = vld [vmem:[%s18253_s29 + $0x51] sm:$0xff] }
 0x399   : > { %16273 = vmatprep.mubr.msk.bf16.mxu0 %vm613_vm2, %v3349_v51  ;;  %v6539_v51 = vpack.c.bf16 %v13977_v35, %v13976_v63  ;;  %v14049_v63 = vld [vmem:[%s18253_s29 + $0x89] sm:$0xff]  ;;  %v14050_v35 = vld [vmem:[%s18253_s29 + $0x91] sm:$0xff] }
 0x3a0   : > { %16274 = vmatmul.mubr.msk.bf16.gmra.mrb[116].mxu0 %vm613_vm2, %v3350_v5  ;;  %v7538_v5 = vpack.c.bf16 %v14044_v29, %v14043_v17  ;;  %v14051_v17 = vld [vmem:[%s18253_s29 + $0xa1] sm:$0xff]  ;;  %v14052_v29 = vld [vmem:[%s18253_s29 + $0xa9] sm:$0xff] }
 0x3a1   : > { %16277 = vmatprep.mubr.msk.bf16.mxu0 %vm613_vm2, %v3351_v52  ;;  %v14045_v52 = vld [vmem:[%s18253_s29 + $0x61] sm:$0xff] }
 0x3a8   : > { %16278 = vmatmul.mubr.msk.bf16.gmra.mrb[120].mxu0 %vm613_vm2, %v3352_v45  ;;  %v14047_v45 = vld [vmem:[%s18253_s29 + $0x79] sm:$0xff] }
 0x3a9   : > { %16281 = vmatprep.mubr.msk.bf16.mxu0 %vm613_vm2, %v6538_v21  ;;  %v7539_v21 = vpack.c.bf16 %v14046_v37, %v14045_v52  ;;  %v7540_v16 = vpack.c.bf16 %v14048_v30, %v14047_v45  ;;  %v14053_v52 = vld [vmem:[%s18253_s29 + $0xb1] sm:$0xff]  ;;  %v14054_v37 = vld [vmem:[%s18253_s29 + $0xb9] sm:$0xff] }
 0x3aa   : > { %v7543_v45 = vpack.c.bf16 %v14054_v37, %v14053_v52  ;;  %v14062_v52 = vld [vmem:[%s18253_s29 + $0x109] sm:$0xff]  ;;  %v14063_v37 = vld [vmem:[%s18253_s29 + $0x119] sm:$0xff] }
 0x3b0   : > { %16282 = vmatmul.mubr.msk.bf16.gmra.mrb[124].mxu0 %vm613_vm2, %v6539_v51  ;;  %v7541_v51 = vpack.c.bf16 %v14050_v35, %v14049_v63  ;;  %v14058_v63 = vld [vmem:[%s18253_s29 + $0xe1] sm:$0xff]  ;;  %v14059_v35 = vld [vmem:[%s18253_s29 + $0xf1] sm:$0xff] }
 0x3b1   : > { %16287 = vmatprep.mubr.msk.bf16.mxu0 %vm613_vm2, %v7538_v5  ;;  %v7542_v5 = vpack.c.bf16 %v14052_v29, %v14051_v17  ;;  %v14060_v17 = vld [vmem:[%s18253_s29 + $0xf9] sm:$0xff] }
 0x3b8   : > { %16288 = vmatmul.mubr.msk.bf16.vlgmr.msra.gmra.mrb[0].mxu0 %vm613_vm2, %v7539_v21  ;;  %v14057_v21 = vld [vmem:[%s18253_s29 + $0xd9] sm:$0xff] }
 0x3b9   : > { %16416 = vmatpush3.bf16.msra.mxu0 %v19856_v8  ;;  %16291 = vmatprep.mubr.msk.bf16.mxu0 %vm613_vm2, %v7540_v16  ;;  %v14055_v8 = vld [vmem:[%s18253_s29 + $0xc9] sm:$0xff]  ;;  %v14056_v16 = vld [vmem:[%s18253_s29 + $0xd1] sm:$0xff]  ;;  %v7545_v29 = vpack.c.bf16 %v14058_v63, %v14057_v21  ;;  %v14067_v63 = vld [vmem:[%s18253_s29 + $0x141] sm:$0xff] }
 0x3ba   : > { %v7544_v30 = vpack.c.bf16 %v14056_v16, %v14055_v8  ;;  %v14064_v8 = vld [vmem:[%s18253_s29 + $0x121] sm:$0xff]  ;;  %v14066_v21 = vld [vmem:[%s18253_s29 + $0x131] sm:$0xff] }
 0x3c0   : > { %16292 = vmatmul.mubr.msk.bf16.gmra.mrb[4].mxu0 %vm613_vm2, %v7541_v51  ;;  %v7546_v51 = vpack.c.bf16 %v14060_v17, %v14059_v35  ;;  %v14068_v35 = vld [vmem:[%s18253_s29 + $0x149] sm:$0xff] }
 0x3c1   : > { %16295 = vmatprep.mubr.msk.bf16.mxu0 %vm613_vm2, %v7542_v5  ;;  %v14061_v5 = vld [vmem:[%s18253_s29 + $0x101] sm:$0xff] }
 0x3c2   : > { %v7547_v16 = vpack.c.bf16 %v14062_v52, %v14061_v5  ;;  %v14070_v5 = vld [vmem:[%s18253_s29 + $0x159] sm:$0xff]  ;;  %v14071_v52 = vld [vmem:[%s18253_s29 + $0x169] sm:$0xff] }
 0x3c8   : > { %16296 = vmatmul.mubr.msk.bf16.gmra.mrb[8].mxu0 %vm613_vm2, %v7543_v45  ;;  %v7548_v45 = vpack.c.bf16 %v14064_v8, %v14063_v37  ;;  %v14072_v37 = vld [vmem:[%s18253_s29 + $0x171] sm:$0xff] }
 0x3c9   : > { %16299 = vmatprep.mubr.msk.bf16.mxu0 %vm613_vm2, %v7544_v30  ;;  %v14065_v30 = vld [vmem:[%s18253_s29 + $0x129] sm:$0xff] }
 0x3ca   : > { %v7549_v17 = vpack.c.bf16 %v14066_v21, %v14065_v30  ;;  %v14074_v30 = vld [vmem:[%s18253_s29 + $0x181] sm:$0xff] }
 0x3d0   : > { %16300 = vmatmul.mubr.msk.bf16.gmra.mrb[12].mxu0 %vm613_vm2, %v7545_v29  ;;  %v7550_v29 = vpack.c.bf16 %v14068_v35, %v14067_v63  ;;  %v14075_v63 = vld [vmem:[%s18253_s29 + $0x191] sm:$0xff]  ;;  %v14076_v35 = vld [vmem:[%s18253_s29 + $0x199] sm:$0xff] }
 0x3d1   : > { %16303 = vmatprep.mubr.msk.bf16.mxu0 %vm613_vm2, %v7546_v51  ;;  %v14069_v51 = vld [vmem:[%s18253_s29 + $0x151] sm:$0xff] }
 0x3d2   : > { %v7551_v8 = vpack.c.bf16 %v14070_v5, %v14069_v51 }
 0x3d8   : > { %16304 = vmatmul.mubr.msk.bf16.gmra.mrb[16].mxu0 %vm613_vm2, %v7547_v16  ;;  %v7552_v16 = vpack.c.bf16 %v14072_v37, %v14071_v52  ;;  %v7554_v52 = vpack.c.bf16 %v14076_v35, %v14075_v63  ;;  %v14077_v37 = vld [vmem:[%s18253_s29 + $0x1a1] sm:$0xff]  ;;  %v14081_v35 = vld [vmem:[%s18253_s29 + $0x1c9] sm:$0xff] }
 0x3d9   : > { %16307 = vmatprep.mubr.msk.bf16.mxu0 %vm613_vm2, %v7548_v45  ;;  %v14073_v45 = vld [vmem:[%s18253_s29 + $0x179] sm:$0xff] }
 0x3da   : > { %v7553_v51 = vpack.c.bf16 %v14074_v30, %v14073_v45 }
 0x3e0   : > { %16308 = vmatmul.mubr.msk.bf16.gmra.mrb[20].mxu0 %vm613_vm2, %v7549_v17 }
 0x3e1   : > { %16311 = vmatprep.mubr.msk.bf16.mxu0 %vm613_vm2, %v7550_v29 }
 0x3e8   : > { %16312 = vmatmul.mubr.msk.bf16.gmra.mrb[24].mxu0 %vm613_vm2, %v7551_v8  ;;  %v14078_v8 = vld [vmem:[%s18253_s29 + $0x1a9] sm:$0xff] }
 0x3e9   : > { %16315 = vmatprep.mubr.msk.bf16.mxu0 %vm613_vm2, %v7552_v16  ;;  %v7555_v30 = vpack.c.bf16 %v14078_v8, %v14077_v37 }
 0x3ea   : > { %v20124_v21 = vpop.f32.mrb[80].mxu1 }
 0x3eb   : > { %21523 = vst [vmem:[#allocation39_spill] sm:$0xff] %v20124_v21  ;;  %v20128_v17 = vpop.f32.mrb[81].mxu1  ;;  %v14079_v21 = vld [vmem:[%s18253_s29 + $0x1b9] sm:$0xff] }
 0x3ec   : > { %21524 = vst [vmem:[#allocation40_spill] sm:$0xff] %v20128_v17  ;;  %v20130_v29 = vpop.f32.mrb[82].mxu1  ;;  %v14080_v17 = vld [vmem:[%s18253_s29 + $0x1c1] sm:$0xff] }
 0x3ed   : > { %21525 = vst [vmem:[#allocation41_spill] sm:$0xff] %v20130_v29  ;;  %v20132_v5 = vpop.f32.mrb[83].mxu1  ;;  %v7556_v63 = vpack.c.bf16 %v14080_v17, %v14079_v21  ;;  %v14085_v17 = vld [vmem:[%s18253_s29 + $0x1f1] sm:$0xff] }
 0x3ee   : > { %21526 = vst [vmem:[#allocation42_spill] sm:$0xff] %v20132_v5 }
 0x3f0   : > { %16316 = vmatmul.mubr.msk.bf16.gmra.mrb[28].mxu0 %vm613_vm2, %v7553_v51  ;;  %v14082_v51 = vld [vmem:[%s18253_s29 + $0x1d1] sm:$0xff] }
 0x3f1   : > { %16319 = vmatprep.mubr.msk.bf16.mxu0 %vm613_vm2, %v7554_v52  ;;  %v7557_v8 = vpack.c.bf16 %v14082_v51, %v14081_v35 }
 0x3f2   : > { %v20138_v16 = vpop.f32.mrb[84].mxu1 }
 0x3f3   : > { %21527 = vst [vmem:[#allocation43_spill] sm:$0xff] %v20138_v16  ;;  %v20142_v43 = vpop.f32.mrb[85].mxu1  ;;  %v14083_v16 = vld [vmem:[%s18253_s29 + $0x1e1] sm:$0xff] }
 0x3f4   : > { %21528 = vst [vmem:[#allocation44_spill] sm:$0xff] %v20142_v43  ;;  %v20144_v45 = vpop.f32.mrb[86].mxu1  ;;  %v14084_v43 = vld [vmem:[%s18253_s29 + $0x1e9] sm:$0xff] }
 0x3f5   : > { %21529 = vst [vmem:[#allocation45_spill] sm:$0xff] %v20144_v45  ;;  %v20146_v5 = vpop.f32.mrb[87].mxu1  ;;  %v7558_v21 = vpack.c.bf16 %v14084_v43, %v14083_v16  ;;  %v14089_v16 = vld [vmem:[%s18253_s29 + $0x219] sm:$0xff] }
 0x3f6   : > { %21530 = vst [vmem:[#allocation46_spill] sm:$0xff] %v20146_v5 }
 0x3f8   : > { %16320 = vmatmul.mubr.msk.bf16.gmra.mrb[32].mxu0 %vm613_vm2, %v7555_v30  ;;  %v14086_v30 = vld [vmem:[%s18253_s29 + $0x1f9] sm:$0xff] }
 0x3f9   : > { %16323 = vmatprep.mubr.msk.bf16.mxu0 %vm613_vm2, %v7556_v63  ;;  %v7559_v51 = vpack.c.bf16 %v14086_v30, %v14085_v17 }
 0x3fa   : > { %v20152_v52 = vpop.f32.mrb[88].mxu1 }
 0x3fb   : > { %21531 = vst [vmem:[#allocation47_spill] sm:$0xff] %v20152_v52  ;;  %v20156_v29 = vpop.f32.mrb[89].mxu1  ;;  %v14087_v52 = vld [vmem:[%s18253_s29 + $0x209] sm:$0xff] }
 0x3fc   : > { %21532 = vst [vmem:[#allocation48_spill] sm:$0xff] %v20156_v29  ;;  %v20158_v37 = vpop.f32.mrb[90].mxu1  ;;  %v14088_v29 = vld [vmem:[%s18253_s29 + $0x211] sm:$0xff] }
 0x3fd   : > { %21533 = vst [vmem:[#allocation49_spill] sm:$0xff] %v20158_v37  ;;  %v20160_v5 = vpop.f32.mrb[91].mxu1  ;;  %v7560_v43 = vpack.c.bf16 %v14088_v29, %v14087_v52  ;;  %v14093_v52 = vld [vmem:[%s18253_s29 + $0x241] sm:$0xff] }
 0x3fe   : > { %21534 = vst [vmem:[#allocation50_spill] sm:$0xff] %v20160_v5 }
 0x400   : > { %16324 = vmatmul.mubr.msk.bf16.gmra.mrb[36].mxu0 %vm613_vm2, %v7557_v8  ;;  %v14090_v8 = vld [vmem:[%s18253_s29 + $0x221] sm:$0xff] }
 0x401   : > { %16327 = vmatprep.mubr.msk.bf16.mxu0 %vm613_vm2, %v7558_v21  ;;  %v7561_v30 = vpack.c.bf16 %v14090_v8, %v14089_v16 }
 0x402   : > { %v20166_v63 = vpop.f32.mrb[92].mxu1 }
 0x403   : > { %21535 = vst [vmem:[#allocation51_spill] sm:$0xff] %v20166_v63  ;;  %v20170_v45 = vpop.f32.mrb[93].mxu1  ;;  %v14091_v63 = vld [vmem:[%s18253_s29 + $0x231] sm:$0xff] }
 0x404   : > { %21536 = vst [vmem:[#allocation52_spill] sm:$0xff] %v20170_v45  ;;  %v20172_v35 = vpop.f32.mrb[94].mxu1  ;;  %v14092_v45 = vld [vmem:[%s18253_s29 + $0x239] sm:$0xff] }
 0x405   : > { %21537 = vst [vmem:[#allocation53_spill] sm:$0xff] %v20172_v35  ;;  %v20174_v5 = vpop.f32.mrb[95].mxu1  ;;  %v7562_v29 = vpack.c.bf16 %v14092_v45, %v14091_v63  ;;  %v14097_v63 = vld [vmem:[%s18253_s29 + $0x269] sm:$0xff] }
 0x406   : > { %21538 = vst [vmem:[#allocation54_spill] sm:$0xff] %v20174_v5 }
 0x408   : > { %16328 = vmatmul.mubr.msk.bf16.gmra.mrb[40].mxu0 %vm613_vm2, %v7559_v51  ;;  %v14094_v51 = vld [vmem:[%s18253_s29 + $0x249] sm:$0xff] }
 0x409   : > { %16331 = vmatprep.mubr.msk.bf16.mxu0 %vm613_vm2, %v7560_v43  ;;  %v7563_v8 = vpack.c.bf16 %v14094_v51, %v14093_v52 }
 0x40a   : > { %v20180_v21 = vpop.f32.mrb[96].mxu1 }
 0x40b   : > { %21539 = vst [vmem:[#allocation55_spill] sm:$0xff] %v20180_v21  ;;  %v20184_v37 = vpop.f32.mrb[97].mxu1  ;;  %v14095_v21 = vld [vmem:[%s18253_s29 + $0x259] sm:$0xff] }
 0x40c   : > { %21540 = vst [vmem:[#allocation56_spill] sm:$0xff] %v20184_v37  ;;  %v20186_v17 = vpop.f32.mrb[98].mxu1  ;;  %v14096_v37 = vld [vmem:[%s18253_s29 + $0x261] sm:$0xff] }
 0x40d   : > { %21541 = vst [vmem:[#allocation57_spill] sm:$0xff] %v20186_v17  ;;  %v20188_v5 = vpop.f32.mrb[99].mxu1  ;;  %v7564_v45 = vpack.c.bf16 %v14096_v37, %v14095_v21  ;;  %v14101_v21 = vld [vmem:[%s18253_s29 + $0x291] sm:$0xff] }
 0x40e   : > { %21542 = vst [vmem:[#allocation58_spill] sm:$0xff] %v20188_v5 }
 0x410   : > { %16332 = vmatmul.mubr.msk.bf16.gmra.mrb[44].mxu0 %vm613_vm2, %v7561_v30  ;;  %v14098_v30 = vld [vmem:[%s18253_s29 + $0x271] sm:$0xff] }
 0x411   : > { %16335 = vmatprep.mubr.msk.bf16.mxu0 %vm613_vm2, %v7562_v29  ;;  %v7565_v51 = vpack.c.bf16 %v14098_v30, %v14097_v63 }
 0x412   : > { %v20194_v43 = vpop.f32.mrb[100].mxu1 }
 0x413   : > { %21543 = vst [vmem:[#allocation59_spill] sm:$0xff] %v20194_v43  ;;  %v20198_v35 = vpop.f32.mrb[101].mxu1  ;;  %v14099_v43 = vld [vmem:[%s18253_s29 + $0x281] sm:$0xff] }
 0x414   : > { %21544 = vst [vmem:[#allocation60_spill] sm:$0xff] %v20198_v35  ;;  %v20200_v16 = vpop.f32.mrb[102].mxu1  ;;  %v14100_v35 = vld [vmem:[%s18253_s29 + $0x289] sm:$0xff] }
 0x415   : > { %21545 = vst [vmem:[#allocation61_spill] sm:$0xff] %v20200_v16  ;;  %v20202_v5 = vpop.f32.mrb[103].mxu1  ;;  %v7566_v37 = vpack.c.bf16 %v14100_v35, %v14099_v43  ;;  %v14105_v43 = vld [vmem:[%s18253_s29 + $0x2b9] sm:$0xff] }
 0x416   : > { %21546 = vst [vmem:[#allocation62_spill] sm:$0xff] %v20202_v5 }
 0x418   : > { %16336 = vmatmul.mubr.msk.bf16.gmra.mrb[48].mxu0 %vm613_vm2, %v7563_v8  ;;  %v14102_v8 = vld [vmem:[%s18253_s29 + $0x299] sm:$0xff] }
 0x419   : > { %16339 = vmatprep.mubr.msk.bf16.mxu0 %vm613_vm2, %v7564_v45  ;;  %v7567_v30 = vpack.c.bf16 %v14102_v8, %v14101_v21 }
 0x41a   : > { %v20208_v29 = vpop.f32.mrb[104].mxu1 }
 0x41b   : > { %21547 = vst [vmem:[#allocation63_spill] sm:$0xff] %v20208_v29  ;;  %v20212_v17 = vpop.f32.mrb[105].mxu1  ;;  %v14103_v29 = vld [vmem:[%s18253_s29 + $0x2a9] sm:$0xff] }
 0x41c   : > { %21548 = vst [vmem:[#allocation64_spill] sm:$0xff] %v20212_v17  ;;  %v20214_v52 = vpop.f32.mrb[106].mxu1  ;;  %v14104_v17 = vld [vmem:[%s18253_s29 + $0x2b1] sm:$0xff] }
 0x41d   : > { %21549 = vst [vmem:[#allocation65_spill] sm:$0xff] %v20214_v52  ;;  %v20216_v5 = vpop.f32.mrb[107].mxu1  ;;  %v7568_v35 = vpack.c.bf16 %v14104_v17, %v14103_v29  ;;  %v14109_v29 = vld [vmem:[%s18253_s29 + $0x2e1] sm:$0xff] }
 0x41e   : > { %21550 = vst [vmem:[#allocation66_spill] sm:$0xff] %v20216_v5 }
 0x420   : > { %16340 = vmatmul.mubr.msk.bf16.gmra.mrb[52].mxu0 %vm613_vm2, %v7565_v51  ;;  %v14106_v51 = vld [vmem:[%s18253_s29 + $0x2c1] sm:$0xff] }
 0x421   : > { %16343 = vmatprep.mubr.msk.bf16.mxu0 %vm613_vm2, %v7566_v37  ;;  %v7569_v8 = vpack.c.bf16 %v14106_v51, %v14105_v43 }
 0x422   : > { %v20222_v45 = vpop.f32.mrb[108].mxu1 }
 0x423   : > { %21551 = vst [vmem:[#allocation67_spill] sm:$0xff] %v20222_v45  ;;  %v20226_v16 = vpop.f32.mrb[109].mxu1  ;;  %v14107_v45 = vld [vmem:[%s18253_s29 + $0x2d1] sm:$0xff] }
 0x424   : > { %21552 = vst [vmem:[#allocation68_spill] sm:$0xff] %v20226_v16  ;;  %v20228_v63 = vpop.f32.mrb[110].mxu1  ;;  %v14108_v16 = vld [vmem:[%s18253_s29 + $0x2d9] sm:$0xff] }
 0x425   : > { %21553 = vst [vmem:[#allocation69_spill] sm:$0xff] %v20228_v63  ;;  %v20230_v5 = vpop.f32.mrb[111].mxu1  ;;  %v7570_v17 = vpack.c.bf16 %v14108_v16, %v14107_v45  ;;  %v14113_v45 = vld [vmem:[%s18253_s29 + $0x309] sm:$0xff] }
 0x426   : > { %21554 = vst [vmem:[#allocation70_spill] sm:$0xff] %v20230_v5 }
 0x428   : > { %16344 = vmatmul.mubr.msk.bf16.gmra.mrb[56].mxu0 %vm613_vm2, %v7567_v30  ;;  %v14110_v30 = vld [vmem:[%s18253_s29 + $0x2e9] sm:$0xff] }
 0x429   : > { %16347 = vmatprep.mubr.msk.bf16.mxu0 %vm613_vm2, %v7568_v35  ;;  %v7571_v51 = vpack.c.bf16 %v14110_v30, %v14109_v29 }
 0x42a   : > { %v20236_v37 = vpop.f32.mrb[112].mxu1 }
 0x42b   : > { %21555 = vst [vmem:[#allocation71_spill] sm:$0xff] %v20236_v37  ;;  %v20240_v52 = vpop.f32.mrb[113].mxu1  ;;  %v14111_v37 = vld [vmem:[%s18253_s29 + $0x2f9] sm:$0xff] }
 0x42c   : > { %21556 = vst [vmem:[#allocation72_spill] sm:$0xff] %v20240_v52  ;;  %v20242_v21 = vpop.f32.mrb[114].mxu1  ;;  %v14112_v52 = vld [vmem:[%s18253_s29 + $0x301] sm:$0xff] }
 0x42d   : > { %21557 = vst [vmem:[#allocation73_spill] sm:$0xff] %v20242_v21  ;;  %v20244_v5 = vpop.f32.mrb[115].mxu1  ;;  %v7572_v16 = vpack.c.bf16 %v14112_v52, %v14111_v37  ;;  %v14117_v37 = vld [vmem:[%s18253_s29 + $0x331] sm:$0xff] }
 0x42e   : > { %21558 = vst [vmem:[#allocation74_spill] sm:$0xff] %v20244_v5 }
 0x430   : > { %16348 = vmatmul.mubr.msk.bf16.gmra.mrb[60].mxu0 %vm613_vm2, %v7569_v8  ;;  %v14114_v8 = vld [vmem:[%s18253_s29 + $0x311] sm:$0xff] }
 0x431   : > { %16351 = vmatprep.mubr.msk.bf16.mxu0 %vm613_vm2, %v7570_v17  ;;  %v7573_v30 = vpack.c.bf16 %v14114_v8, %v14113_v45 }
 0x432   : > { %v20250_v35 = vpop.f32.mrb[116].mxu1 }
 0x433   : > { %21559 = vst [vmem:[#allocation75_spill] sm:$0xff] %v20250_v35  ;;  %v20254_v63 = vpop.f32.mrb[117].mxu1  ;;  %v14115_v35 = vld [vmem:[%s18253_s29 + $0x321] sm:$0xff] }
 0x434   : > { %21560 = vst [vmem:[#allocation76_spill] sm:$0xff] %v20254_v63  ;;  %v20256_v43 = vpop.f32.mrb[118].mxu1  ;;  %v14116_v63 = vld [vmem:[%s18253_s29 + $0x329] sm:$0xff] }
 0x435   : > { %21561 = vst [vmem:[#allocation77_spill] sm:$0xff] %v20256_v43  ;;  %v20258_v5 = vpop.f32.mrb[119].mxu1  ;;  %v7574_v52 = vpack.c.bf16 %v14116_v63, %v14115_v35  ;;  %v20456_v43 = vld [vmem:[%s18253_s29 + $0x29a] sm:$0xff] }
 0x436   : > { %21562 = vst [vmem:[#allocation78_spill] sm:$0xff] %v20258_v5 }
 0x438   : > { %16352 = vmatmul.mubr.msk.bf16.gmra.mrb[64].mxu0 %vm613_vm2, %v7571_v51  ;;  %v14118_v51 = vld [vmem:[%s18253_s29 + $0x339] sm:$0xff] }
 0x439   : > { %16355 = vmatprep.mubr.msk.bf16.mxu0 %vm613_vm2, %v7572_v16  ;;  %v7575_v63 = vpack.c.bf16 %v14118_v51, %v14117_v37  ;;  %v14125_v37 = vld [vmem:[%s18253_s29 + $0x381] sm:$0xff] }
 0x43a   : > { %v20264_v17 = vpop.f32.mrb[120].mxu1  ;;  %v14128_v51 = vld [vmem:[%s18253_s29 + $0x3a1] sm:$0xff] }
 0x43b   : > { %21563 = vst [vmem:[#allocation79_spill] sm:$0xff] %v20264_v17  ;;  %v20268_v21 = vpop.f32.mrb[121].mxu1  ;;  %v14119_v17 = vld [vmem:[%s18253_s29 + $0x349] sm:$0xff] }
 0x43c   : > { %21564 = vst [vmem:[#allocation80_spill] sm:$0xff] %v20268_v21  ;;  %v20270_v29 = vpop.f32.mrb[122].mxu1  ;;  %v14120_v21 = vld [vmem:[%s18253_s29 + $0x351] sm:$0xff] }
 0x43d   : > { %21565 = vst [vmem:[#allocation81_spill] sm:$0xff] %v20270_v29  ;;  %v20272_v5 = vpop.f32.mrb[123].mxu1  ;;  %v7576_v8 = vpack.c.bf16 %v14120_v21, %v14119_v17  ;;  %v14126_v21 = vld [vmem:[%s18253_s29 + $0x389] sm:$0xff]  ;;  %v14127_v17 = vld [vmem:[%s18253_s29 + $0x399] sm:$0xff] }
 0x43e   : > { %21566 = vst [vmem:[#allocation82_spill] sm:$0xff] %v20272_v5 }
 0x440   : > { %16356 = vmatmul.mubr.msk.bf16.gmra.mrb[68].mxu0 %vm613_vm2, %v7573_v30  ;;  %v14121_v30 = vld [vmem:[%s18253_s29 + $0x359] sm:$0xff] }
 0x441   : > { %16359 = vmatprep.mubr.msk.bf16.mxu0 %vm613_vm2, %v7574_v52  ;;  %v14122_v52 = vld [vmem:[%s18253_s29 + $0x361] sm:$0xff] }
 0x442   : > { %v20278_v16 = vpop.f32.mrb[124].mxu1  ;;  %v7577_v5 = vpack.c.bf16 %v14122_v52, %v14121_v30  ;;  %v14129_v30 = vld [vmem:[%s18253_s29 + $0x3a9] sm:$0xff] }
 0x443   : > { %21567 = vst [vmem:[#allocation83_spill] sm:$0xff] %v20278_v16  ;;  %v20282_v29 = vpop.f32.mrb[125].mxu1  ;;  %v14123_v16 = vld [vmem:[%s18253_s29 + $0x371] sm:$0xff] }
 0x444   : > { %21568 = vst [vmem:[#allocation84_spill] sm:$0xff] %v20282_v29  ;;  %v20284_v45 = vpop.f32.mrb[126].mxu1  ;;  %v14124_v29 = vld [vmem:[%s18253_s29 + $0x379] sm:$0xff] }
 0x445   : > { %21569 = vst [vmem:[#allocation85_spill] sm:$0xff] %v20284_v45  ;;  %v20286_v35 = vpop.f32.mrb[127].mxu1  ;;  %v7578_v45 = vpack.c.bf16 %v14124_v29, %v14123_v16  ;;  %v14130_v29 = vld [vmem:[%s18253_s29 + $0x3b1] sm:$0xff]  ;;  %v14132_v16 = vld [vmem:[%s18253_s29 + $0x3c9] sm:$0xff] }
 0x446   : > { %21570 = vst [vmem:[#allocation86_spill] sm:$0xff] %v20286_v35  ;;  %v20453_v35 = vld [vmem:[%s18253_s29 + $0x292] sm:$0xff] }
 0x448   : > { %16360 = vmatmul.mubr.msk.bf16.gmra.mrb[72].mxu0 %vm613_vm2, %v7575_v63  ;;  %v7579_v63 = vpack.c.bf16 %v14126_v21, %v14125_v37  ;;  %v14133_v37 = vld [vmem:[%s18253_s29 + $0x3d1] sm:$0xff]  ;;  %v14134_v21 = vld [vmem:[%s18253_s29 + $0x3d9] sm:$0xff] }
 0x449   : > { %16363 = vmatprep.mubr.msk.bf16.mxu0 %vm613_vm2, %v7576_v8  ;;  %v7580_v8 = vpack.c.bf16 %v14128_v51, %v14127_v17  ;;  %v14135_v17 = vld [vmem:[%s18253_s29 + $0x3e9] sm:$0xff]  ;;  %v14136_v51 = vld [vmem:[%s18253_s29 + $0x3f1] sm:$0xff] }
 0x450   : > { %16364 = vmatmul.mubr.msk.bf16.gmra.mrb[76].mxu0 %vm613_vm2, %v7577_v5  ;;  %v14131_v5 = vld [vmem:[%s18253_s29 + $0x3c1] sm:$0xff] }
 0x451   : > { %16367 = vmatprep.mubr.msk.bf16.mxu0 %vm613_vm2, %v7578_v45  ;;  %v7581_v45 = vpack.c.bf16 %v14130_v29, %v14129_v30  ;;  %v7582_v52 = vpack.c.bf16 %v14132_v16, %v14131_v5  ;;  %v14137_v30 = vld [vmem:[%s18253_s29 + $0x3f9] sm:$0xff]  ;;  %v14138_v29 = vld [vmem:[%s18253_s29 + $0x401] sm:$0xff]  ;;  %v14139_v5 = vld [vmem:[%s18253_s29 + $0x411] sm:$0xff] }
 0x452   : > { %v14140_v16 = vld [vmem:[%s18253_s29 + $0x419] sm:$0xff] }
 0x458   : > { %16368 = vmatmul.mubr.msk.bf16.gmra.mrb[80].mxu0 %vm613_vm2, %v7579_v63  ;;  %v7583_v63 = vpack.c.bf16 %v14134_v21, %v14133_v37  ;;  %v14141_v37 = vld [vmem:[%s18253_s29 + $0x421] sm:$0xff]  ;;  %v14142_v21 = vld [vmem:[%s18253_s29 + $0x429] sm:$0xff] }
 0x459   : > { %16371 = vmatprep.mubr.msk.bf16.mxu0 %vm613_vm2, %v7580_v8  ;;  %v7584_v8 = vpack.c.bf16 %v14136_v51, %v14135_v17  ;;  %v14143_v17 = vld [vmem:[%s18253_s29 + $0x439] sm:$0xff]  ;;  %v14144_v51 = vld [vmem:[%s18253_s29 + $0x441] sm:$0xff] }
 0x460   : > { %16372 = vmatmul.mubr.msk.bf16.gmra.mrb[84].mxu0 %vm613_vm2, %v7581_v45  ;;  %v7585_v45 = vpack.c.bf16 %v14138_v29, %v14137_v30  ;;  %v14145_v30 = vld [vmem:[%s18253_s29 + $0x449] sm:$0xff]  ;;  %v14146_v29 = vld [vmem:[%s18253_s29 + $0x451] sm:$0xff] }
 0x461   : > { %16375 = vmatprep.mubr.msk.bf16.mxu0 %vm613_vm2, %v7582_v52  ;;  %v7586_v52 = vpack.c.bf16 %v14140_v16, %v14139_v5  ;;  %v14147_v5 = vld [vmem:[%s18253_s29 + $0x461] sm:$0xff]  ;;  %v14148_v16 = vld [vmem:[%s18253_s29 + $0x469] sm:$0xff] }
 0x468   : > { %16376 = vmatmul.mubr.msk.bf16.gmra.mrb[88].mxu0 %vm613_vm2, %v7583_v63  ;;  %v7587_v63 = vpack.c.bf16 %v14142_v21, %v14141_v37  ;;  %v14149_v37 = vld [vmem:[%s18253_s29 + $0x471] sm:$0xff]  ;;  %v14150_v21 = vld [vmem:[%s18253_s29 + $0x479] sm:$0xff] }
 0x469   : > { %16379 = vmatprep.mubr.msk.bf16.mxu0 %vm613_vm2, %v7584_v8  ;;  %v7588_v8 = vpack.c.bf16 %v14144_v51, %v14143_v17  ;;  %v14151_v17 = vld [vmem:[%s18253_s29 + $0x489] sm:$0xff]  ;;  %v14152_v51 = vld [vmem:[%s18253_s29 + $0x491] sm:$0xff] }
 0x470   : > { %16380 = vmatmul.mubr.msk.bf16.gmra.mrb[92].mxu0 %vm613_vm2, %v7585_v45  ;;  %v7589_v45 = vpack.c.bf16 %v14146_v29, %v14145_v30  ;;  %v14153_v30 = vld [vmem:[%s18253_s29 + $0x499] sm:$0xff]  ;;  %v14154_v29 = vld [vmem:[%s18253_s29 + $0x4a1] sm:$0xff] }
 0x471   : > { %16383 = vmatprep.mubr.msk.bf16.mxu0 %vm613_vm2, %v7586_v52  ;;  %v7590_v52 = vpack.c.bf16 %v14148_v16, %v14147_v5  ;;  %v14155_v5 = vld [vmem:[%s18253_s29 + $0x4b1] sm:$0xff]  ;;  %v14156_v16 = vld [vmem:[%s18253_s29 + $0x4b9] sm:$0xff] }
 0x478   : > { %16384 = vmatmul.mubr.msk.bf16.gmra.mrb[96].mxu0 %vm613_vm2, %v7587_v63  ;;  %v7591_v63 = vpack.c.bf16 %v14150_v21, %v14149_v37  ;;  %v14157_v37 = vld [vmem:[%s18253_s29 + $0x4c1] sm:$0xff]  ;;  %v14158_v21 = vld [vmem:[%s18253_s29 + $0x4c9] sm:$0xff] }
 0x479   : > { %16387 = vmatprep.mubr.msk.bf16.mxu0 %vm613_vm2, %v7588_v8  ;;  %v7592_v8 = vpack.c.bf16 %v14152_v51, %v14151_v17  ;;  %v14159_v17 = vld [vmem:[%s18253_s29 + $0x4d9] sm:$0xff]  ;;  %v14160_v51 = vld [vmem:[%s18253_s29 + $0x4e1] sm:$0xff] }
 0x480   : > { %16388 = vmatmul.mubr.msk.bf16.gmra.mrb[100].mxu0 %vm613_vm2, %v7589_v45  ;;  %v7593_v45 = vpack.c.bf16 %v14154_v29, %v14153_v30  ;;  %v14161_v30 = vld [vmem:[%s18253_s29 + $0x4e9] sm:$0xff]  ;;  %v14162_v29 = vld [vmem:[%s18253_s29 + $0x4f1] sm:$0xff] }
 0x481   : > { %16391 = vmatprep.mubr.msk.bf16.mxu0 %vm613_vm2, %v7590_v52  ;;  %v7594_v52 = vpack.c.bf16 %v14156_v16, %v14155_v5  ;;  %v14163_v5 = vld [vmem:[%s18253_s29 + $0x501] sm:$0xff]  ;;  %v14164_v16 = vld [vmem:[%s18253_s29 + $0x509] sm:$0xff] }
 0x488   : > { %16392 = vmatmul.mubr.msk.bf16.gmra.mrb[104].mxu0 %vm613_vm2, %v7591_v63  ;;  %v7595_v63 = vpack.c.bf16 %v14158_v21, %v14157_v37  ;;  %v14165_v37 = vld [vmem:[%s18253_s29 + $0x511] sm:$0xff]  ;;  %v14166_v21 = vld [vmem:[%s18253_s29 + $0x519] sm:$0xff] }
 0x489   : > { %16395 = vmatprep.mubr.msk.bf16.mxu0 %vm613_vm2, %v7592_v8  ;;  %v7596_v8 = vpack.c.bf16 %v14160_v51, %v14159_v17  ;;  %v14167_v17 = vld [vmem:[%s18253_s29 + $0x529] sm:$0xff]  ;;  %v14168_v51 = vld [vmem:[%s18253_s29 + $0x531] sm:$0xff] }
 0x490   : > { %16396 = vmatmul.mubr.msk.bf16.gmra.mrb[108].mxu0 %vm613_vm2, %v7593_v45  ;;  %v7597_v45 = vpack.c.bf16 %v14162_v29, %v14161_v30  ;;  %v14169_v30 = vld [vmem:[%s18253_s29 + $0x539] sm:$0xff]  ;;  %v14170_v29 = vld [vmem:[%s18253_s29 + $0x541] sm:$0xff] }
 0x491   : > { %16399 = vmatprep.mubr.msk.bf16.mxu0 %vm613_vm2, %v7594_v52  ;;  %v7598_v52 = vpack.c.bf16 %v14164_v16, %v14163_v5  ;;  %v14236_v5 = vld [vmem:[%s18253_s29 + $0x52] sm:$0xff]  ;;  %v14237_v16 = vld [vmem:[%s18253_s29 + $0x5a] sm:$0xff] }
 0x498   : > { %16400 = vmatmul.mubr.msk.bf16.gmra.mrb[112].mxu0 %vm613_vm2, %v7595_v63  ;;  %v7599_v63 = vpack.c.bf16 %v14166_v21, %v14165_v37  ;;  %v14238_v37 = vld [vmem:[%s18253_s29 + $0x62] sm:$0xff]  ;;  %v14239_v21 = vld [vmem:[%s18253_s29 + $0x6a] sm:$0xff] }
 0x499   : > { %16403 = vmatprep.mubr.msk.bf16.mxu0 %vm613_vm2, %v7596_v8  ;;  %v7600_v8 = vpack.c.bf16 %v14168_v51, %v14167_v17  ;;  %v14240_v17 = vld [vmem:[%s18253_s29 + $0x7a] sm:$0xff]  ;;  %v14241_v51 = vld [vmem:[%s18253_s29 + $0x82] sm:$0xff] }
 0x4a0   : > { %16404 = vmatmul.mubr.msk.bf16.gmra.mrb[116].mxu0 %vm613_vm2, %v7597_v45  ;;  %v7601_v45 = vpack.c.bf16 %v14170_v29, %v14169_v30  ;;  %v14242_v30 = vld [vmem:[%s18253_s29 + $0x8a] sm:$0xff]  ;;  %v14243_v29 = vld [vmem:[%s18253_s29 + $0x92] sm:$0xff] }
 0x4a1   : > { %16407 = vmatprep.mubr.msk.bf16.mxu0 %vm613_vm2, %v7598_v52  ;;  %v8600_v52 = vpack.c.bf16 %v14237_v16, %v14236_v5  ;;  %v14244_v5 = vld [vmem:[%s18253_s29 + $0xa2] sm:$0xff]  ;;  %v14245_v16 = vld [vmem:[%s18253_s29 + $0xaa] sm:$0xff] }
 0x4a8   : > { %16408 = vmatmul.mubr.msk.bf16.gmra.mrb[120].mxu0 %vm613_vm2, %v7599_v63  ;;  %v8601_v63 = vpack.c.bf16 %v14239_v21, %v14238_v37  ;;  %v14246_v37 = vld [vmem:[%s18253_s29 + $0xb2] sm:$0xff]  ;;  %v14247_v21 = vld [vmem:[%s18253_s29 + $0xba] sm:$0xff] }
 0x4a9   : > { %16411 = vmatprep.mubr.msk.bf16.mxu0 %vm613_vm2, %v7600_v8  ;;  %v8602_v8 = vpack.c.bf16 %v14241_v51, %v14240_v17  ;;  %v14248_v17 = vld [vmem:[%s18253_s29 + $0xca] sm:$0xff]  ;;  %v14249_v51 = vld [vmem:[%s18253_s29 + $0xd2] sm:$0xff] }
 0x4b0   : > { %16412 = vmatmul.mubr.msk.bf16.gmra.mrb[124].mxu0 %vm613_vm2, %v7601_v45  ;;  %v8603_v45 = vpack.c.bf16 %v14243_v29, %v14242_v30  ;;  %v14250_v30 = vld [vmem:[%s18253_s29 + $0xda] sm:$0xff]  ;;  %v14251_v29 = vld [vmem:[%s18253_s29 + $0xe2] sm:$0xff] }
 0x4b1   : > { %16417 = vmatprep.mubr.msk.bf16.mxu0 %vm613_vm2, %v8600_v52  ;;  %v8604_v52 = vpack.c.bf16 %v14245_v16, %v14244_v5  ;;  %v14252_v5 = vld [vmem:[%s18253_s29 + $0xf2] sm:$0xff]  ;;  %v14253_v16 = vld [vmem:[%s18253_s29 + $0xfa] sm:$0xff] }
 0x4b8   : > { %16418 = vmatmul.mubr.msk.bf16.vlgmr.msra.gmra.mrb[0].mxu0 %vm613_vm2, %v8601_v63  ;;  %v8605_v63 = vpack.c.bf16 %v14247_v21, %v14246_v37  ;;  %v14254_v37 = vld [vmem:[%s18253_s29 + $0x102] sm:$0xff]  ;;  %v14255_v21 = vld [vmem:[%s18253_s29 + $0x10a] sm:$0xff] }
 0x4b9   : > { %16421 = vmatprep.mubr.msk.bf16.mxu0 %vm613_vm2, %v8602_v8  ;;  %v8606_v8 = vpack.c.bf16 %v14249_v51, %v14248_v17  ;;  %v14256_v17 = vld [vmem:[%s18253_s29 + $0x11a] sm:$0xff]  ;;  %v14257_v51 = vld [vmem:[%s18253_s29 + $0x122] sm:$0xff] }
 0x4c0   : > { %16422 = vmatmul.mubr.msk.bf16.gmra.mrb[4].mxu0 %vm613_vm2, %v8603_v45  ;;  %v8607_v45 = vpack.c.bf16 %v14251_v29, %v14250_v30  ;;  %v14258_v30 = vld [vmem:[%s18253_s29 + $0x12a] sm:$0xff]  ;;  %v14259_v29 = vld [vmem:[%s18253_s29 + $0x132] sm:$0xff] }
 0x4c1   : > { %16425 = vmatprep.mubr.msk.bf16.mxu0 %vm613_vm2, %v8604_v52  ;;  %v8608_v52 = vpack.c.bf16 %v14253_v16, %v14252_v5  ;;  %v14260_v5 = vld [vmem:[%s18253_s29 + $0x142] sm:$0xff]  ;;  %v14261_v16 = vld [vmem:[%s18253_s29 + $0x14a] sm:$0xff] }
 0x4c8   : > { %16426 = vmatmul.mubr.msk.bf16.gmra.mrb[8].mxu0 %vm613_vm2, %v8605_v63  ;;  %v8609_v63 = vpack.c.bf16 %v14255_v21, %v14254_v37  ;;  %v14262_v37 = vld [vmem:[%s18253_s29 + $0x152] sm:$0xff]  ;;  %v14263_v21 = vld [vmem:[%s18253_s29 + $0x15a] sm:$0xff] }
 0x4c9   : > { %16429 = vmatprep.mubr.msk.bf16.mxu0 %vm613_vm2, %v8606_v8  ;;  %v8610_v8 = vpack.c.bf16 %v14257_v51, %v14256_v17  ;;  %v14264_v17 = vld [vmem:[%s18253_s29 + $0x16a] sm:$0xff]  ;;  %v14265_v51 = vld [vmem:[%s18253_s29 + $0x172] sm:$0xff] }
 0x4d0   : > { %16430 = vmatmul.mubr.msk.bf16.gmra.mrb[12].mxu0 %vm613_vm2, %v8607_v45  ;;  %v8611_v45 = vpack.c.bf16 %v14259_v29, %v14258_v30  ;;  %v14266_v30 = vld [vmem:[%s18253_s29 + $0x17a] sm:$0xff]  ;;  %v14267_v29 = vld [vmem:[%s18253_s29 + $0x182] sm:$0xff] }
 0x4d1   : > { %16433 = vmatprep.mubr.msk.bf16.mxu0 %vm613_vm2, %v8608_v52  ;;  %v8612_v52 = vpack.c.bf16 %v14261_v16, %v14260_v5  ;;  %v14268_v5 = vld [vmem:[%s18253_s29 + $0x192] sm:$0xff]  ;;  %v14269_v16 = vld [vmem:[%s18253_s29 + $0x19a] sm:$0xff] }
 0x4d8   : > { %16434 = vmatmul.mubr.msk.bf16.gmra.mrb[16].mxu0 %vm613_vm2, %v8609_v63  ;;  %v8613_v63 = vpack.c.bf16 %v14263_v21, %v14262_v37  ;;  %v14270_v37 = vld [vmem:[%s18253_s29 + $0x1a2] sm:$0xff]  ;;  %v14271_v21 = vld [vmem:[%s18253_s29 + $0x1aa] sm:$0xff] }
 0x4d9   : > { %16437 = vmatprep.mubr.msk.bf16.mxu0 %vm613_vm2, %v8610_v8  ;;  %v8614_v8 = vpack.c.bf16 %v14265_v51, %v14264_v17  ;;  %v14272_v17 = vld [vmem:[%s18253_s29 + $0x1ba] sm:$0xff]  ;;  %v14273_v51 = vld [vmem:[%s18253_s29 + $0x1c2] sm:$0xff] }
 0x4e0   : > { %16438 = vmatmul.mubr.msk.bf16.gmra.mrb[20].mxu0 %vm613_vm2, %v8611_v45  ;;  %v8615_v45 = vpack.c.bf16 %v14267_v29, %v14266_v30  ;;  %v14274_v30 = vld [vmem:[%s18253_s29 + $0x1ca] sm:$0xff]  ;;  %v14275_v29 = vld [vmem:[%s18253_s29 + $0x1d2] sm:$0xff] }
 0x4e1   : > { %16441 = vmatprep.mubr.msk.bf16.mxu0 %vm613_vm2, %v8612_v52  ;;  %v8616_v52 = vpack.c.bf16 %v14269_v16, %v14268_v5  ;;  %v14276_v5 = vld [vmem:[%s18253_s29 + $0x1e2] sm:$0xff]  ;;  %v14277_v16 = vld [vmem:[%s18253_s29 + $0x1ea] sm:$0xff] }
 0x4e8   : > { %16442 = vmatmul.mubr.msk.bf16.gmra.mrb[24].mxu0 %vm613_vm2, %v8613_v63  ;;  %v8617_v63 = vpack.c.bf16 %v14271_v21, %v14270_v37  ;;  %v14278_v37 = vld [vmem:[%s18253_s29 + $0x1f2] sm:$0xff]  ;;  %v14279_v21 = vld [vmem:[%s18253_s29 + $0x1fa] sm:$0xff] }
 0x4e9   : > { %16445 = vmatprep.mubr.msk.bf16.mxu0 %vm613_vm2, %v8614_v8  ;;  %v8618_v8 = vpack.c.bf16 %v14273_v51, %v14272_v17  ;;  %v14280_v17 = vld [vmem:[%s18253_s29 + $0x20a] sm:$0xff]  ;;  %v14281_v51 = vld [vmem:[%s18253_s29 + $0x212] sm:$0xff] }
 0x4f0   : > { %16446 = vmatmul.mubr.msk.bf16.gmra.mrb[28].mxu0 %vm613_vm2, %v8615_v45  ;;  %v8619_v45 = vpack.c.bf16 %v14275_v29, %v14274_v30  ;;  %v14282_v30 = vld [vmem:[%s18253_s29 + $0x21a] sm:$0xff]  ;;  %v14283_v29 = vld [vmem:[%s18253_s29 + $0x222] sm:$0xff] }
 0x4f1   : > { %16449 = vmatprep.mubr.msk.bf16.mxu0 %vm613_vm2, %v8616_v52  ;;  %v8620_v52 = vpack.c.bf16 %v14277_v16, %v14276_v5  ;;  %v14284_v5 = vld [vmem:[%s18253_s29 + $0x232] sm:$0xff]  ;;  %v14285_v16 = vld [vmem:[%s18253_s29 + $0x23a] sm:$0xff] }
 0x4f8   : > { %16450 = vmatmul.mubr.msk.bf16.gmra.mrb[32].mxu0 %vm613_vm2, %v8617_v63  ;;  %v8621_v63 = vpack.c.bf16 %v14279_v21, %v14278_v37  ;;  %v14286_v37 = vld [vmem:[%s18253_s29 + $0x242] sm:$0xff]  ;;  %v14287_v21 = vld [vmem:[%s18253_s29 + $0x24a] sm:$0xff] }
 0x4f9   : > { %16453 = vmatprep.mubr.msk.bf16.mxu0 %vm613_vm2, %v8618_v8  ;;  %v8622_v8 = vpack.c.bf16 %v14281_v51, %v14280_v17  ;;  %v14288_v17 = vld [vmem:[%s18253_s29 + $0x25a] sm:$0xff]  ;;  %v14289_v51 = vld [vmem:[%s18253_s29 + $0x262] sm:$0xff] }
 0x500   : > { %16454 = vmatmul.mubr.msk.bf16.gmra.mrb[36].mxu0 %vm613_vm2, %v8619_v45  ;;  %v8623_v45 = vpack.c.bf16 %v14283_v29, %v14282_v30  ;;  %v14290_v30 = vld [vmem:[%s18253_s29 + $0x26a] sm:$0xff]  ;;  %v14291_v29 = vld [vmem:[%s18253_s29 + $0x272] sm:$0xff] }
 0x501   : > { %16457 = vmatprep.mubr.msk.bf16.mxu0 %vm613_vm2, %v8620_v52  ;;  %v8624_v52 = vpack.c.bf16 %v14285_v16, %v14284_v5  ;;  %v14292_v5 = vld [vmem:[%s18253_s29 + $0x282] sm:$0xff]  ;;  %v14293_v16 = vld [vmem:[%s18253_s29 + $0x28a] sm:$0xff] }
 0x508   : > { %16458 = vmatmul.mubr.msk.bf16.gmra.mrb[40].mxu0 %vm613_vm2, %v8621_v63  ;;  %v8625_v63 = vpack.c.bf16 %v14287_v21, %v14286_v37  ;;  %v20459_v37 = vld [vmem:[%s18253_s29 + $0x2aa] sm:$0xff]  ;;  %v14297_v21 = vld [vmem:[%s18253_s29 + $0x2b2] sm:$0xff] }
 0x509   : > { %16461 = vmatprep.mubr.msk.bf16.mxu0 %vm613_vm2, %v8622_v8  ;;  %v8626_v8 = vpack.c.bf16 %v14289_v51, %v14288_v17  ;;  %v8629_v17 = vpack.c.bf16 %v20456_v43, %v20453_v35  ;;  %v8630_v51 = vpack.c.bf16 %v14297_v21, %v20459_v37  ;;  %v14298_v43 = vld [vmem:[%s18253_s29 + $0x2ba] sm:$0xff]  ;;  %v14299_v35 = vld [vmem:[%s18253_s29 + $0x2c2] sm:$0xff] }
 0x510   : > { %16462 = vmatmul.mubr.msk.bf16.gmra.mrb[44].mxu0 %vm613_vm2, %v8623_v45  ;;  %v8627_v45 = vpack.c.bf16 %v14291_v29, %v14290_v30  ;;  %v14300_v30 = vld [vmem:[%s18253_s29 + $0x2d2] sm:$0xff]  ;;  %v14301_v29 = vld [vmem:[%s18253_s29 + $0x2da] sm:$0xff] }
 0x511   : > { %16465 = vmatprep.mubr.msk.bf16.mxu0 %vm613_vm2, %v8624_v52  ;;  %v8628_v52 = vpack.c.bf16 %v14293_v16, %v14292_v5  ;;  %v8631_v5 = vpack.c.bf16 %v14299_v35, %v14298_v43  ;;  %v8632_v16 = vpack.c.bf16 %v14301_v29, %v14300_v30  ;;  %v14305_v43 = vld [vmem:[%s18253_s29 + $0x302] sm:$0xff]  ;;  %v14306_v30 = vld [vmem:[%s18253_s29 + $0x30a] sm:$0xff]  ;;  %v14307_v29 = vld [vmem:[%s18253_s29 + $0x312] sm:$0xff] }
 0x518   : > { %16466 = vmatmul.mubr.msk.bf16.gmra.mrb[48].mxu0 %vm613_vm2, %v8625_v63  ;;  %v18190_v63 = vmov 0.0  }
 0x519   : > { %16469 = vmatprep.mubr.msk.bf16.mxu0 %vm613_vm2, %v8626_v8  ;;  %10090 = vst.msk [vmem:[#allocation3 + $0x20] sm:$0xff] %vm9861_vm3, %v18190_v63  ;;  %10085 = vst.msk [vmem:[#allocation3] sm:$0xff] %vm9861_vm3, %v18190_v63  ;;  %v18162_v8 = vld [vmem:[%s21486_s3 + $0x10] sm:$0xff]  }
 0x51a   : > { %10091 = vst.msk [vmem:[#allocation3 + $0x28] sm:$0x3] %vm10087_vm4, %v18190_v63  ;;  %10088 = vst.msk [vmem:[#allocation3 + $0x10] sm:$0x3] %vm10087_vm4, %v18190_v63  ;;  %16545 = vmatprep.subr.bf16.mxu1 %v18162_v8 }
 0x51b   : > { %10086 = vst.msk [vmem:[#allocation3 + $0x8] sm:$0xff] %vm9861_vm3, %v18190_v63  ;;  %10089 = vst.msk [vmem:[#allocation3 + $0x18] sm:$0xff] %vm9861_vm3, %v18190_v63  ;;  %16546 = vmatpush3.bf16.msra.mxu1 %v18162_v8 }
 0x51c   : > { %10092 = vst.msk [vmem:[#allocation3 + $0x30] sm:$0xff] %vm9861_vm3, %v18190_v63  ;;  %10093 = vst.msk [vmem:[#allocation3 + $0x38] sm:$0xff] %vm9861_vm3, %v18190_v63 }
 0x51d   : > { %10094 = vst.msk [vmem:[#allocation3 + $0x40] sm:$0x3] %vm10087_vm4, %v18190_v63  ;;  %10097 = vst.msk [vmem:[#allocation3 + $0x58] sm:$0x3] %vm10087_vm4, %v18190_v63 }
 0x51e   : > { %10095 = vst.msk [vmem:[#allocation3 + $0x48] sm:$0xff] %vm9861_vm3, %v18190_v63  ;;  %10096 = vst.msk [vmem:[#allocation3 + $0x50] sm:$0xff] %vm9861_vm3, %v18190_v63 }
 0x51f   : > { %10098 = vst.msk [vmem:[#allocation3 + $0x60] sm:$0xff] %vm9861_vm3, %v18190_v63  ;;  %10099 = vst.msk [vmem:[#allocation3 + $0x68] sm:$0xff] %vm9861_vm3, %v18190_v63 }
 0x520   : > { %16470 = vmatmul.mubr.msk.bf16.gmra.mrb[52].mxu0 %vm613_vm2, %v8627_v45  ;;  %10100 = vst.msk [vmem:[#allocation3 + $0x70] sm:$0x3] %vm10087_vm4, %v18190_v63  ;;  %10103 = vst.msk [vmem:[#allocation3 + $0x88] sm:$0x3] %vm10087_vm4, %v18190_v63  ;;  %v18163_v45 = vld [vmem:[%s21486_s3 + $0x18] sm:$0xff]  }
 0x521   : > { %16473 = vmatprep.mubr.msk.bf16.mxu0 %vm613_vm2, %v8628_v52  ;;  %10101 = vst.msk [vmem:[#allocation3 + $0x78] sm:$0xff] %vm9861_vm3, %v18190_v63  ;;  %10102 = vst.msk [vmem:[#allocation3 + $0x80] sm:$0xff] %vm9861_vm3, %v18190_v63  ;;  %16547 = vmatprep.subr.bf16.mxu1 %v18163_v45 }
 0x522   : > { %10104 = vst.msk [vmem:[#allocation3 + $0x90] sm:$0xff] %vm9861_vm3, %v18190_v63  ;;  %10105 = vst.msk [vmem:[#allocation3 + $0x98] sm:$0xff] %vm9861_vm3, %v18190_v63  ;;  %v10225_v52 = vld [vmem:[#allocation3 + $0x1] sm:$0xff]  ;;  %v10226_v37 = vld [vmem:[#allocation3 + $0x9] sm:$0xff]  ;;  %16548 = vmatpush3.bf16.msra.mxu1 %v18163_v45  ;;  %v8635_v45 = vpack.c.bf16 %v14307_v29, %v14306_v30 }
 0x523   : > { %10106 = vst.msk [vmem:[#allocation3 + $0xa0] sm:$0x3] %vm10087_vm4, %v18190_v63  ;;  %10109 = vst.msk [vmem:[#allocation3 + $0xb8] sm:$0x3] %vm10087_vm4, %v18190_v63  ;;  %v10257_v21 = vpack.c.bf16 %v10226_v37, %v10225_v52  ;;  %v14310_v37 = vld [vmem:[%s18253_s29 + $0x332] sm:$0xff]  ;;  %v14317_v29 = vld [vmem:[%s18253_s29 + $0x37a] sm:$0xff] }
 0x524   : > { %10107 = vst.msk [vmem:[#allocation3 + $0xa8] sm:$0xff] %vm9861_vm3, %v18190_v63  ;;  %10108 = vst.msk [vmem:[#allocation3 + $0xb0] sm:$0xff] %vm9861_vm3, %v18190_v63  ;;  %v14316_v30 = vld [vmem:[%s18253_s29 + $0x372] sm:$0xff] }
 0x525   : > { %10110 = vst.msk [vmem:[#allocation3 + $0xc0] sm:$0xff] %vm9861_vm3, %v18190_v63  ;;  %10111 = vst.msk [vmem:[#allocation3 + $0xc8] sm:$0xff] %vm9861_vm3, %v18190_v63  ;;  %16549 = vmatprep.mubr.msk.bf16.mxu1 %vm9861_vm3, %v10257_v21  ;;  %v14311_v21 = vld [vmem:[%s18253_s29 + $0x33a] sm:$0xff] }
 0x526   : > { %10112 = vst.msk [vmem:[#allocation3 + $0xd0] sm:$0x3] %vm10087_vm4, %v18190_v63  ;;  %10115 = vst.msk [vmem:[#allocation3 + $0xe8] sm:$0x3] %vm10087_vm4, %v18190_v63 }
 0x527   : > { %10113 = vst.msk [vmem:[#allocation3 + $0xd8] sm:$0xff] %vm9861_vm3, %v18190_v63  ;;  %10114 = vst.msk [vmem:[#allocation3 + $0xe0] sm:$0xff] %vm9861_vm3, %v18190_v63 }
 0x528   : > { %10116 = vst.msk [vmem:[#allocation3 + $0xf0] sm:$0xff] %vm9861_vm3, %v18190_v63  ;;  %10117 = vst.msk [vmem:[#allocation3 + $0xf8] sm:$0xff] %vm9861_vm3, %v18190_v63  ;;  %16474 = vmatmul.mubr.msk.bf16.gmra.mrb[56].mxu0 %vm613_vm2, %v8629_v17  ;;  %v14302_v17 = vld [vmem:[%s18253_s29 + $0x2e2] sm:$0xff] }
 0x529   : > { %10118 = vst.msk [vmem:[#allocation3 + $0x100] sm:$0x3] %vm10087_vm4, %v18190_v63  ;;  %10121 = vst.msk [vmem:[#allocation3 + $0x118] sm:$0x3] %vm10087_vm4, %v18190_v63  ;;  %16477 = vmatprep.mubr.msk.bf16.mxu0 %vm613_vm2, %v8630_v51  ;;  %v14303_v51 = vld [vmem:[%s18253_s29 + $0x2ea] sm:$0xff] }
 0x52a   : > { %10119 = vst.msk [vmem:[#allocation3 + $0x108] sm:$0xff] %vm9861_vm3, %v18190_v63  ;;  %10120 = vst.msk [vmem:[#allocation3 + $0x110] sm:$0xff] %vm9861_vm3, %v18190_v63  ;;  %v8633_v35 = vpack.c.bf16 %v14303_v51, %v14302_v17  ;;  %v14312_v17 = vld [vmem:[%s18253_s29 + $0x34a] sm:$0xff]  ;;  %v14313_v51 = vld [vmem:[%s18253_s29 + $0x352] sm:$0xff] }
 0x52b   : > { %10122 = vst.msk [vmem:[#allocation3 + $0x120] sm:$0xff] %vm9861_vm3, %v18190_v63  ;;  %10123 = vst.msk [vmem:[#allocation3 + $0x128] sm:$0xff] %vm9861_vm3, %v18190_v63 }
 0x52c   : > { %10124 = vst.msk [vmem:[#allocation3 + $0x130] sm:$0x3] %vm10087_vm4, %v18190_v63  ;;  %10127 = vst.msk [vmem:[#allocation3 + $0x148] sm:$0x3] %vm10087_vm4, %v18190_v63 }
 0x52d   : > { %10125 = vst.msk [vmem:[#allocation3 + $0x138] sm:$0xff] %vm9861_vm3, %v18190_v63  ;;  %10126 = vst.msk [vmem:[#allocation3 + $0x140] sm:$0xff] %vm9861_vm3, %v18190_v63 }
 0x52e   : > { %10128 = vst.msk [vmem:[#allocation3 + $0x150] sm:$0xff] %vm9861_vm3, %v18190_v63  ;;  %10129 = vst.msk [vmem:[#allocation3 + $0x158] sm:$0xff] %vm9861_vm3, %v18190_v63 }
 0x52f   : > { %10130 = vst.msk [vmem:[#allocation3 + $0x160] sm:$0x3] %vm10087_vm4, %v18190_v63  ;;  %10133 = vst.msk [vmem:[#allocation3 + $0x178] sm:$0x3] %vm10087_vm4, %v18190_v63 }
 0x530   : > { %10131 = vst.msk [vmem:[#allocation3 + $0x168] sm:$0xff] %vm9861_vm3, %v18190_v63  ;;  %10132 = vst.msk [vmem:[#allocation3 + $0x170] sm:$0xff] %vm9861_vm3, %v18190_v63  ;;  %16478 = vmatmul.mubr.msk.bf16.gmra.mrb[60].mxu0 %vm613_vm2, %v8631_v5  ;;  %v14308_v5 = vld [vmem:[%s18253_s29 + $0x322] sm:$0xff] }
 0x531   : > { %10134 = vst.msk [vmem:[#allocation3 + $0x180] sm:$0xff] %vm9861_vm3, %v18190_v63  ;;  %10135 = vst.msk [vmem:[#allocation3 + $0x188] sm:$0xff] %vm9861_vm3, %v18190_v63  ;;  %16481 = vmatprep.mubr.msk.bf16.mxu0 %vm613_vm2, %v8632_v16  ;;  %v14309_v16 = vld [vmem:[%s18253_s29 + $0x32a] sm:$0xff] }
 0x532   : > { %10136 = vst.msk [vmem:[#allocation3 + $0x190] sm:$0x3] %vm10087_vm4, %v18190_v63  ;;  %10139 = vst.msk [vmem:[#allocation3 + $0x1a8] sm:$0x3] %vm10087_vm4, %v18190_v63  ;;  %v8636_v52 = vpack.c.bf16 %v14309_v16, %v14308_v5  ;;  %v8640_v16 = vpack.c.bf16 %v14317_v29, %v14316_v30 }
 0x533   : > { %10137 = vst.msk [vmem:[#allocation3 + $0x198] sm:$0xff] %vm9861_vm3, %v18190_v63  ;;  %10138 = vst.msk [vmem:[#allocation3 + $0x1a0] sm:$0xff] %vm9861_vm3, %v18190_v63  ;;  %v14304_v63 = vld [vmem:[%s18253_s29 + $0x2fa] sm:$0xff] }
 0x534   : > { %v8634_v8 = vpack.c.bf16 %v14305_v43, %v14304_v63  ;;  %v8637_v63 = vpack.c.bf16 %v14311_v21, %v14310_v37  ;;  %v8638_v43 = vpack.c.bf16 %v14313_v51, %v14312_v17  ;;  %v14320_v37 = vld [vmem:[%s18253_s29 + $0x39a] sm:$0xff]  ;;  %v14321_v21 = vld [vmem:[%s18253_s29 + $0x3a2] sm:$0xff] }
 0x535   : > { %v8642_v51 = vpack.c.bf16 %v14321_v21, %v14320_v37 }
 0x538   : > { %16482 = vmatmul.mubr.msk.bf16.gmra.mrb[64].mxu0 %vm613_vm2, %v8633_v35  ;;  %v14314_v35 = vld [vmem:[%s18253_s29 + $0x35a] sm:$0xff] }
 0x539   : > { %16485 = vmatprep.mubr.msk.bf16.mxu0 %vm613_vm2, %v8634_v8  ;;  %v14315_v8 = vld [vmem:[%s18253_s29 + $0x362] sm:$0xff] }
 0x53a   : > { %v8639_v5 = vpack.c.bf16 %v14315_v8, %v14314_v35  ;;  %v14324_v35 = vld [vmem:[%s18253_s29 + $0x3c2] sm:$0xff]  ;;  %v14325_v8 = vld [vmem:[%s18253_s29 + $0x3ca] sm:$0xff] }
 0x53b   : > { %v8644_v29 = vpack.c.bf16 %v14325_v8, %v14324_v35 }
 0x540   : > { %16486 = vmatmul.mubr.msk.bf16.gmra.mrb[68].mxu0 %vm613_vm2, %v8635_v45  ;;  %v14318_v45 = vld [vmem:[%s18253_s29 + $0x382] sm:$0xff] }
 0x541   : > { %16489 = vmatprep.mubr.msk.bf16.mxu0 %vm613_vm2, %v8636_v52  ;;  %v14319_v52 = vld [vmem:[%s18253_s29 + $0x38a] sm:$0xff] }
 0x542   : > { %v8641_v17 = vpack.c.bf16 %v14319_v52, %v14318_v45  ;;  %v14328_v45 = vld [vmem:[%s18253_s29 + $0x3ea] sm:$0xff]  ;;  %v14329_v52 = vld [vmem:[%s18253_s29 + $0x3f2] sm:$0xff] }
 0x543   : > { %v8646_v21 = vpack.c.bf16 %v14329_v52, %v14328_v45 }
 0x548   : > { %16490 = vmatmul.mubr.msk.bf16.gmra.mrb[72].mxu0 %vm613_vm2, %v8637_v63  ;;  %v14322_v63 = vld [vmem:[%s18253_s29 + $0x3aa] sm:$0xff] }
 0x549   : > { %16493 = vmatprep.mubr.msk.bf16.mxu0 %vm613_vm2, %v8638_v43  ;;  %v14323_v43 = vld [vmem:[%s18253_s29 + $0x3b2] sm:$0xff] }
 0x54a   : > { %v8643_v30 = vpack.c.bf16 %v14323_v43, %v14322_v63  ;;  %v14332_v63 = vld [vmem:[%s18253_s29 + $0x412] sm:$0xff]  ;;  %v14333_v43 = vld [vmem:[%s18253_s29 + $0x41a] sm:$0xff] }
 0x54b   : > { %v8648_v8 = vpack.c.bf16 %v14333_v43, %v14332_v63 }
 0x550   : > { %16494 = vmatmul.mubr.msk.bf16.gmra.mrb[76].mxu0 %vm613_vm2, %v8639_v5  ;;  %v14326_v5 = vld [vmem:[%s18253_s29 + $0x3d2] sm:$0xff] }
 0x551   : > { %16497 = vmatprep.mubr.msk.bf16.mxu0 %vm613_vm2, %v8640_v16  ;;  %v14327_v16 = vld [vmem:[%s18253_s29 + $0x3da] sm:$0xff] }
 0x552   : > { %v8645_v37 = vpack.c.bf16 %v14327_v16, %v14326_v5  ;;  %v14336_v5 = vld [vmem:[%s18253_s29 + $0x43a] sm:$0xff]  ;;  %v14337_v16 = vld [vmem:[%s18253_s29 + $0x442] sm:$0xff] }
 0x553   : > { %v8650_v52 = vpack.c.bf16 %v14337_v16, %v14336_v5 }
 0x558   : > { %16498 = vmatmul.mubr.msk.bf16.gmra.mrb[80].mxu0 %vm613_vm2, %v8641_v17  ;;  %v14330_v17 = vld [vmem:[%s18253_s29 + $0x3fa] sm:$0xff] }
 0x559   : > { %16501 = vmatprep.mubr.msk.bf16.mxu0 %vm613_vm2, %v8642_v51  ;;  %v14331_v51 = vld [vmem:[%s18253_s29 + $0x402] sm:$0xff] }
 0x55a   : > { %v8647_v35 = vpack.c.bf16 %v14331_v51, %v14330_v17  ;;  %v14340_v17 = vld [vmem:[%s18253_s29 + $0x462] sm:$0xff]  ;;  %v14341_v51 = vld [vmem:[%s18253_s29 + $0x46a] sm:$0xff] }
 0x55b   : > { %v8652_v43 = vpack.c.bf16 %v14341_v51, %v14340_v17 }
 0x560   : > { %16502 = vmatmul.mubr.msk.bf16.gmra.mrb[84].mxu0 %vm613_vm2, %v8643_v30  ;;  %v14334_v30 = vld [vmem:[%s18253_s29 + $0x422] sm:$0xff] }
 0x561   : > { %16505 = vmatprep.mubr.msk.bf16.mxu0 %vm613_vm2, %v8644_v29  ;;  %v14335_v29 = vld [vmem:[%s18253_s29 + $0x42a] sm:$0xff] }
 0x562   : > { %v8649_v45 = vpack.c.bf16 %v14335_v29, %v14334_v30  ;;  %v14344_v30 = vld [vmem:[%s18253_s29 + $0x48a] sm:$0xff]  ;;  %v14345_v29 = vld [vmem:[%s18253_s29 + $0x492] sm:$0xff] }
 0x563   : > { %v8654_v16 = vpack.c.bf16 %v14345_v29, %v14344_v30 }
 0x568   : > { %16506 = vmatmul.mubr.msk.bf16.gmra.mrb[88].mxu0 %vm613_vm2, %v8645_v37  ;;  %v14338_v37 = vld [vmem:[%s18253_s29 + $0x44a] sm:$0xff] }
 0x569   : > { %16509 = vmatprep.mubr.msk.bf16.mxu0 %vm613_vm2, %v8646_v21  ;;  %v14339_v21 = vld [vmem:[%s18253_s29 + $0x452] sm:$0xff] }
 0x56a   : > { %v8651_v63 = vpack.c.bf16 %v14339_v21, %v14338_v37  ;;  %v14349_v37 = vld [vmem:[%s18253_s29 + $0x4ba] sm:$0xff] }
 0x570   : > { %16510 = vmatmul.mubr.msk.bf16.gmra.mrb[92].mxu0 %vm613_vm2, %v8647_v35  ;;  %v14342_v35 = vld [vmem:[%s18253_s29 + $0x472] sm:$0xff] }
 0x571   : > { %16513 = vmatprep.mubr.msk.bf16.mxu0 %vm613_vm2, %v8648_v8  ;;  %v14343_v8 = vld [vmem:[%s18253_s29 + $0x47a] sm:$0xff] }
 0x572   : > { %v8653_v5 = vpack.c.bf16 %v14343_v8, %v14342_v35  ;;  %v8656_v8 = vpack.c.bf16 %v14349_v37, %v14348_v57 }
 0x578   : > { %16514 = vmatmul.mubr.msk.bf16.gmra.mrb[96].mxu0 %vm613_vm2, %v8649_v45  ;;  %v14346_v45 = vld [vmem:[%s18253_s29 + $0x49a] sm:$0xff] }
 0x579   : > { %16517 = vmatprep.mubr.msk.bf16.mxu0 %vm613_vm2, %v8650_v52  ;;  %v14347_v52 = vld [vmem:[%s18253_s29 + $0x4a2] sm:$0xff] }
 0x580   : > { %16518 = vmatmul.mubr.msk.bf16.gmra.mrb[100].mxu0 %vm613_vm2, %v8651_v63  ;;  %v8655_v63 = vpack.c.bf16 %v14347_v52, %v14346_v45  ;;  %v14351_v45 = vld [vmem:[%s18253_s29 + $0x4ca] sm:$0xff]  ;;  %v14352_v52 = vld [vmem:[%s18253_s29 + $0x4da] sm:$0xff] }
 0x581   : > { %16521 = vmatprep.mubr.msk.bf16.mxu0 %vm613_vm2, %v8652_v43 }
 0x588   : > { %16522 = vmatmul.mubr.msk.bf16.gmra.mrb[104].mxu0 %vm613_vm2, %v8653_v5 }
 0x589   : > { %16525 = vmatprep.mubr.msk.bf16.mxu0 %vm613_vm2, %v8654_v16  ;;  %v20612_v16 = vld [vmem:[%s21485_s2] ss:$0 sm:$0xff] }
 0x58b   : > { %v16419_v21 = vpop.f32.mrb[0].mxu0 }
 0x58c   : > { %v16871_v17 = vadd.f32 %v16419_v21, %v19648_v19  ;;  %v8895_v51 = vpop.f32.mrb[1].mxu0  ;;  %v14350_v19 = vld [vmem:[%s18253_s29 + $0x4c2] sm:$0xff] }
 0x58d   : > { %v16872_v43 = vadd.f32 %v8895_v51, %v19650_v28  ;;  %v16420_v35 = vpop.f32.mrb[2].mxu0  ;;  %v14353_v28 = vld [vmem:[%s18253_s29 + $0x4e2] sm:$0xff] }
 0x58e   : > { %v16873_v30 = vadd.f32 %v16420_v35, %v19652_v20  ;;  %v8898_v29 = vpop.f32.mrb[3].mxu0  ;;  %v9543_v57 = vadd.f32 %v16871_v17, %v20612_v16 }
 0x58f   : > { %v16874_v5 = vadd.f32 %v8898_v29, %v19654_v56  ;;  %v8657_v56 = vpack.c.bf16 %v14351_v45, %v14350_v19  ;;  %v9541_v51 = vadd.f32 %v16872_v43, %v20612_v16  ;;  %v8658_v29 = vpack.c.bf16 %v14353_v28, %v14352_v52 }
 0x590   : > { %16526 = vmatmul.mubr.msk.bf16.gmra.mrb[108].mxu0 %vm613_vm2, %v8655_v63 }
 0x591   : > { %16529 = vmatprep.mubr.msk.bf16.mxu0 %vm613_vm2, %v8656_v8  ;;  %v9544_v8 = vadd.f32 %v16873_v30, %v20612_v16  ;;  %v9542_v17 = vadd.f32 %v16874_v5, %v20612_v16  ;;  %v9669_v30 = vmax.f32 %v9541_v51, 0.0  ;;  %v14355_v5 = vld [vmem:[%s18253_s29 + $0x4f2] sm:$0xff] }
 0x593   : > { %v16423_v21 = vpop.f32.mrb[4].mxu0 }
 0x594   : > { %v16875_v20 = vadd.f32 %v16423_v21, %v19666_v1  ;;  %v8911_v37 = vpop.f32.mrb[5].mxu0  ;;  %v9672_v21 = vmax.f32 %v9544_v8, 0.0 }
 0x595   : > { %v16876_v63 = vadd.f32 %v8911_v37, %v19668_v53  ;;  %v16424_v35 = vpop.f32.mrb[6].mxu0  ;;  %v9671_v53 = vmax.f32 %v9543_v57, 0.0 }
 0x596   : > { %v9547_v60 = vadd.f32 %v16875_v20, %v20612_v16  ;;  %v16877_v27 = vadd.f32 %v16424_v35, %v19670_v12  ;;  %v8914_v34 = vpop.f32.mrb[7].mxu0  ;;  %v14354_v12 = vld [vmem:[%s18253_s29 + $0x4ea] sm:$0xff] }
 0x597   : > { %v9545_v1 = vadd.f32 %v16876_v63, %v20612_v16  ;;  %v16878_v43 = vadd.f32 %v8914_v34, %v19672_v4  ;;  %v14356_v63 = vld [vmem:[%s18253_s29 + $0x502] sm:$0xff]  ;;  %v14357_v35 = vld [vmem:[%s18253_s29 + $0x50a] sm:$0xff]  ;;  %v9670_v4 = vmax.f32 %v9542_v17, 0.0 }
 0x598   : > { %v9675_v19 = vmax.f32 %v9547_v60, 0.0  ;;  %v9548_v45 = vadd.f32 %v16877_v27, %v20612_v16  ;;  %16530 = vmatmul.mubr.msk.bf16.gmra.mrb[112].mxu0 %vm613_vm2, %v8657_v56 }
 0x599   : > { %v9673_v52 = vmax.f32 %v9545_v1, 0.0  ;;  %v9546_v28 = vadd.f32 %v16878_v43, %v20612_v16  ;;  %16533 = vmatprep.mubr.msk.bf16.mxu0 %vm613_vm2, %v8658_v29  ;;  %v8659_v29 = vpack.c.bf16 %v14355_v5, %v14354_v12  ;;  %v8660_v43 = vpack.c.bf16 %v14357_v35, %v14356_v63 }
 0x59a   : > { %v9799_v20 = vmax.f32 %v9671_v53, %v9675_v19  ;;  %v9676_v37 = vmax.f32 %v9548_v45, 0.0  ;;  %v14358_v45 = vld [vmem:[%s18253_s29 + $0x512] sm:$0xff] }
 0x59b   : > { %v9797_v34 = vmax.f32 %v9669_v30, %v9673_v52  ;;  %v9674_v60 = vmax.f32 %v9546_v28, 0.0  ;;  %v16427_v57 = vpop.f32.mrb[8].mxu0  ;;  %v14359_v30 = vld [vmem:[%s18253_s29 + $0x51a] sm:$0xff]  ;;  %v14360_v52 = vld [vmem:[%s18253_s29 + $0x52a] sm:$0xff]  ;;  %v14361_v28 = vld [vmem:[%s18253_s29 + $0x532] sm:$0xff] }
 0x59c   : > { %9864 = vst.msk [vmem:[#allocation2 + $0x10] sm:$0xff] %vm9861_vm3, %v9799_v20  ;;  %v9800_v27 = vmax.f32 %v9672_v21, %v9676_v37  ;;  %v16879_v56 = vadd.f32 %v16427_v57, %v19684_v24  ;;  %v8927_v51 = vpop.f32.mrb[9].mxu0 }
 0x59d   : > { %9862 = vst.msk [vmem:[#allocation2] sm:$0xff] %vm9861_vm3, %v9797_v34  ;;  %v9798_v8 = vmax.f32 %v9670_v4, %v9674_v60  ;;  %v16880_v1 = vadd.f32 %v8927_v51, %v19686_v47  ;;  %v16428_v17 = vpop.f32.mrb[10].mxu0  ;;  %v8662_v4 = vpack.c.bf16 %v14361_v28, %v14360_v52 }
 0x59e   : > { %9865 = vst.msk [vmem:[#allocation2 + $0x18] sm:$0xff] %vm9861_vm3, %v9800_v27  ;;  %v16881_v53 = vadd.f32 %v16428_v17, %v19688_v7  ;;  %v8930_v19 = vpop.f32.mrb[11].mxu0  ;;  %v9551_v12 = vadd.f32 %v16879_v56, %v20612_v16  ;;  %v8661_v7 = vpack.c.bf16 %v14359_v30, %v14358_v45  ;;  %v14363_v30 = vld [vmem:[%s18253_s29 + $0x542] sm:$0xff] }
 0x59f   : > { %9863 = vst.msk [vmem:[#allocation2 + $0x8] sm:$0xff] %vm9861_vm3, %v9798_v8  ;;  %v16882_v24 = vadd.f32 %v8930_v19, %v19690_v48  ;;  %v9549_v63 = vadd.f32 %v16880_v1, %v20612_v16 }
 0x5a0   : > { %16534 = vmatmul.mubr.msk.bf16.gmra.mrb[116].mxu0 %vm613_vm2, %v8659_v29  ;;  %v9552_v27 = vadd.f32 %v16881_v53, %v20612_v16  ;;  %v9679_v17 = vmax.f32 %v9551_v12, 0.0 }
 0x5a1   : > { %16537 = vmatprep.mubr.msk.bf16.mxu0 %vm613_vm2, %v8660_v43  ;;  %v9550_v8 = vadd.f32 %v16882_v24, %v20612_v16  ;;  %v14362_v24 = vld [vmem:[%s18253_s29 + $0x53a] sm:$0xff] }
 0x5a2   : > { %v9680_v52 = vmax.f32 %v9552_v27, 0.0 }
 0x5a3   : > { %v16431_v47 = vpop.f32.mrb[12].mxu0 }
 0x5a4   : > { %v16883_v5 = vadd.f32 %v16431_v47, %v19702_v15  ;;  %v8943_v21 = vpop.f32.mrb[13].mxu0  ;;  %v9678_v47 = vmax.f32 %v9550_v8, 0.0 }
 0x5a5   : > { %v9928_v20 = vld [vmem:[#allocation2 + $0x10] ss:$2 sm:$0xff]  ;;  %v9992_v37 = vld [vmem:[#allocation2 + $0x11] ss:$2 sm:$0xff]  ;;  %v16884_v48 = vadd.f32 %v8943_v21, %v19704_v14  ;;  %v16432_v35 = vpop.f32.mrb[14].mxu0 }
 0x5a6   : > { %v10054_v34 = vmax.f32 %v9928_v20, %v9992_v37  ;;  %v9926_v60 = vld [vmem:[#allocation2] ss:$2 sm:$0xff]  ;;  %v9990_v57 = vld [vmem:[#allocation2 + $0x1] ss:$2 sm:$0xff]  ;;  %v9555_v51 = vadd.f32 %v16883_v5, %v20612_v16  ;;  %v16885_v56 = vadd.f32 %v16432_v35, %v19706_v18  ;;  %v8946_v15 = vpop.f32.mrb[15].mxu0  ;;  %v9677_v18 = vmax.f32 %v9549_v63, 0.0 }
 0x5a7   : > { %v10053_v29 = vmax.f32 %v9926_v60, %v9990_v57  ;;  %v9553_v1 = vadd.f32 %v16884_v48, %v20612_v16  ;;  %v16886_v14 = vadd.f32 %v8946_v15, %v19708_v55  ;;  %v8663_v63 = vpack.c.bf16 %v14363_v30, %v14362_v24 }
 0x5a8   : > { %10142 = vst.msk [vmem:[#allocation3 + $0x21] sm:$0xff] %vm9861_vm3, %v10054_v34  ;;  %v9683_v43 = vmax.f32 %v9555_v51, 0.0  ;;  %v9556_v53 = vadd.f32 %v16885_v56, %v20612_v16  ;;  %16538 = vmatmul.mubr.msk.bf16.gmra.mrb[120].mxu0 %vm613_vm2, %v8661_v7 }
 0x5a9   : > { %10141 = vst.msk [vmem:[#allocation3 + $0x19] sm:$0xff] %vm9861_vm3, %v10053_v29  ;;  %v9681_v19 = vmax.f32 %v9553_v1, 0.0  ;;  %v9554_v45 = vadd.f32 %v16886_v14, %v20612_v16  ;;  %16541 = vmatprep.mubr.msk.bf16.mxu0 %vm613_vm2, %v8662_v4 }
 0x5aa   : > { %v9803_v55 = vmax.f32 %v9679_v17, %v9683_v43  ;;  %v9684_v28 = vmax.f32 %v9556_v53, 0.0 }
 0x5ab   : > { %v9801_v12 = vmax.f32 %v9677_v18, %v9681_v19  ;;  %v9682_v5 = vmax.f32 %v9554_v45, 0.0  ;;  %v16435_v21 = vpop.f32.mrb[16].mxu0 }
 0x5ac   : > { %9868 = vst.msk [vmem:[#allocation2 + $0x30] sm:$0xff] %vm9861_vm3, %v9803_v55  ;;  %v9804_v7 = vmax.f32 %v9680_v52, %v9684_v28  ;;  %v16887_v20 = vadd.f32 %v16435_v21, %v19722_v31  ;;  %v8959_v37 = vpop.f32.mrb[17].mxu0 }
 0x5ad   : > { %9866 = vst.msk [vmem:[#allocation2 + $0x20] sm:$0xff] %vm9861_vm3, %v9801_v12  ;;  %v9802_v48 = vmax.f32 %v9678_v47, %v9682_v5  ;;  %v16888_v35 = vadd.f32 %v8959_v37, %v19724_v22  ;;  %v16436_v4 = vpop.f32.mrb[18].mxu0 }
 0x5ae   : > { %9869 = vst.msk [vmem:[#allocation2 + $0x38] sm:$0xff] %vm9861_vm3, %v9804_v7  ;;  %v16889_v34 = vadd.f32 %v16436_v4, %v19728_v36  ;;  %v8962_v60 = vpop.f32.mrb[19].mxu0  ;;  %v9559_v22 = vadd.f32 %v16887_v20, %v20612_v16 }
 0x5af   : > { %9867 = vst.msk [vmem:[#allocation2 + $0x28] sm:$0xff] %vm9861_vm3, %v9802_v48  ;;  %v16890_v57 = vadd.f32 %v8962_v60, %v19730_v38  ;;  %v10228_v27 = vld [vmem:[#allocation3 + $0x21] sm:$0xff]  ;;  %v9557_v1 = vadd.f32 %v16888_v35, %v20612_v16 }
 0x5b0   : > { %16542 = vmatmul.mubr.msk.bf16.gmra.mrb[124].mxu0 %vm613_vm2, %v8663_v63  ;;  %v10227_v31 = vld [vmem:[#allocation3 + $0x19] sm:$0xff]  ;;  %v9560_v18 = vadd.f32 %v16889_v34, %v20612_v16 }
 0x5b1   : > { %v10258_v51 = vpack.c.bf16 %v10228_v27, %v10227_v31  ;;  %v9685_v12 = vmax.f32 %v9557_v1, 0.0 }
 0x5b2   : > { %v9688_v21 = vmax.f32 %v9560_v18, 0.0 }
 0x5b3   : > { %v16439_v56 = vpop.f32.mrb[20].mxu0  ;;  %16550 = vmatmul.mubr.msk.bf16.vlgmr.msra.gmra.mrb[128].mxu1 %vm9861_vm3, %v10258_v51 }
 0x5b4   : > { %v16891_v15 = vadd.f32 %v16439_v56, %v19746_v10  ;;  %v8975_v29 = vpop.f32.mrb[21].mxu0  ;;  %v9558_v10 = vadd.f32 %v16890_v57, %v20612_v16 }
 0x5b5   : > { %v9932_v8 = vld [vmem:[#allocation2 + $0x30] ss:$2 sm:$0xff]  ;;  %v9996_v36 = vld [vmem:[#allocation2 + $0x31] ss:$2 sm:$0xff]  ;;  %v16892_v14 = vadd.f32 %v8975_v29, %v19750_v26  ;;  %v16440_v38 = vpop.f32.mrb[22].mxu0  ;;  %v9687_v26 = vmax.f32 %v9559_v22, 0.0 }
 0x5b6   : > { %v10056_v17 = vmax.f32 %v9932_v8, %v9996_v36  ;;  %v9930_v43 = vld [vmem:[#allocation2 + $0x20] ss:$2 sm:$0xff]  ;;  %v9994_v53 = vld [vmem:[#allocation2 + $0x21] ss:$2 sm:$0xff]  ;;  %v9563_v19 = vadd.f32 %v16891_v15, %v20612_v16  ;;  %v16893_v45 = vadd.f32 %v16440_v38, %v19754_v32  ;;  %v8978_v24 = vpop.f32.mrb[23].mxu0  ;;  %v9686_v37 = vmax.f32 %v9558_v10, 0.0 }
 0x5b7   : > { %v10055_v30 = vmax.f32 %v9930_v43, %v9994_v53  ;;  %v9561_v52 = vadd.f32 %v16892_v14, %v20612_v16  ;;  %v16894_v55 = vadd.f32 %v8978_v24, %v19756_v9 }
 0x5b8   : > { %10144 = vst.msk [vmem:[#allocation3 + $0x39] sm:$0xff] %vm9861_vm3, %v10056_v17  ;;  %v9691_v28 = vmax.f32 %v9563_v19, 0.0  ;;  %v9564_v47 = vadd.f32 %v16893_v45, %v20612_v16 }
 0x5b9   : > { %10143 = vst.msk [vmem:[#allocation3 + $0x31] sm:$0xff] %vm9861_vm3, %v10055_v30  ;;  %v9689_v5 = vmax.f32 %v9561_v52, 0.0  ;;  %v9562_v32 = vadd.f32 %v16894_v55, %v20612_v16 }
 0x5ba   : > { %v9807_v7 = vmax.f32 %v9687_v26, %v9691_v28  ;;  %v9692_v20 = vmax.f32 %v9564_v47, 0.0 }
 0x5bb   : > { %v9805_v63 = vmax.f32 %v9685_v12, %v9689_v5  ;;  %v9690_v48 = vmax.f32 %v9562_v32, 0.0  ;;  %v16443_v35 = vpop.f32.mrb[24].mxu0 }
 0x5bc   : > { %9872 = vst.msk [vmem:[#allocation2 + $0x50] sm:$0xff] %vm9861_vm3, %v9807_v7  ;;  %v9808_v9 = vmax.f32 %v9688_v21, %v9692_v20  ;;  %v16895_v4 = vadd.f32 %v16443_v35, %v19772_v13  ;;  %v8991_v34 = vpop.f32.mrb[25].mxu0 }
 0x5bd   : > { %9870 = vst.msk [vmem:[#allocation2 + $0x40] sm:$0xff] %vm9861_vm3, %v9805_v63  ;;  %v9806_v60 = vmax.f32 %v9686_v37, %v9690_v48  ;;  %v16896_v57 = vadd.f32 %v8991_v34, %v19776_v61  ;;  %v16444_v27 = vpop.f32.mrb[26].mxu0 }
 0x5be   : > { %9873 = vst.msk [vmem:[#allocation2 + $0x58] sm:$0xff] %vm9861_vm3, %v9808_v9  ;;  %v16897_v31 = vadd.f32 %v16444_v27, %v19780_v40  ;;  %v8994_v51 = vpop.f32.mrb[27].mxu0  ;;  %v9567_v8 = vadd.f32 %v16895_v4, %v20612_v16 }
 0x5bf   : > { %9871 = vst.msk [vmem:[#allocation2 + $0x48] sm:$0xff] %vm9861_vm3, %v9806_v60  ;;  %v16898_v56 = vadd.f32 %v8994_v51, %v19782_v0  ;;  %v10230_v22 = vld [vmem:[#allocation3 + $0x39] sm:$0xff]  ;;  %v9565_v40 = vadd.f32 %v16896_v57, %v20612_v16 }
 0x5c0   : > { %v10229_v15 = vld [vmem:[#allocation3 + $0x31] sm:$0xff]  ;;  %v9568_v18 = vadd.f32 %v16897_v31, %v20612_v16 }
 0x5c1   : > { %v10259_v29 = vpack.c.bf16 %v10230_v22, %v10229_v15  ;;  %v9693_v28 = vmax.f32 %v9565_v40, 0.0  ;;  %v21571_v22 = vld [vmem:[#allocation5_spill] sm:$0xff] }
 0x5c2   : > { %v9696_v12 = vmax.f32 %v9568_v18, 0.0 }
 0x5c3   : > { %v16447_v13 = vpop.f32.mrb[28].mxu0  ;;  %16553 = vmatprep.mubr.msk.bf16.mxu1 %vm9861_vm3, %v10259_v29 }
 0x5c4   : > { %v16899_v61 = vadd.f32 %v16447_v13, %v19798_v39  ;;  %v9007_v36 = vpop.f32.mrb[29].mxu0  ;;  %v9566_v39 = vadd.f32 %v16898_v56, %v20612_v16 }
 0x5c5   : > { %v9936_v1 = vld [vmem:[#allocation2 + $0x50] ss:$2 sm:$0xff]  ;;  %v10000_v14 = vld [vmem:[#allocation2 + $0x51] ss:$2 sm:$0xff]  ;;  %v16900_v38 = vadd.f32 %v9007_v36, %v19802_v44  ;;  %v16448_v17 = vpop.f32.mrb[30].mxu0  ;;  %v9695_v44 = vmax.f32 %v9567_v8, 0.0 }
 0x5c6   : > { %v10058_v43 = vmax.f32 %v9936_v1, %v10000_v14  ;;  %v9934_v0 = vld [vmem:[#allocation2 + $0x40] ss:$2 sm:$0xff]  ;;  %v9998_v53 = vld [vmem:[#allocation2 + $0x41] ss:$2 sm:$0xff]  ;;  %v9571_v19 = vadd.f32 %v16899_v61, %v20612_v16  ;;  %v16901_v45 = vadd.f32 %v16448_v17, %v19806_v58  ;;  %v9010_v24 = vpop.f32.mrb[31].mxu0  ;;  %v9694_v21 = vmax.f32 %v9566_v39, 0.0 }
 0x5c7   : > { %v10057_v30 = vmax.f32 %v9934_v0, %v9998_v53  ;;  %v9569_v10 = vadd.f32 %v16900_v38, %v20612_v16  ;;  %v16902_v52 = vadd.f32 %v9010_v24, %v19808_v54  ;;  %v21572_v8 = vld [vmem:[#allocation6_spill] sm:$0xff]  ;;  %v21573_v17 = vld [vmem:[#allocation7_spill] sm:$0xff] }
 0x5c8   : > { %10146 = vst.msk [vmem:[#allocation3 + $0x51] sm:$0xff] %vm9861_vm3, %v10058_v43  ;;  %v9699_v55 = vmax.f32 %v9571_v19, 0.0  ;;  %v9572_v26 = vadd.f32 %v16901_v45, %v20612_v16  ;;  %v21574_v45 = vld [vmem:[#allocation8_spill] sm:$0xff] }
 0x5c9   : > { %10145 = vst.msk [vmem:[#allocation3 + $0x49] sm:$0xff] %vm9861_vm3, %v10057_v30  ;;  %v9697_v47 = vmax.f32 %v9569_v10, 0.0  ;;  %v9570_v58 = vadd.f32 %v16902_v52, %v20612_v16 }
 0x5ca   : > { %v9811_v5 = vmax.f32 %v9695_v44, %v9699_v55  ;;  %v9700_v32 = vmax.f32 %v9572_v26, 0.0 }
 0x5cb   : > { %v9809_v7 = vmax.f32 %v9693_v28, %v9697_v47  ;;  %v9698_v20 = vmax.f32 %v9570_v58, 0.0  ;;  %v16451_v37 = vpop.f32.mrb[32].mxu0 }
 0x5cc   : > { %9876 = vst.msk [vmem:[#allocation2 + $0x70] sm:$0xff] %vm9861_vm3, %v9811_v5  ;;  %v9812_v54 = vmax.f32 %v9696_v12, %v9700_v32  ;;  %v16903_v63 = vadd.f32 %v16451_v37, %v19824_v2  ;;  %v9023_v48 = vpop.f32.mrb[33].mxu0 }
 0x5cd   : > { %9874 = vst.msk [vmem:[#allocation2 + $0x60] sm:$0xff] %vm9861_vm3, %v9809_v7  ;;  %v9810_v35 = vmax.f32 %v9694_v21, %v9698_v20  ;;  %v16904_v9 = vadd.f32 %v9023_v48, %v19828_v46  ;;  %v16452_v4 = vpop.f32.mrb[34].mxu0  ;;  %v21575_v7 = vld [vmem:[#allocation9_spill] sm:$0xff] }
 0x5ce   : > { %9877 = vst.msk [vmem:[#allocation2 + $0x78] sm:$0xff] %vm9861_vm3, %v9812_v54  ;;  %v16905_v34 = vadd.f32 %v16452_v4, %v19832_v41  ;;  %v9026_v60 = vpop.f32.mrb[35].mxu0  ;;  %v9575_v56 = vadd.f32 %v16903_v63, %v20612_v16  ;;  %v21576_v63 = vld [vmem:[#allocation10_spill] sm:$0xff] }
 0x5cf   : > { %9875 = vst.msk [vmem:[#allocation2 + $0x68] sm:$0xff] %vm9861_vm3, %v9810_v35  ;;  %v16906_v57 = vadd.f32 %v9026_v60, %v19834_v11  ;;  %v10232_v27 = vld [vmem:[#allocation3 + $0x51] sm:$0xff]  ;;  %v9573_v41 = vadd.f32 %v16904_v9, %v20612_v16  ;;  %v21577_v9 = vld [vmem:[#allocation11_spill] sm:$0xff]  ;;  %v21578_v60 = vld [vmem:[#allocation12_spill] sm:$0xff] }
 0x5d0   : > { %v10231_v31 = vld [vmem:[#allocation3 + $0x49] sm:$0xff]  ;;  %v9576_v40 = vadd.f32 %v16905_v34, %v20612_v16  ;;  %v9703_v30 = vmax.f32 %v9575_v56, 0.0 }
 0x5d1   : > { %v10260_v51 = vpack.c.bf16 %v10232_v27, %v10231_v31  ;;  %v9574_v18 = vadd.f32 %v16906_v57, %v20612_v16  ;;  %v9701_v52 = vmax.f32 %v9573_v41, 0.0  ;;  %v21579_v41 = vld [vmem:[#allocation13_spill] sm:$0xff] }
 0x5d2   : > { %v9704_v26 = vmax.f32 %v9576_v40, 0.0 }
 0x5d3   : > { %v16455_v2 = vpop.f32.mrb[36].mxu0  ;;  %16554 = vmatmul.mubr.msk.bf16.gmra.mrb[132].mxu1 %vm9861_vm3, %v10260_v51  ;;  %v9702_v58 = vmax.f32 %v9574_v18, 0.0  ;;  %v21581_v18 = vld [vmem:[#allocation15_spill] sm:$0xff] }
 0x5d4   : > { %v16907_v46 = vadd.f32 %v16455_v2, %v21571_v22  ;;  %v9039_v15 = vpop.f32.mrb[37].mxu0 }
 0x5d5   : > { %v9940_v29 = vld [vmem:[#allocation2 + $0x70] ss:$2 sm:$0xff]  ;;  %v10004_v13 = vld [vmem:[#allocation2 + $0x71] ss:$2 sm:$0xff]  ;;  %v16908_v61 = vadd.f32 %v9039_v15, %v21572_v8  ;;  %v16456_v36 = vpop.f32.mrb[38].mxu0 }
 0x5d6   : > { %v10060_v1 = vmax.f32 %v9940_v29, %v10004_v13  ;;  %v9938_v11 = vld [vmem:[#allocation2 + $0x60] ss:$2 sm:$0xff]  ;;  %v10002_v14 = vld [vmem:[#allocation2 + $0x61] ss:$2 sm:$0xff]  ;;  %v9579_v38 = vadd.f32 %v16907_v46, %v20612_v16  ;;  %v16909_v43 = vadd.f32 %v16456_v36, %v21573_v17  ;;  %v9042_v0 = vpop.f32.mrb[39].mxu0 }
 0x5d7   : > { %v10059_v53 = vmax.f32 %v9938_v11, %v10002_v14  ;;  %v9577_v19 = vadd.f32 %v16908_v61, %v20612_v16  ;;  %v16910_v24 = vadd.f32 %v9042_v0, %v21574_v45 }
 0x5d8   : > { %10148 = vst.msk [vmem:[#allocation3 + $0x69] sm:$0xff] %vm9861_vm3, %v10060_v1  ;;  %v9707_v39 = vmax.f32 %v9579_v38, 0.0  ;;  %v9580_v10 = vadd.f32 %v16909_v43, %v20612_v16  ;;  %v21580_v38 = vld [vmem:[#allocation14_spill] sm:$0xff] }
 0x5d9   : > { %10147 = vst.msk [vmem:[#allocation3 + $0x61] sm:$0xff] %vm9861_vm3, %v10059_v53  ;;  %v9705_v44 = vmax.f32 %v9577_v19, 0.0  ;;  %v9578_v55 = vadd.f32 %v16910_v24, %v20612_v16 }
 0x5da   : > { %v9815_v28 = vmax.f32 %v9703_v30, %v9707_v39  ;;  %v9708_v47 = vmax.f32 %v9580_v10, 0.0 }
 0x5db   : > { %v9813_v12 = vmax.f32 %v9701_v52, %v9705_v44  ;;  %v9706_v5 = vmax.f32 %v9578_v55, 0.0  ;;  %v16459_v32 = vpop.f32.mrb[40].mxu0  ;;  %v18164_v44 = vld [vmem:[%s21486_s3] sm:$0xff]  }
 0x5dc   : > { %9880 = vst.msk [vmem:[#allocation2 + $0x90] sm:$0xff] %vm9861_vm3, %v9815_v28  ;;  %v9816_v21 = vmax.f32 %v9704_v26, %v9708_v47  ;;  %v16911_v20 = vadd.f32 %v16459_v32, %v21575_v7  ;;  %v9055_v37 = vpop.f32.mrb[41].mxu0  ;;  %16581 = vmatprep.subr.bf16.mxu1 %v18164_v44 }
 0x5dd   : > { %9878 = vst.msk [vmem:[#allocation2 + $0x80] sm:$0xff] %vm9861_vm3, %v9813_v12  ;;  %v9814_v54 = vmax.f32 %v9702_v58, %v9706_v5  ;;  %v16912_v48 = vadd.f32 %v9055_v37, %v21576_v63  ;;  %v16460_v35 = vpop.f32.mrb[42].mxu0  ;;  %16582 = vmatpush3.bf16.msra.mxu1 %v18164_v44 }
 0x5de   : > { %9881 = vst.msk [vmem:[#allocation2 + $0x98] sm:$0xff] %vm9861_vm3, %v9816_v21  ;;  %v16913_v4 = vadd.f32 %v16460_v35, %v21577_v9  ;;  %v9058_v34 = vpop.f32.mrb[43].mxu0  ;;  %v9583_v56 = vadd.f32 %v16911_v20, %v20612_v16  ;;  %v21582_v21 = vld [vmem:[#allocation16_spill] sm:$0xff]  ;;  %v21584_v35 = vld [vmem:[#allocation18_spill] sm:$0xff] }
 0x5df   : > { %9879 = vst.msk [vmem:[#allocation2 + $0x88] sm:$0xff] %vm9861_vm3, %v9814_v54  ;;  %v16914_v57 = vadd.f32 %v9058_v34, %v21578_v60  ;;  %v10234_v27 = vld [vmem:[#allocation3 + $0x69] sm:$0xff]  ;;  %v9581_v13 = vadd.f32 %v16912_v48, %v20612_v16  ;;  %v21585_v34 = vld [vmem:[#allocation19_spill] sm:$0xff] }
 0x5e0   : > { %v10233_v31 = vld [vmem:[#allocation3 + $0x61] sm:$0xff]  ;;  %v9584_v14 = vadd.f32 %v16913_v4, %v20612_v16  ;;  %v9711_v45 = vmax.f32 %v9583_v56, 0.0  ;;  %v21583_v54 = vld [vmem:[#allocation17_spill] sm:$0xff] }
 0x5e1   : > { %v10261_v51 = vpack.c.bf16 %v10234_v27, %v10233_v31  ;;  %v9709_v39 = vmax.f32 %v9581_v13, 0.0  ;;  %v21586_v56 = vld [vmem:[#allocation20_spill] sm:$0xff] }
 0x5e2   : > { %v9712_v55 = vmax.f32 %v9584_v14, 0.0 }
 0x5e3   : > { %v16463_v2 = vpop.f32.mrb[44].mxu0  ;;  %16557 = vmatprep.mubr.msk.bf16.mxu1 %vm9861_vm3, %v10261_v51 }
 0x5e4   : > { %v16915_v22 = vadd.f32 %v16463_v2, %v19907_v33  ;;  %v9071_v46 = vpop.f32.mrb[45].mxu0  ;;  %v9582_v33 = vadd.f32 %v16914_v57, %v20612_v16 }
 0x5e5   : > { %v9944_v15 = vld [vmem:[#allocation2 + $0x90] ss:$2 sm:$0xff]  ;;  %v10008_v29 = vld [vmem:[#allocation2 + $0x91] ss:$2 sm:$0xff]  ;;  %v16916_v8 = vadd.f32 %v9071_v46, %v21579_v41  ;;  %v16464_v61 = vpop.f32.mrb[46].mxu0 }
 0x5e6   : > { %v10062_v36 = vmax.f32 %v9944_v15, %v10008_v29  ;;  %v9942_v1 = vld [vmem:[#allocation2 + $0x80] ss:$2 sm:$0xff]  ;;  %v10006_v11 = vld [vmem:[#allocation2 + $0x81] ss:$2 sm:$0xff]  ;;  %v9587_v40 = vadd.f32 %v16915_v22, %v20612_v16  ;;  %v16917_v17 = vadd.f32 %v16464_v61, %v21580_v38  ;;  %v9074_v43 = vpop.f32.mrb[47].mxu0  ;;  %v9710_v47 = vmax.f32 %v9582_v33, 0.0 }
 0x5e7   : > { %v10061_v0 = vmax.f32 %v9942_v1, %v10006_v11  ;;  %v9585_v53 = vadd.f32 %v16916_v8, %v20612_v16  ;;  %v16918_v19 = vadd.f32 %v9074_v43, %v21581_v18  ;;  %v21587_v41 = vld [vmem:[#allocation21_spill] sm:$0xff]  ;;  %v21588_v38 = vld [vmem:[#allocation22_spill] sm:$0xff]  ;;  %v21589_v18 = vld [vmem:[#allocation23_spill] sm:$0xff] }
 0x5e8   : > { %10150 = vst.msk [vmem:[#allocation3 + $0x81] sm:$0xff] %vm9861_vm3, %v10062_v36  ;;  %v9715_v24 = vmax.f32 %v9587_v40, 0.0  ;;  %v9588_v30 = vadd.f32 %v16917_v17, %v20612_v16 }
 0x5e9   : > { %10149 = vst.msk [vmem:[#allocation3 + $0x79] sm:$0xff] %vm9861_vm3, %v10061_v0  ;;  %v9713_v10 = vmax.f32 %v9585_v53, 0.0  ;;  %v9586_v52 = vadd.f32 %v16918_v19, %v20612_v16 }
 0x5ea   : > { %v9819_v26 = vmax.f32 %v9711_v45, %v9715_v24  ;;  %v9716_v28 = vmax.f32 %v9588_v30, 0.0 }
 0x5eb   : > { %v9817_v58 = vmax.f32 %v9709_v39, %v9713_v10  ;;  %v9714_v12 = vmax.f32 %v9586_v52, 0.0  ;;  %v16467_v5 = vpop.f32.mrb[48].mxu0 }
 0x5ec   : > { %9884 = vst.msk [vmem:[#allocation2 + $0xb0] sm:$0xff] %vm9861_vm3, %v9819_v26  ;;  %v9820_v32 = vmax.f32 %v9712_v55, %v9716_v28  ;;  %v16919_v7 = vadd.f32 %v16467_v5, %v21582_v21  ;;  %v9087_v20 = vpop.f32.mrb[49].mxu0 }
 0x5ed   : > { %9882 = vst.msk [vmem:[#allocation2 + $0xa0] sm:$0xff] %vm9861_vm3, %v9817_v58  ;;  %v9818_v37 = vmax.f32 %v9710_v47, %v9714_v12  ;;  %v16920_v63 = vadd.f32 %v9087_v20, %v21583_v54  ;;  %v16468_v48 = vpop.f32.mrb[50].mxu0 }
 0x5ee   : > { %9885 = vst.msk [vmem:[#allocation2 + $0xb8] sm:$0xff] %vm9861_vm3, %v9820_v32  ;;  %v16921_v9 = vadd.f32 %v16468_v48, %v21584_v35  ;;  %v9090_v4 = vpop.f32.mrb[51].mxu0  ;;  %v9591_v2 = vadd.f32 %v16919_v7, %v20612_v16  ;;  %v21590_v32 = vld [vmem:[#allocation24_spill] sm:$0xff]  ;;  %v21592_v48 = vld [vmem:[#allocation26_spill] sm:$0xff] }
 0x5ef   : > { %9883 = vst.msk [vmem:[#allocation2 + $0xa8] sm:$0xff] %vm9861_vm3, %v9818_v37  ;;  %v16922_v60 = vadd.f32 %v9090_v4, %v21585_v34  ;;  %v10236_v57 = vld [vmem:[#allocation3 + $0x81] sm:$0xff]  ;;  %v9589_v13 = vadd.f32 %v16920_v63, %v20612_v16  ;;  %v21591_v37 = vld [vmem:[#allocation25_spill] sm:$0xff] }
 0x5f0   : > { %v10235_v27 = vld [vmem:[#allocation3 + $0x79] sm:$0xff]  ;;  %v9592_v14 = vadd.f32 %v16921_v9, %v20612_v16  ;;  %v9719_v45 = vmax.f32 %v9591_v2, 0.0 }
 0x5f1   : > { %v10262_v31 = vpack.c.bf16 %v10236_v57, %v10235_v27  ;;  %v9590_v33 = vadd.f32 %v16922_v60, %v20612_v16  ;;  %v9717_v39 = vmax.f32 %v9589_v13, 0.0  ;;  %v21593_v4 = vld [vmem:[#allocation27_spill] sm:$0xff] }
 0x5f2   : > { %v9720_v44 = vmax.f32 %v9592_v14, 0.0 }
 0x5f3   : > { %v16471_v51 = vpop.f32.mrb[52].mxu0  ;;  %16558 = vmatmul.mubr.msk.bf16.gmra.mrb[136].mxu1 %vm9861_vm3, %v10262_v31  ;;  %v9718_v28 = vmax.f32 %v9590_v33, 0.0 }
 0x5f4   : > { %v16923_v22 = vadd.f32 %v16471_v51, %v21586_v56  ;;  %v9103_v46 = vpop.f32.mrb[53].mxu0 }
 0x5f5   : > { %v9948_v15 = vld [vmem:[#allocation2 + $0xb0] ss:$2 sm:$0xff]  ;;  %v10012_v29 = vld [vmem:[#allocation2 + $0xb1] ss:$2 sm:$0xff]  ;;  %v16924_v8 = vadd.f32 %v9103_v46, %v21587_v41  ;;  %v16472_v61 = vpop.f32.mrb[54].mxu0 }
 0x5f6   : > { %v10064_v36 = vmax.f32 %v9948_v15, %v10012_v29  ;;  %v9946_v1 = vld [vmem:[#allocation2 + $0xa0] ss:$2 sm:$0xff]  ;;  %v10010_v11 = vld [vmem:[#allocation2 + $0xa1] ss:$2 sm:$0xff]  ;;  %v9595_v40 = vadd.f32 %v16923_v22, %v20612_v16  ;;  %v16925_v17 = vadd.f32 %v16472_v61, %v21588_v38  ;;  %v9106_v43 = vpop.f32.mrb[55].mxu0 }
 0x5f7   : > { %v10063_v0 = vmax.f32 %v9946_v1, %v10010_v11  ;;  %v9593_v53 = vadd.f32 %v16924_v8, %v20612_v16  ;;  %v16926_v19 = vadd.f32 %v9106_v43, %v21589_v18 }
 0x5f8   : > { %10152 = vst.msk [vmem:[#allocation3 + $0x99] sm:$0xff] %vm9861_vm3, %v10064_v36  ;;  %v9723_v24 = vmax.f32 %v9595_v40, 0.0  ;;  %v9596_v30 = vadd.f32 %v16925_v17, %v20612_v16  ;;  %v21594_v17 = vld [vmem:[#allocation28_spill] sm:$0xff] }
 0x5f9   : > { %10151 = vst.msk [vmem:[#allocation3 + $0x91] sm:$0xff] %vm9861_vm3, %v10063_v0  ;;  %v9721_v10 = vmax.f32 %v9593_v53, 0.0  ;;  %v9594_v52 = vadd.f32 %v16926_v19, %v20612_v16  ;;  %v18165_v19 = vld [vmem:[%s21486_s3 + $0x8] sm:$0xff]  }
 0x5fa   : > { %v9823_v55 = vmax.f32 %v9719_v45, %v9723_v24  ;;  %v9724_v26 = vmax.f32 %v9596_v30, 0.0  ;;  %16583 = vmatprep.subr.bf16.mxu1 %v18165_v19 }
 0x5fb   : > { %v9821_v47 = vmax.f32 %v9717_v39, %v9721_v10  ;;  %v9722_v58 = vmax.f32 %v9594_v52, 0.0  ;;  %v16475_v12 = vpop.f32.mrb[56].mxu0  ;;  %16584 = vmatpush3.bf16.msra.mxu1 %v18165_v19 }
 0x5fc   : > { %9888 = vst.msk [vmem:[#allocation2 + $0xd0] sm:$0xff] %vm9861_vm3, %v9823_v55  ;;  %v9824_v5 = vmax.f32 %v9720_v44, %v9724_v26  ;;  %v16927_v21 = vadd.f32 %v16475_v12, %v21590_v32  ;;  %v9119_v7 = vpop.f32.mrb[57].mxu0  ;;  %v21595_v26 = vld [vmem:[#allocation29_spill] sm:$0xff] }
 0x5fd   : > { %9886 = vst.msk [vmem:[#allocation2 + $0xc0] sm:$0xff] %vm9861_vm3, %v9821_v47  ;;  %v9822_v20 = vmax.f32 %v9718_v28, %v9722_v58  ;;  %v16928_v54 = vadd.f32 %v9119_v7, %v21591_v37  ;;  %v16476_v63 = vpop.f32.mrb[58].mxu0  ;;  %v21596_v7 = vld [vmem:[#allocation30_spill] sm:$0xff] }
 0x5fe   : > { %9889 = vst.msk [vmem:[#allocation2 + $0xd8] sm:$0xff] %vm9861_vm3, %v9824_v5  ;;  %v16929_v35 = vadd.f32 %v16476_v63, %v21592_v48  ;;  %v9122_v9 = vpop.f32.mrb[59].mxu0  ;;  %v9599_v51 = vadd.f32 %v16927_v21, %v20612_v16 }
 0x5ff   : > { %9887 = vst.msk [vmem:[#allocation2 + $0xc8] sm:$0xff] %vm9861_vm3, %v9822_v20  ;;  %v16930_v34 = vadd.f32 %v9122_v9, %v21593_v4  ;;  %v10238_v60 = vld [vmem:[#allocation3 + $0x99] sm:$0xff]  ;;  %v9597_v15 = vadd.f32 %v16928_v54, %v20612_v16 }
 0x600   : > { %v10237_v57 = vld [vmem:[#allocation3 + $0x91] sm:$0xff]  ;;  %v9600_v36 = vadd.f32 %v16929_v35, %v20612_v16 }
 0x601   : > { %v10263_v27 = vpack.c.bf16 %v10238_v60, %v10237_v57  ;;  %v9725_v53 = vmax.f32 %v9597_v15, 0.0 }
 0x602   : > { %v9728_v45 = vmax.f32 %v9600_v36, 0.0 }
 0x603   : > { %v16479_v31 = vpop.f32.mrb[60].mxu0  ;;  %16561 = vmatprep.mubr.msk.bf16.mxu1 %vm9861_vm3, %v10263_v27 }
 0x604   : > { %v16931_v2 = vadd.f32 %v16479_v31, %v19996_v49  ;;  %v9135_v56 = vpop.f32.mrb[61].mxu0  ;;  %v9598_v49 = vadd.f32 %v16930_v34, %v20612_v16 }
 0x605   : > { %v9952_v22 = vld [vmem:[#allocation2 + $0xd0] ss:$2 sm:$0xff]  ;;  %v10016_v46 = vld [vmem:[#allocation2 + $0xd1] ss:$2 sm:$0xff]  ;;  %v16932_v29 = vadd.f32 %v9135_v56, %v19998_v3  ;;  %v16480_v13 = vpop.f32.mrb[62].mxu0  ;;  %v9727_v3 = vmax.f32 %v9599_v51, 0.0 }
 0x606   : > { %v10066_v41 = vmax.f32 %v9952_v22, %v10016_v46  ;;  %v9950_v8 = vld [vmem:[#allocation2 + $0xc0] ss:$2 sm:$0xff]  ;;  %v10014_v61 = vld [vmem:[#allocation2 + $0xc1] ss:$2 sm:$0xff]  ;;  %v9603_v1 = vadd.f32 %v16931_v2, %v20612_v16  ;;  %v16933_v11 = vadd.f32 %v16480_v13, %v20000_v6  ;;  %v9138_v14 = vpop.f32.mrb[63].mxu0  ;;  %v9726_v39 = vmax.f32 %v9598_v49, 0.0 }
 0x607   : > { %v10065_v40 = vmax.f32 %v9950_v8, %v10014_v61  ;;  %v9601_v38 = vadd.f32 %v16932_v29, %v20612_v16  ;;  %v16934_v43 = vadd.f32 %v9138_v14, %v21594_v17  ;;  %v21597_v13 = vld [vmem:[#allocation31_spill] sm:$0xff] }
 0x608   : > { %10154 = vst.msk [vmem:[#allocation3 + $0xb1] sm:$0xff] %vm9861_vm3, %v10066_v41  ;;  %v9731_v0 = vmax.f32 %v9603_v1, 0.0  ;;  %v9604_v33 = vadd.f32 %v16933_v11, %v20612_v16  ;;  %v20840_v11 = vld [vmem:[%s21486_s3 + $0x20] sm:$0xff]  }
 0x609   : > { %10153 = vst.msk [vmem:[#allocation3 + $0xa9] sm:$0xff] %vm9861_vm3, %v10065_v40  ;;  %v9729_v18 = vmax.f32 %v9601_v38, 0.0  ;;  %v9602_v6 = vadd.f32 %v16934_v43, %v20612_v16  ;;  %16617 = vmatprep.subr.bf16.mxu1 %v20840_v11 }
 0x60a   : > { %v9827_v24 = vmax.f32 %v9727_v3, %v9731_v0  ;;  %v9732_v30 = vmax.f32 %v9604_v33, 0.0 }
 0x60b   : > { %v9825_v10 = vmax.f32 %v9725_v53, %v9729_v18  ;;  %v9730_v52 = vmax.f32 %v9602_v6, 0.0  ;;  %v16483_v44 = vpop.f32.mrb[64].mxu0  ;;  %v21598_v6 = vld [vmem:[#allocation32_spill] sm:$0xff] }
 0x60c   : > { %9892 = vst.msk [vmem:[#allocation2 + $0xf0] sm:$0xff] %vm9861_vm3, %v9827_v24  ;;  %v9828_v55 = vmax.f32 %v9728_v45, %v9732_v30  ;;  %v16935_v28 = vadd.f32 %v16483_v44, %v21595_v26  ;;  %v9151_v47 = vpop.f32.mrb[65].mxu0  ;;  %v21599_v24 = vld [vmem:[#allocation33_spill] sm:$0xff] }
 0x60d   : > { %9890 = vst.msk [vmem:[#allocation2 + $0xe0] sm:$0xff] %vm9861_vm3, %v9825_v10  ;;  %v9826_v58 = vmax.f32 %v9726_v39, %v9730_v52  ;;  %v16936_v12 = vadd.f32 %v9151_v47, %v20014_v59  ;;  %v16484_v5 = vpop.f32.mrb[66].mxu0  ;;  %v21600_v10 = vld [vmem:[#allocation34_spill] sm:$0xff]  ;;  %v21601_v47 = vld [vmem:[#allocation35_spill] sm:$0xff] }
 0x60e   : > { %9893 = vst.msk [vmem:[#allocation2 + $0xf8] sm:$0xff] %vm9861_vm3, %v9828_v55  ;;  %v16937_v32 = vadd.f32 %v16484_v5, %v20016_v42  ;;  %v9154_v21 = vpop.f32.mrb[67].mxu0  ;;  %v9607_v35 = vadd.f32 %v16935_v28, %v20612_v16 }
 0x60f   : > { %9891 = vst.msk [vmem:[#allocation2 + $0xe8] sm:$0xff] %vm9861_vm3, %v9826_v58  ;;  %v16938_v20 = vadd.f32 %v9154_v21, %v21596_v7  ;;  %v10240_v37 = vld [vmem:[#allocation3 + $0xb1] sm:$0xff]  ;;  %v9605_v42 = vadd.f32 %v16936_v12, %v20612_v16  ;;  %v21602_v7 = vld [vmem:[#allocation36_spill] sm:$0xff] }
 0x610   : > { %v10239_v54 = vld [vmem:[#allocation3 + $0xa9] sm:$0xff]  ;;  %v9608_v2 = vadd.f32 %v16937_v32, %v20612_v16 }
 0x611   : > { %v10264_v63 = vpack.c.bf16 %v10240_v37, %v10239_v54  ;;  %v9733_v36 = vmax.f32 %v9605_v42, 0.0 }
 0x612   : > { %v9736_v14 = vmax.f32 %v9608_v2, 0.0 }
 0x613   : > { %v16487_v48 = vpop.f32.mrb[68].mxu0  ;;  %16562 = vmatmul.mubr.msk.bf16.gmra.mrb[140].mxu1 %vm9861_vm3, %v10264_v63 }
 0x614   : > { %v16939_v59 = vadd.f32 %v16487_v48, %v20025_v62  ;;  %v9167_v9 = vpop.f32.mrb[69].mxu0  ;;  %v9606_v62 = vadd.f32 %v16938_v20, %v20612_v16 }
 0x615   : > { %v9956_v4 = vld [vmem:[#allocation2 + $0xf0] ss:$2 sm:$0xff]  ;;  %v10020_v34 = vld [vmem:[#allocation2 + $0xf1] ss:$2 sm:$0xff]  ;;  %v16940_v60 = vadd.f32 %v9167_v9, %v20027_v50  ;;  %v16488_v57 = vpop.f32.mrb[70].mxu0  ;;  %v9735_v50 = vmax.f32 %v9607_v35, 0.0 }
 0x616   : > { %v10068_v27 = vmax.f32 %v9956_v4, %v10020_v34  ;;  %v9954_v31 = vld [vmem:[#allocation2 + $0xe0] ss:$2 sm:$0xff]  ;;  %v10018_v51 = vld [vmem:[#allocation2 + $0xe1] ss:$2 sm:$0xff]  ;;  %v9611_v56 = vadd.f32 %v16939_v59, %v20612_v16  ;;  %v16941_v22 = vadd.f32 %v16488_v57, %v20029_v25  ;;  %v9170_v46 = vpop.f32.mrb[71].mxu0  ;;  %v9734_v38 = vmax.f32 %v9606_v62, 0.0 }
 0x617   : > { %v10067_v15 = vmax.f32 %v9954_v31, %v10018_v51  ;;  %v9609_v29 = vadd.f32 %v16940_v60, %v20612_v16  ;;  %v16942_v41 = vadd.f32 %v9170_v46, %v21597_v13  ;;  %v21603_v9 = vld [vmem:[#allocation37_spill] sm:$0xff]  ;;  %v20863_v57 = vld [vmem:[%s21485_s2] ss:$0 sm:$0xff]  ;;  %v21604_v31 = vld [vmem:[#allocation38_spill] sm:$0xff] }
 0x618   : > { %10156 = vst.msk [vmem:[#allocation3 + $0xc9] sm:$0xff] %vm9861_vm3, %v10068_v27  ;;  %v9739_v8 = vmax.f32 %v9611_v56, 0.0  ;;  %v9612_v61 = vadd.f32 %v16941_v22, %v20612_v16 }
 0x619   : > { %10155 = vst.msk [vmem:[#allocation3 + $0xc1] sm:$0xff] %vm9861_vm3, %v10067_v15  ;;  %v9737_v1 = vmax.f32 %v9609_v29, 0.0  ;;  %v9610_v25 = vadd.f32 %v16942_v41, %v20612_v16 }
 0x61a   : > { %v9831_v40 = vmax.f32 %v9735_v50, %v9739_v8  ;;  %v9740_v49 = vmax.f32 %v9612_v61, 0.0 }
 0x61b   : > { %v9829_v17 = vmax.f32 %v9733_v36, %v9737_v1  ;;  %v9738_v43 = vmax.f32 %v9610_v25, 0.0  ;;  %v16491_v3 = vpop.f32.mrb[72].mxu0  ;;  %v21605_v1 = vld [vmem:[#allocation39_spill] sm:$0xff] }
 0x61c   : > { %9896 = vst.msk [vmem:[#allocation2 + $0x110] sm:$0xff] %vm9861_vm3, %v9831_v40  ;;  %v9832_v0 = vmax.f32 %v9736_v14, %v9740_v49  ;;  %v16943_v33 = vadd.f32 %v16491_v3, %v20037_v23  ;;  %v9183_v53 = vpop.f32.mrb[73].mxu0  ;;  %v21606_v49 = vld [vmem:[#allocation40_spill] sm:$0xff] }
 0x61d   : > { %9894 = vst.msk [vmem:[#allocation2 + $0x100] sm:$0xff] %vm9861_vm3, %v9829_v17  ;;  %v9830_v18 = vmax.f32 %v9734_v38, %v9738_v43  ;;  %v16944_v19 = vadd.f32 %v9183_v53, %v21598_v6  ;;  %v16492_v45 = vpop.f32.mrb[74].mxu0  ;;  %v21607_v43 = vld [vmem:[#allocation41_spill] sm:$0xff] }
 0x61e   : > { %9897 = vst.msk [vmem:[#allocation2 + $0x118] sm:$0xff] %vm9861_vm3, %v9832_v0  ;;  %v16945_v30 = vadd.f32 %v16492_v45, %v21599_v24  ;;  %v9186_v39 = vpop.f32.mrb[75].mxu0  ;;  %v9615_v28 = vadd.f32 %v16943_v33, %v20612_v16  ;;  %v21608_v33 = vld [vmem:[#allocation42_spill] sm:$0xff] }
 0x61f   : > { %9895 = vst.msk [vmem:[#allocation2 + $0x108] sm:$0xff] %vm9861_vm3, %v9830_v18  ;;  %v16946_v52 = vadd.f32 %v9186_v39, %v21600_v10  ;;  %v10242_v44 = vld [vmem:[#allocation3 + $0xc9] sm:$0xff]  ;;  %v9613_v21 = vadd.f32 %v16944_v19, %v20612_v16 }
 0x620   : > { %v10241_v55 = vld [vmem:[#allocation3 + $0xc1] sm:$0xff]  ;;  %v9616_v35 = vadd.f32 %v16945_v30, %v20612_v16  ;;  %v9743_v2 = vmax.f32 %v9615_v28, 0.0 }
 0x621   : > { %v10265_v26 = vpack.c.bf16 %v10242_v44, %v10241_v55  ;;  %v9614_v60 = vadd.f32 %v16946_v52, %v20612_v16  ;;  %v9741_v46 = vmax.f32 %v9613_v21, 0.0  ;;  %v21609_v30 = vld [vmem:[#allocation43_spill] sm:$0xff]  ;;  %v21611_v21 = vld [vmem:[#allocation45_spill] sm:$0xff] }
 0x622   : > { %v9744_v62 = vmax.f32 %v9616_v35, 0.0 }
 0x623   : > { %v16495_v23 = vpop.f32.mrb[76].mxu0  ;;  %16565 = vmatprep.mubr.msk.bf16.mxu1 %vm9861_vm3, %v10265_v26  ;;  %v9742_v41 = vmax.f32 %v9614_v60, 0.0  ;;  %v21610_v26 = vld [vmem:[#allocation44_spill] sm:$0xff] }
 0x624   : > { %v16947_v58 = vadd.f32 %v16495_v23, %v21601_v47  ;;  %v9199_v12 = vpop.f32.mrb[77].mxu0 }
 0x625   : > { %v9960_v5 = vld [vmem:[#allocation2 + $0x110] ss:$2 sm:$0xff]  ;;  %v10024_v32 = vld [vmem:[#allocation2 + $0x111] ss:$2 sm:$0xff]  ;;  %v16948_v20 = vadd.f32 %v9199_v12, %v21602_v7  ;;  %v16496_v37 = vpop.f32.mrb[78].mxu0 }
 0x626   : > { %v10070_v54 = vmax.f32 %v9960_v5, %v10024_v32  ;;  %v9958_v63 = vld [vmem:[#allocation2 + $0x100] ss:$2 sm:$0xff]  ;;  %v10022_v48 = vld [vmem:[#allocation2 + $0x101] ss:$2 sm:$0xff]  ;;  %v9619_v59 = vadd.f32 %v16947_v58, %v20612_v16  ;;  %v16949_v4 = vadd.f32 %v16496_v37, %v21603_v9  ;;  %v9202_v34 = vpop.f32.mrb[79].mxu0 }
 0x627   : > { %v10069_v42 = vmax.f32 %v9958_v63, %v10022_v48  ;;  %v9617_v27 = vadd.f32 %v20863_v57, %v16948_v20  ;;  %v16950_v51 = vadd.f32 %v9202_v34, %v21604_v31  ;;  %v21612_v48 = vld [vmem:[#allocation46_spill] sm:$0xff] }
 0x628   : > { %10158 = vst.msk [vmem:[#allocation3 + $0xe1] sm:$0xff] %vm9861_vm3, %v10070_v54  ;;  %v9747_v56 = vmax.f32 %v9619_v59, 0.0  ;;  %v9620_v22 = vadd.f32 %v20863_v57, %v16949_v4 }
 0x629   : > { %10157 = vst.msk [vmem:[#allocation3 + $0xd9] sm:$0xff] %vm9861_vm3, %v10069_v42  ;;  %v9745_v15 = vmax.f32 %v9617_v27, 0.0  ;;  %v9618_v16 = vadd.f32 %v20863_v57, %v16950_v51 }
 0x62a   : > { %v9835_v29 = vmax.f32 %v9743_v2, %v9747_v56  ;;  %v9748_v13 = vmax.f32 %v9620_v22, 0.0 }
 0x62b   : > { %v9833_v50 = vmax.f32 %v9741_v46, %v9745_v15  ;;  %v9746_v8 = vmax.f32 %v9618_v16, 0.0  ;;  %v16499_v61 = vpop.f32.mrb[80].mxu0  ;;  %v21613_v16 = vld [vmem:[#allocation47_spill] sm:$0xff] }
 0x62c   : > { %9900 = vst.msk [vmem:[#allocation2 + $0x130] sm:$0xff] %vm9861_vm3, %v9835_v29  ;;  %v9836_v36 = vmax.f32 %v9744_v62, %v9748_v13  ;;  %v16951_v25 = vadd.f32 %v16499_v61, %v21605_v1  ;;  %v9215_v14 = vpop.f32.mrb[81].mxu0  ;;  %v21615_v61 = vld [vmem:[#allocation49_spill] sm:$0xff] }
 0x62d   : > { %9898 = vst.msk [vmem:[#allocation2 + $0x120] sm:$0xff] %vm9861_vm3, %v9833_v50  ;;  %v9834_v40 = vmax.f32 %v9742_v41, %v9746_v8  ;;  %v16952_v38 = vadd.f32 %v9215_v14, %v21606_v49  ;;  %v16500_v17 = vpop.f32.mrb[82].mxu0  ;;  %v21614_v41 = vld [vmem:[#allocation48_spill] sm:$0xff] }
 0x62e   : > { %9901 = vst.msk [vmem:[#allocation2 + $0x138] sm:$0xff] %vm9861_vm3, %v9836_v36  ;;  %v16953_v3 = vadd.f32 %v16500_v17, %v21607_v43  ;;  %v9218_v0 = vpop.f32.mrb[83].mxu0  ;;  %v9623_v24 = vadd.f32 %v20863_v57, %v16951_v25  ;;  %v21616_v25 = vld [vmem:[#allocation50_spill] sm:$0xff] }
 0x62f   : > { %9899 = vst.msk [vmem:[#allocation2 + $0x128] sm:$0xff] %vm9861_vm3, %v9834_v40  ;;  %v16954_v53 = vadd.f32 %v9218_v0, %v21608_v33  ;;  %v10244_v18 = vld [vmem:[#allocation3 + $0xe1] sm:$0xff]  ;;  %v9621_v55 = vadd.f32 %v20863_v57, %v16952_v38 }
 0x630   : > { %v10243_v6 = vld [vmem:[#allocation3 + $0xd9] sm:$0xff]  ;;  %v9624_v5 = vadd.f32 %v20863_v57, %v16953_v3  ;;  %v9751_v59 = vmax.f32 %v9623_v24, 0.0 }
 0x631   : > { %v10266_v19 = vpack.c.bf16 %v10244_v18, %v10243_v6  ;;  %v9622_v54 = vadd.f32 %v20863_v57, %v16954_v53  ;;  %v9749_v34 = vmax.f32 %v9621_v55, 0.0  ;;  %v21617_v3 = vld [vmem:[#allocation51_spill] sm:$0xff]  ;;  %v21619_v55 = vld [vmem:[#allocation53_spill] sm:$0xff] }
 0x632   : > { %v9752_v27 = vmax.f32 %v9624_v5, 0.0 }
 0x633   : > { %v16503_v45 = vpop.f32.mrb[84].mxu0  ;;  %16566 = vmatmul.mubr.msk.bf16.gmra.mrb[144].mxu1 %vm9861_vm3, %v10266_v19  ;;  %v9750_v2 = vmax.f32 %v9622_v54, 0.0  ;;  %v21618_v19 = vld [vmem:[#allocation52_spill] sm:$0xff] }
 0x634   : > { %v16955_v39 = vadd.f32 %v16503_v45, %v21609_v30  ;;  %v9231_v10 = vpop.f32.mrb[85].mxu0 }
 0x635   : > { %v9964_v52 = vld [vmem:[#allocation2 + $0x130] ss:$2 sm:$0xff]  ;;  %v10028_v44 = vld [vmem:[#allocation2 + $0x131] ss:$2 sm:$0xff]  ;;  %v16956_v23 = vadd.f32 %v9231_v10, %v21610_v26  ;;  %v16504_v28 = vpop.f32.mrb[86].mxu0 }
 0x636   : > { %v10072_v47 = vmax.f32 %v9964_v52, %v10028_v44  ;;  %v9962_v58 = vld [vmem:[#allocation2 + $0x120] ss:$2 sm:$0xff]  ;;  %v10026_v12 = vld [vmem:[#allocation2 + $0x121] ss:$2 sm:$0xff]  ;;  %v9627_v32 = vadd.f32 %v20863_v57, %v16955_v39  ;;  %v16957_v7 = vadd.f32 %v16504_v28, %v21611_v21  ;;  %v9234_v20 = vpop.f32.mrb[87].mxu0 }
 0x637   : > { %v10071_v37 = vmax.f32 %v9962_v58, %v10026_v12  ;;  %v9625_v63 = vadd.f32 %v20863_v57, %v16956_v23  ;;  %v16958_v35 = vadd.f32 %v9234_v20, %v21612_v48  ;;  %v21620_v12 = vld [vmem:[#allocation54_spill] sm:$0xff] }
 0x638   : > { %10160 = vst.msk [vmem:[#allocation3 + $0xf9] sm:$0xff] %vm9861_vm3, %v10072_v47  ;;  %v9755_v9 = vmax.f32 %v9627_v32, 0.0  ;;  %v9628_v4 = vadd.f32 %v20863_v57, %v16957_v7 }
 0x639   : > { %10159 = vst.msk [vmem:[#allocation3 + $0xf1] sm:$0xff] %vm9861_vm3, %v10071_v37  ;;  %v9753_v42 = vmax.f32 %v9625_v63, 0.0  ;;  %v9626_v60 = vadd.f32 %v20863_v57, %v16958_v35 }
 0x63a   : > { %v9839_v31 = vmax.f32 %v9751_v59, %v9755_v9  ;;  %v9756_v51 = vmax.f32 %v9628_v4, 0.0 }
 0x63b   : > { %v9837_v56 = vmax.f32 %v9749_v34, %v9753_v42  ;;  %v9754_v22 = vmax.f32 %v9626_v60, 0.0  ;;  %v16507_v46 = vpop.f32.mrb[88].mxu0  ;;  %v21621_v60 = vld [vmem:[#allocation55_spill] sm:$0xff] }
 0x63c   : > { %9904 = vst.msk [vmem:[#allocation2 + $0x150] sm:$0xff] %vm9861_vm3, %v9839_v31  ;;  %v9840_v15 = vmax.f32 %v9752_v27, %v9756_v51  ;;  %v16959_v62 = vadd.f32 %v16507_v46, %v21613_v16  ;;  %v9247_v29 = vpop.f32.mrb[89].mxu0  ;;  %v21623_v46 = vld [vmem:[#allocation57_spill] sm:$0xff] }
 0x63d   : > { %9902 = vst.msk [vmem:[#allocation2 + $0x140] sm:$0xff] %vm9861_vm3, %v9837_v56  ;;  %v9838_v13 = vmax.f32 %v9750_v2, %v9754_v22  ;;  %v16960_v50 = vadd.f32 %v9247_v29, %v21614_v41  ;;  %v16508_v8 = vpop.f32.mrb[90].mxu0  ;;  %v21622_v2 = vld [vmem:[#allocation56_spill] sm:$0xff] }
 0x63e   : > { %9905 = vst.msk [vmem:[#allocation2 + $0x158] sm:$0xff] %vm9861_vm3, %v9840_v15  ;;  %v16961_v36 = vadd.f32 %v16508_v8, %v21615_v61  ;;  %v9250_v1 = vpop.f32.mrb[91].mxu0  ;;  %v9631_v43 = vadd.f32 %v20863_v57, %v16959_v62  ;;  %v21624_v62 = vld [vmem:[#allocation58_spill] sm:$0xff] }
 0x63f   : > { %9903 = vst.msk [vmem:[#allocation2 + $0x148] sm:$0xff] %vm9861_vm3, %v9838_v13  ;;  %v16962_v14 = vadd.f32 %v9250_v1, %v21616_v25  ;;  %v10246_v40 = vld [vmem:[#allocation3 + $0xf9] sm:$0xff]  ;;  %v9629_v6 = vadd.f32 %v20863_v57, %v16960_v50 }
 0x640   : > { %v10245_v49 = vld [vmem:[#allocation3 + $0xf1] sm:$0xff]  ;;  %v9632_v52 = vadd.f32 %v20863_v57, %v16961_v36  ;;  %v9759_v32 = vmax.f32 %v9631_v43, 0.0  ;;  %v21625_v36 = vld [vmem:[#allocation59_spill] sm:$0xff] }
 0x641   : > { %v10267_v38 = vpack.c.bf16 %v10246_v40, %v10245_v49  ;;  %v9630_v47 = vadd.f32 %v20863_v57, %v16962_v14  ;;  %v9757_v20 = vmax.f32 %v9629_v6, 0.0  ;;  %v21627_v6 = vld [vmem:[#allocation61_spill] sm:$0xff] }
 0x642   : > { %v9760_v63 = vmax.f32 %v9632_v52, 0.0 }
 0x643   : > { %v16511_v17 = vpop.f32.mrb[92].mxu0  ;;  %16569 = vmatprep.mubr.msk.bf16.mxu1 %vm9861_vm3, %v10267_v38  ;;  %v9758_v59 = vmax.f32 %v9630_v47, 0.0  ;;  %v21626_v38 = vld [vmem:[#allocation60_spill] sm:$0xff] }
 0x644   : > { %v16963_v0 = vadd.f32 %v16511_v17, %v21617_v3  ;;  %v9263_v33 = vpop.f32.mrb[93].mxu0 }
 0x645   : > { %v9968_v53 = vld [vmem:[#allocation2 + $0x150] ss:$2 sm:$0xff]  ;;  %v10032_v18 = vld [vmem:[#allocation2 + $0x151] ss:$2 sm:$0xff]  ;;  %v16964_v45 = vadd.f32 %v9263_v33, %v21618_v19  ;;  %v16512_v24 = vpop.f32.mrb[94].mxu0 }
 0x646   : > { %v10074_v30 = vmax.f32 %v9968_v53, %v10032_v18  ;;  %v9966_v39 = vld [vmem:[#allocation2 + $0x140] ss:$2 sm:$0xff]  ;;  %v10030_v10 = vld [vmem:[#allocation2 + $0x141] ss:$2 sm:$0xff]  ;;  %v9635_v44 = vadd.f32 %v20863_v57, %v16963_v0  ;;  %v16965_v26 = vadd.f32 %v16512_v24, %v21619_v55  ;;  %v9266_v23 = vpop.f32.mrb[95].mxu0 }
 0x647   : > { %v10073_v28 = vmax.f32 %v9966_v39, %v10030_v10  ;;  %v9633_v58 = vadd.f32 %v20863_v57, %v16964_v45  ;;  %v16966_v5 = vadd.f32 %v9266_v23, %v21620_v12  ;;  %v21628_v10 = vld [vmem:[#allocation62_spill] sm:$0xff] }
 0x648   : > { %10162 = vst.msk [vmem:[#allocation3 + $0x111] sm:$0xff] %vm9861_vm3, %v10074_v30  ;;  %v9763_v21 = vmax.f32 %v9635_v44, 0.0  ;;  %v9636_v7 = vadd.f32 %v20863_v57, %v16965_v26 }
 0x649   : > { %10161 = vst.msk [vmem:[#allocation3 + $0x109] sm:$0xff] %vm9861_vm3, %v10073_v28  ;;  %v9761_v37 = vmax.f32 %v9633_v58, 0.0  ;;  %v9634_v54 = vadd.f32 %v20863_v57, %v16966_v5 }
 0x64a   : > { %v9843_v48 = vmax.f32 %v9759_v32, %v9763_v21  ;;  %v9764_v35 = vmax.f32 %v9636_v7, 0.0 }
 0x64b   : > { %v9841_v9 = vmax.f32 %v9757_v20, %v9761_v37  ;;  %v9762_v4 = vmax.f32 %v9634_v54, 0.0  ;;  %v16515_v34 = vpop.f32.mrb[96].mxu0  ;;  %v21629_v54 = vld [vmem:[#allocation63_spill] sm:$0xff] }
 0x64c   : > { %9908 = vst.msk [vmem:[#allocation2 + $0x170] sm:$0xff] %vm9861_vm3, %v9843_v48  ;;  %v9844_v42 = vmax.f32 %v9760_v63, %v9764_v35  ;;  %v16967_v27 = vadd.f32 %v16515_v34, %v21621_v60  ;;  %v9279_v31 = vpop.f32.mrb[97].mxu0  ;;  %v21631_v34 = vld [vmem:[#allocation65_spill] sm:$0xff] }
 0x64d   : > { %9906 = vst.msk [vmem:[#allocation2 + $0x160] sm:$0xff] %vm9861_vm3, %v9841_v9  ;;  %v9842_v51 = vmax.f32 %v9758_v59, %v9762_v4  ;;  %v16968_v56 = vadd.f32 %v9279_v31, %v21622_v2  ;;  %v16516_v22 = vpop.f32.mrb[98].mxu0  ;;  %v21630_v59 = vld [vmem:[#allocation64_spill] sm:$0xff] }
 0x64e   : > { %9909 = vst.msk [vmem:[#allocation2 + $0x178] sm:$0xff] %vm9861_vm3, %v9844_v42  ;;  %v16969_v15 = vadd.f32 %v16516_v22, %v21623_v46  ;;  %v9282_v16 = vpop.f32.mrb[99].mxu0  ;;  %v9639_v61 = vadd.f32 %v20863_v57, %v16967_v27  ;;  %v21632_v27 = vld [vmem:[#allocation66_spill] sm:$0xff] }
 0x64f   : > { %9907 = vst.msk [vmem:[#allocation2 + $0x168] sm:$0xff] %vm9861_vm3, %v9842_v51  ;;  %v16970_v29 = vadd.f32 %v9282_v16, %v21624_v62  ;;  %v10248_v13 = vld [vmem:[#allocation3 + $0x111] sm:$0xff]  ;;  %v9637_v49 = vadd.f32 %v20863_v57, %v16968_v56 }
 0x650   : > { %v10247_v41 = vld [vmem:[#allocation3 + $0x109] sm:$0xff]  ;;  %v9640_v53 = vadd.f32 %v20863_v57, %v16969_v15  ;;  %v9767_v44 = vmax.f32 %v9639_v61, 0.0  ;;  %v21633_v15 = vld [vmem:[#allocation67_spill] sm:$0xff] }
 0x651   : > { %v20925_v50 = vpack.c.bf16 %v10248_v13, %v10247_v41  ;;  %v9638_v30 = vadd.f32 %v20863_v57, %v16970_v29  ;;  %v9765_v23 = vmax.f32 %v9637_v49, 0.0 }
 0x652   : > { %v9768_v58 = vmax.f32 %v9640_v53, 0.0  ;;  %v21636_v53 = vld [vmem:[#allocation70_spill] sm:$0xff] }
 0x653   : > { %v16519_v8 = vpop.f32.mrb[100].mxu0  ;;  %16570 = vmatmul.mubr.msk.bf16.gmra.mrb[148].mxu1 %vm9861_vm3, %v20925_v50  ;;  %v9766_v32 = vmax.f32 %v9638_v30, 0.0 }
 0x654   : > { %v16971_v1 = vadd.f32 %v16519_v8, %v21625_v36  ;;  %v9295_v25 = vpop.f32.mrb[101].mxu0  ;;  %v21634_v8 = vld [vmem:[#allocation68_spill] sm:$0xff] }
 0x655   : > { %v9972_v14 = vld [vmem:[#allocation2 + $0x170] ss:$2 sm:$0xff]  ;;  %v10036_v40 = vld [vmem:[#allocation2 + $0x171] ss:$2 sm:$0xff]  ;;  %v16972_v17 = vadd.f32 %v9295_v25, %v21626_v38  ;;  %v16520_v43 = vpop.f32.mrb[102].mxu0 }
 0x656   : > { %v10076_v3 = vmax.f32 %v9972_v14, %v10036_v40  ;;  %v9970_v0 = vld [vmem:[#allocation2 + $0x160] ss:$2 sm:$0xff]  ;;  %v10034_v33 = vld [vmem:[#allocation2 + $0x161] ss:$2 sm:$0xff]  ;;  %v9643_v18 = vadd.f32 %v20863_v57, %v16971_v1  ;;  %v16973_v19 = vadd.f32 %v16520_v43, %v21627_v6  ;;  %v9298_v45 = vpop.f32.mrb[103].mxu0  ;;  %v21635_v38 = vld [vmem:[#allocation69_spill] sm:$0xff] }
 0x657   : > { %v10075_v24 = vmax.f32 %v9970_v0, %v10034_v33  ;;  %v9641_v39 = vadd.f32 %v20863_v57, %v16972_v17  ;;  %v16974_v52 = vadd.f32 %v9298_v45, %v21628_v10 }
 0x658   : > { %10164 = vst.msk [vmem:[#allocation3 + $0x129] sm:$0xff] %vm9861_vm3, %v10076_v3  ;;  %v9771_v55 = vmax.f32 %v9643_v18, 0.0  ;;  %v9644_v26 = vadd.f32 %v20863_v57, %v16973_v19 }
 0x659   : > { %10163 = vst.msk [vmem:[#allocation3 + $0x121] sm:$0xff] %vm9861_vm3, %v10075_v24  ;;  %v9769_v28 = vmax.f32 %v9641_v39, 0.0  ;;  %v9642_v47 = vadd.f32 %v20863_v57, %v16974_v52 }
 0x65a   : > { %v9847_v12 = vmax.f32 %v9767_v44, %v9771_v55  ;;  %v9772_v5 = vmax.f32 %v9644_v26, 0.0 }
 0x65b   : > { %v9845_v21 = vmax.f32 %v9765_v23, %v9769_v28  ;;  %v9770_v7 = vmax.f32 %v9642_v47, 0.0  ;;  %v16523_v20 = vpop.f32.mrb[104].mxu0 }
 0x65c   : > { %9912 = vst.msk [vmem:[#allocation2 + $0x190] sm:$0xff] %vm9861_vm3, %v9847_v12  ;;  %v9848_v37 = vmax.f32 %v9768_v58, %v9772_v5  ;;  %v16975_v63 = vadd.f32 %v16523_v20, %v21629_v54  ;;  %v9311_v48 = vpop.f32.mrb[105].mxu0  ;;  %v21637_v58 = vld [vmem:[#allocation71_spill] sm:$0xff] }
 0x65d   : > { %9910 = vst.msk [vmem:[#allocation2 + $0x180] sm:$0xff] %vm9861_vm3, %v9845_v21  ;;  %v9846_v35 = vmax.f32 %v9766_v32, %v9770_v7  ;;  %v16976_v9 = vadd.f32 %v9311_v48, %v21630_v59  ;;  %v16524_v4 = vpop.f32.mrb[106].mxu0  ;;  %v21638_v21 = vld [vmem:[#allocation72_spill] sm:$0xff]  ;;  %v21640_v48 = vld [vmem:[#allocation74_spill] sm:$0xff] }
 0x65e   : > { %9913 = vst.msk [vmem:[#allocation2 + $0x198] sm:$0xff] %vm9861_vm3, %v9848_v37  ;;  %v16977_v42 = vadd.f32 %v16524_v4, %v21631_v34  ;;  %v9314_v60 = vpop.f32.mrb[107].mxu0  ;;  %v9647_v46 = vadd.f32 %v20863_v57, %v16975_v63  ;;  %v21639_v37 = vld [vmem:[#allocation73_spill] sm:$0xff] }
 0x65f   : > { %9911 = vst.msk [vmem:[#allocation2 + $0x188] sm:$0xff] %vm9861_vm3, %v9846_v35  ;;  %v16978_v31 = vadd.f32 %v9314_v60, %v21632_v27  ;;  %v10250_v51 = vld [vmem:[#allocation3 + $0x129] sm:$0xff]  ;;  %v9645_v41 = vadd.f32 %v20863_v57, %v16976_v9  ;;  %v21641_v60 = vld [vmem:[#allocation75_spill] sm:$0xff] }
 0x660   : > { %v10249_v2 = vld [vmem:[#allocation3 + $0x121] sm:$0xff]  ;;  %v9648_v40 = vadd.f32 %v20863_v57, %v16977_v42  ;;  %v9775_v6 = vmax.f32 %v9647_v46, 0.0 }
 0x661   : > { %v20951_v56 = vpack.c.bf16 %v10250_v51, %v10249_v2  ;;  %v9646_v0 = vadd.f32 %v20863_v57, %v16978_v31  ;;  %v9773_v24 = vmax.f32 %v9645_v41, 0.0  ;;  %v21642_v46 = vld [vmem:[#allocation76_spill] sm:$0xff] }
 0x662   : > { %v9776_v10 = vmax.f32 %v9648_v40, 0.0 }
 0x663   : > { %v16527_v22 = vpop.f32.mrb[108].mxu0  ;;  %16573 = vmatprep.mubr.msk.bf16.mxu1 %vm9861_vm3, %v20951_v56  ;;  %v9774_v55 = vmax.f32 %v9646_v0, 0.0 }
 0x664   : > { %v16979_v16 = vadd.f32 %v16527_v22, %v21633_v15  ;;  %v9327_v62 = vpop.f32.mrb[109].mxu0 }
 0x665   : > { %v9976_v29 = vld [vmem:[#allocation2 + $0x190] ss:$2 sm:$0xff]  ;;  %v10040_v13 = vld [vmem:[#allocation2 + $0x191] ss:$2 sm:$0xff]  ;;  %v16980_v61 = vadd.f32 %v9327_v62, %v21634_v8  ;;  %v16528_v36 = vpop.f32.mrb[110].mxu0 }
 0x666   : > { %v10078_v1 = vmax.f32 %v9976_v29, %v10040_v13  ;;  %v9974_v25 = vld [vmem:[#allocation2 + $0x180] ss:$2 sm:$0xff]  ;;  %v10038_v14 = vld [vmem:[#allocation2 + $0x181] ss:$2 sm:$0xff]  ;;  %v9651_v49 = vadd.f32 %v20863_v57, %v16979_v16  ;;  %v16981_v17 = vadd.f32 %v16528_v36, %v21635_v38  ;;  %v9330_v43 = vpop.f32.mrb[111].mxu0 }
 0x667   : > { %v10077_v3 = vmax.f32 %v9974_v25, %v10038_v14  ;;  %v9649_v33 = vadd.f32 %v20863_v57, %v16980_v61  ;;  %v16982_v18 = vadd.f32 %v9330_v43, %v21636_v53  ;;  %v21643_v61 = vld [vmem:[#allocation77_spill] sm:$0xff] }
 0x668   : > { %10166 = vst.msk [vmem:[#allocation3 + $0x141] sm:$0xff] %vm9861_vm3, %v10078_v1  ;;  %v9779_v19 = vmax.f32 %v9651_v49, 0.0  ;;  %v9652_v45 = vadd.f32 %v20863_v57, %v16981_v17  ;;  %v21644_v49 = vld [vmem:[#allocation78_spill] sm:$0xff] }
 0x669   : > { %10165 = vst.msk [vmem:[#allocation3 + $0x139] sm:$0xff] %vm9861_vm3, %v10077_v3  ;;  %v9777_v30 = vmax.f32 %v9649_v33, 0.0  ;;  %v9650_v39 = vadd.f32 %v20863_v57, %v16982_v18 }
 0x66a   : > { %v9851_v52 = vmax.f32 %v9775_v6, %v9779_v19  ;;  %v9780_v44 = vmax.f32 %v9652_v45, 0.0 }
 0x66b   : > { %v9849_v26 = vmax.f32 %v9773_v24, %v9777_v30  ;;  %v9778_v23 = vmax.f32 %v9650_v39, 0.0  ;;  %v16531_v28 = vpop.f32.mrb[112].mxu0 }
 0x66c   : > { %9916 = vst.msk [vmem:[#allocation2 + $0x1b0] sm:$0xff] %vm9861_vm3, %v9851_v52  ;;  %v9852_v47 = vmax.f32 %v9776_v10, %v9780_v44  ;;  %v16983_v12 = vadd.f32 %v16531_v28, %v21637_v58  ;;  %v9343_v5 = vpop.f32.mrb[113].mxu0  ;;  %v21645_v52 = vld [vmem:[#allocation79_spill] sm:$0xff]  ;;  %v21647_v58 = vld [vmem:[#allocation81_spill] sm:$0xff] }
 0x66d   : > { %9914 = vst.msk [vmem:[#allocation2 + $0x1a0] sm:$0xff] %vm9861_vm3, %v9849_v26  ;;  %v9850_v32 = vmax.f32 %v9774_v55, %v9778_v23  ;;  %v16984_v7 = vadd.f32 %v9343_v5, %v21638_v21  ;;  %v16532_v20 = vpop.f32.mrb[114].mxu0  ;;  %v21646_v23 = vld [vmem:[#allocation80_spill] sm:$0xff] }
 0x66e   : > { %9917 = vst.msk [vmem:[#allocation2 + $0x1b8] sm:$0xff] %vm9861_vm3, %v9852_v47  ;;  %v16985_v54 = vadd.f32 %v16532_v20, %v21639_v37  ;;  %v9346_v63 = vpop.f32.mrb[115].mxu0  ;;  %v9655_v42 = vadd.f32 %v20863_v57, %v16983_v12 }
 0x66f   : > { %9915 = vst.msk [vmem:[#allocation2 + $0x1a8] sm:$0xff] %vm9861_vm3, %v9850_v32  ;;  %v16986_v35 = vadd.f32 %v9346_v63, %v21640_v48  ;;  %v10252_v59 = vld [vmem:[#allocation3 + $0x141] sm:$0xff]  ;;  %v9653_v22 = vadd.f32 %v20863_v57, %v16984_v7  ;;  %v21648_v32 = vld [vmem:[#allocation82_spill] sm:$0xff] }
 0x670   : > { %v10251_v9 = vld [vmem:[#allocation3 + $0x139] sm:$0xff]  ;;  %v9656_v41 = vadd.f32 %v20863_v57, %v16985_v54  ;;  %v9783_v17 = vmax.f32 %v9655_v42, 0.0 }
 0x671   : > { %v20977_v4 = vpack.c.bf16 %v10252_v59, %v10251_v9  ;;  %v9654_v14 = vadd.f32 %v20863_v57, %v16986_v35  ;;  %v9781_v0 = vmax.f32 %v9653_v22, 0.0  ;;  %v21649_v48 = vld [vmem:[#allocation83_spill] sm:$0xff] }
 0x672   : > { %v9784_v18 = vmax.f32 %v9656_v41, 0.0 }
 0x673   : > { %v16535_v34 = vpop.f32.mrb[116].mxu0  ;;  %16574 = vmatmul.mubr.msk.bf16.gmra.mrb[152].mxu1 %vm9861_vm3, %v20977_v4  ;;  %v9782_v45 = vmax.f32 %v9654_v14, 0.0 }
 0x674   : > { %v16987_v27 = vadd.f32 %v16535_v34, %v21641_v60  ;;  %v9359_v31 = vpop.f32.mrb[117].mxu0  ;;  %v21650_v60 = vld [vmem:[#allocation84_spill] sm:$0xff] }
 0x675   : > { %v9980_v51 = vld [vmem:[#allocation2 + $0x1b0] ss:$2 sm:$0xff]  ;;  %v10044_v2 = vld [vmem:[#allocation2 + $0x1b1] ss:$2 sm:$0xff]  ;;  %v16988_v15 = vadd.f32 %v9359_v31, %v21642_v46  ;;  %v16536_v16 = vpop.f32.mrb[118].mxu0 }
 0x676   : > { %v10080_v62 = vmax.f32 %v9980_v51, %v10044_v2  ;;  %v9978_v29 = vld [vmem:[#allocation2 + $0x1a0] ss:$2 sm:$0xff]  ;;  %v10042_v13 = vld [vmem:[#allocation2 + $0x1a1] ss:$2 sm:$0xff]  ;;  %v9659_v8 = vadd.f32 %v20863_v57, %v16987_v27  ;;  %v16989_v36 = vadd.f32 %v16536_v16, %v21643_v61  ;;  %v9362_v1 = vpop.f32.mrb[119].mxu0  ;;  %v21651_v16 = vld [vmem:[#allocation85_spill] sm:$0xff] }
 0x677   : > { %v10079_v25 = vmax.f32 %v9978_v29, %v10042_v13  ;;  %v9657_v40 = vadd.f32 %v20863_v57, %v16988_v15  ;;  %v16990_v38 = vadd.f32 %v9362_v1, %v21644_v49  ;;  %v21652_v61 = vld [vmem:[#allocation86_spill] sm:$0xff] }
 0x678   : > { %10168 = vst.msk [vmem:[#allocation3 + $0x159] sm:$0xff] %vm9861_vm3, %v10080_v62  ;;  %v9787_v43 = vmax.f32 %v9659_v8, 0.0  ;;  %v9660_v3 = vadd.f32 %v20863_v57, %v16989_v36 }
 0x679   : > { %10167 = vst.msk [vmem:[#allocation3 + $0x151] sm:$0xff] %vm9861_vm3, %v10079_v25  ;;  %v9785_v33 = vmax.f32 %v9657_v40, 0.0  ;;  %v9658_v53 = vadd.f32 %v20863_v57, %v16990_v38 }
 0x67a   : > { %v9855_v6 = vmax.f32 %v9783_v17, %v9787_v43  ;;  %v9788_v19 = vmax.f32 %v9660_v3, 0.0 }
 0x67b   : > { %v9853_v24 = vmax.f32 %v9781_v0, %v9785_v33  ;;  %v9786_v30 = vmax.f32 %v9658_v53, 0.0  ;;  %v16539_v39 = vpop.f32.mrb[120].mxu0 }
 0x67c   : > { %9920 = vst.msk [vmem:[#allocation2 + $0x1d0] sm:$0xff] %vm9861_vm3, %v9855_v6  ;;  %v9856_v10 = vmax.f32 %v9784_v18, %v9788_v19  ;;  %v16991_v44 = vadd.f32 %v16539_v39, %v21645_v52  ;;  %v9375_v55 = vpop.f32.mrb[121].mxu0  ;;  %v10173_v19 = vld [vmem:[#allocation3] sm:$0xff] }
 0x67d   : > { %9918 = vst.msk [vmem:[#allocation2 + $0x1c0] sm:$0xff] %vm9861_vm3, %v9853_v24  ;;  %v9854_v26 = vmax.f32 %v9782_v45, %v9786_v30  ;;  %v16992_v28 = vadd.f32 %v9375_v55, %v21646_v23  ;;  %v16540_v47 = vpop.f32.mrb[122].mxu0  ;;  %v10174_v45 = vld [vmem:[#allocation3 + $0x8] sm:$0xff] }
 0x67e   : > { %9921 = vst.msk [vmem:[#allocation2 + $0x1d8] sm:$0xff] %vm9861_vm3, %v9856_v10  ;;  %v16993_v12 = vadd.f32 %v16540_v47, %v21647_v58  ;;  %v9378_v5 = vpop.f32.mrb[123].mxu0  ;;  %v9663_v63 = vadd.f32 %v20863_v57, %v16991_v44  ;;  %v10205_v30 = vpack.c.bf16 %v10174_v45, %v10173_v19  ;;  %v10175_v44 = vld [vmem:[#allocation3 + $0x18] sm:$0xff]  ;;  %v10177_v58 = vld [vmem:[#allocation3 + $0x30] sm:$0xff] }
 0x67f   : > { %9919 = vst.msk [vmem:[#allocation2 + $0x1c8] sm:$0xff] %vm9861_vm3, %v9854_v26  ;;  %v16994_v21 = vadd.f32 %v9378_v5, %v21648_v32  ;;  %v10254_v7 = vld [vmem:[#allocation3 + $0x159] sm:$0xff]  ;;  %v9661_v42 = vadd.f32 %v20863_v57, %v16992_v28  ;;  %v18167_v32 = vld [vmem:[%s21486_s3 + $0x28] sm:$0xff]  }
 0x680   : > { %v10253_v20 = vld [vmem:[#allocation3 + $0x151] sm:$0xff]  ;;  %v9664_v46 = vadd.f32 %v20863_v57, %v16993_v12  ;;  %v9791_v1 = vmax.f32 %v9663_v63, 0.0  ;;  %v10176_v28 = vld [vmem:[#allocation3 + $0x20] sm:$0xff] }
 0x681   : > { %v21003_v37 = vpack.c.bf16 %v10254_v7, %v10253_v20  ;;  %v9662_v41 = vadd.f32 %v20863_v57, %v16994_v21  ;;  %v9789_v40 = vmax.f32 %v9661_v42, 0.0  ;;  %v10178_v12 = vld [vmem:[#allocation3 + $0x38] sm:$0xff]  ;;  %v21032_v5 = vpack.c.bf16 %v10176_v28, %v10175_v44  ;;  %v21047_v7 = vld [vmem:[%s21486_s3 + $0x30] sm:$0xff]   ;;  %v10179_v20 = vld [vmem:[#allocation3 + $0x48] sm:$0xff] }
 0x682   : > { %v9792_v17 = vmax.f32 %v9664_v46, 0.0  ;;  %v21037_v21 = vpack.c.bf16 %v10178_v12, %v10177_v58  ;;  %v10181_v63 = vld [vmem:[#allocation3 + $0x60] sm:$0xff]  ;;  %v10186_v42 = vld [vmem:[#allocation3 + $0x98] sm:$0xff]  ;;  %v10729_v58 = vld [vmem:[#allocation3 + $0x6a] sm:$0xff] }
 0x683   : > { %v16543_v54 = vpop.f32.mrb[124].mxu0  ;;  %16577 = vmatprep.mubr.msk.bf16.mxu1 %vm9861_vm3, %v21003_v37  ;;  %v9790_v0 = vmax.f32 %v9662_v41, 0.0  ;;  %v18169_v44 = vld [vmem:[%s21486_s3 + $0x38] sm:$0xff]  }
 0x684   : > { %v16995_v35 = vadd.f32 %v16543_v54, %v21649_v48  ;;  %v9391_v59 = vpop.f32.mrb[125].mxu0  ;;  %v10180_v54 = vld [vmem:[#allocation3 + $0x50] sm:$0xff]  ;;  %v10182_v48 = vld [vmem:[#allocation3 + $0x68] sm:$0xff] }
 0x685   : > { %v9984_v9 = vld [vmem:[#allocation2 + $0x1d0] ss:$2 sm:$0xff]  ;;  %v10048_v34 = vld [vmem:[#allocation2 + $0x1d1] ss:$2 sm:$0xff]  ;;  %v16996_v27 = vadd.f32 %v9391_v59, %v21650_v60  ;;  %v16544_v31 = vpop.f32.mrb[126].mxu0  ;;  %v21052_v59 = vpack.c.bf16 %v10182_v48, %v10181_v63 }
 0x686   : > { %v10082_v51 = vmax.f32 %v9984_v9, %v10048_v34  ;;  %v9982_v2 = vld [vmem:[#allocation2 + $0x1c0] ss:$2 sm:$0xff]  ;;  %v10046_v22 = vld [vmem:[#allocation2 + $0x1c1] ss:$2 sm:$0xff]  ;;  %v9667_v15 = vadd.f32 %v20863_v57, %v16995_v35  ;;  %v16997_v62 = vadd.f32 %v16544_v31, %v21651_v16  ;;  %v9394_v29 = vpop.f32.mrb[127].mxu0  ;;  %v21049_v35 = vpack.c.bf16 %v10180_v54, %v10179_v20  ;;  %v10185_v34 = vld [vmem:[#allocation3 + $0x90] sm:$0xff] }
 0x687   : > { %v10081_v13 = vmax.f32 %v9982_v2, %v10046_v22  ;;  %v9665_v8 = vadd.f32 %v20863_v57, %v16996_v27  ;;  %v16998_v36 = vadd.f32 %v9394_v29, %v21652_v61  ;;  %v10184_v9 = vld [vmem:[#allocation3 + $0x80] sm:$0xff]  ;;  %v21060_v27 = vpack.c.bf16 %v10186_v42, %v10185_v34  ;;  %v10187_v31 = vld [vmem:[#allocation3 + $0xa8] sm:$0xff]  ;;  %v10191_v16 = vld [vmem:[#allocation3 + $0xd8] sm:$0xff] }
 0x688   : > { %10170 = vst.msk [vmem:[#allocation3 + $0x171] sm:$0xff] %vm9861_vm3, %v10082_v51  ;;  %v9795_v25 = vmax.f32 %v9667_v15, 0.0  ;;  %v9668_v14 = vadd.f32 %v20863_v57, %v16997_v62  ;;  %v10188_v51 = vld [vmem:[#allocation3 + $0xb0] sm:$0xff]  ;;  %v10189_v2 = vld [vmem:[#allocation3 + $0xc0] sm:$0xff]  ;;  %v10190_v22 = vld [vmem:[#allocation3 + $0xc8] sm:$0xff] }
 0x689   : > { %10169 = vst.msk [vmem:[#allocation3 + $0x169] sm:$0xff] %vm9861_vm3, %v10081_v13  ;;  %v9793_v49 = vmax.f32 %v9665_v8, 0.0  ;;  %v9666_v38 = vadd.f32 %v20863_v57, %v16998_v36  ;;  %v21066_v46 = vpack.c.bf16 %v10188_v51, %v10187_v31  ;;  %v21068_v15 = vpack.c.bf16 %v10190_v22, %v10189_v2  ;;  %v10192_v62 = vld [vmem:[#allocation3 + $0xe0] sm:$0xff]  ;;  %v10193_v29 = vld [vmem:[#allocation3 + $0xf0] sm:$0xff]  ;;  %v10194_v13 = vld [vmem:[#allocation3 + $0xf8] sm:$0xff] }
 0x68a   : > { %v9859_v43 = vmax.f32 %v9791_v1, %v9795_v25  ;;  %v9796_v3 = vmax.f32 %v9668_v14, 0.0  ;;  %v21074_v41 = vpack.c.bf16 %v10192_v62, %v10191_v16  ;;  %v21076_v8 = vpack.c.bf16 %v10194_v13, %v10193_v29  ;;  %v10195_v61 = vld [vmem:[#allocation3 + $0x108] sm:$0xff]  ;;  %v10196_v36 = vld [vmem:[#allocation3 + $0x110] sm:$0xff]  ;;  %v10197_v1 = vld [vmem:[#allocation3 + $0x120] sm:$0xff] }
 0x68b   : > { %v9857_v33 = vmax.f32 %v9789_v40, %v9793_v49  ;;  %v9794_v53 = vmax.f32 %v9666_v38, 0.0  ;;  %v10198_v25 = vld [vmem:[#allocation3 + $0x128] sm:$0xff]  ;;  %v21082_v14 = vpack.c.bf16 %v10196_v36, %v10195_v61  ;;  %v10199_v49 = vld [vmem:[#allocation3 + $0x138] sm:$0xff]  ;;  %v10200_v38 = vld [vmem:[#allocation3 + $0x140] sm:$0xff] }
 0x68c   : > { %9924 = vst.msk [vmem:[#allocation2 + $0x1f0] sm:$0xff] %vm9861_vm3, %v9859_v43  ;;  %v9860_v18 = vmax.f32 %v9792_v17, %v9796_v3  ;;  %v21084_v40 = vpack.c.bf16 %v10198_v25, %v10197_v1  ;;  %v10201_v17 = vld [vmem:[#allocation3 + $0x150] sm:$0xff]  ;;  %v10202_v43 = vld [vmem:[#allocation3 + $0x158] sm:$0xff]  ;;  %v21090_v3 = vpack.c.bf16 %v10200_v38, %v10199_v49  ;;  %v10731_v20 = vld [vmem:[#allocation3 + $0x82] sm:$0xff] }
 0x68d   : > { %9922 = vst.msk [vmem:[#allocation2 + $0x1e0] sm:$0xff] %vm9861_vm3, %v9857_v33  ;;  %v9858_v6 = vmax.f32 %v9790_v0, %v9794_v53  ;;  %v21092_v0 = vpack.c.bf16 %v10202_v43, %v10201_v17  ;;  %v10720_v33 = vld [vmem:[#allocation3 + $0x2] sm:$0xff]  ;;  %v10721_v53 = vld [vmem:[#allocation3 + $0xa] sm:$0xff]  ;;  %v10727_v28 = vld [vmem:[#allocation3 + $0x52] sm:$0xff] }
 0x68e   : > { %9925 = vst.msk [vmem:[#allocation2 + $0x1f8] sm:$0xff] %vm9861_vm3, %v9860_v18  ;;  %v10752_v19 = vpack.c.bf16 %v10721_v53, %v10720_v33  ;;  %v10732_v54 = vld [vmem:[#allocation3 + $0x92] sm:$0xff]  ;;  %v10733_v63 = vld [vmem:[#allocation3 + $0x9a] sm:$0xff]  ;;  %v10736_v42 = vld [vmem:[#allocation3 + $0xc2] sm:$0xff] }
 0x68f   : > { %9923 = vst.msk [vmem:[#allocation2 + $0x1e8] sm:$0xff] %vm9861_vm3, %v9858_v6  ;;  %v10256_v24 = vld [vmem:[#allocation3 + $0x171] sm:$0xff]  ;;  %v10738_v22 = vld [vmem:[#allocation3 + $0xda] sm:$0xff]  ;;  %v10739_v16 = vld [vmem:[#allocation3 + $0xe2] sm:$0xff] }
 0x690   : > { %v10255_v57 = vld [vmem:[#allocation3 + $0x169] sm:$0xff]  ;;  %v10735_v34 = vld [vmem:[#allocation3 + $0xb2] sm:$0xff]  ;;  %v10741_v29 = vld [vmem:[#allocation3 + $0xfa] sm:$0xff]  ;;  %v21142_v13 = vpack.c.bf16 %v10739_v16, %v10738_v22 }
 0x691   : > { %v21025_v39 = vpack.c.bf16 %v10256_v24, %v10255_v57  ;;  %v10203_v18 = vld [vmem:[#allocation3 + $0x168] sm:$0xff]  ;;  %v10204_v6 = vld [vmem:[#allocation3 + $0x170] sm:$0xff]  ;;  %v10722_v24 = vld [vmem:[#allocation3 + $0x1a] sm:$0xff] }
 0x692   : > { %v21098_v45 = vpack.c.bf16 %v10204_v6, %v10203_v18  ;;  %v10723_v57 = vld [vmem:[#allocation3 + $0x22] sm:$0xff]  ;;  %v10737_v31 = vld [vmem:[#allocation3 + $0xca] sm:$0xff]  ;;  %v10740_v62 = vld [vmem:[#allocation3 + $0xf2] sm:$0xff] }
 0x693   : > { %16578 = vmatmul.mubr.msk.bf16.gmra.mrb[156].mxu1 %vm9861_vm3, %v21025_v39  ;;  %v21136_v2 = vpack.c.bf16 %v10737_v31, %v10736_v42  ;;  %v21144_v61 = vpack.c.bf16 %v10741_v29, %v10740_v62  ;;  %v10742_v36 = vld [vmem:[#allocation3 + $0x10a] sm:$0xff]  ;;  %v10743_v1 = vld [vmem:[#allocation3 + $0x112] sm:$0xff]  ;;  %v10744_v25 = vld [vmem:[#allocation3 + $0x122] sm:$0xff] }
 0x694   : > { %16585 = vmatprep.mubr.msk.bf16.mxu1 %vm9861_vm3, %v10205_v30  ;;  %v10724_v30 = vld [vmem:[#allocation3 + $0x32] sm:$0xff]  ;;  %v10745_v49 = vld [vmem:[#allocation3 + $0x12a] sm:$0xff]  ;;  %v21150_v38 = vpack.c.bf16 %v10743_v1, %v10742_v36  ;;  %v10746_v43 = vld [vmem:[#allocation3 + $0x13a] sm:$0xff] }
 0x695   : > { %v9988_v10 = vld [vmem:[#allocation2 + $0x1f0] ss:$2 sm:$0xff]  ;;  %v10052_v52 = vld [vmem:[#allocation2 + $0x1f1] ss:$2 sm:$0xff]  ;;  %v21152_v17 = vpack.c.bf16 %v10745_v49, %v10744_v25  ;;  %v10747_v33 = vld [vmem:[#allocation3 + $0x142] sm:$0xff] }
 0x696   : > { %v10084_v55 = vmax.f32 %v9988_v10, %v10052_v52  ;;  %v9986_v26 = vld [vmem:[#allocation2 + $0x1e0] ss:$2 sm:$0xff]  ;;  %v10050_v23 = vld [vmem:[#allocation2 + $0x1e1] ss:$2 sm:$0xff]  ;;  %v21103_v52 = vpack.c.bf16 %v10723_v57, %v10722_v24  ;;  %v10748_v53 = vld [vmem:[#allocation3 + $0x152] sm:$0xff]  ;;  %v21158_v6 = vpack.c.bf16 %v10747_v33, %v10746_v43 }
 0x697   : > { %v10083_v47 = vmax.f32 %v9986_v26, %v10050_v23  ;;  %v10725_v10 = vld [vmem:[#allocation3 + $0x3a] sm:$0xff]  ;;  %v10726_v23 = vld [vmem:[#allocation3 + $0x4a] sm:$0xff]  ;;  %v10751_v57 = vld [vmem:[#allocation3 + $0x172] sm:$0xff] }
 0x698   : > { %10172 = vst.msk [vmem:[#allocation3 + $0x189] sm:$0xff] %vm9861_vm3, %v10084_v55  ;;  %v21108_v55 = vpack.c.bf16 %v10725_v10, %v10724_v30  ;;  %v18170_v26 = vld [vmem:[%s21486_s3 + $0x40] sm:$0xff]   ;;  %v21118_v12 = vpack.c.bf16 %v10727_v28, %v10726_v23  ;;  %v10750_v24 = vld [vmem:[#allocation3 + $0x16a] sm:$0xff] }
 0x699   : > { %10171 = vst.msk [vmem:[#allocation3 + $0x181] sm:$0xff] %vm9861_vm3, %v10083_v47  ;;  %v10728_v47 = vld [vmem:[#allocation3 + $0x62] sm:$0xff]  ;;  %v10749_v18 = vld [vmem:[#allocation3 + $0x15a] sm:$0xff]  ;;  %v21166_v30 = vpack.c.bf16 %v10751_v57, %v10750_v24  ;;  %v11342_v25 = vld [vmem:[#allocation3 + $0x91] sm:$0xff] }
 0x69a   : > { %v18171_v10 = vld [vmem:[%s21486_s3 + $0x48] sm:$0xff]   ;;  %v11332_v23 = vld [vmem:[#allocation3 + $0x19] sm:$0xff]  ;;  %v11345_v33 = vld [vmem:[#allocation3 + $0xb1] sm:$0xff] }
 0x69b   : > { %16586 = vmatmul.mubr.msk.bf16.vlgmr.msra.gmra.mrb[128].mxu1 %vm9861_vm3, %v21032_v5  ;;  %v11333_v28 = vld [vmem:[#allocation3 + $0x21] sm:$0xff]  ;;  %v11339_v16 = vld [vmem:[#allocation3 + $0x69] sm:$0xff]  ;;  %v11340_v62 = vld [vmem:[#allocation3 + $0x79] sm:$0xff] }
 0x69c   : > { %16618 = vmatpush3.bf16.msra.mxu1 %v20840_v11  ;;  %16589 = vmatprep.mubr.msk.bf16.mxu1 %vm9861_vm3, %v21037_v21  ;;  %v10183_v11 = vld [vmem:[#allocation3 + $0x78] sm:$0xff]  ;;  %v18174_v31 = vld [vmem:[%s21486_s3 + $0x60] sm:$0xff]   ;;  %v11344_v43 = vld [vmem:[#allocation3 + $0xa9] sm:$0xff] }
 0x69d   : > { %16619 = vmatprep.subr.bf16.mxu1 %v18167_v32  ;;  %v21058_v60 = vpack.c.bf16 %v10184_v9, %v10183_v11  ;;  %v21128_v11 = vpack.c.bf16 %v10733_v63, %v10732_v54  ;;  %v10734_v9 = vld [vmem:[#allocation3 + $0xaa] sm:$0xff]  ;;  %v11338_v22 = vld [vmem:[#allocation3 + $0x61] sm:$0xff]  ;;  %v11343_v49 = vld [vmem:[#allocation3 + $0x99] sm:$0xff] }
 0x69e   : > { %v21134_v51 = vpack.c.bf16 %v10735_v34, %v10734_v9  ;;  %v11336_v54 = vld [vmem:[#allocation3 + $0x49] sm:$0xff]  ;;  %v11337_v63 = vld [vmem:[#allocation3 + $0x51] sm:$0xff]  ;;  %v11341_v29 = vld [vmem:[#allocation3 + $0x81] sm:$0xff]  ;;  %v21225_v36 = vpack.c.bf16 %v11339_v16, %v11338_v22 }
 0x69f   : > { %v18173_v34 = vld [vmem:[%s21486_s3 + $0x58] sm:$0xff]   ;;  %v21216_v42 = vpack.c.bf16 %v11337_v63, %v11336_v54  ;;  %v21227_v1 = vpack.c.bf16 %v11341_v29, %v11340_v62  ;;  %v11346_v24 = vld [vmem:[#allocation3 + $0xc1] sm:$0xff]  ;;  %v11347_v57 = vld [vmem:[#allocation3 + $0xc9] sm:$0xff] }
 0x6a0   : > { %16620 = vmatpush3.bf16.msra.mxu1 %v18167_v32  ;;  %v21120_v32 = vpack.c.bf16 %v10729_v58, %v10728_v47  ;;  %v11364_v58 = vpack.c.bf16 %v11333_v28, %v11332_v23  ;;  %v11350_v23 = vld [vmem:[#allocation3 + $0xf1] sm:$0xff]  ;;  %v11351_v28 = vld [vmem:[#allocation3 + $0xf9] sm:$0xff] }
 0x6a1   : > { %16653 = vmatprep.subr.bf16.mxu1 %v21047_v7  ;;  %v18177_v63 = vld [vmem:[%s21486_s3 + $0x78] sm:$0xff]  }
 0x6a3   : > { %16590 = vmatmul.mubr.msk.bf16.gmra.mrb[132].mxu1 %vm9861_vm3, %v21049_v35 }
 0x6a4   : > { %16593 = vmatprep.mubr.msk.bf16.mxu1 %vm9861_vm3, %v21052_v59 }
 0x6ab   : > { %16594 = vmatmul.mubr.msk.bf16.gmra.mrb[136].mxu1 %vm9861_vm3, %v21058_v60 }
 0x6ac   : > { %16597 = vmatprep.mubr.msk.bf16.mxu1 %vm9861_vm3, %v21060_v27 }
 0x6b3   : > { %16598 = vmatmul.mubr.msk.bf16.gmra.mrb[140].mxu1 %vm9861_vm3, %v21066_v46 }
 0x6b4   : > { %16601 = vmatprep.mubr.msk.bf16.mxu1 %vm9861_vm3, %v21068_v15 }
 0x6bb   : > { %16602 = vmatmul.mubr.msk.bf16.gmra.mrb[144].mxu1 %vm9861_vm3, %v21074_v41 }
 0x6bc   : > { %16605 = vmatprep.mubr.msk.bf16.mxu1 %vm9861_vm3, %v21076_v8 }
 0x6c3   : > { %16606 = vmatmul.mubr.msk.bf16.gmra.mrb[148].mxu1 %vm9861_vm3, %v21082_v14 }
 0x6c4   : > { %16609 = vmatprep.mubr.msk.bf16.mxu1 %vm9861_vm3, %v21084_v40 }
 0x6cb   : > { %16610 = vmatmul.mubr.msk.bf16.gmra.mrb[152].mxu1 %vm9861_vm3, %v21090_v3 }
 0x6cc   : > { %16613 = vmatprep.mubr.msk.bf16.mxu1 %vm9861_vm3, %v21092_v0 }
 0x6d3   : > { %16614 = vmatmul.mubr.msk.bf16.gmra.mrb[156].mxu1 %vm9861_vm3, %v21098_v45 }
 0x6d4   : > { %16621 = vmatprep.mubr.msk.bf16.mxu1 %vm9861_vm3, %v10752_v19  ;;  %v21160_v19 = vpack.c.bf16 %v10749_v18, %v10748_v53  ;;  %v21233_v53 = vpack.c.bf16 %v11343_v49, %v11342_v25  ;;  %v21235_v18 = vpack.c.bf16 %v11345_v33, %v11344_v43 }
 0x6db   : > { %16622 = vmatmul.mubr.msk.bf16.vlgmr.msra.gmra.mrb[128].mxu1 %vm9861_vm3, %v21103_v52 }
 0x6dc   : > { %16654 = vmatpush3.bf16.msra.mxu1 %v21047_v7  ;;  %16625 = vmatprep.mubr.msk.bf16.mxu1 %vm9861_vm3, %v21108_v55  ;;  %v10730_v7 = vld [vmem:[#allocation3 + $0x7a] sm:$0xff] }
 0x6dd   : > { %16655 = vmatprep.subr.bf16.mxu1 %v18169_v44  ;;  %v21126_v48 = vpack.c.bf16 %v10731_v20, %v10730_v7  ;;  %v11334_v7 = vld [vmem:[#allocation3 + $0x31] sm:$0xff]  ;;  %v11335_v20 = vld [vmem:[#allocation3 + $0x39] sm:$0xff] }
 0x6de   : > { %v21211_v9 = vpack.c.bf16 %v11335_v20, %v11334_v7  ;;  %v11362_v7 = vld [vmem:[#allocation3 + $0x181] sm:$0xff]  ;;  %v11363_v20 = vld [vmem:[#allocation3 + $0x189] sm:$0xff] }
 0x6df   : > { %v21263_v54 = vpack.c.bf16 %v11363_v20, %v11362_v7 }
 0x6e0   : > { %16656 = vmatpush3.bf16.msra.mxu1 %v18169_v44  ;;  %v18172_v44 = vld [vmem:[%s21486_s3 + $0x50] sm:$0xff]  }
 0x6e1   : > { %16689 = vmatprep.subr.bf16.mxu1 %v18170_v26 }
 0x6e3   : > { %16626 = vmatmul.mubr.msk.bf16.gmra.mrb[132].mxu1 %vm9861_vm3, %v21118_v12 }
 0x6e4   : > { %16629 = vmatprep.mubr.msk.bf16.mxu1 %vm9861_vm3, %v21120_v32 }
 0x6eb   : > { %16630 = vmatmul.mubr.msk.bf16.gmra.mrb[136].mxu1 %vm9861_vm3, %v21126_v48 }
 0x6ec   : > { %16633 = vmatprep.mubr.msk.bf16.mxu1 %vm9861_vm3, %v21128_v11 }
 0x6f3   : > { %16634 = vmatmul.mubr.msk.bf16.gmra.mrb[140].mxu1 %vm9861_vm3, %v21134_v51 }
 0x6f4   : > { %16637 = vmatprep.mubr.msk.bf16.mxu1 %vm9861_vm3, %v21136_v2 }
 0x6fb   : > { %16638 = vmatmul.mubr.msk.bf16.gmra.mrb[144].mxu1 %vm9861_vm3, %v21142_v13 }
 0x6fc   : > { %16641 = vmatprep.mubr.msk.bf16.mxu1 %vm9861_vm3, %v21144_v61 }
 0x703   : > { %16642 = vmatmul.mubr.msk.bf16.gmra.mrb[148].mxu1 %vm9861_vm3, %v21150_v38 }
 0x704   : > { %16645 = vmatprep.mubr.msk.bf16.mxu1 %vm9861_vm3, %v21152_v17 }
 0x70b   : > { %16646 = vmatmul.mubr.msk.bf16.gmra.mrb[152].mxu1 %vm9861_vm3, %v21158_v6 }
 0x70c   : > { %16649 = vmatprep.mubr.msk.bf16.mxu1 %vm9861_vm3, %v21160_v19 }
 0x713   : > { %16650 = vmatmul.mubr.msk.bf16.gmra.mrb[156].mxu1 %vm9861_vm3, %v21166_v30 }
 0x714   : > { %16657 = vmatprep.mubr.msk.bf16.mxu1 %vm9861_vm3, %v21032_v5  ;;  %v11056_v5 = vld [vmem:[#allocation3 + $0x180] sm:$0xff] }
 0x71b   : > { %16658 = vmatmul.mubr.msk.bf16.vlgmr.msra.gmra.mrb[128].mxu1 %vm9861_vm3, %v21037_v21 }
 0x71c   : > { %16690 = vmatpush3.bf16.msra.mxu1 %v18170_v26  ;;  %16661 = vmatprep.mubr.msk.bf16.mxu1 %vm9861_vm3, %v21049_v35  ;;  %v11057_v26 = vld [vmem:[#allocation3 + $0x188] sm:$0xff] }
 0x71d   : > { %16691 = vmatprep.subr.bf16.mxu1 %v18171_v10  ;;  %v21206_v47 = vpack.c.bf16 %v11057_v26, %v11056_v5  ;;  %v21241_v5 = vpack.c.bf16 %v11347_v57, %v11346_v24 }
 0x720   : > { %16692 = vmatpush3.bf16.msra.mxu1 %v18171_v10  ;;  %v11348_v10 = vld [vmem:[#allocation3 + $0xd9] sm:$0xff] }
 0x721   : > { %16725 = vmatprep.subr.bf16.mxu1 %v18172_v44 }
 0x723   : > { %16662 = vmatmul.mubr.msk.bf16.gmra.mrb[132].mxu1 %vm9861_vm3, %v21052_v59 }
 0x724   : > { %16665 = vmatprep.mubr.msk.bf16.mxu1 %vm9861_vm3, %v21058_v60 }
 0x72b   : > { %16666 = vmatmul.mubr.msk.bf16.gmra.mrb[136].mxu1 %vm9861_vm3, %v21060_v27 }
 0x72c   : > { %16669 = vmatprep.mubr.msk.bf16.mxu1 %vm9861_vm3, %v21066_v46 }
 0x733   : > { %16670 = vmatmul.mubr.msk.bf16.gmra.mrb[140].mxu1 %vm9861_vm3, %v21068_v15 }
 0x734   : > { %16673 = vmatprep.mubr.msk.bf16.mxu1 %vm9861_vm3, %v21074_v41 }
 0x73b   : > { %16674 = vmatmul.mubr.msk.bf16.gmra.mrb[144].mxu1 %vm9861_vm3, %v21076_v8 }
 0x73c   : > { %16677 = vmatprep.mubr.msk.bf16.mxu1 %vm9861_vm3, %v21082_v14 }
 0x743   : > { %16678 = vmatmul.mubr.msk.bf16.gmra.mrb[148].mxu1 %vm9861_vm3, %v21084_v40 }
 0x744   : > { %16681 = vmatprep.mubr.msk.bf16.mxu1 %vm9861_vm3, %v21090_v3 }
 0x74b   : > { %16682 = vmatmul.mubr.msk.bf16.gmra.mrb[152].mxu1 %vm9861_vm3, %v21092_v0 }
 0x74c   : > { %16685 = vmatprep.mubr.msk.bf16.mxu1 %vm9861_vm3, %v21098_v45 }
 0x753   : > { %16686 = vmatmul.mubr.msk.bf16.gmra.mrb[156].mxu1 %vm9861_vm3, %v21206_v47 }
 0x754   : > { %16693 = vmatprep.mubr.msk.bf16.mxu1 %vm9861_vm3, %v11364_v58  ;;  %v21249_v58 = vpack.c.bf16 %v11351_v28, %v11350_v23 }
 0x75b   : > { %16694 = vmatmul.mubr.msk.bf16.vlgmr.msra.gmra.mrb[128].mxu1 %vm9861_vm3, %v21211_v9 }
 0x75c   : > { %16726 = vmatpush3.bf16.msra.mxu1 %v18172_v44  ;;  %16697 = vmatprep.mubr.msk.bf16.mxu1 %vm9861_vm3, %v21216_v42  ;;  %v11349_v44 = vld [vmem:[#allocation3 + $0xe1] sm:$0xff] }
 0x75d   : > { %16727 = vmatprep.subr.bf16.mxu1 %v18173_v34  ;;  %v21243_v26 = vpack.c.bf16 %v11349_v44, %v11348_v10 }
 0x760   : > { %16728 = vmatpush3.bf16.msra.mxu1 %v18173_v34  ;;  %v18178_v34 = vld [vmem:[%s21486_s3 + $0x80] sm:$0xff]  }
 0x761   : > { %16761 = vmatprep.subr.bf16.mxu1 %v18174_v31 }
 0x763   : > { %16698 = vmatmul.mubr.msk.bf16.gmra.mrb[132].mxu1 %vm9861_vm3, %v21225_v36 }
 0x764   : > { %16701 = vmatprep.mubr.msk.bf16.mxu1 %vm9861_vm3, %v21227_v1 }
 0x76b   : > { %16702 = vmatmul.mubr.msk.bf16.gmra.mrb[136].mxu1 %vm9861_vm3, %v21233_v53 }
 0x76c   : > { %16705 = vmatprep.mubr.msk.bf16.mxu1 %vm9861_vm3, %v21235_v18 }
 0x773   : > { %16706 = vmatmul.mubr.msk.bf16.gmra.mrb[140].mxu1 %vm9861_vm3, %v21241_v5 }
 0x774   : > { %16709 = vmatprep.mubr.msk.bf16.mxu1 %vm9861_vm3, %v21243_v26 }
 0x77b   : > { %16710 = vmatmul.mubr.msk.bf16.gmra.mrb[144].mxu1 %vm9861_vm3, %v21249_v58 }
 0x77c   : > { %16713 = vmatprep.mubr.msk.bf16.mxu1 %vm9861_vm3, %v20925_v50  ;;  %v18175_v50 = vld [vmem:[%s21486_s3 + $0x68] sm:$0xff]  }
 0x783   : > { %16714 = vmatmul.mubr.msk.bf16.gmra.mrb[148].mxu1 %vm9861_vm3, %v20951_v56  ;;  %v18176_v56 = vld [vmem:[%s21486_s3 + $0x70] sm:$0xff]  }
 0x784   : > { %16717 = vmatprep.mubr.msk.bf16.mxu1 %vm9861_vm3, %v20977_v4  ;;  %v11668_v4 = vld [vmem:[#allocation3 + $0x182] sm:$0xff] }
 0x78b   : > { %16718 = vmatmul.mubr.msk.bf16.gmra.mrb[152].mxu1 %vm9861_vm3, %v21003_v37  ;;  %v11669_v37 = vld [vmem:[#allocation3 + $0x18a] sm:$0xff] }
 0x78c   : > { %16721 = vmatprep.mubr.msk.bf16.mxu1 %vm9861_vm3, %v21025_v39 }
 0x793   : > { %16722 = vmatmul.mubr.msk.bf16.gmra.mrb[156].mxu1 %vm9861_vm3, %v21263_v54 }
 0x794   : > { %16729 = vmatprep.mubr.msk.bf16.mxu1 %vm9861_vm3, %v21103_v52  ;;  %v21303_v52 = vpack.c.bf16 %v11669_v37, %v11668_v4 }
 0x79b   : > { %16730 = vmatmul.mubr.msk.bf16.vlgmr.msra.gmra.mrb[128].mxu1 %vm9861_vm3, %v21108_v55 }
 0x79c   : > { %16762 = vmatpush3.bf16.msra.mxu1 %v18174_v31  ;;  %16733 = vmatprep.mubr.msk.bf16.mxu1 %vm9861_vm3, %v21118_v12  ;;  %v12282_v31 = vld [vmem:[#allocation3 + $0x1a1] sm:$0xff] }
 0x79d   : > { %16763 = vmatprep.subr.bf16.mxu1 %v18175_v50 }
 0x7a0   : > { %16764 = vmatpush3.bf16.msra.mxu1 %v18175_v50 }
 0x7a1   : > { %16797 = vmatprep.subr.bf16.mxu1 %v18176_v56 }
 0x7a3   : > { %16734 = vmatmul.mubr.msk.bf16.gmra.mrb[132].mxu1 %vm9861_vm3, %v21120_v32 }
 0x7a4   : > { %16737 = vmatprep.mubr.msk.bf16.mxu1 %vm9861_vm3, %v21126_v48 }
 0x7ab   : > { %16738 = vmatmul.mubr.msk.bf16.gmra.mrb[136].mxu1 %vm9861_vm3, %v21128_v11 }
 0x7ac   : > { %16741 = vmatprep.mubr.msk.bf16.mxu1 %vm9861_vm3, %v21134_v51 }
 0x7b3   : > { %16742 = vmatmul.mubr.msk.bf16.gmra.mrb[140].mxu1 %vm9861_vm3, %v21136_v2 }
 0x7b4   : > { %16745 = vmatprep.mubr.msk.bf16.mxu1 %vm9861_vm3, %v21142_v13 }
 0x7bb   : > { %16746 = vmatmul.mubr.msk.bf16.gmra.mrb[144].mxu1 %vm9861_vm3, %v21144_v61 }
 0x7bc   : > { %16749 = vmatprep.mubr.msk.bf16.mxu1 %vm9861_vm3, %v21150_v38 }
 0x7c3   : > { %16750 = vmatmul.mubr.msk.bf16.gmra.mrb[148].mxu1 %vm9861_vm3, %v21152_v17 }
 0x7c4   : > { %16753 = vmatprep.mubr.msk.bf16.mxu1 %vm9861_vm3, %v21158_v6 }
 0x7cb   : > { %16754 = vmatmul.mubr.msk.bf16.gmra.mrb[152].mxu1 %vm9861_vm3, %v21160_v19 }
 0x7cc   : > { %16757 = vmatprep.mubr.msk.bf16.mxu1 %vm9861_vm3, %v21166_v30 }
 0x7d3   : > { %16758 = vmatmul.mubr.msk.bf16.gmra.mrb[156].mxu1 %vm9861_vm3, %v21303_v52 }
 0x7d4   : > { %16765 = vmatprep.mubr.msk.bf16.mxu1 %vm9861_vm3, %v21037_v21  ;;  %v11975_v21 = vld [vmem:[#allocation3 + $0x198] sm:$0xff] }
 0x7db   : > { %16766 = vmatmul.mubr.msk.bf16.vlgmr.msra.gmra.mrb[128].mxu1 %vm9861_vm3, %v21049_v35  ;;  %v11976_v35 = vld [vmem:[#allocation3 + $0x1a0] sm:$0xff] }
 0x7dc   : > { %16798 = vmatpush3.bf16.msra.mxu1 %v18176_v56  ;;  %16769 = vmatprep.mubr.msk.bf16.mxu1 %vm9861_vm3, %v21052_v59  ;;  %v11992_v59 = vpack.c.bf16 %v11976_v35, %v11975_v21 }
 0x7dd   : > { %16799 = vmatprep.subr.bf16.mxu1 %v18177_v63 }
 0x7e0   : > { %16800 = vmatpush3.bf16.msra.mxu1 %v18177_v63 }
 0x7e1   : > { %16833 = vmatprep.subr.bf16.mxu1 %v18178_v34 }
 0x7e3   : > { %16770 = vmatmul.mubr.msk.bf16.gmra.mrb[132].mxu1 %vm9861_vm3, %v21058_v60  ;;  %v18179_v60 = vld [vmem:[%s21486_s3 + $0x88] sm:$0xff]  }
 0x7e4   : > { %16773 = vmatprep.mubr.msk.bf16.mxu1 %vm9861_vm3, %v21060_v27  ;;  %v12269_v27 = vld [vmem:[#allocation3 + $0x109] sm:$0xff] }
 0x7eb   : > { %16774 = vmatmul.mubr.msk.bf16.gmra.mrb[136].mxu1 %vm9861_vm3, %v21066_v46  ;;  %v12270_v46 = vld [vmem:[#allocation3 + $0x111] sm:$0xff] }
 0x7ec   : > { %16777 = vmatprep.mubr.msk.bf16.mxu1 %vm9861_vm3, %v21068_v15  ;;  %v12271_v15 = vld [vmem:[#allocation3 + $0x121] sm:$0xff] }
 0x7f3   : > { %16778 = vmatmul.mubr.msk.bf16.gmra.mrb[140].mxu1 %vm9861_vm3, %v21074_v41  ;;  %v12272_v41 = vld [vmem:[#allocation3 + $0x129] sm:$0xff] }
 0x7f4   : > { %16781 = vmatprep.mubr.msk.bf16.mxu1 %vm9861_vm3, %v21076_v8  ;;  %v12292_v8 = vpack.c.bf16 %v12270_v46, %v12269_v27 }
 0x7fb   : > { %16782 = vmatmul.mubr.msk.bf16.gmra.mrb[144].mxu1 %vm9861_vm3, %v21082_v14  ;;  %v12293_v14 = vpack.c.bf16 %v12272_v41, %v12271_v15 }
 0x7fc   : > { %16785 = vmatprep.mubr.msk.bf16.mxu1 %vm9861_vm3, %v21084_v40  ;;  %v12273_v40 = vld [vmem:[#allocation3 + $0x139] sm:$0xff] }
 0x803   : > { %16786 = vmatmul.mubr.msk.bf16.gmra.mrb[148].mxu1 %vm9861_vm3, %v21090_v3  ;;  %v12274_v3 = vld [vmem:[#allocation3 + $0x141] sm:$0xff] }
 0x804   : > { %16789 = vmatprep.mubr.msk.bf16.mxu1 %vm9861_vm3, %v21092_v0  ;;  %v12275_v0 = vld [vmem:[#allocation3 + $0x151] sm:$0xff] }
 0x80b   : > { %16790 = vmatmul.mubr.msk.bf16.gmra.mrb[152].mxu1 %vm9861_vm3, %v21098_v45  ;;  %v12276_v45 = vld [vmem:[#allocation3 + $0x159] sm:$0xff] }
 0x80c   : > { %16793 = vmatprep.mubr.msk.bf16.mxu1 %vm9861_vm3, %v21206_v47  ;;  %v12294_v47 = vpack.c.bf16 %v12274_v3, %v12273_v40 }
 0x813   : > { %16794 = vmatmul.mubr.msk.bf16.gmra.mrb[156].mxu1 %vm9861_vm3, %v11992_v59 }
 0x814   : > { %16801 = vmatprep.mubr.msk.bf16.mxu1 %vm9861_vm3, %v21211_v9  ;;  %v12295_v9 = vpack.c.bf16 %v12276_v45, %v12275_v0 }
 0x81b   : > { %16802 = vmatmul.mubr.msk.bf16.vlgmr.msra.gmra.mrb[128].mxu1 %vm9861_vm3, %v21216_v42  ;;  %v12281_v42 = vld [vmem:[#allocation3 + $0x199] sm:$0xff] }
 0x81c   : > { %16834 = vmatpush3.bf16.msra.mxu1 %v18178_v34  ;;  %16805 = vmatprep.mubr.msk.bf16.mxu1 %vm9861_vm3, %v21225_v36  ;;  %v12298_v22 = vpack.c.bf16 %v12282_v31, %v12281_v42 }
 0x81d   : > { %16835 = vmatprep.subr.bf16.mxu1 %v18179_v60 }
 0x820   : > { %16836 = vmatpush3.bf16.msra.mxu1 %v18179_v60 }
 0x823   : > { %16806 = vmatmul.mubr.msk.bf16.gmra.mrb[132].mxu1 %vm9861_vm3, %v21227_v1 }
 0x824   : > { %16809 = vmatprep.mubr.msk.bf16.mxu1 %vm9861_vm3, %v21233_v53 }
 0x82b   : > { %16810 = vmatmul.mubr.msk.bf16.gmra.mrb[136].mxu1 %vm9861_vm3, %v21235_v18 }
 0x82c   : > { %16813 = vmatprep.mubr.msk.bf16.mxu1 %vm9861_vm3, %v21241_v5 }
 0x833   : > { %16814 = vmatmul.mubr.msk.bf16.gmra.mrb[140].mxu1 %vm9861_vm3, %v21243_v26 }
 0x834   : > { %16817 = vmatprep.mubr.msk.bf16.mxu1 %vm9861_vm3, %v21249_v58 }
 0x83b   : > { %16818 = vmatmul.mubr.msk.bf16.gmra.mrb[144].mxu1 %vm9861_vm3, %v12292_v8 }
 0x83c   : > { %16821 = vmatprep.mubr.msk.bf16.mxu1 %vm9861_vm3, %v12293_v14 }
 0x843   : > { %16822 = vmatmul.mubr.msk.bf16.gmra.mrb[148].mxu1 %vm9861_vm3, %v12294_v47 }
 0x844   : > { %16825 = vmatprep.mubr.msk.bf16.mxu1 %vm9861_vm3, %v12295_v9 }
 0x84b   : > { %16826 = vmatmul.mubr.msk.bf16.gmra.mrb[152].mxu1 %vm9861_vm3, %v21025_v39  ;;  %v12587_v39 = vld [vmem:[#allocation3 + $0x19a] sm:$0xff] }
 0x84c   : > { %16829 = vmatprep.mubr.msk.bf16.mxu1 %vm9861_vm3, %v21263_v54 }
 0x853   : > { %16830 = vmatmul.mubr.msk.bf16.gmra.mrb[156].mxu1 %vm9861_vm3, %v12298_v22 }
 0x854   : > { %16837 = vmatprep.mubr.msk.bf16.mxu1 %vm9861_vm3, %v21108_v55  ;;  %v12588_v55 = vld [vmem:[#allocation3 + $0x1a2] sm:$0xff] }
 0x85b   : > { %16838 = vmatmul.mubr.msk.bf16.vlgmr.msra.gmra.mrb[128].mxu1 %vm9861_vm3, %v21118_v12  ;;  %v12604_v12 = vpack.c.bf16 %v12588_v55, %v12587_v39 }
 0x85c   : > { %16841 = vmatprep.mubr.msk.bf16.mxu1 %vm9861_vm3, %v21120_v32  ;;  %v21408_v32 = vld [vmem:[%s21487_s4] ss:$0 sm:$0xff] }
 0x863   : > { %16842 = vmatmul.mubr.msk.bf16.gmra.mrb[132].mxu1 %vm9861_vm3, %v21126_v48 }
 0x864   : > { %16845 = vmatprep.mubr.msk.bf16.mxu1 %vm9861_vm3, %v21128_v11 }
 0x86b   : > { %16846 = vmatmul.mubr.msk.bf16.gmra.mrb[136].mxu1 %vm9861_vm3, %v21134_v51 }
 0x86c   : > { %16849 = vmatprep.mubr.msk.bf16.mxu1 %vm9861_vm3, %v21136_v2 }
 0x873   : > { %16850 = vmatmul.mubr.msk.bf16.gmra.mrb[140].mxu1 %vm9861_vm3, %v21142_v13 }
 0x874   : > { %16853 = vmatprep.mubr.msk.bf16.mxu1 %vm9861_vm3, %v21144_v61 }
 0x87b   : > { %16854 = vmatmul.mubr.msk.bf16.gmra.mrb[144].mxu1 %vm9861_vm3, %v21150_v38 }
 0x87c   : > { %16857 = vmatprep.mubr.msk.bf16.mxu1 %vm9861_vm3, %v21152_v17 }
 0x883   : > { %16858 = vmatmul.mubr.msk.bf16.gmra.mrb[148].mxu1 %vm9861_vm3, %v21158_v6 }
 0x884   : > { %16861 = vmatprep.mubr.msk.bf16.mxu1 %vm9861_vm3, %v21160_v19 }
 0x88b   : > { %16862 = vmatmul.mubr.msk.bf16.gmra.mrb[152].mxu1 %vm9861_vm3, %v21166_v30 }
 0x88c   : > { %16865 = vmatprep.mubr.msk.bf16.mxu1 %vm9861_vm3, %v21303_v52 }
 0x893   : > { %16866 = vmatmul.mubr.msk.bf16.gmra.mrb[156].mxu1 %vm9861_vm3, %v12604_v12 }
 0x92e   : > { %v16839_v48 = vpop.f32.mrb[128].mxu1 }
 0x92f   : > { %v12872_v11 = vadd.f32 %v16839_v48, %v21408_v32  ;;  %v12704_v51 = vpop.f32.mrb[129].mxu1 }
 0x930   : > { %v12870_v2 = vadd.f32 %v21408_v32, %v12704_v51  ;;  %v16840_v13 = vpop.f32.mrb[130].mxu1 }
 0x931   : > { %v12904_v61 = vmax.f32 %v12872_v11, 0.0  ;;  %v12873_v38 = vadd.f32 %v16840_v13, %v21408_v32  ;;  %v12707_v17 = vpop.f32.mrb[131].mxu1 }
 0x932   : > { %v12902_v6 = vmax.f32 %v12870_v2, 0.0  ;;  %v12871_v19 = vadd.f32 %v21408_v32, %v12707_v17 }
 0x933   : > { %v12905_v30 = vmax.f32 %v12873_v38, 0.0 }
 0x934   : > { %v12934_v16 = vmax.f32 %v12902_v6, %v12904_v61  ;;  %v12903_v62 = vmax.f32 %v12871_v19, 0.0 }
 0x936   : > { %12951 = vst.msk [vmem:[#allocation4] sm:$0xff] %vm12950_vm5, %v12934_v16  ;;  %v12935_v29 = vmax.f32 %v12903_v62, %v12905_v30  ;;  %v16843_v36 = vpop.f32.mrb[132].mxu1 }
 0x937   : > { %v12876_v1 = vadd.f32 %v16843_v36, %v21408_v32  ;;  %v12720_v25 = vpop.f32.mrb[133].mxu1 }
 0x938   : > { %12952 = vst.msk [vmem:[#allocation4 + $0x8] sm:$0xff] %vm12950_vm5, %v12935_v29  ;;  %v12874_v49 = vadd.f32 %v21408_v32, %v12720_v25  ;;  %v16844_v43 = vpop.f32.mrb[134].mxu1 }
 0x939   : > { %v12908_v33 = vmax.f32 %v12876_v1, 0.0  ;;  %v12877_v53 = vadd.f32 %v16844_v43, %v21408_v32  ;;  %v12723_v18 = vpop.f32.mrb[135].mxu1 }
 0x93a   : > { %v12906_v24 = vmax.f32 %v12874_v49, 0.0  ;;  %v12875_v57 = vadd.f32 %v21408_v32, %v12723_v18 }
 0x93b   : > { %v12909_v10 = vmax.f32 %v12877_v53, 0.0 }
 0x93c   : > { %v12936_v44 = vmax.f32 %v12906_v24, %v12908_v33  ;;  %v12907_v5 = vmax.f32 %v12875_v57, 0.0 }
 0x93e   : > { %12953 = vst.msk [vmem:[#allocation4 + $0x10] sm:$0xff] %vm12950_vm5, %v12936_v44  ;;  %v12937_v26 = vmax.f32 %v12907_v5, %v12909_v10  ;;  %v16847_v23 = vpop.f32.mrb[136].mxu1 }
 0x93f   : > { %v12967_v28 = vld [vmem:[#allocation4] ss:$2 sm:$0xff]  ;;  %v12983_v58 = vld [vmem:[#allocation4 + $0x1] ss:$2 sm:$0xff]  ;;  %v12880_v7 = vadd.f32 %v16847_v23, %v21408_v32  ;;  %v12736_v20 = vpop.f32.mrb[137].mxu1 }
 0x940   : > { %v12998_v54 = vmax.f32 %v12967_v28, %v12983_v58  ;;  %12954 = vst.msk [vmem:[#allocation4 + $0x18] sm:$0xff] %vm12950_vm5, %v12937_v26  ;;  %v12878_v50 = vadd.f32 %v21408_v32, %v12736_v20  ;;  %v16848_v56 = vpop.f32.mrb[138].mxu1 }
 0x941   : > { %v12912_v4 = vmax.f32 %v12880_v7, 0.0  ;;  %v12881_v37 = vadd.f32 %v16848_v56, %v21408_v32  ;;  %v12739_v52 = vpop.f32.mrb[139].mxu1 }
 0x942   : > { %13006 = vst.msk [vmem:[%s21425_s16] sm:$0xff] %vm12950_vm5, %v12998_v54  ;;  %v12910_v63 = vmax.f32 %v12878_v50, 0.0  ;;  %v12879_v34 = vadd.f32 %v21408_v32, %v12739_v52 }
 0x943   : > { %v12913_v21 = vmax.f32 %v12881_v37, 0.0 }
 0x944   : > { %v12938_v35 = vmax.f32 %v12910_v63, %v12912_v4  ;;  %v12911_v59 = vmax.f32 %v12879_v34, 0.0 }
 0x946   : > { %12955 = vst.msk [vmem:[#allocation4 + $0x20] sm:$0xff] %vm12950_vm5, %v12938_v35  ;;  %v12939_v60 = vmax.f32 %v12911_v59, %v12913_v21  ;;  %v16851_v27 = vpop.f32.mrb[140].mxu1 }
 0x947   : > { %v12969_v46 = vld [vmem:[#allocation4 + $0x10] ss:$2 sm:$0xff]  ;;  %v12985_v15 = vld [vmem:[#allocation4 + $0x11] ss:$2 sm:$0xff]  ;;  %v12884_v41 = vadd.f32 %v16851_v27, %v21408_v32  ;;  %v12752_v8 = vpop.f32.mrb[141].mxu1 }
 0x948   : > { %v12999_v14 = vmax.f32 %v12969_v46, %v12985_v15  ;;  %12956 = vst.msk [vmem:[#allocation4 + $0x28] sm:$0xff] %vm12950_vm5, %v12939_v60  ;;  %v12882_v40 = vadd.f32 %v21408_v32, %v12752_v8  ;;  %v16852_v3 = vpop.f32.mrb[142].mxu1 }
 0x949   : > { %v12916_v0 = vmax.f32 %v12884_v41, 0.0  ;;  %v12885_v45 = vadd.f32 %v16852_v3, %v21408_v32  ;;  %v12755_v47 = vpop.f32.mrb[143].mxu1 }
 0x94a   : > { %13007 = vst.msk [vmem:[%s21425_s16 + $0x8] sm:$0xff] %vm12950_vm5, %v12999_v14  ;;  %v12914_v9 = vmax.f32 %v12882_v40, 0.0  ;;  %v12883_v42 = vadd.f32 %v21408_v32, %v12755_v47 }
 0x94b   : > { %v12917_v31 = vmax.f32 %v12885_v45, 0.0 }
 0x94c   : > { %v12940_v22 = vmax.f32 %v12914_v9, %v12916_v0  ;;  %v12915_v39 = vmax.f32 %v12883_v42, 0.0 }
 0x94e   : > { %12957 = vst.msk [vmem:[#allocation4 + $0x30] sm:$0xff] %vm12950_vm5, %v12940_v22  ;;  %v12941_v55 = vmax.f32 %v12915_v39, %v12917_v31  ;;  %v16855_v12 = vpop.f32.mrb[144].mxu1 }
 0x94f   : > { %v12971_v48 = vld [vmem:[#allocation4 + $0x20] ss:$2 sm:$0xff]  ;;  %v12987_v11 = vld [vmem:[#allocation4 + $0x21] ss:$2 sm:$0xff]  ;;  %v12888_v51 = vadd.f32 %v16855_v12, %v21408_v32  ;;  %v12768_v2 = vpop.f32.mrb[145].mxu1 }
 0x950   : > { %v13000_v13 = vmax.f32 %v12971_v48, %v12987_v11  ;;  %12958 = vst.msk [vmem:[#allocation4 + $0x38] sm:$0xff] %vm12950_vm5, %v12941_v55  ;;  %v12886_v61 = vadd.f32 %v21408_v32, %v12768_v2  ;;  %v16856_v38 = vpop.f32.mrb[146].mxu1 }
 0x951   : > { %v12920_v17 = vmax.f32 %v12888_v51, 0.0  ;;  %v12889_v6 = vadd.f32 %v16856_v38, %v21408_v32  ;;  %v12771_v19 = vpop.f32.mrb[147].mxu1 }
 0x952   : > { %13008 = vst.msk [vmem:[%s21425_s16 + $0x10] sm:$0xff] %vm12950_vm5, %v13000_v13  ;;  %v12918_v30 = vmax.f32 %v12886_v61, 0.0  ;;  %v12887_v16 = vadd.f32 %v21408_v32, %v12771_v19 }
 0x953   : > { %v12921_v62 = vmax.f32 %v12889_v6, 0.0 }
 0x954   : > { %v12942_v29 = vmax.f32 %v12918_v30, %v12920_v17  ;;  %v12919_v36 = vmax.f32 %v12887_v16, 0.0 }
 0x956   : > { %12959 = vst.msk [vmem:[#allocation4 + $0x40] sm:$0xff] %vm12950_vm5, %v12942_v29  ;;  %v12943_v1 = vmax.f32 %v12919_v36, %v12921_v62  ;;  %v16859_v25 = vpop.f32.mrb[148].mxu1 }
 0x957   : > { %v12973_v49 = vld [vmem:[#allocation4 + $0x30] ss:$2 sm:$0xff]  ;;  %v12989_v43 = vld [vmem:[#allocation4 + $0x31] ss:$2 sm:$0xff]  ;;  %v12892_v33 = vadd.f32 %v16859_v25, %v21408_v32  ;;  %v12784_v53 = vpop.f32.mrb[149].mxu1 }
 0x958   : > { %v13001_v18 = vmax.f32 %v12973_v49, %v12989_v43  ;;  %12960 = vst.msk [vmem:[#allocation4 + $0x48] sm:$0xff] %vm12950_vm5, %v12943_v1  ;;  %v12890_v24 = vadd.f32 %v21408_v32, %v12784_v53  ;;  %v16860_v57 = vpop.f32.mrb[150].mxu1 }
 0x959   : > { %v12924_v10 = vmax.f32 %v12892_v33, 0.0  ;;  %v12893_v44 = vadd.f32 %v16860_v57, %v21408_v32  ;;  %v12787_v5 = vpop.f32.mrb[151].mxu1 }
 0x95a   : > { %13009 = vst.msk [vmem:[%s21425_s16 + $0x18] sm:$0xff] %vm12950_vm5, %v13001_v18  ;;  %v12922_v26 = vmax.f32 %v12890_v24, 0.0  ;;  %v12891_v23 = vadd.f32 %v21408_v32, %v12787_v5 }
 0x95b   : > { %v12925_v28 = vmax.f32 %v12893_v44, 0.0 }
 0x95c   : > { %v12944_v58 = vmax.f32 %v12922_v26, %v12924_v10  ;;  %v12923_v7 = vmax.f32 %v12891_v23, 0.0 }
 0x95e   : > { %12961 = vst.msk [vmem:[#allocation4 + $0x50] sm:$0xff] %vm12950_vm5, %v12944_v58  ;;  %v12945_v20 = vmax.f32 %v12923_v7, %v12925_v28  ;;  %v16863_v54 = vpop.f32.mrb[152].mxu1 }
 0x95f   : > { %v12975_v50 = vld [vmem:[#allocation4 + $0x40] ss:$2 sm:$0xff]  ;;  %v12991_v56 = vld [vmem:[#allocation4 + $0x41] ss:$2 sm:$0xff]  ;;  %v12896_v4 = vadd.f32 %v16863_v54, %v21408_v32  ;;  %v12800_v37 = vpop.f32.mrb[153].mxu1 }
 0x960   : > { %v13002_v52 = vmax.f32 %v12975_v50, %v12991_v56  ;;  %12962 = vst.msk [vmem:[#allocation4 + $0x58] sm:$0xff] %vm12950_vm5, %v12945_v20  ;;  %v12894_v63 = vadd.f32 %v21408_v32, %v12800_v37  ;;  %v16864_v34 = vpop.f32.mrb[154].mxu1 }
 0x961   : > { %v12928_v21 = vmax.f32 %v12896_v4, 0.0  ;;  %v12897_v35 = vadd.f32 %v16864_v34, %v21408_v32  ;;  %v12803_v59 = vpop.f32.mrb[155].mxu1 }
 0x962   : > { %13010 = vst.msk [vmem:[%s21425_s16 + $0x20] sm:$0xff] %vm12950_vm5, %v13002_v52  ;;  %v12926_v60 = vmax.f32 %v12894_v63, 0.0  ;;  %v12895_v27 = vadd.f32 %v21408_v32, %v12803_v59 }
 0x963   : > { %v12929_v46 = vmax.f32 %v12897_v35, 0.0 }
 0x964   : > { %v12946_v15 = vmax.f32 %v12926_v60, %v12928_v21  ;;  %v12927_v41 = vmax.f32 %v12895_v27, 0.0 }
 0x966   : > { %12963 = vst.msk [vmem:[#allocation4 + $0x60] sm:$0xff] %vm12950_vm5, %v12946_v15  ;;  %v12947_v8 = vmax.f32 %v12927_v41, %v12929_v46  ;;  %v16867_v14 = vpop.f32.mrb[156].mxu1 }
 0x967   : > { %v12977_v40 = vld [vmem:[#allocation4 + $0x50] ss:$2 sm:$0xff]  ;;  %v12993_v3 = vld [vmem:[#allocation4 + $0x51] ss:$2 sm:$0xff]  ;;  %v12900_v0 = vadd.f32 %v16867_v14, %v21408_v32  ;;  %v12816_v45 = vpop.f32.mrb[157].mxu1 }
 0x968   : > { %v13003_v47 = vmax.f32 %v12977_v40, %v12993_v3  ;;  %12964 = vst.msk [vmem:[#allocation4 + $0x68] sm:$0xff] %vm12950_vm5, %v12947_v8  ;;  %v12898_v9 = vadd.f32 %v21408_v32, %v12816_v45  ;;  %v16868_v42 = vpop.f32.mrb[158].mxu1 }
 0x969   : > { %v12932_v31 = vmax.f32 %v12900_v0, 0.0  ;;  %v12901_v22 = vadd.f32 %v16868_v42, %v21408_v32  ;;  %v12819_v39 = vpop.f32.mrb[159].mxu1 }
 0x96a   : > { %13011 = vst.msk [vmem:[%s21425_s16 + $0x28] sm:$0xff] %vm12950_vm5, %v13003_v47  ;;  %v12930_v55 = vmax.f32 %v12898_v9, 0.0  ;;  %v12899_v12 = vadd.f32 %v21408_v32, %v12819_v39 }
 0x96b   : > { %v12933_v48 = vmax.f32 %v12901_v22, 0.0 }
 0x96c   : > { %v12948_v11 = vmax.f32 %v12930_v55, %v12932_v31  ;;  %v12931_v51 = vmax.f32 %v12899_v12, 0.0 }
 0x96e   : > { %12965 = vst.msk [vmem:[#allocation4 + $0x70] sm:$0xff] %vm12950_vm5, %v12948_v11  ;;  %v12949_v2 = vmax.f32 %v12931_v51, %v12933_v48 }
 0x96f   : > { %v12979_v13 = vld [vmem:[#allocation4 + $0x60] ss:$2 sm:$0xff]  ;;  %v12995_v61 = vld [vmem:[#allocation4 + $0x61] ss:$2 sm:$0xff] }
 0x970   : > { %v13004_v38 = vmax.f32 %v12979_v13, %v12995_v61  ;;  %12966 = vst.msk [vmem:[#allocation4 + $0x78] sm:$0xff] %vm12950_vm5, %v12949_v2 }
 0x972   : > { %13012 = vst.msk [vmem:[%s21425_s16 + $0x30] sm:$0xff] %vm12950_vm5, %v13004_v38 }
 0x977   : > { %v12981_v17 = vld [vmem:[#allocation4 + $0x70] ss:$2 sm:$0xff]  ;;  %v12997_v6 = vld [vmem:[#allocation4 + $0x71] ss:$2 sm:$0xff] }
 0x978   : > { %v13005_v19 = vmax.f32 %v12981_v17, %v12997_v6 }
 0x97a   : > { %13013 = vst.msk [vmem:[%s21425_s16 + $0x38] sm:$0xff] %vm12950_vm5, %v13005_v19 }
 0x97b PF: > { %s15_s18 = sadd.s32 1, %s18187_s18  }
 0x97c   : > { %p12_p4 = scmp.ge.s32.totalorder %s15_s18, 4  }
 0x97e   :  { %14 = sbr.rel (!%p12_p4) target bundleno = 1 (0x1), region = 168 }

</bundles_post_ra>
